<compile_context>
chip_gen: v7x
topology: tpu7x:2x2x1
jax: 0.10.0
libtpu: 0.0.40
codegen_flags: <defaults>
</compile_context>

<pallas_src>
import jax
import jax.numpy as jnp
from jax.experimental import pallas as pl
from jax.experimental.pallas import tpu as pltpu


# ---------------------------------------------------------------------------
# Stage 1: per-frame max pool
# ---------------------------------------------------------------------------

_TILE_BUDGET_BYTES = 6 * 1024 * 1024   # per input pipeline buffer (x2: double-buffered)
_MAX_FOLD_COLS = 128 * 64               # bounds the static VPU-fold unroll per tile
_MIN_ROW_BLOCKS = 4                     # >= 2 grid steps per TensorCore on 2-TC chips


def _max_tile_sizes(n_rows, n_cols, itemsize):
    """Pick (row_tile, col_tile) for the (R, S) max reduction."""
    sub = 8 * max(1, 4 // itemsize)          # sublane packing: 8 f32 / 16 bf16 / 32 i8
    if n_cols <= _MAX_FOLD_COLS and sub * n_cols * itemsize <= _TILE_BUDGET_BYTES:
        col_tile = n_cols                     # full spatial extent in one chunk
    else:
        by_budget = ((_TILE_BUDGET_BYTES // (sub * itemsize)) // 128) * 128
        col_tile = max(128, min(_MAX_FOLD_COLS, by_budget))   # 128-lane aligned chunks
    budget_rows = max(sub, _TILE_BUDGET_BYTES // (col_tile * itemsize))
    # Cap so the row grid has >= _MIN_ROW_BLOCKS blocks (pipeline overlap and
    # megacore balance on 2-TC chips); per-step overhead is negligible at
    # multi-MiB tiles.
    cap_rows = max(sub, -(-n_rows // _MIN_ROW_BLOCKS))
    max_rows = min(budget_rows, cap_rows)
    if max_rows >= n_rows:
        row_tile = n_rows
    else:
        row_tile = max(sub, (max_rows // sub) * sub)
    return row_tile, col_tile


def _make_per_frame_max_kernel(n_cols, col_tile, n_col_tiles, dtype):
    ragged_cols = n_col_tiles > 1 and (n_cols % col_tile) != 0
    n_full = col_tile // 128
    rem = col_tile - n_full * 128
    if n_col_tiles > 1:
        assert rem == 0, "column tiles must be 128-lane aligned"
    if jnp.issubdtype(dtype, jnp.floating):
        neutral = -jnp.inf
    else:
        neutral = jnp.iinfo(dtype).min

    def kernel(x_ref, o_ref, acc_ref):
        x = x_ref[...]                                         # (row_tile, col_tile)
        if ragged_cols:                                        # mask lanes past S (tail chunk)
            col = (jax.lax.broadcasted_iota(jnp.int32, x.shape, 1)
                   + pl.program_id(1) * col_tile)
            x = jnp.where(col < n_cols, x, jnp.asarray(neutral, dtype=x.dtype))

        # VPU fold: combine 128-lane slices with jnp.maximum (no XLU work here).
        if n_full > 0:
            folded = x[:, 0:128]
            for c in range(1, n_full):
                folded = jnp.maximum(folded, x[:, c * 128:(c + 1) * 128])
        else:                                                  # col_tile < 128
            folded = x

        j = pl.program_id(1)

        @pl.when(j == 0)
        def _init():
            acc_ref[...] = folded

        @pl.when(j != 0)
        def _accum():
            acc_ref[...] = jnp.maximum(acc_ref[...], folded)

        @pl.when(j == n_col_tiles - 1)
        def _reduce_and_store():
            # Single 128->1 cross-lane reduce per row tile; stored as a
            # natural (row_tile, 1) column block (no transpose).
            m = jnp.max(acc_ref[...], axis=-1, keepdims=True)
            if rem > 0 and n_full > 0:     # ragged lanes, single-chunk case only
                tail = jnp.max(x[:, n_full * 128:], axis=-1, keepdims=True)
                m = jnp.maximum(m, tail)
            o_ref[...] = m.astype(o_ref.dtype)

    return kernel


def per_frame_max_pool(x):
    """x: (B, C, T, W, H) -> (B, C, T), max over the flattened spatial dims."""
    assert x.ndim == 5
    B, C, T, W, H = x.shape
    R, S = B * C * T, W * H
    # Collapse to (R, S).  With the default row-major HBM layout this is a
    # bitcast; if an upstream layout pads the minor (W, H) dims, check the HLO
    # and feed the array with a 5-D BlockSpec instead (reduce W, H in-kernel).
    x2d = x.reshape(R, S)
    itemsize = jnp.dtype(x.dtype).itemsize
    row_tile, col_tile = _max_tile_sizes(R, S, itemsize)
    n_row_tiles = pl.cdiv(R, row_tile)
    n_col_tiles = pl.cdiv(S, col_tile)
    acc_width = 128 if col_tile >= 128 else col_tile

    out2 = pl.pallas_call(
        _make_per_frame_max_kernel(S, col_tile, n_col_tiles, x.dtype),
        out_shape=jax.ShapeDtypeStruct((n_row_tiles * row_tile, 1), x.dtype),
        grid_spec=pltpu.PrefetchScalarGridSpec(
            num_scalar_prefetch=0,
            grid=(n_row_tiles, n_col_tiles),
            in_specs=[pl.BlockSpec((row_tile, col_tile), lambda i, j: (i, j))],
            out_specs=pl.BlockSpec((row_tile, 1), lambda i, j: (i, 0)),
            scratch_shapes=[pltpu.VMEM((row_tile, acc_width), x.dtype)],
        ),
        compiler_params=pltpu.CompilerParams(
            dimension_semantics=("parallel", "arbitrary"),
            vmem_limit_bytes=32 * 1024 * 1024,
        ),
    )(x2d)

    # Invariant: the last row block may overhang R; those rows hold undefined
    # data and are sliced off here (each row's max depends only on its own row).
    return out2[:R, 0].reshape(B, C, T)


# ---------------------------------------------------------------------------
# Stage 2: Conv1d(k=11, pad=5, no bias) -> attention pool -> hidden_fc, fused.
# ---------------------------------------------------------------------------

def _volume_pool_kernel(lhs_ref, w_ref, wa_ref, ba_ref, whT_ref, bh_ref,
                        va_ref, vis_ref, hid_ref, fc_ref):
    Bv, Tv, _ = va_ref.shape
    Cv = w_ref.shape[1]

    # Conv1d as ONE im2col matmul: (B*T, K*C) @ (K*C, C), bf16 in / f32 acc.
    y = jnp.dot(lhs_ref[...], w_ref[...], preferred_element_type=jnp.float32)
    y3 = y.reshape(Bv, Tv, Cv)     # splits the sublane dim only (B*T -> B, T)

    # attention_fc (Linear(C, 1)): per-(batch, time-step) scores, f32.
    scores = jnp.sum(y3 * wa_ref[...], axis=-1, keepdims=True) + ba_ref[...]  # (B, T, 1)
    m = jnp.max(scores, axis=1, keepdims=True)
    e = jnp.exp(scores - m)
    s = jnp.sum(e, axis=1, keepdims=True)
    attn = e / s                                       # softmax    over T, (B, T, 1)
    log_attn = (scores - m) - jnp.log(s)               # logsoftmax over T, (B, T, 1)
    va_ref[...] = log_attn.astype(va_ref.dtype)
    vis_ref[...] = attn.astype(vis_ref.dtype)

    # hidden[b, c] = sum_t attn[b, t] * y[b, t, c]
    hidden = jnp.sum(y3 * attn, axis=1)                # (B, C), f32
    hid_ref[...] = hidden.astype(hid_ref.dtype)

    # hidden_fc (Linear(C, Hd)).
    fc = jnp.dot(hidden.astype(whT_ref.dtype), whT_ref[...],
                 preferred_element_type=jnp.float32) + bh_ref[...]
    fc_ref[...] = fc.astype(fc_ref.dtype)


def conv1d_attn_pool_and_fc(h, conv_w, attn_w, attn_b, fc_w, fc_b):
    """h: (B, C, T) -> (volume_attention (B,T), volume_attention_vis (B,1,T),
    hidden (B,C), fc_out (B,Hd))."""
    B, C, T = h.shape
    Co, Ci, K = conv_w.shape
    assert Ci == C and Co == C
    pad = K // 2
    Hd = fc_w.shape[0]

    # One-off layout plumbing on tiny tensors: time-major zero-padded copy,
    # im2col LHS + stacked conv weight (so the conv is one matmul), and bf16
    # casts of the MXU operands (f32 accumulation happens in-kernel).
    ht_pad = jnp.pad(jnp.transpose(h, (0, 2, 1)).astype(jnp.float32),
                     ((0, 0), (pad, pad), (0, 0)))                       # (B, T+2p, C)
    lhs = jnp.concatenate([ht_pad[:, k:k + T, :] for k in range(K)], axis=-1)
    lhs = lhs.reshape(B * T, K * C).astype(jnp.bfloat16)                 # (B*T, K*C)
    w_stack = (jnp.transpose(conv_w, (2, 1, 0))
               .reshape(K * C, C).astype(jnp.bfloat16))                  # (K*C, C)
    wa = attn_w.reshape(1, 1, C).astype(jnp.float32)                     # (1, 1, C)
    ba = attn_b.reshape(1, 1, 1).astype(jnp.float32)                     # (1, 1, 1)
    whT = jnp.transpose(fc_w, (1, 0)).astype(jnp.bfloat16)               # (C, Hd)
    bh = fc_b.reshape(1, Hd).astype(jnp.float32)                         # (1, Hd)

    out_shapes = (
        jax.ShapeDtypeStruct((B, T, 1), jnp.float32),   # logsoftmax scores
        jax.ShapeDtypeStruct((B, T, 1), jnp.float32),   # softmax scores
        jax.ShapeDtypeStruct((B, C), jnp.float32),      # attention-pooled hidden
        jax.ShapeDtypeStruct((B, Hd), jnp.float32),     # hidden_fc output
    )
    # Single invocation (no grid): operands land in VMEM once, single-buffered.
    # Working set ~6.5 MiB (dominated by the bf16 stacked conv weight) fits the
    # default scoped VMEM budget on v5e / v6e / v7x, so no vmem_limit override.
    va, vis, hid, fc = pl.pallas_call(
        _volume_pool_kernel,
        out_shape=out_shapes,
    )(lhs, w_stack, wa, ba, whT, bh)

    return va.reshape(B, T), jnp.transpose(vis, (0, 2, 1)), hid, fc


# ---------------------------------------------------------------------------
# Full module forward
# ---------------------------------------------------------------------------

def multi_attention_pool_2(x, params):
    """Forward pass of MultiAttentionPool_2.  x: (B, C, T, W, H), C == 512."""
    mih = per_frame_max_pool(x)                                    # (B, C, T)
    va, vis, hidden, fc_out = conv1d_attn_pool_and_fc(
        mih.astype(jnp.float32), params["conv_w"], params["attn_w"],
        params["attn_b"], params["fc_w"], params["fc_b"])
    return {
        "multi_image_hidden_2": mih,
        "volume_attention_2": va,
        "volume_attention_vis_2": vis,
        "hidden_2": hidden,
        "hidden": fc_out,
    }


def _reference_forward(x, params):
    B, C, T, W, H = x.shape
    K = params["conv_w"].shape[-1]
    mih = jnp.max(x.reshape(B, C, T, W * H), axis=-1)
    y = jax.lax.conv_general_dilated(
        mih.astype(jnp.float32), params["conv_w"],
        window_strides=(1,), padding=((K // 2, K // 2),),
        dimension_numbers=("NCH", "OIH", "NCH"))
    scores = jnp.einsum("bct,c->bt", y, params["attn_w"][0]) + params["attn_b"][0]
    log_attn = jax.nn.log_softmax(scores, axis=-1)
    attn = jax.nn.softmax(scores, axis=-1)
    hidden = jnp.einsum("bct,bt->bc", y, attn)
    fc_out = hidden @ params["fc_w"].T + params["fc_b"]
    return {
        "multi_image_hidden_2": mih,
        "volume_attention_2": log_attn,
        "volume_attention_vis_2": attn[:, None, :],
        "hidden_2": hidden,
        "hidden": fc_out,
    }


if __name__ == "__main__":
    key = jax.random.PRNGKey(0)
    ks = jax.random.split(key, 6)

    # Shapes implied by the module: num_chan / hidden_fc are hard-coded to 512.
    B, C, T, W, H = 2, 512, 8, 16, 16
    K = 11

    x = jax.random.normal(ks[0], (B, C, T, W, H), dtype=jnp.float32)
    params = {
        "conv_w": jax.random.normal(ks[1], (C, C, K), jnp.float32) / jnp.sqrt(C * K),
        "attn_w": jax.random.normal(ks[2], (1, C), jnp.float32) / jnp.sqrt(C),
        "attn_b": jax.random.normal(ks[3], (1,), jnp.float32) * 0.1,
        "fc_w": jax.random.normal(ks[4], (C, C), jnp.float32) / jnp.sqrt(C),
        "fc_b": jax.random.normal(ks[5], (C,), jnp.float32) * 0.1,
    }

    fwd = jax.jit(multi_attention_pool_2)
    out = jax.block_until_ready(fwd(x, params))

    ref = _reference_forward(x, params)

    assert out["multi_image_hidden_2"].shape == (B, C, T)
    assert out["volume_attention_2"].shape == (B, T)
    assert out["volume_attention_vis_2"].shape == (B, 1, T)
    assert out["hidden_2"].shape == (B, C)
    assert out["hidden"].shape == (B, C)

    # Max pooling is exact arithmetic -> exact match expected.
    assert jnp.allclose(out["multi_image_hidden_2"],
                        ref["multi_image_hidden_2"]), "max-pool mismatch"
    # Stage-2 uses bf16 MXU operands with f32 accumulation -> loose tolerance.
    for name in ("volume_attention_2", "volume_attention_vis_2", "hidden_2", "hidden"):
        assert jnp.allclose(out[name], ref[name], atol=2e-2, rtol=2e-2), f"{name} mismatch"

    print("KERNEL_OK")
</pallas_src>

<mosaic_0001>
module attributes {stable_mosaic.version = 11 : i64} {
  func.func @kernel(%arg0: i32, %arg1: i32, %arg2: memref<2048x256xf32, #tpu.memory_space<vmem>>, %arg3: memref<2048x1xf32, #tpu.memory_space<vmem>>, %arg4: memref<2048x128xf32, #tpu.memory_space<vmem>>) attributes {dimension_semantics = [#tpu.dimension_semantics<parallel>, #tpu.dimension_semantics<arbitrary>], iteration_bounds = array<i64: 4, 1>, scalar_prefetch = 0 : i64, scratch_operands = 1 : i64, tpu.core_type = #tpu.core_type<tc>, window_params = [{transform_indices = @transform_0, window_bounds = array<i64: 2048, 256>}, {transform_indices = @transform_1, window_bounds = array<i64: 2048, 1>}]} {
    %c0 = arith.constant 0 : index
    %c0_0 = arith.constant 0 : index
    %0 = vector.load %arg2[%c0, %c0_0] : memref<2048x256xf32, #tpu.memory_space<vmem>>, vector<2048x256xf32>
    %1 = vector.extract_strided_slice %0 {offsets = [0, 0], sizes = [2048, 128], strides = [1, 1]} : vector<2048x256xf32> to vector<2048x128xf32>
    %2 = vector.extract_strided_slice %0 {offsets = [0, 128], sizes = [2048, 128], strides = [1, 1]} : vector<2048x256xf32> to vector<2048x128xf32>
    %3 = arith.maximumf %1, %2 : vector<2048x128xf32>
    %c0_i32 = arith.constant 0 : i32
    %4 = arith.cmpi eq, %arg1, %c0_i32 : i32
    %5 = arith.extui %4 : i1 to i32
    %c0_i32_1 = arith.constant 0 : i32
    %6 = arith.cmpi ne, %5, %c0_i32_1 : i32
    scf.if %6 {
      %c0_6 = arith.constant 0 : index
      %c0_7 = arith.constant 0 : index
      %13 = vector.load %arg4[%c0_6, %c0_7] : memref<2048x128xf32, #tpu.memory_space<vmem>>, vector<2048x128xf32>
      tpu.vector_store %arg4[%c0_6, %c0_7], %3 {strides = array<i32>} : memref<2048x128xf32, #tpu.memory_space<vmem>>, vector<2048x128xf32>,
    } else {
    }
    %c0_i32_2 = arith.constant 0 : i32
    %7 = arith.cmpi ne, %arg1, %c0_i32_2 : i32
    %8 = arith.extui %7 : i1 to i32
    %c0_i32_3 = arith.constant 0 : i32
    %9 = arith.cmpi ne, %8, %c0_i32_3 : i32
    scf.if %9 {
      %c0_6 = arith.constant 0 : index
      %c0_7 = arith.constant 0 : index
      %13 = vector.load %arg4[%c0_6, %c0_7] : memref<2048x128xf32, #tpu.memory_space<vmem>>, vector<2048x128xf32>
      %14 = arith.maximumf %13, %3 : vector<2048x128xf32>
      %c0_8 = arith.constant 0 : index
      %c0_9 = arith.constant 0 : index
      %15 = vector.load %arg4[%c0_8, %c0_9] : memref<2048x128xf32, #tpu.memory_space<vmem>>, vector<2048x128xf32>
      tpu.vector_store %arg4[%c0_8, %c0_9], %14 {strides = array<i32>} : memref<2048x128xf32, #tpu.memory_space<vmem>>, vector<2048x128xf32>,
    } else {
    }
    %c0_i32_4 = arith.constant 0 : i32
    %10 = arith.cmpi eq, %arg1, %c0_i32_4 : i32
    %11 = arith.extui %10 : i1 to i32
    %c0_i32_5 = arith.constant 0 : i32
    %12 = arith.cmpi ne, %11, %c0_i32_5 : i32
    scf.if %12 {
      %c0_6 = arith.constant 0 : index
      %c0_7 = arith.constant 0 : index
      %13 = vector.load %arg4[%c0_6, %c0_7] : memref<2048x128xf32, #tpu.memory_space<vmem>>, vector<2048x128xf32>
      %cst = arith.constant dense<0xFF800000> : vector<2048xf32>
      %14 = vector.multi_reduction <maximumf>, %13, %cst [1] : vector<2048x128xf32> to vector<2048xf32>
      %15 = vector.shape_cast %14 : vector<2048xf32> to vector<2048x1xf32>
      %c0_8 = arith.constant 0 : index
      %c0_9 = arith.constant 0 : index
      %16 = vector.load %arg3[%c0_8, %c0_9] : memref<2048x1xf32, #tpu.memory_space<vmem>>, vector<2048x1xf32>
      tpu.vector_store %arg3[%c0_8, %c0_9], %15 {strides = array<i32>} : memref<2048x1xf32, #tpu.memory_space<vmem>>, vector<2048x1xf32>,
    } else {
    }
    return
  }
  func.func @transform_0(%arg0: i32, %arg1: i32) -> (i32, i32) {
    %c0_i32 = arith.constant 0 : i32
    return %arg0, %arg1 : i32, i32
  }
  func.func @transform_1(%arg0: i32, %arg1: i32) -> (i32, i32) {
    %c0_i32 = arith.constant 0 : i32
    %c0_i32_0 = arith.constant 0 : i32
    return %arg0, %c0_i32 : i32, i32
  }
}

module attributes {stable_mosaic.version = 11 : i64} {
  func.func @_volume_pool_kernel(%arg0: memref<16x5632xbf16, #tpu.memory_space<vmem>>, %arg1: memref<5632x512xbf16, #tpu.memory_space<vmem>>, %arg2: memref<1x1x512xf32, #tpu.memory_space<vmem>>, %arg3: memref<1x1x1xf32, #tpu.memory_space<vmem>>, %arg4: memref<512x512xbf16, #tpu.memory_space<vmem>>, %arg5: memref<1x512xf32, #tpu.memory_space<vmem>>, %arg6: memref<2x8x1xf32, #tpu.memory_space<vmem>>, %arg7: memref<2x8x1xf32, #tpu.memory_space<vmem>>, %arg8: memref<2x512xf32, #tpu.memory_space<vmem>>, %arg9: memref<2x512xf32, #tpu.memory_space<vmem>>) attributes {dimension_semantics = [], scalar_prefetch = 0 : i64, scratch_operands = 0 : i64, tpu.core_type = #tpu.core_type<tc>} {
    %c0 = arith.constant 0 : index
    %c0_0 = arith.constant 0 : index
    %0 = vector.load %arg0[%c0, %c0_0] : memref<16x5632xbf16, #tpu.memory_space<vmem>>, vector<16x5632xbf16>
    %c0_1 = arith.constant 0 : index
    %c0_2 = arith.constant 0 : index
    %1 = vector.load %arg1[%c0_1, %c0_2] : memref<5632x512xbf16, #tpu.memory_space<vmem>>, vector<5632x512xbf16>
    %cst = arith.constant dense<0.000000e+00> : vector<16x512xf32>
    %2 = tpu.matmul %0, %1, %cst {dimension_numbers = #tpu.dot_dimension_numbers<[1], [0], [0], [1], [0, 0, 1, 1], [], []>} : vector<16x5632xbf16>, vector<5632x512xbf16>, vector<16x512xf32> -> vector<16x512xf32>
    %3 = vector.shape_cast %2 : vector<16x512xf32> to vector<2x8x512xf32>
    %c0_3 = arith.constant 0 : index
    %c0_4 = arith.constant 0 : index
    %c0_5 = arith.constant 0 : index
    %4 = vector.load %arg2[%c0_3, %c0_4, %c0_5] : memref<1x1x512xf32, #tpu.memory_space<vmem>>, vector<1x1x512xf32>
    %5 = vector.broadcast %4 : vector<1x1x512xf32> to vector<2x8x512xf32>
    %6 = arith.mulf %3, %5 : vector<2x8x512xf32>
    %cst_6 = arith.constant dense<0.000000e+00> : vector<2x8xf32>
    %7 = vector.multi_reduction <add>, %6, %cst_6 [2] : vector<2x8x512xf32> to vector<2x8xf32>
    %8 = vector.shape_cast %7 : vector<2x8xf32> to vector<2x8x1xf32>
    %c0_7 = arith.constant 0 : index
    %c0_8 = arith.constant 0 : index
    %c0_9 = arith.constant 0 : index
    %9 = vector.load %arg3[%c0_7, %c0_8, %c0_9] : memref<1x1x1xf32, #tpu.memory_space<vmem>>, vector<1x1x1xf32>
    %10 = vector.broadcast %9 : vector<1x1x1xf32> to vector<2x8x1xf32>
    %11 = arith.addf %8, %10 : vector<2x8x1xf32>
    %cst_10 = arith.constant dense<0xFF800000> : vector<2x1xf32>
    %12 = vector.multi_reduction <maximumf>, %11, %cst_10 [1] : vector<2x8x1xf32> to vector<2x1xf32>
    %13 = vector.shape_cast %12 : vector<2x1xf32> to vector<2x1x1xf32>
    %14 = vector.broadcast %13 : vector<2x1x1xf32> to vector<2x8x1xf32>
    %15 = arith.subf %11, %14 : vector<2x8x1xf32>
    %16 = math.exp %15 : vector<2x8x1xf32>
    %cst_11 = arith.constant dense<0.000000e+00> : vector<2x1xf32>
    %17 = vector.multi_reduction <add>, %16, %cst_11 [1] : vector<2x8x1xf32> to vector<2x1xf32>
    %18 = vector.shape_cast %17 : vector<2x1xf32> to vector<2x1x1xf32>
    %19 = vector.broadcast %18 : vector<2x1x1xf32> to vector<2x8x1xf32>
    %20 = arith.divf %16, %19 : vector<2x8x1xf32>
    %21 = vector.broadcast %13 : vector<2x1x1xf32> to vector<2x8x1xf32>
    %22 = arith.subf %11, %21 : vector<2x8x1xf32>
    %23 = math.log %18 : vector<2x1x1xf32>
    %24 = vector.broadcast %23 : vector<2x1x1xf32> to vector<2x8x1xf32>
    %25 = arith.subf %22, %24 : vector<2x8x1xf32>
    %c0_12 = arith.constant 0 : index
    %c0_13 = arith.constant 0 : index
    %c0_14 = arith.constant 0 : index
    %26 = vector.load %arg6[%c0_12, %c0_13, %c0_14] : memref<2x8x1xf32, #tpu.memory_space<vmem>>, vector<2x8x1xf32>
    tpu.vector_store %arg6[%c0_12, %c0_13, %c0_14], %25 {strides = array<i32>} : memref<2x8x1xf32, #tpu.memory_space<vmem>>, vector<2x8x1xf32>,
    %c0_15 = arith.constant 0 : index
    %c0_16 = arith.constant 0 : index
    %c0_17 = arith.constant 0 : index
    %27 = vector.load %arg7[%c0_15, %c0_16, %c0_17] : memref<2x8x1xf32, #tpu.memory_space<vmem>>, vector<2x8x1xf32>
    tpu.vector_store %arg7[%c0_15, %c0_16, %c0_17], %20 {strides = array<i32>} : memref<2x8x1xf32, #tpu.memory_space<vmem>>, vector<2x8x1xf32>,
    %28 = vector.broadcast %20 : vector<2x8x1xf32> to vector<2x8x512xf32>
    %29 = arith.mulf %3, %28 : vector<2x8x512xf32>
    %cst_18 = arith.constant dense<0.000000e+00> : vector<2x512xf32>
    %30 = vector.multi_reduction <add>, %29, %cst_18 [1] : vector<2x8x512xf32> to vector<2x512xf32>
    %c0_19 = arith.constant 0 : index
    %c0_20 = arith.constant 0 : index
    %31 = vector.load %arg8[%c0_19, %c0_20] : memref<2x512xf32, #tpu.memory_space<vmem>>, vector<2x512xf32>
    tpu.vector_store %arg8[%c0_19, %c0_20], %30 {strides = array<i32>} : memref<2x512xf32, #tpu.memory_space<vmem>>, vector<2x512xf32>,
    %32 = arith.truncf %30 : vector<2x512xf32> to vector<2x512xbf16>
    %c0_21 = arith.constant 0 : index
    %c0_22 = arith.constant 0 : index
    %33 = vector.load %arg4[%c0_21, %c0_22] : memref<512x512xbf16, #tpu.memory_space<vmem>>, vector<512x512xbf16>
    %cst_23 = arith.constant dense<0.000000e+00> : vector<2x512xf32>
    %34 = tpu.matmul %32, %33, %cst_23 {dimension_numbers = #tpu.dot_dimension_numbers<[1], [0], [0], [1], [0, 0, 1, 1], [], []>} : vector<2x512xbf16>, vector<512x512xbf16>, vector<2x512xf32> -> vector<2x512xf32>
    %c0_24 = arith.constant 0 : index
    %c0_25 = arith.constant 0 : index
    %35 = vector.load %arg5[%c0_24, %c0_25] : memref<1x512xf32, #tpu.memory_space<vmem>>, vector<1x512xf32>
    %36 = vector.broadcast %35 : vector<1x512xf32> to vector<2x512xf32>
    %37 = arith.addf %34, %36 : vector<2x512xf32>
    %c0_26 = arith.constant 0 : index
    %c0_27 = arith.constant 0 : index
    %38 = vector.load %arg9[%c0_26, %c0_27] : memref<2x512xf32, #tpu.memory_space<vmem>>, vector<2x512xf32>
    tpu.vector_store %arg9[%c0_26, %c0_27], %37 {strides = array<i32>} : memref<2x512xf32, #tpu.memory_space<vmem>>, vector<2x512xf32>,
    return
  }
}

</mosaic_0001>

<bundles_post_ra>
// kernel: multi_attention_pool_2.2
= control target key start
LH: loop header
LB: loop body
LE: loop exit
PB: predicated region body
PF: predicated region fallthrough
CT: control target
= control target key end

     0   :  { %s3121_s6 = smov 0   ;;  %s3123_s7 = smov 0   ;;  %s4186_s0 = inlined_call_operand.vmem [shape: f32[8192,256], index: 0, kind: input, shape index: {}]   ;;  %s4187_s1 = inlined_call_operand.vmem [shape: f32[8192,1], index: 1, kind: output, shape index: {}]  }
   0x1   :  { %s3125_s8 = smov 0  }
   0x2 LB: > { %s23_s9 = sadd.s32 1, %s3105_s7  ;;  %p3054_p0 = scmp.ge.s32.totalorder %s3109_s8, 1  ;;  %s3109_s8 = sphi %s3125_s8, %s11_s8   ;;  %s3105_s7 = sphi %s3123_s7, %s4189_s7   ;;  %s3101_s6 = sphi %s3121_s6, %s4188_s6  }
   0x3   : > { %p25_p1 = scmp.ge.s32.totalorder %s23_s9, 4  ;;  %p108_p2 = scmp.lt.s32.totalorder %s3109_s8, 5 }
   0x5   : > { %s4191_s9 = smov (%p25_p1, %s23_s9), 0  ;;  %p109_p3 = pnand %p3054_p0, %p108_p2 }
   0x6   : > { %s3055_s10 = sshll.u32 (!%p109_p3), %s3101_s6, 8  ;;  %vm2722_vm0 = vcmask (!%p109_p3), 7168  }
   0x7   : > { %112 = sbr.rel (%p109_p3) target bundleno = 672 (0x2a0), region = 24  ;;  %p135_p4 = scmp.lt.s32.totalorder (!%p109_p3), %s3055_s10, 1023 }
   0xe   : > { %s4193_s10 = smov (!%p135_p4, %s3055_s10), 1023 }
   0xf   : > { %s3062_s11 = sshll.u32 %s4193_s10, 4  ;;  %s3059_s15 = sshll.u32 %s4193_s10, 3 }
  0x10   : > { %s3145_s14 = scalar_lea.vmem %s4186_s0, %s3062_s11  ;;  %s3299_s18 = scalar_lea.vmem %s4187_s1, %s3059_s15 }
  0x11   : > { %v155_v0 = vld [vmem:[%s3145_s14 + $0x20] sm:$0xff]  ;;  %v156_v1 = vld [vmem:[%s3145_s14 + $0x28] sm:$0xff]  ;;  %v157_v5 = vld [vmem:[%s3145_s14 + $0x30] sm:$0xff] }
  0x12   : > { %v151_v2 = vld [vmem:[%s3145_s14] sm:$0xff]  ;;  %v665_v3 = vmax.f32 %v155_v0, %v156_v1  ;;  %v152_v4 = vld [vmem:[%s3145_s14 + $0x8] sm:$0xff]  ;;  %v158_v6 = vld [vmem:[%s3145_s14 + $0x38] sm:$0xff] }
  0x13   : > { %v663_v7 = vmax.f32 %v151_v2, %v152_v4  ;;  %v153_v8 = vld [vmem:[%s3145_s14 + $0x10] sm:$0xff]  ;;  %v154_v9 = vld [vmem:[%s3145_s14 + $0x18] sm:$0xff]  ;;  %v666_v10 = vmax.f32 %v157_v5, %v158_v6  ;;  %v159_v14 = vld [vmem:[%s3145_s14 + $0x40] sm:$0xff] }
  0x14   : > { %2214 = vmax.xlane.f32.xlu1 %v665_v3  ;;  %v664_v11 = vmax.f32 %v153_v8, %v154_v9  ;;  %v161_v12 = vld [vmem:[%s3145_s14 + $0x50] sm:$0xff]  ;;  %v162_v13 = vld [vmem:[%s3145_s14 + $0x58] sm:$0xff]  ;;  %v160_v15 = vld [vmem:[%s3145_s14 + $0x48] sm:$0xff] }
  0x15   : > { %2210 = vmax.xlane.f32.xlu0 %v663_v7  ;;  %v668_v16 = vmax.f32 %v161_v12, %v162_v13  ;;  %v667_v17 = vmax.f32 %v159_v14, %v160_v15  ;;  %v165_v18 = vld [vmem:[%s3145_s14 + $0x70] sm:$0xff]  ;;  %v166_v19 = vld [vmem:[%s3145_s14 + $0x78] sm:$0xff]  ;;  %v163_v20 = vld [vmem:[%s3145_s14 + $0x60] sm:$0xff] }
  0x16   : > { %v164_v21 = vld [vmem:[%s3145_s14 + $0x68] sm:$0xff]  ;;  %v670_v22 = vmax.f32 %v165_v18, %v166_v19  ;;  %v169_v24 = vld [vmem:[%s3145_s14 + $0x90] sm:$0xff]  ;;  %v170_v25 = vld [vmem:[%s3145_s14 + $0x98] sm:$0xff] }
  0x17   : > { %v669_v23 = vmax.f32 %v163_v20, %v164_v21  ;;  %v167_v26 = vld [vmem:[%s3145_s14 + $0x80] sm:$0xff]  ;;  %v168_v27 = vld [vmem:[%s3145_s14 + $0x88] sm:$0xff]  ;;  %v672_v28 = vmax.f32 %v169_v24, %v170_v25  ;;  %v173_v30 = vld [vmem:[%s3145_s14 + $0xb0] sm:$0xff] }
  0x18   : > { %2216 = vmax.xlane.f32.xlu1 %v666_v10  ;;  %v671_v29 = vmax.f32 %v167_v26, %v168_v27  ;;  %v174_v31 = vld [vmem:[%s3145_s14 + $0xb8] sm:$0xff]  ;;  %v171_v32 = vld [vmem:[%s3145_s14 + $0xa0] sm:$0xff]  ;;  %v172_v33 = vld [vmem:[%s3145_s14 + $0xa8] sm:$0xff] }
  0x19   : > { %2212 = vmax.xlane.f32.xlu0 %v664_v11  ;;  %v674_v34 = vmax.f32 %v173_v30, %v174_v31  ;;  %v673_v35 = vmax.f32 %v171_v32, %v172_v33  ;;  %v177_v36 = vld [vmem:[%s3145_s14 + $0xd0] sm:$0xff]  ;;  %v178_v37 = vld [vmem:[%s3145_s14 + $0xd8] sm:$0xff]  ;;  %v175_v38 = vld [vmem:[%s3145_s14 + $0xc0] sm:$0xff] }
  0x1a   : > { %v176_v39 = vld [vmem:[%s3145_s14 + $0xc8] sm:$0xff]  ;;  %v676_v40 = vmax.f32 %v177_v36, %v178_v37  ;;  %v181_v42 = vld [vmem:[%s3145_s14 + $0xf0] sm:$0xff]  ;;  %v182_v43 = vld [vmem:[%s3145_s14 + $0xf8] sm:$0xff] }
  0x1b   : > { %v675_v41 = vmax.f32 %v175_v38, %v176_v39  ;;  %v179_v44 = vld [vmem:[%s3145_s14 + $0xe0] sm:$0xff]  ;;  %v180_v45 = vld [vmem:[%s3145_s14 + $0xe8] sm:$0xff]  ;;  %v678_v46 = vmax.f32 %v181_v42, %v182_v43  ;;  %v185_v48 = vld [vmem:[%s3145_s14 + $0x110] sm:$0xff] }
  0x1c   : > { %2220 = vmax.xlane.f32.xlu1 %v668_v16  ;;  %v677_v47 = vmax.f32 %v179_v44, %v180_v45  ;;  %v186_v49 = vld [vmem:[%s3145_s14 + $0x118] sm:$0xff]  ;;  %v183_v50 = vld [vmem:[%s3145_s14 + $0x100] sm:$0xff]  ;;  %v184_v51 = vld [vmem:[%s3145_s14 + $0x108] sm:$0xff] }
  0x1d   : > { %2218 = vmax.xlane.f32.xlu0 %v667_v17  ;;  %v680_v52 = vmax.f32 %v185_v48, %v186_v49  ;;  %v679_v53 = vmax.f32 %v183_v50, %v184_v51  ;;  %v189_v54 = vld [vmem:[%s3145_s14 + $0x130] sm:$0xff]  ;;  %v190_v55 = vld [vmem:[%s3145_s14 + $0x138] sm:$0xff]  ;;  %v187_v56 = vld [vmem:[%s3145_s14 + $0x120] sm:$0xff] }
  0x1e   : > { %v188_v57 = vld [vmem:[%s3145_s14 + $0x128] sm:$0xff]  ;;  %v682_v58 = vmax.f32 %v189_v54, %v190_v55  ;;  %v193_v60 = vld [vmem:[%s3145_s14 + $0x150] sm:$0xff]  ;;  %v194_v61 = vld [vmem:[%s3145_s14 + $0x158] sm:$0xff] }
  0x1f   : > { %v681_v59 = vmax.f32 %v187_v56, %v188_v57  ;;  %v191_v62 = vld [vmem:[%s3145_s14 + $0x140] sm:$0xff]  ;;  %v192_v63 = vld [vmem:[%s3145_s14 + $0x148] sm:$0xff]  ;;  %v684_v0 = vmax.f32 %v193_v60, %v194_v61  ;;  %v197_v2 = vld [vmem:[%s3145_s14 + $0x170] sm:$0xff] }
  0x20   : > { %2224 = vmax.xlane.f32.xlu1 %v670_v22  ;;  %v683_v1 = vmax.f32 %v191_v62, %v192_v63  ;;  %v198_v3 = vld [vmem:[%s3145_s14 + $0x178] sm:$0xff]  ;;  %v195_v4 = vld [vmem:[%s3145_s14 + $0x160] sm:$0xff]  ;;  %v196_v5 = vld [vmem:[%s3145_s14 + $0x168] sm:$0xff] }
  0x21   : > { %2222 = vmax.xlane.f32.xlu0 %v669_v23  ;;  %v686_v6 = vmax.f32 %v197_v2, %v198_v3  ;;  %v685_v7 = vmax.f32 %v195_v4, %v196_v5  ;;  %v201_v8 = vld [vmem:[%s3145_s14 + $0x190] sm:$0xff]  ;;  %v202_v9 = vld [vmem:[%s3145_s14 + $0x198] sm:$0xff]  ;;  %v199_v10 = vld [vmem:[%s3145_s14 + $0x180] sm:$0xff] }
  0x22   : > { %v200_v11 = vld [vmem:[%s3145_s14 + $0x188] sm:$0xff]  ;;  %v688_v12 = vmax.f32 %v201_v8, %v202_v9  ;;  %v205_v14 = vld [vmem:[%s3145_s14 + $0x1b0] sm:$0xff]  ;;  %v206_v15 = vld [vmem:[%s3145_s14 + $0x1b8] sm:$0xff] }
  0x23   : > { %v687_v13 = vmax.f32 %v199_v10, %v200_v11  ;;  %v203_v16 = vld [vmem:[%s3145_s14 + $0x1a0] sm:$0xff]  ;;  %v204_v17 = vld [vmem:[%s3145_s14 + $0x1a8] sm:$0xff]  ;;  %v690_v18 = vmax.f32 %v205_v14, %v206_v15  ;;  %v209_v20 = vld [vmem:[%s3145_s14 + $0x1d0] sm:$0xff] }
  0x24   : > { %2228 = vmax.xlane.f32.xlu1 %v672_v28  ;;  %v689_v19 = vmax.f32 %v203_v16, %v204_v17  ;;  %v210_v21 = vld [vmem:[%s3145_s14 + $0x1d8] sm:$0xff]  ;;  %v207_v22 = vld [vmem:[%s3145_s14 + $0x1c0] sm:$0xff]  ;;  %v208_v23 = vld [vmem:[%s3145_s14 + $0x1c8] sm:$0xff] }
  0x25   : > { %2226 = vmax.xlane.f32.xlu0 %v671_v29  ;;  %v692_v24 = vmax.f32 %v209_v20, %v210_v21  ;;  %v691_v25 = vmax.f32 %v207_v22, %v208_v23  ;;  %v213_v26 = vld [vmem:[%s3145_s14 + $0x1f0] sm:$0xff]  ;;  %v214_v27 = vld [vmem:[%s3145_s14 + $0x1f8] sm:$0xff]  ;;  %v211_v28 = vld [vmem:[%s3145_s14 + $0x1e0] sm:$0xff] }
  0x26   : > { %v212_v29 = vld [vmem:[%s3145_s14 + $0x1e8] sm:$0xff]  ;;  %v694_v30 = vmax.f32 %v213_v26, %v214_v27  ;;  %v217_v32 = vld [vmem:[%s3145_s14 + $0x210] sm:$0xff]  ;;  %v218_v33 = vld [vmem:[%s3145_s14 + $0x218] sm:$0xff] }
  0x27   : > { %v693_v31 = vmax.f32 %v211_v28, %v212_v29  ;;  %v696_v36 = vmax.f32 %v217_v32, %v218_v33  ;;  %v221_v38 = vld [vmem:[%s3145_s14 + $0x230] sm:$0xff]  ;;  %v222_v39 = vld [vmem:[%s3145_s14 + $0x238] sm:$0xff] }
  0x28   : > { %2232 = vmax.xlane.f32.xlu1 %v674_v34  ;;  %v215_v34 = vld [vmem:[%s3145_s14 + $0x200] sm:$0xff]  ;;  %v698_v42 = vmax.f32 %v221_v38, %v222_v39  ;;  %v225_v44 = vld [vmem:[%s3145_s14 + $0x250] sm:$0xff]  ;;  %v226_v45 = vld [vmem:[%s3145_s14 + $0x258] sm:$0xff] }
  0x29   : > { %2230 = vmax.xlane.f32.xlu0 %v673_v35  ;;  %v216_v35 = vld [vmem:[%s3145_s14 + $0x208] sm:$0xff]  ;;  %v700_v48 = vmax.f32 %v225_v44, %v226_v45  ;;  %v229_v50 = vld [vmem:[%s3145_s14 + $0x270] sm:$0xff]  ;;  %v230_v51 = vld [vmem:[%s3145_s14 + $0x278] sm:$0xff] }
  0x2a   : > { %v695_v37 = vmax.f32 %v215_v34, %v216_v35  ;;  %v702_v54 = vmax.f32 %v229_v50, %v230_v51  ;;  %v233_v56 = vld [vmem:[%s3145_s14 + $0x290] sm:$0xff]  ;;  %v234_v57 = vld [vmem:[%s3145_s14 + $0x298] sm:$0xff] }
  0x2b   : > { %v704_v60 = vmax.f32 %v233_v56, %v234_v57  ;;  %v237_v62 = vld [vmem:[%s3145_s14 + $0x2b0] sm:$0xff]  ;;  %v238_v63 = vld [vmem:[%s3145_s14 + $0x2b8] sm:$0xff] }
  0x2c   : > { %2236 = vmax.xlane.f32.xlu1 %v676_v40  ;;  %v219_v40 = vld [vmem:[%s3145_s14 + $0x220] sm:$0xff]  ;;  %v706_v2 = vmax.f32 %v237_v62, %v238_v63  ;;  %v241_v4 = vld [vmem:[%s3145_s14 + $0x2d0] sm:$0xff]  ;;  %v242_v5 = vld [vmem:[%s3145_s14 + $0x2d8] sm:$0xff] }
  0x2d   : > { %2234 = vmax.xlane.f32.xlu0 %v675_v41  ;;  %v220_v41 = vld [vmem:[%s3145_s14 + $0x228] sm:$0xff]  ;;  %v708_v8 = vmax.f32 %v241_v4, %v242_v5  ;;  %v245_v10 = vld [vmem:[%s3145_s14 + $0x2f0] sm:$0xff]  ;;  %v246_v11 = vld [vmem:[%s3145_s14 + $0x2f8] sm:$0xff] }
  0x2e   : > { %v697_v43 = vmax.f32 %v219_v40, %v220_v41  ;;  %v710_v14 = vmax.f32 %v245_v10, %v246_v11  ;;  %v249_v16 = vld [vmem:[%s3145_s14 + $0x310] sm:$0xff]  ;;  %v250_v17 = vld [vmem:[%s3145_s14 + $0x318] sm:$0xff] }
  0x2f   : > { %v712_v20 = vmax.f32 %v249_v16, %v250_v17  ;;  %v253_v22 = vld [vmem:[%s3145_s14 + $0x330] sm:$0xff]  ;;  %v254_v23 = vld [vmem:[%s3145_s14 + $0x338] sm:$0xff] }
  0x30   : > { %2240 = vmax.xlane.f32.xlu1 %v678_v46  ;;  %v223_v46 = vld [vmem:[%s3145_s14 + $0x240] sm:$0xff]  ;;  %v714_v26 = vmax.f32 %v253_v22, %v254_v23  ;;  %v257_v28 = vld [vmem:[%s3145_s14 + $0x350] sm:$0xff]  ;;  %v258_v29 = vld [vmem:[%s3145_s14 + $0x358] sm:$0xff] }
  0x31   : > { %2238 = vmax.xlane.f32.xlu0 %v677_v47  ;;  %v224_v47 = vld [vmem:[%s3145_s14 + $0x248] sm:$0xff]  ;;  %v716_v32 = vmax.f32 %v257_v28, %v258_v29  ;;  %v261_v34 = vld [vmem:[%s3145_s14 + $0x370] sm:$0xff]  ;;  %v262_v35 = vld [vmem:[%s3145_s14 + $0x378] sm:$0xff] }
  0x32   : > { %v699_v49 = vmax.f32 %v223_v46, %v224_v47  ;;  %v718_v38 = vmax.f32 %v261_v34, %v262_v35  ;;  %v265_v40 = vld [vmem:[%s3145_s14 + $0x390] sm:$0xff]  ;;  %v266_v41 = vld [vmem:[%s3145_s14 + $0x398] sm:$0xff]  ;;  %v299_v34 = vld [vmem:[%s3145_s14 + $0x4a0] sm:$0xff] }
  0x33   : > { %v720_v44 = vmax.f32 %v265_v40, %v266_v41  ;;  %v269_v46 = vld [vmem:[%s3145_s14 + $0x3b0] sm:$0xff]  ;;  %v270_v47 = vld [vmem:[%s3145_s14 + $0x3b8] sm:$0xff]  ;;  %v300_v35 = vld [vmem:[%s3145_s14 + $0x4a8] sm:$0xff] }
  0x34   : > { %2244 = vmax.xlane.f32.xlu1 %v680_v52  ;;  %v227_v52 = vld [vmem:[%s3145_s14 + $0x260] sm:$0xff]  ;;  %v722_v50 = vmax.f32 %v269_v46, %v270_v47  ;;  %v306_v40 = vld [vmem:[%s3145_s14 + $0x4d8] sm:$0xff]  ;;  %v309_v47 = vld [vmem:[%s3145_s14 + $0x4f0] sm:$0xff] }
  0x35   : > { %2242 = vmax.xlane.f32.xlu0 %v679_v53  ;;  %v228_v53 = vld [vmem:[%s3145_s14 + $0x268] sm:$0xff] }
  0x36   : > { %v701_v55 = vmax.f32 %v227_v52, %v228_v53  ;;  %v273_v52 = vld [vmem:[%s3145_s14 + $0x3d0] sm:$0xff]  ;;  %v274_v53 = vld [vmem:[%s3145_s14 + $0x3d8] sm:$0xff] }
  0x37   : > { %v724_v56 = vmax.f32 %v273_v52, %v274_v53 }
  0x38   : > { %2248 = vmax.xlane.f32.xlu1 %v682_v58  ;;  %v231_v58 = vld [vmem:[%s3145_s14 + $0x280] sm:$0xff] }
  0x39   : > { %2246 = vmax.xlane.f32.xlu0 %v681_v59  ;;  %v232_v59 = vld [vmem:[%s3145_s14 + $0x288] sm:$0xff] }
  0x3a   : > { %v703_v61 = vmax.f32 %v231_v58, %v232_v59  ;;  %v277_v58 = vld [vmem:[%s3145_s14 + $0x3f0] sm:$0xff]  ;;  %v278_v59 = vld [vmem:[%s3145_s14 + $0x3f8] sm:$0xff] }
  0x3b   : > { %v726_v62 = vmax.f32 %v277_v58, %v278_v59  ;;  %v311_v58 = vld [vmem:[%s3145_s14 + $0x500] sm:$0xff]  ;;  %v312_v59 = vld [vmem:[%s3145_s14 + $0x508] sm:$0xff] }
  0x3c   : > { %2252 = vmax.xlane.f32.xlu1 %v684_v0  ;;  %v235_v0 = vld [vmem:[%s3145_s14 + $0x2a0] sm:$0xff] }
  0x3d   : > { %2250 = vmax.xlane.f32.xlu0 %v683_v1  ;;  %v236_v1 = vld [vmem:[%s3145_s14 + $0x2a8] sm:$0xff] }
  0x3e   : > { %v705_v3 = vmax.f32 %v235_v0, %v236_v1  ;;  %v281_v0 = vld [vmem:[%s3145_s14 + $0x410] sm:$0xff]  ;;  %v282_v1 = vld [vmem:[%s3145_s14 + $0x418] sm:$0xff] }
  0x3f   : > { %v728_v4 = vmax.f32 %v281_v0, %v282_v1  ;;  %v318_v0 = vld [vmem:[%s3145_s14 + $0x538] sm:$0xff] }
  0x40   : > { %2256 = vmax.xlane.f32.xlu1 %v686_v6  ;;  %v239_v6 = vld [vmem:[%s3145_s14 + $0x2c0] sm:$0xff] }
  0x41   : > { %2254 = vmax.xlane.f32.xlu0 %v685_v7  ;;  %v240_v7 = vld [vmem:[%s3145_s14 + $0x2c8] sm:$0xff] }
  0x42   : > { %v707_v9 = vmax.f32 %v239_v6, %v240_v7  ;;  %v285_v6 = vld [vmem:[%s3145_s14 + $0x430] sm:$0xff]  ;;  %v286_v7 = vld [vmem:[%s3145_s14 + $0x438] sm:$0xff] }
  0x43   : > { %v730_v10 = vmax.f32 %v285_v6, %v286_v7  ;;  %v321_v7 = vld [vmem:[%s3145_s14 + $0x550] sm:$0xff] }
  0x44   : > { %2260 = vmax.xlane.f32.xlu1 %v688_v12  ;;  %v243_v12 = vld [vmem:[%s3145_s14 + $0x2e0] sm:$0xff] }
  0x45   : > { %2258 = vmax.xlane.f32.xlu0 %v687_v13  ;;  %v244_v13 = vld [vmem:[%s3145_s14 + $0x2e8] sm:$0xff] }
  0x46   : > { %v709_v15 = vmax.f32 %v243_v12, %v244_v13  ;;  %v289_v12 = vld [vmem:[%s3145_s14 + $0x450] sm:$0xff]  ;;  %v290_v13 = vld [vmem:[%s3145_s14 + $0x458] sm:$0xff] }
  0x47   : > { %v732_v16 = vmax.f32 %v289_v12, %v290_v13 }
  0x48   : > { %2264 = vmax.xlane.f32.xlu1 %v690_v18  ;;  %v247_v18 = vld [vmem:[%s3145_s14 + $0x300] sm:$0xff] }
  0x49   : > { %2262 = vmax.xlane.f32.xlu0 %v689_v19  ;;  %v248_v19 = vld [vmem:[%s3145_s14 + $0x308] sm:$0xff] }
  0x4a   : > { %v711_v21 = vmax.f32 %v247_v18, %v248_v19  ;;  %v293_v18 = vld [vmem:[%s3145_s14 + $0x470] sm:$0xff]  ;;  %v294_v19 = vld [vmem:[%s3145_s14 + $0x478] sm:$0xff] }
  0x4b   : > { %v734_v22 = vmax.f32 %v293_v18, %v294_v19  ;;  %v323_v18 = vld [vmem:[%s3145_s14 + $0x560] sm:$0xff]  ;;  %v324_v19 = vld [vmem:[%s3145_s14 + $0x568] sm:$0xff] }
  0x4c   : > { %2268 = vmax.xlane.f32.xlu1 %v692_v24  ;;  %v251_v24 = vld [vmem:[%s3145_s14 + $0x320] sm:$0xff] }
  0x4d   : > { %2266 = vmax.xlane.f32.xlu0 %v691_v25  ;;  %v252_v25 = vld [vmem:[%s3145_s14 + $0x328] sm:$0xff] }
  0x4e   : > { %v713_v27 = vmax.f32 %v251_v24, %v252_v25  ;;  %v297_v24 = vld [vmem:[%s3145_s14 + $0x490] sm:$0xff]  ;;  %v298_v25 = vld [vmem:[%s3145_s14 + $0x498] sm:$0xff] }
  0x4f   : > { %v736_v28 = vmax.f32 %v297_v24, %v298_v25  ;;  %v330_v24 = vld [vmem:[%s3145_s14 + $0x598] sm:$0xff] }
  0x50   : > { %2272 = vmax.xlane.f32.xlu1 %v694_v30  ;;  %v255_v30 = vld [vmem:[%s3145_s14 + $0x340] sm:$0xff] }
  0x51   : > { %2270 = vmax.xlane.f32.xlu0 %v693_v31  ;;  %v256_v31 = vld [vmem:[%s3145_s14 + $0x348] sm:$0xff] }
  0x52   : > { %v715_v33 = vmax.f32 %v255_v30, %v256_v31  ;;  %v301_v31 = vld [vmem:[%s3145_s14 + $0x4b0] sm:$0xff] }
  0x54   : > { %2276 = vmax.xlane.f32.xlu1 %v696_v36  ;;  %v259_v36 = vld [vmem:[%s3145_s14 + $0x360] sm:$0xff] }
  0x55   : > { %2274 = vmax.xlane.f32.xlu0 %v695_v37  ;;  %v260_v37 = vld [vmem:[%s3145_s14 + $0x368] sm:$0xff] }
  0x56   : > { %v717_v39 = vmax.f32 %v259_v36, %v260_v37 }
  0x58   : > { %2280 = vmax.xlane.f32.xlu1 %v698_v42  ;;  %v263_v42 = vld [vmem:[%s3145_s14 + $0x380] sm:$0xff] }
  0x59   : > { %2278 = vmax.xlane.f32.xlu0 %v697_v43  ;;  %v264_v43 = vld [vmem:[%s3145_s14 + $0x388] sm:$0xff] }
  0x5a   : > { %v719_v45 = vmax.f32 %v263_v42, %v264_v43  ;;  %v303_v42 = vld [vmem:[%s3145_s14 + $0x4c0] sm:$0xff]  ;;  %v304_v43 = vld [vmem:[%s3145_s14 + $0x4c8] sm:$0xff] }
  0x5b   : > { %v739_v46 = vmax.f32 %v303_v42, %v304_v43  ;;  %v335_v42 = vld [vmem:[%s3145_s14 + $0x5c0] sm:$0xff]  ;;  %v336_v43 = vld [vmem:[%s3145_s14 + $0x5c8] sm:$0xff] }
  0x5c   : > { %2284 = vmax.xlane.f32.xlu1 %v700_v48  ;;  %v267_v48 = vld [vmem:[%s3145_s14 + $0x3a0] sm:$0xff] }
  0x5d   : > { %2282 = vmax.xlane.f32.xlu0 %v699_v49  ;;  %v268_v49 = vld [vmem:[%s3145_s14 + $0x3a8] sm:$0xff] }
  0x5e   : > { %v721_v51 = vmax.f32 %v267_v48, %v268_v49  ;;  %v310_v48 = vld [vmem:[%s3145_s14 + $0x4f8] sm:$0xff] }
  0x5f   : > { %v742_v52 = vmax.f32 %v309_v47, %v310_v48  ;;  %v341_v47 = vld [vmem:[%s3145_s14 + $0x5f0] sm:$0xff]  ;;  %v342_v48 = vld [vmem:[%s3145_s14 + $0x5f8] sm:$0xff] }
  0x60   : > { %2288 = vmax.xlane.f32.xlu1 %v702_v54  ;;  %v271_v54 = vld [vmem:[%s3145_s14 + $0x3c0] sm:$0xff] }
  0x61   : > { %2286 = vmax.xlane.f32.xlu0 %v701_v55  ;;  %v272_v55 = vld [vmem:[%s3145_s14 + $0x3c8] sm:$0xff] }
  0x62   : > { %v723_v57 = vmax.f32 %v271_v54, %v272_v55  ;;  %v313_v55 = vld [vmem:[%s3145_s14 + $0x510] sm:$0xff] }
  0x64   : > { %2292 = vmax.xlane.f32.xlu1 %v704_v60  ;;  %v275_v60 = vld [vmem:[%s3145_s14 + $0x3e0] sm:$0xff] }
  0x65   : > { %2290 = vmax.xlane.f32.xlu0 %v703_v61  ;;  %v276_v61 = vld [vmem:[%s3145_s14 + $0x3e8] sm:$0xff] }
  0x66   : > { %v725_v63 = vmax.f32 %v275_v60, %v276_v61 }
  0x68   : > { %2296 = vmax.xlane.f32.xlu1 %v706_v2  ;;  %v279_v2 = vld [vmem:[%s3145_s14 + $0x400] sm:$0xff] }
  0x69   : > { %2294 = vmax.xlane.f32.xlu0 %v705_v3  ;;  %v280_v3 = vld [vmem:[%s3145_s14 + $0x408] sm:$0xff] }
  0x6a   : > { %v727_v5 = vmax.f32 %v279_v2, %v280_v3  ;;  %v315_v2 = vld [vmem:[%s3145_s14 + $0x520] sm:$0xff]  ;;  %v316_v3 = vld [vmem:[%s3145_s14 + $0x528] sm:$0xff] }
  0x6b   : > { %v745_v6 = vmax.f32 %v315_v2, %v316_v3  ;;  %v347_v2 = vld [vmem:[%s3145_s14 + $0x620] sm:$0xff]  ;;  %v348_v3 = vld [vmem:[%s3145_s14 + $0x628] sm:$0xff] }
  0x6c   : > { %2300 = vmax.xlane.f32.xlu1 %v708_v8  ;;  %v283_v8 = vld [vmem:[%s3145_s14 + $0x420] sm:$0xff] }
  0x6d   : > { %2298 = vmax.xlane.f32.xlu0 %v707_v9  ;;  %v284_v9 = vld [vmem:[%s3145_s14 + $0x428] sm:$0xff] }
  0x6e   : > { %v729_v11 = vmax.f32 %v283_v8, %v284_v9  ;;  %v322_v8 = vld [vmem:[%s3145_s14 + $0x558] sm:$0xff] }
  0x6f   : > { %v748_v12 = vmax.f32 %v321_v7, %v322_v8  ;;  %v353_v7 = vld [vmem:[%s3145_s14 + $0x650] sm:$0xff]  ;;  %v354_v8 = vld [vmem:[%s3145_s14 + $0x658] sm:$0xff] }
  0x70   : > { %2304 = vmax.xlane.f32.xlu1 %v710_v14  ;;  %v287_v14 = vld [vmem:[%s3145_s14 + $0x440] sm:$0xff] }
  0x71   : > { %2302 = vmax.xlane.f32.xlu0 %v709_v15  ;;  %v288_v15 = vld [vmem:[%s3145_s14 + $0x448] sm:$0xff] }
  0x72   : > { %v731_v17 = vmax.f32 %v287_v14, %v288_v15  ;;  %v325_v15 = vld [vmem:[%s3145_s14 + $0x570] sm:$0xff] }
  0x74   : > { %2308 = vmax.xlane.f32.xlu1 %v712_v20  ;;  %v291_v20 = vld [vmem:[%s3145_s14 + $0x460] sm:$0xff] }
  0x75   : > { %2306 = vmax.xlane.f32.xlu0 %v711_v21  ;;  %v292_v21 = vld [vmem:[%s3145_s14 + $0x468] sm:$0xff] }
  0x76   : > { %v733_v23 = vmax.f32 %v291_v20, %v292_v21 }
  0x78   : > { %2312 = vmax.xlane.f32.xlu1 %v714_v26  ;;  %v295_v26 = vld [vmem:[%s3145_s14 + $0x480] sm:$0xff] }
  0x79   : > { %2310 = vmax.xlane.f32.xlu0 %v713_v27  ;;  %v296_v27 = vld [vmem:[%s3145_s14 + $0x488] sm:$0xff] }
  0x7a   : > { %v735_v30 = vmax.f32 %v295_v26, %v296_v27  ;;  %v327_v26 = vld [vmem:[%s3145_s14 + $0x580] sm:$0xff]  ;;  %v328_v27 = vld [vmem:[%s3145_s14 + $0x588] sm:$0xff] }
  0x7c   : > { %2316 = vmax.xlane.f32.xlu1 %v716_v32  ;;  %v302_v32 = vld [vmem:[%s3145_s14 + $0x4b8] sm:$0xff] }
  0x7d   : > { %2314 = vmax.xlane.f32.xlu0 %v715_v33  ;;  %v738_v36 = vmax.f32 %v301_v31, %v302_v32  ;;  %v333_v31 = vld [vmem:[%s3145_s14 + $0x5b0] sm:$0xff]  ;;  %v334_v32 = vld [vmem:[%s3145_s14 + $0x5b8] sm:$0xff] }
  0x80   : > { %2320 = vmax.xlane.f32.xlu1 %v718_v38  ;;  %v737_v38 = vmax.f32 %v299_v34, %v300_v35  ;;  %v331_v34 = vld [vmem:[%s3145_s14 + $0x5a0] sm:$0xff]  ;;  %v332_v35 = vld [vmem:[%s3145_s14 + $0x5a8] sm:$0xff] }
  0x81   : > { %2318 = vmax.xlane.f32.xlu0 %v717_v39  ;;  %v305_v39 = vld [vmem:[%s3145_s14 + $0x4d0] sm:$0xff] }
  0x84   : > { %2324 = vmax.xlane.f32.xlu1 %v720_v44  ;;  %v740_v44 = vmax.f32 %v305_v39, %v306_v40  ;;  %v337_v39 = vld [vmem:[%s3145_s14 + $0x5d0] sm:$0xff]  ;;  %v338_v40 = vld [vmem:[%s3145_s14 + $0x5d8] sm:$0xff] }
  0x85   : > { %2322 = vmax.xlane.f32.xlu0 %v719_v45 }
  0x88   : > { %2328 = vmax.xlane.f32.xlu1 %v722_v50  ;;  %v307_v50 = vld [vmem:[%s3145_s14 + $0x4e0] sm:$0xff] }
  0x89   : > { %2326 = vmax.xlane.f32.xlu0 %v721_v51  ;;  %v308_v51 = vld [vmem:[%s3145_s14 + $0x4e8] sm:$0xff] }
  0x8a   : > { %v741_v54 = vmax.f32 %v307_v50, %v308_v51  ;;  %v339_v50 = vld [vmem:[%s3145_s14 + $0x5e0] sm:$0xff]  ;;  %v340_v51 = vld [vmem:[%s3145_s14 + $0x5e8] sm:$0xff] }
  0x8c   : > { %2332 = vmax.xlane.f32.xlu1 %v724_v56  ;;  %v314_v56 = vld [vmem:[%s3145_s14 + $0x518] sm:$0xff] }
  0x8d   : > { %2330 = vmax.xlane.f32.xlu0 %v723_v57  ;;  %v744_v60 = vmax.f32 %v313_v55, %v314_v56  ;;  %v345_v55 = vld [vmem:[%s3145_s14 + $0x610] sm:$0xff]  ;;  %v346_v56 = vld [vmem:[%s3145_s14 + $0x618] sm:$0xff] }
  0x90   : > { %2336 = vmax.xlane.f32.xlu1 %v726_v62  ;;  %v743_v62 = vmax.f32 %v311_v58, %v312_v59  ;;  %v343_v58 = vld [vmem:[%s3145_s14 + $0x600] sm:$0xff]  ;;  %v344_v59 = vld [vmem:[%s3145_s14 + $0x608] sm:$0xff] }
  0x91   : > { %2334 = vmax.xlane.f32.xlu0 %v725_v63  ;;  %v317_v63 = vld [vmem:[%s3145_s14 + $0x530] sm:$0xff] }
  0x94   : > { %2340 = vmax.xlane.f32.xlu1 %v728_v4  ;;  %v746_v4 = vmax.f32 %v317_v63, %v318_v0  ;;  %v349_v63 = vld [vmem:[%s3145_s14 + $0x630] sm:$0xff]  ;;  %v350_v0 = vld [vmem:[%s3145_s14 + $0x638] sm:$0xff] }
  0x95   : > { %2338 = vmax.xlane.f32.xlu0 %v727_v5 }
  0x98   : > { %2344 = vmax.xlane.f32.xlu1 %v730_v10  ;;  %v319_v10 = vld [vmem:[%s3145_s14 + $0x540] sm:$0xff] }
  0x99   : > { %2342 = vmax.xlane.f32.xlu0 %v729_v11  ;;  %v320_v11 = vld [vmem:[%s3145_s14 + $0x548] sm:$0xff] }
  0x9a   : > { %v747_v14 = vmax.f32 %v319_v10, %v320_v11  ;;  %v351_v10 = vld [vmem:[%s3145_s14 + $0x640] sm:$0xff]  ;;  %v352_v11 = vld [vmem:[%s3145_s14 + $0x648] sm:$0xff] }
  0x9c   : > { %2348 = vmax.xlane.f32.xlu1 %v732_v16  ;;  %v326_v16 = vld [vmem:[%s3145_s14 + $0x578] sm:$0xff] }
  0x9d   : > { %2346 = vmax.xlane.f32.xlu0 %v731_v17  ;;  %v750_v20 = vmax.f32 %v325_v15, %v326_v16  ;;  %v357_v15 = vld [vmem:[%s3145_s14 + $0x670] sm:$0xff]  ;;  %v358_v16 = vld [vmem:[%s3145_s14 + $0x678] sm:$0xff] }
  0xa0   : > { %2352 = vmax.xlane.f32.xlu1 %v734_v22  ;;  %v749_v22 = vmax.f32 %v323_v18, %v324_v19  ;;  %v355_v18 = vld [vmem:[%s3145_s14 + $0x660] sm:$0xff]  ;;  %v356_v19 = vld [vmem:[%s3145_s14 + $0x668] sm:$0xff] }
  0xa1   : > { %2350 = vmax.xlane.f32.xlu0 %v733_v23  ;;  %v2215_v29 = vpop.xlane.xlu1 %2214  ;;  %v329_v23 = vld [vmem:[%s3145_s14 + $0x590] sm:$0xff] }
  0xa2   : > { %2725 = vst.msk [vmem:[%s3299_s18 + $0x10] sm:$0xff] %vm2722_vm0, %v2215_v29  ;;  %v2211_v33 = vpop.xlane.xlu0 %2210 }
  0xa3   : > { %2723 = vst.msk [vmem:[%s3299_s18] sm:$0xff] %vm2722_vm0, %v2211_v33 }
  0xa4   : > { %2356 = vmax.xlane.f32.xlu1 %v736_v28  ;;  %v752_v28 = vmax.f32 %v329_v23, %v330_v24  ;;  %v361_v23 = vld [vmem:[%s3145_s14 + $0x690] sm:$0xff]  ;;  %v362_v24 = vld [vmem:[%s3145_s14 + $0x698] sm:$0xff] }
  0xa5   : > { %2354 = vmax.xlane.f32.xlu0 %v735_v30  ;;  %v2217_v37 = vpop.xlane.xlu1 %2216  ;;  %v751_v30 = vmax.f32 %v327_v26, %v328_v27  ;;  %v359_v26 = vld [vmem:[%s3145_s14 + $0x680] sm:$0xff]  ;;  %v360_v27 = vld [vmem:[%s3145_s14 + $0x688] sm:$0xff] }
  0xa6   : > { %2726 = vst.msk [vmem:[%s3299_s18 + $0x18] sm:$0xff] %vm2722_vm0, %v2217_v37  ;;  %v2213_v41 = vpop.xlane.xlu0 %2212 }
  0xa7   : > { %2724 = vst.msk [vmem:[%s3299_s18 + $0x8] sm:$0xff] %vm2722_vm0, %v2213_v41 }
  0xa8   : > { %2360 = vmax.xlane.f32.xlu1 %v738_v36  ;;  %v754_v36 = vmax.f32 %v333_v31, %v334_v32  ;;  %v365_v31 = vld [vmem:[%s3145_s14 + $0x6b0] sm:$0xff]  ;;  %v366_v32 = vld [vmem:[%s3145_s14 + $0x6b8] sm:$0xff] }
  0xa9   : > { %2358 = vmax.xlane.f32.xlu0 %v737_v38  ;;  %v2221_v45 = vpop.xlane.xlu1 %2220  ;;  %v753_v38 = vmax.f32 %v331_v34, %v332_v35  ;;  %v363_v34 = vld [vmem:[%s3145_s14 + $0x6a0] sm:$0xff]  ;;  %v364_v35 = vld [vmem:[%s3145_s14 + $0x6a8] sm:$0xff] }
  0xaa   : > { %2728 = vst.msk [vmem:[%s3299_s18 + $0x28] sm:$0xff] %vm2722_vm0, %v2221_v45  ;;  %v2219_v49 = vpop.xlane.xlu0 %2218 }
  0xab   : > { %2727 = vst.msk [vmem:[%s3299_s18 + $0x20] sm:$0xff] %vm2722_vm0, %v2219_v49 }
  0xac   : > { %2364 = vmax.xlane.f32.xlu1 %v740_v44  ;;  %v756_v44 = vmax.f32 %v337_v39, %v338_v40  ;;  %v369_v39 = vld [vmem:[%s3145_s14 + $0x6d0] sm:$0xff]  ;;  %v370_v40 = vld [vmem:[%s3145_s14 + $0x6d8] sm:$0xff] }
  0xad   : > { %2362 = vmax.xlane.f32.xlu0 %v739_v46  ;;  %v2225_v53 = vpop.xlane.xlu1 %2224  ;;  %v755_v46 = vmax.f32 %v335_v42, %v336_v43  ;;  %v367_v42 = vld [vmem:[%s3145_s14 + $0x6c0] sm:$0xff]  ;;  %v368_v43 = vld [vmem:[%s3145_s14 + $0x6c8] sm:$0xff] }
  0xae   : > { %2730 = vst.msk [vmem:[%s3299_s18 + $0x38] sm:$0xff] %vm2722_vm0, %v2225_v53  ;;  %v2223_v57 = vpop.xlane.xlu0 %2222 }
  0xaf   : > { %2729 = vst.msk [vmem:[%s3299_s18 + $0x30] sm:$0xff] %vm2722_vm0, %v2223_v57 }
  0xb0   : > { %2368 = vmax.xlane.f32.xlu1 %v742_v52  ;;  %v758_v52 = vmax.f32 %v341_v47, %v342_v48  ;;  %v373_v47 = vld [vmem:[%s3145_s14 + $0x6f0] sm:$0xff]  ;;  %v374_v48 = vld [vmem:[%s3145_s14 + $0x6f8] sm:$0xff] }
  0xb1   : > { %2366 = vmax.xlane.f32.xlu0 %v741_v54  ;;  %v2229_v61 = vpop.xlane.xlu1 %2228  ;;  %v757_v54 = vmax.f32 %v339_v50, %v340_v51  ;;  %v371_v50 = vld [vmem:[%s3145_s14 + $0x6e0] sm:$0xff]  ;;  %v372_v51 = vld [vmem:[%s3145_s14 + $0x6e8] sm:$0xff] }
  0xb2   : > { %2732 = vst.msk [vmem:[%s3299_s18 + $0x48] sm:$0xff] %vm2722_vm0, %v2229_v61  ;;  %v2227_v1 = vpop.xlane.xlu0 %2226 }
  0xb3   : > { %2731 = vst.msk [vmem:[%s3299_s18 + $0x40] sm:$0xff] %vm2722_vm0, %v2227_v1 }
  0xb4   : > { %2372 = vmax.xlane.f32.xlu1 %v744_v60  ;;  %v760_v60 = vmax.f32 %v345_v55, %v346_v56  ;;  %v377_v55 = vld [vmem:[%s3145_s14 + $0x710] sm:$0xff]  ;;  %v378_v56 = vld [vmem:[%s3145_s14 + $0x718] sm:$0xff] }
  0xb5   : > { %2370 = vmax.xlane.f32.xlu0 %v743_v62  ;;  %v2233_v5 = vpop.xlane.xlu1 %2232  ;;  %v759_v62 = vmax.f32 %v343_v58, %v344_v59  ;;  %v375_v58 = vld [vmem:[%s3145_s14 + $0x700] sm:$0xff]  ;;  %v376_v59 = vld [vmem:[%s3145_s14 + $0x708] sm:$0xff] }
  0xb6   : > { %2734 = vst.msk [vmem:[%s3299_s18 + $0x58] sm:$0xff] %vm2722_vm0, %v2233_v5  ;;  %v2231_v9 = vpop.xlane.xlu0 %2230 }
  0xb7   : > { %2733 = vst.msk [vmem:[%s3299_s18 + $0x50] sm:$0xff] %vm2722_vm0, %v2231_v9 }
  0xb8   : > { %2376 = vmax.xlane.f32.xlu1 %v746_v4  ;;  %v762_v4 = vmax.f32 %v349_v63, %v350_v0  ;;  %v381_v63 = vld [vmem:[%s3145_s14 + $0x730] sm:$0xff]  ;;  %v382_v0 = vld [vmem:[%s3145_s14 + $0x738] sm:$0xff] }
  0xb9   : > { %2374 = vmax.xlane.f32.xlu0 %v745_v6  ;;  %v2237_v13 = vpop.xlane.xlu1 %2236  ;;  %v761_v6 = vmax.f32 %v347_v2, %v348_v3  ;;  %v379_v2 = vld [vmem:[%s3145_s14 + $0x720] sm:$0xff]  ;;  %v380_v3 = vld [vmem:[%s3145_s14 + $0x728] sm:$0xff] }
  0xba   : > { %2736 = vst.msk [vmem:[%s3299_s18 + $0x68] sm:$0xff] %vm2722_vm0, %v2237_v13  ;;  %v2235_v17 = vpop.xlane.xlu0 %2234 }
  0xbb   : > { %2735 = vst.msk [vmem:[%s3299_s18 + $0x60] sm:$0xff] %vm2722_vm0, %v2235_v17 }
  0xbc   : > { %2380 = vmax.xlane.f32.xlu1 %v748_v12  ;;  %v764_v12 = vmax.f32 %v353_v7, %v354_v8  ;;  %v385_v7 = vld [vmem:[%s3145_s14 + $0x750] sm:$0xff]  ;;  %v386_v8 = vld [vmem:[%s3145_s14 + $0x758] sm:$0xff] }
  0xbd   : > { %2378 = vmax.xlane.f32.xlu0 %v747_v14  ;;  %v2241_v21 = vpop.xlane.xlu1 %2240  ;;  %v763_v14 = vmax.f32 %v351_v10, %v352_v11  ;;  %v383_v10 = vld [vmem:[%s3145_s14 + $0x740] sm:$0xff]  ;;  %v384_v11 = vld [vmem:[%s3145_s14 + $0x748] sm:$0xff] }
  0xbe   : > { %2738 = vst.msk [vmem:[%s3299_s18 + $0x78] sm:$0xff] %vm2722_vm0, %v2241_v21  ;;  %v2239_v25 = vpop.xlane.xlu0 %2238 }
  0xbf   : > { %2737 = vst.msk [vmem:[%s3299_s18 + $0x70] sm:$0xff] %vm2722_vm0, %v2239_v25 }
  0xc0   : > { %2384 = vmax.xlane.f32.xlu1 %v750_v20  ;;  %v766_v20 = vmax.f32 %v357_v15, %v358_v16  ;;  %v389_v15 = vld [vmem:[%s3145_s14 + $0x770] sm:$0xff]  ;;  %v390_v16 = vld [vmem:[%s3145_s14 + $0x778] sm:$0xff] }
  0xc1   : > { %2382 = vmax.xlane.f32.xlu0 %v749_v22  ;;  %v2245_v29 = vpop.xlane.xlu1 %2244  ;;  %v765_v22 = vmax.f32 %v355_v18, %v356_v19  ;;  %v387_v18 = vld [vmem:[%s3145_s14 + $0x760] sm:$0xff]  ;;  %v388_v19 = vld [vmem:[%s3145_s14 + $0x768] sm:$0xff] }
  0xc2   : > { %2740 = vst.msk [vmem:[%s3299_s18 + $0x88] sm:$0xff] %vm2722_vm0, %v2245_v29  ;;  %v2243_v33 = vpop.xlane.xlu0 %2242 }
  0xc3   : > { %2739 = vst.msk [vmem:[%s3299_s18 + $0x80] sm:$0xff] %vm2722_vm0, %v2243_v33 }
  0xc4   : > { %2388 = vmax.xlane.f32.xlu1 %v752_v28  ;;  %v768_v28 = vmax.f32 %v361_v23, %v362_v24  ;;  %v393_v23 = vld [vmem:[%s3145_s14 + $0x790] sm:$0xff]  ;;  %v394_v24 = vld [vmem:[%s3145_s14 + $0x798] sm:$0xff] }
  0xc5   : > { %2386 = vmax.xlane.f32.xlu0 %v751_v30  ;;  %v2249_v37 = vpop.xlane.xlu1 %2248  ;;  %v767_v30 = vmax.f32 %v359_v26, %v360_v27  ;;  %v391_v26 = vld [vmem:[%s3145_s14 + $0x780] sm:$0xff]  ;;  %v392_v27 = vld [vmem:[%s3145_s14 + $0x788] sm:$0xff] }
  0xc6   : > { %2742 = vst.msk [vmem:[%s3299_s18 + $0x98] sm:$0xff] %vm2722_vm0, %v2249_v37  ;;  %v2247_v41 = vpop.xlane.xlu0 %2246 }
  0xc7   : > { %2741 = vst.msk [vmem:[%s3299_s18 + $0x90] sm:$0xff] %vm2722_vm0, %v2247_v41 }
  0xc8   : > { %2392 = vmax.xlane.f32.xlu1 %v754_v36  ;;  %v770_v36 = vmax.f32 %v365_v31, %v366_v32  ;;  %v397_v31 = vld [vmem:[%s3145_s14 + $0x7b0] sm:$0xff]  ;;  %v398_v32 = vld [vmem:[%s3145_s14 + $0x7b8] sm:$0xff] }
  0xc9   : > { %2390 = vmax.xlane.f32.xlu0 %v753_v38  ;;  %v2253_v45 = vpop.xlane.xlu1 %2252  ;;  %v769_v38 = vmax.f32 %v363_v34, %v364_v35  ;;  %v395_v34 = vld [vmem:[%s3145_s14 + $0x7a0] sm:$0xff]  ;;  %v396_v35 = vld [vmem:[%s3145_s14 + $0x7a8] sm:$0xff] }
  0xca   : > { %2744 = vst.msk [vmem:[%s3299_s18 + $0xa8] sm:$0xff] %vm2722_vm0, %v2253_v45  ;;  %v2251_v49 = vpop.xlane.xlu0 %2250 }
  0xcb   : > { %2743 = vst.msk [vmem:[%s3299_s18 + $0xa0] sm:$0xff] %vm2722_vm0, %v2251_v49 }
  0xcc   : > { %2396 = vmax.xlane.f32.xlu1 %v756_v44  ;;  %v772_v44 = vmax.f32 %v369_v39, %v370_v40  ;;  %v401_v39 = vld [vmem:[%s3145_s14 + $0x7d0] sm:$0xff]  ;;  %v402_v40 = vld [vmem:[%s3145_s14 + $0x7d8] sm:$0xff] }
  0xcd   : > { %2394 = vmax.xlane.f32.xlu0 %v755_v46  ;;  %v2257_v53 = vpop.xlane.xlu1 %2256  ;;  %v771_v46 = vmax.f32 %v367_v42, %v368_v43  ;;  %v399_v42 = vld [vmem:[%s3145_s14 + $0x7c0] sm:$0xff]  ;;  %v400_v43 = vld [vmem:[%s3145_s14 + $0x7c8] sm:$0xff] }
  0xce   : > { %2746 = vst.msk [vmem:[%s3299_s18 + $0xb8] sm:$0xff] %vm2722_vm0, %v2257_v53  ;;  %v2255_v57 = vpop.xlane.xlu0 %2254 }
  0xcf   : > { %2745 = vst.msk [vmem:[%s3299_s18 + $0xb0] sm:$0xff] %vm2722_vm0, %v2255_v57 }
  0xd0   : > { %2400 = vmax.xlane.f32.xlu1 %v758_v52  ;;  %v774_v52 = vmax.f32 %v373_v47, %v374_v48  ;;  %v405_v47 = vld [vmem:[%s3145_s14 + $0x7f0] sm:$0xff]  ;;  %v406_v48 = vld [vmem:[%s3145_s14 + $0x7f8] sm:$0xff] }
  0xd1   : > { %2398 = vmax.xlane.f32.xlu0 %v757_v54  ;;  %v2261_v61 = vpop.xlane.xlu1 %2260  ;;  %v773_v54 = vmax.f32 %v371_v50, %v372_v51  ;;  %v403_v50 = vld [vmem:[%s3145_s14 + $0x7e0] sm:$0xff]  ;;  %v404_v51 = vld [vmem:[%s3145_s14 + $0x7e8] sm:$0xff] }
  0xd2   : > { %2748 = vst.msk [vmem:[%s3299_s18 + $0xc8] sm:$0xff] %vm2722_vm0, %v2261_v61  ;;  %v2259_v1 = vpop.xlane.xlu0 %2258 }
  0xd3   : > { %2747 = vst.msk [vmem:[%s3299_s18 + $0xc0] sm:$0xff] %vm2722_vm0, %v2259_v1 }
  0xd4   : > { %2404 = vmax.xlane.f32.xlu1 %v760_v60  ;;  %v776_v60 = vmax.f32 %v377_v55, %v378_v56  ;;  %v409_v55 = vld [vmem:[%s3145_s14 + $0x810] sm:$0xff]  ;;  %v410_v56 = vld [vmem:[%s3145_s14 + $0x818] sm:$0xff] }
  0xd5   : > { %2402 = vmax.xlane.f32.xlu0 %v759_v62  ;;  %v2265_v5 = vpop.xlane.xlu1 %2264  ;;  %v775_v62 = vmax.f32 %v375_v58, %v376_v59  ;;  %v407_v58 = vld [vmem:[%s3145_s14 + $0x800] sm:$0xff]  ;;  %v408_v59 = vld [vmem:[%s3145_s14 + $0x808] sm:$0xff] }
  0xd6   : > { %2750 = vst.msk [vmem:[%s3299_s18 + $0xd8] sm:$0xff] %vm2722_vm0, %v2265_v5  ;;  %v2263_v9 = vpop.xlane.xlu0 %2262 }
  0xd7   : > { %2749 = vst.msk [vmem:[%s3299_s18 + $0xd0] sm:$0xff] %vm2722_vm0, %v2263_v9 }
  0xd8   : > { %2408 = vmax.xlane.f32.xlu1 %v762_v4  ;;  %v778_v4 = vmax.f32 %v381_v63, %v382_v0  ;;  %v413_v63 = vld [vmem:[%s3145_s14 + $0x830] sm:$0xff]  ;;  %v414_v0 = vld [vmem:[%s3145_s14 + $0x838] sm:$0xff] }
  0xd9   : > { %2406 = vmax.xlane.f32.xlu0 %v761_v6  ;;  %v2269_v13 = vpop.xlane.xlu1 %2268  ;;  %v777_v6 = vmax.f32 %v379_v2, %v380_v3  ;;  %v411_v2 = vld [vmem:[%s3145_s14 + $0x820] sm:$0xff]  ;;  %v412_v3 = vld [vmem:[%s3145_s14 + $0x828] sm:$0xff] }
  0xda   : > { %2752 = vst.msk [vmem:[%s3299_s18 + $0xe8] sm:$0xff] %vm2722_vm0, %v2269_v13  ;;  %v2267_v17 = vpop.xlane.xlu0 %2266 }
  0xdb   : > { %2751 = vst.msk [vmem:[%s3299_s18 + $0xe0] sm:$0xff] %vm2722_vm0, %v2267_v17 }
  0xdc   : > { %2412 = vmax.xlane.f32.xlu1 %v764_v12  ;;  %v780_v12 = vmax.f32 %v385_v7, %v386_v8  ;;  %v417_v7 = vld [vmem:[%s3145_s14 + $0x850] sm:$0xff]  ;;  %v418_v8 = vld [vmem:[%s3145_s14 + $0x858] sm:$0xff] }
  0xdd   : > { %2410 = vmax.xlane.f32.xlu0 %v763_v14  ;;  %v2273_v21 = vpop.xlane.xlu1 %2272  ;;  %v779_v14 = vmax.f32 %v383_v10, %v384_v11  ;;  %v415_v10 = vld [vmem:[%s3145_s14 + $0x840] sm:$0xff]  ;;  %v416_v11 = vld [vmem:[%s3145_s14 + $0x848] sm:$0xff] }
  0xde   : > { %2754 = vst.msk [vmem:[%s3299_s18 + $0xf8] sm:$0xff] %vm2722_vm0, %v2273_v21  ;;  %v2271_v25 = vpop.xlane.xlu0 %2270 }
  0xdf   : > { %2753 = vst.msk [vmem:[%s3299_s18 + $0xf0] sm:$0xff] %vm2722_vm0, %v2271_v25 }
  0xe0   : > { %2416 = vmax.xlane.f32.xlu1 %v766_v20  ;;  %v782_v20 = vmax.f32 %v389_v15, %v390_v16  ;;  %v421_v15 = vld [vmem:[%s3145_s14 + $0x870] sm:$0xff]  ;;  %v422_v16 = vld [vmem:[%s3145_s14 + $0x878] sm:$0xff] }
  0xe1   : > { %2414 = vmax.xlane.f32.xlu0 %v765_v22  ;;  %v2277_v29 = vpop.xlane.xlu1 %2276  ;;  %v781_v22 = vmax.f32 %v387_v18, %v388_v19  ;;  %v419_v18 = vld [vmem:[%s3145_s14 + $0x860] sm:$0xff]  ;;  %v420_v19 = vld [vmem:[%s3145_s14 + $0x868] sm:$0xff] }
  0xe2   : > { %2756 = vst.msk [vmem:[%s3299_s18 + $0x108] sm:$0xff] %vm2722_vm0, %v2277_v29  ;;  %v2275_v33 = vpop.xlane.xlu0 %2274 }
  0xe3   : > { %2755 = vst.msk [vmem:[%s3299_s18 + $0x100] sm:$0xff] %vm2722_vm0, %v2275_v33 }
  0xe4   : > { %2420 = vmax.xlane.f32.xlu1 %v768_v28  ;;  %v784_v28 = vmax.f32 %v393_v23, %v394_v24  ;;  %v425_v23 = vld [vmem:[%s3145_s14 + $0x890] sm:$0xff]  ;;  %v426_v24 = vld [vmem:[%s3145_s14 + $0x898] sm:$0xff] }
  0xe5   : > { %2418 = vmax.xlane.f32.xlu0 %v767_v30  ;;  %v2281_v37 = vpop.xlane.xlu1 %2280  ;;  %v783_v30 = vmax.f32 %v391_v26, %v392_v27  ;;  %v423_v26 = vld [vmem:[%s3145_s14 + $0x880] sm:$0xff]  ;;  %v424_v27 = vld [vmem:[%s3145_s14 + $0x888] sm:$0xff] }
  0xe6   : > { %2758 = vst.msk [vmem:[%s3299_s18 + $0x118] sm:$0xff] %vm2722_vm0, %v2281_v37  ;;  %v2279_v41 = vpop.xlane.xlu0 %2278 }
  0xe7   : > { %2757 = vst.msk [vmem:[%s3299_s18 + $0x110] sm:$0xff] %vm2722_vm0, %v2279_v41 }
  0xe8   : > { %2424 = vmax.xlane.f32.xlu1 %v770_v36  ;;  %v786_v36 = vmax.f32 %v397_v31, %v398_v32  ;;  %v429_v31 = vld [vmem:[%s3145_s14 + $0x8b0] sm:$0xff]  ;;  %v430_v32 = vld [vmem:[%s3145_s14 + $0x8b8] sm:$0xff] }
  0xe9   : > { %2422 = vmax.xlane.f32.xlu0 %v769_v38  ;;  %v2285_v45 = vpop.xlane.xlu1 %2284  ;;  %v785_v38 = vmax.f32 %v395_v34, %v396_v35  ;;  %v427_v34 = vld [vmem:[%s3145_s14 + $0x8a0] sm:$0xff]  ;;  %v428_v35 = vld [vmem:[%s3145_s14 + $0x8a8] sm:$0xff] }
  0xea   : > { %2760 = vst.msk [vmem:[%s3299_s18 + $0x128] sm:$0xff] %vm2722_vm0, %v2285_v45  ;;  %v2283_v49 = vpop.xlane.xlu0 %2282 }
  0xeb   : > { %2759 = vst.msk [vmem:[%s3299_s18 + $0x120] sm:$0xff] %vm2722_vm0, %v2283_v49 }
  0xec   : > { %2428 = vmax.xlane.f32.xlu1 %v772_v44  ;;  %v788_v44 = vmax.f32 %v401_v39, %v402_v40  ;;  %v433_v39 = vld [vmem:[%s3145_s14 + $0x8d0] sm:$0xff]  ;;  %v434_v40 = vld [vmem:[%s3145_s14 + $0x8d8] sm:$0xff] }
  0xed   : > { %2426 = vmax.xlane.f32.xlu0 %v771_v46  ;;  %v2289_v53 = vpop.xlane.xlu1 %2288  ;;  %v787_v46 = vmax.f32 %v399_v42, %v400_v43  ;;  %v431_v42 = vld [vmem:[%s3145_s14 + $0x8c0] sm:$0xff]  ;;  %v432_v43 = vld [vmem:[%s3145_s14 + $0x8c8] sm:$0xff] }
  0xee   : > { %2762 = vst.msk [vmem:[%s3299_s18 + $0x138] sm:$0xff] %vm2722_vm0, %v2289_v53  ;;  %v2287_v57 = vpop.xlane.xlu0 %2286 }
  0xef   : > { %2761 = vst.msk [vmem:[%s3299_s18 + $0x130] sm:$0xff] %vm2722_vm0, %v2287_v57 }
  0xf0   : > { %2432 = vmax.xlane.f32.xlu1 %v774_v52  ;;  %v790_v52 = vmax.f32 %v405_v47, %v406_v48  ;;  %v437_v47 = vld [vmem:[%s3145_s14 + $0x8f0] sm:$0xff]  ;;  %v438_v48 = vld [vmem:[%s3145_s14 + $0x8f8] sm:$0xff] }
  0xf1   : > { %2430 = vmax.xlane.f32.xlu0 %v773_v54  ;;  %v2293_v61 = vpop.xlane.xlu1 %2292  ;;  %v789_v54 = vmax.f32 %v403_v50, %v404_v51  ;;  %v435_v50 = vld [vmem:[%s3145_s14 + $0x8e0] sm:$0xff]  ;;  %v436_v51 = vld [vmem:[%s3145_s14 + $0x8e8] sm:$0xff] }
  0xf2   : > { %2764 = vst.msk [vmem:[%s3299_s18 + $0x148] sm:$0xff] %vm2722_vm0, %v2293_v61  ;;  %v2291_v1 = vpop.xlane.xlu0 %2290 }
  0xf3   : > { %2763 = vst.msk [vmem:[%s3299_s18 + $0x140] sm:$0xff] %vm2722_vm0, %v2291_v1 }
  0xf4   : > { %2436 = vmax.xlane.f32.xlu1 %v776_v60  ;;  %v792_v60 = vmax.f32 %v409_v55, %v410_v56  ;;  %v441_v55 = vld [vmem:[%s3145_s14 + $0x910] sm:$0xff]  ;;  %v442_v56 = vld [vmem:[%s3145_s14 + $0x918] sm:$0xff] }
  0xf5   : > { %2434 = vmax.xlane.f32.xlu0 %v775_v62  ;;  %v2297_v5 = vpop.xlane.xlu1 %2296  ;;  %v791_v62 = vmax.f32 %v407_v58, %v408_v59  ;;  %v439_v58 = vld [vmem:[%s3145_s14 + $0x900] sm:$0xff]  ;;  %v440_v59 = vld [vmem:[%s3145_s14 + $0x908] sm:$0xff] }
  0xf6   : > { %2766 = vst.msk [vmem:[%s3299_s18 + $0x158] sm:$0xff] %vm2722_vm0, %v2297_v5  ;;  %v2295_v9 = vpop.xlane.xlu0 %2294 }
  0xf7   : > { %2765 = vst.msk [vmem:[%s3299_s18 + $0x150] sm:$0xff] %vm2722_vm0, %v2295_v9 }
  0xf8   : > { %2440 = vmax.xlane.f32.xlu1 %v778_v4  ;;  %v794_v4 = vmax.f32 %v413_v63, %v414_v0  ;;  %v445_v63 = vld [vmem:[%s3145_s14 + $0x930] sm:$0xff]  ;;  %v446_v0 = vld [vmem:[%s3145_s14 + $0x938] sm:$0xff] }
  0xf9   : > { %2438 = vmax.xlane.f32.xlu0 %v777_v6  ;;  %v2301_v13 = vpop.xlane.xlu1 %2300  ;;  %v793_v6 = vmax.f32 %v411_v2, %v412_v3  ;;  %v443_v2 = vld [vmem:[%s3145_s14 + $0x920] sm:$0xff]  ;;  %v444_v3 = vld [vmem:[%s3145_s14 + $0x928] sm:$0xff] }
  0xfa   : > { %2768 = vst.msk [vmem:[%s3299_s18 + $0x168] sm:$0xff] %vm2722_vm0, %v2301_v13  ;;  %v2299_v17 = vpop.xlane.xlu0 %2298 }
  0xfb   : > { %2767 = vst.msk [vmem:[%s3299_s18 + $0x160] sm:$0xff] %vm2722_vm0, %v2299_v17 }
  0xfc   : > { %2444 = vmax.xlane.f32.xlu1 %v780_v12  ;;  %v796_v12 = vmax.f32 %v417_v7, %v418_v8  ;;  %v449_v7 = vld [vmem:[%s3145_s14 + $0x950] sm:$0xff]  ;;  %v450_v8 = vld [vmem:[%s3145_s14 + $0x958] sm:$0xff] }
  0xfd   : > { %2442 = vmax.xlane.f32.xlu0 %v779_v14  ;;  %v2305_v21 = vpop.xlane.xlu1 %2304  ;;  %v795_v14 = vmax.f32 %v415_v10, %v416_v11  ;;  %v447_v10 = vld [vmem:[%s3145_s14 + $0x940] sm:$0xff]  ;;  %v448_v11 = vld [vmem:[%s3145_s14 + $0x948] sm:$0xff] }
  0xfe   : > { %2770 = vst.msk [vmem:[%s3299_s18 + $0x178] sm:$0xff] %vm2722_vm0, %v2305_v21  ;;  %v2303_v25 = vpop.xlane.xlu0 %2302 }
  0xff   : > { %2769 = vst.msk [vmem:[%s3299_s18 + $0x170] sm:$0xff] %vm2722_vm0, %v2303_v25 }
 0x100   : > { %2448 = vmax.xlane.f32.xlu1 %v782_v20  ;;  %v798_v20 = vmax.f32 %v421_v15, %v422_v16  ;;  %v453_v15 = vld [vmem:[%s3145_s14 + $0x970] sm:$0xff]  ;;  %v454_v16 = vld [vmem:[%s3145_s14 + $0x978] sm:$0xff] }
 0x101   : > { %2446 = vmax.xlane.f32.xlu0 %v781_v22  ;;  %v2309_v29 = vpop.xlane.xlu1 %2308  ;;  %v797_v22 = vmax.f32 %v419_v18, %v420_v19  ;;  %v451_v18 = vld [vmem:[%s3145_s14 + $0x960] sm:$0xff]  ;;  %v452_v19 = vld [vmem:[%s3145_s14 + $0x968] sm:$0xff] }
 0x102   : > { %2772 = vst.msk [vmem:[%s3299_s18 + $0x188] sm:$0xff] %vm2722_vm0, %v2309_v29  ;;  %v2307_v33 = vpop.xlane.xlu0 %2306 }
 0x103   : > { %2771 = vst.msk [vmem:[%s3299_s18 + $0x180] sm:$0xff] %vm2722_vm0, %v2307_v33 }
 0x104   : > { %2452 = vmax.xlane.f32.xlu1 %v784_v28  ;;  %v800_v28 = vmax.f32 %v425_v23, %v426_v24  ;;  %v457_v23 = vld [vmem:[%s3145_s14 + $0x990] sm:$0xff]  ;;  %v458_v24 = vld [vmem:[%s3145_s14 + $0x998] sm:$0xff] }
 0x105   : > { %2450 = vmax.xlane.f32.xlu0 %v783_v30  ;;  %v2313_v37 = vpop.xlane.xlu1 %2312  ;;  %v799_v30 = vmax.f32 %v423_v26, %v424_v27  ;;  %v455_v26 = vld [vmem:[%s3145_s14 + $0x980] sm:$0xff]  ;;  %v456_v27 = vld [vmem:[%s3145_s14 + $0x988] sm:$0xff] }
 0x106   : > { %2774 = vst.msk [vmem:[%s3299_s18 + $0x198] sm:$0xff] %vm2722_vm0, %v2313_v37  ;;  %v2311_v41 = vpop.xlane.xlu0 %2310 }
 0x107   : > { %2773 = vst.msk [vmem:[%s3299_s18 + $0x190] sm:$0xff] %vm2722_vm0, %v2311_v41 }
 0x108   : > { %2456 = vmax.xlane.f32.xlu1 %v786_v36  ;;  %v802_v36 = vmax.f32 %v429_v31, %v430_v32  ;;  %v461_v31 = vld [vmem:[%s3145_s14 + $0x9b0] sm:$0xff]  ;;  %v462_v32 = vld [vmem:[%s3145_s14 + $0x9b8] sm:$0xff] }
 0x109   : > { %2454 = vmax.xlane.f32.xlu0 %v785_v38  ;;  %v2317_v45 = vpop.xlane.xlu1 %2316  ;;  %v801_v38 = vmax.f32 %v427_v34, %v428_v35  ;;  %v459_v34 = vld [vmem:[%s3145_s14 + $0x9a0] sm:$0xff]  ;;  %v460_v35 = vld [vmem:[%s3145_s14 + $0x9a8] sm:$0xff] }
 0x10a   : > { %2776 = vst.msk [vmem:[%s3299_s18 + $0x1a8] sm:$0xff] %vm2722_vm0, %v2317_v45  ;;  %v2315_v49 = vpop.xlane.xlu0 %2314 }
 0x10b   : > { %2775 = vst.msk [vmem:[%s3299_s18 + $0x1a0] sm:$0xff] %vm2722_vm0, %v2315_v49 }
 0x10c   : > { %2460 = vmax.xlane.f32.xlu1 %v788_v44  ;;  %v804_v44 = vmax.f32 %v433_v39, %v434_v40  ;;  %v465_v39 = vld [vmem:[%s3145_s14 + $0x9d0] sm:$0xff]  ;;  %v466_v40 = vld [vmem:[%s3145_s14 + $0x9d8] sm:$0xff] }
 0x10d   : > { %2458 = vmax.xlane.f32.xlu0 %v787_v46  ;;  %v2321_v53 = vpop.xlane.xlu1 %2320  ;;  %v803_v46 = vmax.f32 %v431_v42, %v432_v43  ;;  %v463_v42 = vld [vmem:[%s3145_s14 + $0x9c0] sm:$0xff]  ;;  %v464_v43 = vld [vmem:[%s3145_s14 + $0x9c8] sm:$0xff] }
 0x10e   : > { %2778 = vst.msk [vmem:[%s3299_s18 + $0x1b8] sm:$0xff] %vm2722_vm0, %v2321_v53  ;;  %v2319_v57 = vpop.xlane.xlu0 %2318 }
 0x10f   : > { %2777 = vst.msk [vmem:[%s3299_s18 + $0x1b0] sm:$0xff] %vm2722_vm0, %v2319_v57 }
 0x110   : > { %2464 = vmax.xlane.f32.xlu1 %v790_v52  ;;  %v806_v52 = vmax.f32 %v437_v47, %v438_v48  ;;  %v469_v47 = vld [vmem:[%s3145_s14 + $0x9f0] sm:$0xff]  ;;  %v470_v48 = vld [vmem:[%s3145_s14 + $0x9f8] sm:$0xff] }
 0x111   : > { %2462 = vmax.xlane.f32.xlu0 %v789_v54  ;;  %v2325_v61 = vpop.xlane.xlu1 %2324  ;;  %v805_v54 = vmax.f32 %v435_v50, %v436_v51  ;;  %v467_v50 = vld [vmem:[%s3145_s14 + $0x9e0] sm:$0xff]  ;;  %v468_v51 = vld [vmem:[%s3145_s14 + $0x9e8] sm:$0xff] }
 0x112   : > { %2780 = vst.msk [vmem:[%s3299_s18 + $0x1c8] sm:$0xff] %vm2722_vm0, %v2325_v61  ;;  %v2323_v1 = vpop.xlane.xlu0 %2322 }
 0x113   : > { %2779 = vst.msk [vmem:[%s3299_s18 + $0x1c0] sm:$0xff] %vm2722_vm0, %v2323_v1 }
 0x114   : > { %2468 = vmax.xlane.f32.xlu1 %v792_v60  ;;  %v808_v60 = vmax.f32 %v441_v55, %v442_v56  ;;  %v473_v55 = vld [vmem:[%s3145_s14 + $0xa10] sm:$0xff]  ;;  %v474_v56 = vld [vmem:[%s3145_s14 + $0xa18] sm:$0xff] }
 0x115   : > { %2466 = vmax.xlane.f32.xlu0 %v791_v62  ;;  %v2329_v5 = vpop.xlane.xlu1 %2328  ;;  %v807_v62 = vmax.f32 %v439_v58, %v440_v59  ;;  %v471_v58 = vld [vmem:[%s3145_s14 + $0xa00] sm:$0xff]  ;;  %v472_v59 = vld [vmem:[%s3145_s14 + $0xa08] sm:$0xff] }
 0x116   : > { %2782 = vst.msk [vmem:[%s3299_s18 + $0x1d8] sm:$0xff] %vm2722_vm0, %v2329_v5  ;;  %v2327_v9 = vpop.xlane.xlu0 %2326 }
 0x117   : > { %2781 = vst.msk [vmem:[%s3299_s18 + $0x1d0] sm:$0xff] %vm2722_vm0, %v2327_v9 }
 0x118   : > { %2472 = vmax.xlane.f32.xlu1 %v794_v4  ;;  %v810_v4 = vmax.f32 %v445_v63, %v446_v0  ;;  %v477_v63 = vld [vmem:[%s3145_s14 + $0xa30] sm:$0xff]  ;;  %v478_v0 = vld [vmem:[%s3145_s14 + $0xa38] sm:$0xff] }
 0x119   : > { %2470 = vmax.xlane.f32.xlu0 %v793_v6  ;;  %v2333_v13 = vpop.xlane.xlu1 %2332  ;;  %v809_v6 = vmax.f32 %v443_v2, %v444_v3  ;;  %v475_v2 = vld [vmem:[%s3145_s14 + $0xa20] sm:$0xff]  ;;  %v476_v3 = vld [vmem:[%s3145_s14 + $0xa28] sm:$0xff] }
 0x11a   : > { %2784 = vst.msk [vmem:[%s3299_s18 + $0x1e8] sm:$0xff] %vm2722_vm0, %v2333_v13  ;;  %v2331_v17 = vpop.xlane.xlu0 %2330 }
 0x11b   : > { %2783 = vst.msk [vmem:[%s3299_s18 + $0x1e0] sm:$0xff] %vm2722_vm0, %v2331_v17 }
 0x11c   : > { %2476 = vmax.xlane.f32.xlu1 %v796_v12  ;;  %v812_v12 = vmax.f32 %v449_v7, %v450_v8  ;;  %v481_v7 = vld [vmem:[%s3145_s14 + $0xa50] sm:$0xff]  ;;  %v482_v8 = vld [vmem:[%s3145_s14 + $0xa58] sm:$0xff] }
 0x11d   : > { %2474 = vmax.xlane.f32.xlu0 %v795_v14  ;;  %v2337_v21 = vpop.xlane.xlu1 %2336  ;;  %v811_v14 = vmax.f32 %v447_v10, %v448_v11  ;;  %v479_v10 = vld [vmem:[%s3145_s14 + $0xa40] sm:$0xff]  ;;  %v480_v11 = vld [vmem:[%s3145_s14 + $0xa48] sm:$0xff] }
 0x11e   : > { %2786 = vst.msk [vmem:[%s3299_s18 + $0x1f8] sm:$0xff] %vm2722_vm0, %v2337_v21  ;;  %v2335_v25 = vpop.xlane.xlu0 %2334 }
 0x11f   : > { %2785 = vst.msk [vmem:[%s3299_s18 + $0x1f0] sm:$0xff] %vm2722_vm0, %v2335_v25 }
 0x120   : > { %2480 = vmax.xlane.f32.xlu1 %v798_v20  ;;  %v814_v20 = vmax.f32 %v453_v15, %v454_v16  ;;  %v485_v15 = vld [vmem:[%s3145_s14 + $0xa70] sm:$0xff]  ;;  %v486_v16 = vld [vmem:[%s3145_s14 + $0xa78] sm:$0xff] }
 0x121   : > { %2478 = vmax.xlane.f32.xlu0 %v797_v22  ;;  %v2341_v29 = vpop.xlane.xlu1 %2340  ;;  %v813_v22 = vmax.f32 %v451_v18, %v452_v19  ;;  %v483_v18 = vld [vmem:[%s3145_s14 + $0xa60] sm:$0xff]  ;;  %v484_v19 = vld [vmem:[%s3145_s14 + $0xa68] sm:$0xff] }
 0x122   : > { %2788 = vst.msk [vmem:[%s3299_s18 + $0x208] sm:$0xff] %vm2722_vm0, %v2341_v29  ;;  %v2339_v33 = vpop.xlane.xlu0 %2338 }
 0x123   : > { %2787 = vst.msk [vmem:[%s3299_s18 + $0x200] sm:$0xff] %vm2722_vm0, %v2339_v33 }
 0x124   : > { %2484 = vmax.xlane.f32.xlu1 %v800_v28  ;;  %v816_v28 = vmax.f32 %v457_v23, %v458_v24  ;;  %v489_v23 = vld [vmem:[%s3145_s14 + $0xa90] sm:$0xff]  ;;  %v490_v24 = vld [vmem:[%s3145_s14 + $0xa98] sm:$0xff] }
 0x125   : > { %2482 = vmax.xlane.f32.xlu0 %v799_v30  ;;  %v2345_v37 = vpop.xlane.xlu1 %2344  ;;  %v815_v30 = vmax.f32 %v455_v26, %v456_v27  ;;  %v487_v26 = vld [vmem:[%s3145_s14 + $0xa80] sm:$0xff]  ;;  %v488_v27 = vld [vmem:[%s3145_s14 + $0xa88] sm:$0xff] }
 0x126   : > { %2790 = vst.msk [vmem:[%s3299_s18 + $0x218] sm:$0xff] %vm2722_vm0, %v2345_v37  ;;  %v2343_v41 = vpop.xlane.xlu0 %2342 }
 0x127   : > { %2789 = vst.msk [vmem:[%s3299_s18 + $0x210] sm:$0xff] %vm2722_vm0, %v2343_v41 }
 0x128   : > { %2488 = vmax.xlane.f32.xlu1 %v802_v36  ;;  %v818_v36 = vmax.f32 %v461_v31, %v462_v32  ;;  %v493_v31 = vld [vmem:[%s3145_s14 + $0xab0] sm:$0xff]  ;;  %v494_v32 = vld [vmem:[%s3145_s14 + $0xab8] sm:$0xff] }
 0x129   : > { %2486 = vmax.xlane.f32.xlu0 %v801_v38  ;;  %v2349_v45 = vpop.xlane.xlu1 %2348  ;;  %v817_v38 = vmax.f32 %v459_v34, %v460_v35  ;;  %v491_v34 = vld [vmem:[%s3145_s14 + $0xaa0] sm:$0xff]  ;;  %v492_v35 = vld [vmem:[%s3145_s14 + $0xaa8] sm:$0xff] }
 0x12a   : > { %2792 = vst.msk [vmem:[%s3299_s18 + $0x228] sm:$0xff] %vm2722_vm0, %v2349_v45  ;;  %v2347_v49 = vpop.xlane.xlu0 %2346 }
 0x12b   : > { %2791 = vst.msk [vmem:[%s3299_s18 + $0x220] sm:$0xff] %vm2722_vm0, %v2347_v49 }
 0x12c   : > { %2492 = vmax.xlane.f32.xlu1 %v804_v44  ;;  %v820_v44 = vmax.f32 %v465_v39, %v466_v40  ;;  %v497_v39 = vld [vmem:[%s3145_s14 + $0xad0] sm:$0xff]  ;;  %v498_v40 = vld [vmem:[%s3145_s14 + $0xad8] sm:$0xff] }
 0x12d   : > { %2490 = vmax.xlane.f32.xlu0 %v803_v46  ;;  %v2353_v53 = vpop.xlane.xlu1 %2352  ;;  %v819_v46 = vmax.f32 %v463_v42, %v464_v43  ;;  %v495_v42 = vld [vmem:[%s3145_s14 + $0xac0] sm:$0xff]  ;;  %v496_v43 = vld [vmem:[%s3145_s14 + $0xac8] sm:$0xff] }
 0x12e   : > { %2794 = vst.msk [vmem:[%s3299_s18 + $0x238] sm:$0xff] %vm2722_vm0, %v2353_v53  ;;  %v2351_v57 = vpop.xlane.xlu0 %2350 }
 0x12f   : > { %2793 = vst.msk [vmem:[%s3299_s18 + $0x230] sm:$0xff] %vm2722_vm0, %v2351_v57 }
 0x130   : > { %2496 = vmax.xlane.f32.xlu1 %v806_v52  ;;  %v822_v52 = vmax.f32 %v469_v47, %v470_v48  ;;  %v501_v47 = vld [vmem:[%s3145_s14 + $0xaf0] sm:$0xff]  ;;  %v502_v48 = vld [vmem:[%s3145_s14 + $0xaf8] sm:$0xff] }
 0x131   : > { %2494 = vmax.xlane.f32.xlu0 %v805_v54  ;;  %v2357_v61 = vpop.xlane.xlu1 %2356  ;;  %v821_v54 = vmax.f32 %v467_v50, %v468_v51  ;;  %v499_v50 = vld [vmem:[%s3145_s14 + $0xae0] sm:$0xff]  ;;  %v500_v51 = vld [vmem:[%s3145_s14 + $0xae8] sm:$0xff] }
 0x132   : > { %2796 = vst.msk [vmem:[%s3299_s18 + $0x248] sm:$0xff] %vm2722_vm0, %v2357_v61  ;;  %v2355_v1 = vpop.xlane.xlu0 %2354 }
 0x133   : > { %2795 = vst.msk [vmem:[%s3299_s18 + $0x240] sm:$0xff] %vm2722_vm0, %v2355_v1 }
 0x134   : > { %2500 = vmax.xlane.f32.xlu1 %v808_v60  ;;  %v824_v60 = vmax.f32 %v473_v55, %v474_v56  ;;  %v505_v55 = vld [vmem:[%s3145_s14 + $0xb10] sm:$0xff]  ;;  %v506_v56 = vld [vmem:[%s3145_s14 + $0xb18] sm:$0xff] }
 0x135   : > { %2498 = vmax.xlane.f32.xlu0 %v807_v62  ;;  %v2361_v5 = vpop.xlane.xlu1 %2360  ;;  %v823_v62 = vmax.f32 %v471_v58, %v472_v59  ;;  %v503_v58 = vld [vmem:[%s3145_s14 + $0xb00] sm:$0xff]  ;;  %v504_v59 = vld [vmem:[%s3145_s14 + $0xb08] sm:$0xff] }
 0x136   : > { %2798 = vst.msk [vmem:[%s3299_s18 + $0x258] sm:$0xff] %vm2722_vm0, %v2361_v5  ;;  %v2359_v9 = vpop.xlane.xlu0 %2358 }
 0x137   : > { %2797 = vst.msk [vmem:[%s3299_s18 + $0x250] sm:$0xff] %vm2722_vm0, %v2359_v9 }
 0x138   : > { %2504 = vmax.xlane.f32.xlu1 %v810_v4  ;;  %v826_v4 = vmax.f32 %v477_v63, %v478_v0  ;;  %v509_v63 = vld [vmem:[%s3145_s14 + $0xb30] sm:$0xff]  ;;  %v510_v0 = vld [vmem:[%s3145_s14 + $0xb38] sm:$0xff] }
 0x139   : > { %2502 = vmax.xlane.f32.xlu0 %v809_v6  ;;  %v2365_v13 = vpop.xlane.xlu1 %2364  ;;  %v825_v6 = vmax.f32 %v475_v2, %v476_v3  ;;  %v507_v2 = vld [vmem:[%s3145_s14 + $0xb20] sm:$0xff]  ;;  %v508_v3 = vld [vmem:[%s3145_s14 + $0xb28] sm:$0xff] }
 0x13a   : > { %2800 = vst.msk [vmem:[%s3299_s18 + $0x268] sm:$0xff] %vm2722_vm0, %v2365_v13  ;;  %v2363_v17 = vpop.xlane.xlu0 %2362 }
 0x13b   : > { %2799 = vst.msk [vmem:[%s3299_s18 + $0x260] sm:$0xff] %vm2722_vm0, %v2363_v17 }
 0x13c   : > { %2508 = vmax.xlane.f32.xlu1 %v812_v12  ;;  %v828_v12 = vmax.f32 %v481_v7, %v482_v8  ;;  %v513_v7 = vld [vmem:[%s3145_s14 + $0xb50] sm:$0xff]  ;;  %v514_v8 = vld [vmem:[%s3145_s14 + $0xb58] sm:$0xff] }
 0x13d   : > { %2506 = vmax.xlane.f32.xlu0 %v811_v14  ;;  %v2369_v21 = vpop.xlane.xlu1 %2368  ;;  %v827_v14 = vmax.f32 %v479_v10, %v480_v11  ;;  %v511_v10 = vld [vmem:[%s3145_s14 + $0xb40] sm:$0xff]  ;;  %v512_v11 = vld [vmem:[%s3145_s14 + $0xb48] sm:$0xff] }
 0x13e   : > { %2802 = vst.msk [vmem:[%s3299_s18 + $0x278] sm:$0xff] %vm2722_vm0, %v2369_v21  ;;  %v2367_v25 = vpop.xlane.xlu0 %2366 }
 0x13f   : > { %2801 = vst.msk [vmem:[%s3299_s18 + $0x270] sm:$0xff] %vm2722_vm0, %v2367_v25 }
 0x140   : > { %2512 = vmax.xlane.f32.xlu1 %v814_v20  ;;  %v830_v20 = vmax.f32 %v485_v15, %v486_v16  ;;  %v517_v15 = vld [vmem:[%s3145_s14 + $0xb70] sm:$0xff]  ;;  %v518_v16 = vld [vmem:[%s3145_s14 + $0xb78] sm:$0xff] }
 0x141   : > { %2510 = vmax.xlane.f32.xlu0 %v813_v22  ;;  %v2373_v29 = vpop.xlane.xlu1 %2372  ;;  %v829_v22 = vmax.f32 %v483_v18, %v484_v19  ;;  %v515_v18 = vld [vmem:[%s3145_s14 + $0xb60] sm:$0xff]  ;;  %v516_v19 = vld [vmem:[%s3145_s14 + $0xb68] sm:$0xff] }
 0x142   : > { %2804 = vst.msk [vmem:[%s3299_s18 + $0x288] sm:$0xff] %vm2722_vm0, %v2373_v29  ;;  %v2371_v33 = vpop.xlane.xlu0 %2370 }
 0x143   : > { %2803 = vst.msk [vmem:[%s3299_s18 + $0x280] sm:$0xff] %vm2722_vm0, %v2371_v33 }
 0x144   : > { %2516 = vmax.xlane.f32.xlu1 %v816_v28  ;;  %v832_v28 = vmax.f32 %v489_v23, %v490_v24  ;;  %v521_v23 = vld [vmem:[%s3145_s14 + $0xb90] sm:$0xff]  ;;  %v522_v24 = vld [vmem:[%s3145_s14 + $0xb98] sm:$0xff] }
 0x145   : > { %2514 = vmax.xlane.f32.xlu0 %v815_v30  ;;  %v2377_v37 = vpop.xlane.xlu1 %2376  ;;  %v831_v30 = vmax.f32 %v487_v26, %v488_v27  ;;  %v519_v26 = vld [vmem:[%s3145_s14 + $0xb80] sm:$0xff]  ;;  %v520_v27 = vld [vmem:[%s3145_s14 + $0xb88] sm:$0xff] }
 0x146   : > { %2806 = vst.msk [vmem:[%s3299_s18 + $0x298] sm:$0xff] %vm2722_vm0, %v2377_v37  ;;  %v2375_v41 = vpop.xlane.xlu0 %2374 }
 0x147   : > { %2805 = vst.msk [vmem:[%s3299_s18 + $0x290] sm:$0xff] %vm2722_vm0, %v2375_v41 }
 0x148   : > { %2520 = vmax.xlane.f32.xlu1 %v818_v36  ;;  %v834_v36 = vmax.f32 %v493_v31, %v494_v32  ;;  %v525_v31 = vld [vmem:[%s3145_s14 + $0xbb0] sm:$0xff]  ;;  %v526_v32 = vld [vmem:[%s3145_s14 + $0xbb8] sm:$0xff] }
 0x149   : > { %2518 = vmax.xlane.f32.xlu0 %v817_v38  ;;  %v2381_v45 = vpop.xlane.xlu1 %2380  ;;  %v833_v38 = vmax.f32 %v491_v34, %v492_v35  ;;  %v523_v34 = vld [vmem:[%s3145_s14 + $0xba0] sm:$0xff]  ;;  %v524_v35 = vld [vmem:[%s3145_s14 + $0xba8] sm:$0xff] }
 0x14a   : > { %2808 = vst.msk [vmem:[%s3299_s18 + $0x2a8] sm:$0xff] %vm2722_vm0, %v2381_v45  ;;  %v2379_v49 = vpop.xlane.xlu0 %2378 }
 0x14b   : > { %2807 = vst.msk [vmem:[%s3299_s18 + $0x2a0] sm:$0xff] %vm2722_vm0, %v2379_v49 }
 0x14c   : > { %2524 = vmax.xlane.f32.xlu1 %v820_v44  ;;  %v836_v44 = vmax.f32 %v497_v39, %v498_v40  ;;  %v529_v39 = vld [vmem:[%s3145_s14 + $0xbd0] sm:$0xff]  ;;  %v530_v40 = vld [vmem:[%s3145_s14 + $0xbd8] sm:$0xff] }
 0x14d   : > { %2522 = vmax.xlane.f32.xlu0 %v819_v46  ;;  %v2385_v53 = vpop.xlane.xlu1 %2384  ;;  %v835_v46 = vmax.f32 %v495_v42, %v496_v43  ;;  %v527_v42 = vld [vmem:[%s3145_s14 + $0xbc0] sm:$0xff]  ;;  %v528_v43 = vld [vmem:[%s3145_s14 + $0xbc8] sm:$0xff] }
 0x14e   : > { %2810 = vst.msk [vmem:[%s3299_s18 + $0x2b8] sm:$0xff] %vm2722_vm0, %v2385_v53  ;;  %v2383_v57 = vpop.xlane.xlu0 %2382 }
 0x14f   : > { %2809 = vst.msk [vmem:[%s3299_s18 + $0x2b0] sm:$0xff] %vm2722_vm0, %v2383_v57 }
 0x150   : > { %2528 = vmax.xlane.f32.xlu1 %v822_v52  ;;  %v838_v52 = vmax.f32 %v501_v47, %v502_v48  ;;  %v533_v47 = vld [vmem:[%s3145_s14 + $0xbf0] sm:$0xff]  ;;  %v534_v48 = vld [vmem:[%s3145_s14 + $0xbf8] sm:$0xff] }
 0x151   : > { %2526 = vmax.xlane.f32.xlu0 %v821_v54  ;;  %v2389_v61 = vpop.xlane.xlu1 %2388  ;;  %v837_v54 = vmax.f32 %v499_v50, %v500_v51  ;;  %v531_v50 = vld [vmem:[%s3145_s14 + $0xbe0] sm:$0xff]  ;;  %v532_v51 = vld [vmem:[%s3145_s14 + $0xbe8] sm:$0xff] }
 0x152   : > { %2812 = vst.msk [vmem:[%s3299_s18 + $0x2c8] sm:$0xff] %vm2722_vm0, %v2389_v61  ;;  %v2387_v1 = vpop.xlane.xlu0 %2386 }
 0x153   : > { %2811 = vst.msk [vmem:[%s3299_s18 + $0x2c0] sm:$0xff] %vm2722_vm0, %v2387_v1 }
 0x154   : > { %2532 = vmax.xlane.f32.xlu1 %v824_v60  ;;  %v840_v60 = vmax.f32 %v505_v55, %v506_v56  ;;  %v537_v55 = vld [vmem:[%s3145_s14 + $0xc10] sm:$0xff]  ;;  %v538_v56 = vld [vmem:[%s3145_s14 + $0xc18] sm:$0xff] }
 0x155   : > { %2530 = vmax.xlane.f32.xlu0 %v823_v62  ;;  %v2393_v5 = vpop.xlane.xlu1 %2392  ;;  %v839_v62 = vmax.f32 %v503_v58, %v504_v59  ;;  %v535_v58 = vld [vmem:[%s3145_s14 + $0xc00] sm:$0xff]  ;;  %v536_v59 = vld [vmem:[%s3145_s14 + $0xc08] sm:$0xff] }
 0x156   : > { %2814 = vst.msk [vmem:[%s3299_s18 + $0x2d8] sm:$0xff] %vm2722_vm0, %v2393_v5  ;;  %v2391_v9 = vpop.xlane.xlu0 %2390 }
 0x157   : > { %2813 = vst.msk [vmem:[%s3299_s18 + $0x2d0] sm:$0xff] %vm2722_vm0, %v2391_v9 }
 0x158   : > { %2536 = vmax.xlane.f32.xlu1 %v826_v4  ;;  %v842_v4 = vmax.f32 %v509_v63, %v510_v0  ;;  %v541_v63 = vld [vmem:[%s3145_s14 + $0xc30] sm:$0xff]  ;;  %v542_v0 = vld [vmem:[%s3145_s14 + $0xc38] sm:$0xff] }
 0x159   : > { %2534 = vmax.xlane.f32.xlu0 %v825_v6  ;;  %v2397_v13 = vpop.xlane.xlu1 %2396  ;;  %v841_v6 = vmax.f32 %v507_v2, %v508_v3  ;;  %v539_v2 = vld [vmem:[%s3145_s14 + $0xc20] sm:$0xff]  ;;  %v540_v3 = vld [vmem:[%s3145_s14 + $0xc28] sm:$0xff] }
 0x15a   : > { %2816 = vst.msk [vmem:[%s3299_s18 + $0x2e8] sm:$0xff] %vm2722_vm0, %v2397_v13  ;;  %v2395_v17 = vpop.xlane.xlu0 %2394 }
 0x15b   : > { %2815 = vst.msk [vmem:[%s3299_s18 + $0x2e0] sm:$0xff] %vm2722_vm0, %v2395_v17 }
 0x15c   : > { %2540 = vmax.xlane.f32.xlu1 %v828_v12  ;;  %v844_v12 = vmax.f32 %v513_v7, %v514_v8  ;;  %v545_v7 = vld [vmem:[%s3145_s14 + $0xc50] sm:$0xff]  ;;  %v546_v8 = vld [vmem:[%s3145_s14 + $0xc58] sm:$0xff] }
 0x15d   : > { %2538 = vmax.xlane.f32.xlu0 %v827_v14  ;;  %v2401_v21 = vpop.xlane.xlu1 %2400  ;;  %v843_v14 = vmax.f32 %v511_v10, %v512_v11  ;;  %v543_v10 = vld [vmem:[%s3145_s14 + $0xc40] sm:$0xff]  ;;  %v544_v11 = vld [vmem:[%s3145_s14 + $0xc48] sm:$0xff] }
 0x15e   : > { %2818 = vst.msk [vmem:[%s3299_s18 + $0x2f8] sm:$0xff] %vm2722_vm0, %v2401_v21  ;;  %v2399_v25 = vpop.xlane.xlu0 %2398 }
 0x15f   : > { %2817 = vst.msk [vmem:[%s3299_s18 + $0x2f0] sm:$0xff] %vm2722_vm0, %v2399_v25 }
 0x160   : > { %2544 = vmax.xlane.f32.xlu1 %v830_v20  ;;  %v846_v20 = vmax.f32 %v517_v15, %v518_v16  ;;  %v549_v15 = vld [vmem:[%s3145_s14 + $0xc70] sm:$0xff]  ;;  %v550_v16 = vld [vmem:[%s3145_s14 + $0xc78] sm:$0xff] }
 0x161   : > { %2542 = vmax.xlane.f32.xlu0 %v829_v22  ;;  %v2405_v29 = vpop.xlane.xlu1 %2404  ;;  %v845_v22 = vmax.f32 %v515_v18, %v516_v19  ;;  %v547_v18 = vld [vmem:[%s3145_s14 + $0xc60] sm:$0xff]  ;;  %v548_v19 = vld [vmem:[%s3145_s14 + $0xc68] sm:$0xff] }
 0x162   : > { %2820 = vst.msk [vmem:[%s3299_s18 + $0x308] sm:$0xff] %vm2722_vm0, %v2405_v29  ;;  %v2403_v33 = vpop.xlane.xlu0 %2402 }
 0x163   : > { %2819 = vst.msk [vmem:[%s3299_s18 + $0x300] sm:$0xff] %vm2722_vm0, %v2403_v33 }
 0x164   : > { %2548 = vmax.xlane.f32.xlu1 %v832_v28  ;;  %v848_v28 = vmax.f32 %v521_v23, %v522_v24  ;;  %v553_v23 = vld [vmem:[%s3145_s14 + $0xc90] sm:$0xff]  ;;  %v554_v24 = vld [vmem:[%s3145_s14 + $0xc98] sm:$0xff] }
 0x165   : > { %2546 = vmax.xlane.f32.xlu0 %v831_v30  ;;  %v2409_v37 = vpop.xlane.xlu1 %2408  ;;  %v847_v30 = vmax.f32 %v519_v26, %v520_v27  ;;  %v551_v26 = vld [vmem:[%s3145_s14 + $0xc80] sm:$0xff]  ;;  %v552_v27 = vld [vmem:[%s3145_s14 + $0xc88] sm:$0xff] }
 0x166   : > { %2822 = vst.msk [vmem:[%s3299_s18 + $0x318] sm:$0xff] %vm2722_vm0, %v2409_v37  ;;  %v2407_v41 = vpop.xlane.xlu0 %2406 }
 0x167   : > { %2821 = vst.msk [vmem:[%s3299_s18 + $0x310] sm:$0xff] %vm2722_vm0, %v2407_v41 }
 0x168   : > { %2552 = vmax.xlane.f32.xlu1 %v834_v36  ;;  %v850_v36 = vmax.f32 %v525_v31, %v526_v32  ;;  %v557_v31 = vld [vmem:[%s3145_s14 + $0xcb0] sm:$0xff]  ;;  %v558_v32 = vld [vmem:[%s3145_s14 + $0xcb8] sm:$0xff] }
 0x169   : > { %2550 = vmax.xlane.f32.xlu0 %v833_v38  ;;  %v2413_v45 = vpop.xlane.xlu1 %2412  ;;  %v849_v38 = vmax.f32 %v523_v34, %v524_v35  ;;  %v555_v34 = vld [vmem:[%s3145_s14 + $0xca0] sm:$0xff]  ;;  %v556_v35 = vld [vmem:[%s3145_s14 + $0xca8] sm:$0xff] }
 0x16a   : > { %2824 = vst.msk [vmem:[%s3299_s18 + $0x328] sm:$0xff] %vm2722_vm0, %v2413_v45  ;;  %v2411_v49 = vpop.xlane.xlu0 %2410 }
 0x16b   : > { %2823 = vst.msk [vmem:[%s3299_s18 + $0x320] sm:$0xff] %vm2722_vm0, %v2411_v49 }
 0x16c   : > { %2556 = vmax.xlane.f32.xlu1 %v836_v44  ;;  %v852_v44 = vmax.f32 %v529_v39, %v530_v40  ;;  %v561_v39 = vld [vmem:[%s3145_s14 + $0xcd0] sm:$0xff]  ;;  %v562_v40 = vld [vmem:[%s3145_s14 + $0xcd8] sm:$0xff] }
 0x16d   : > { %2554 = vmax.xlane.f32.xlu0 %v835_v46  ;;  %v2417_v53 = vpop.xlane.xlu1 %2416  ;;  %v851_v46 = vmax.f32 %v527_v42, %v528_v43  ;;  %v559_v42 = vld [vmem:[%s3145_s14 + $0xcc0] sm:$0xff]  ;;  %v560_v43 = vld [vmem:[%s3145_s14 + $0xcc8] sm:$0xff] }
 0x16e   : > { %2826 = vst.msk [vmem:[%s3299_s18 + $0x338] sm:$0xff] %vm2722_vm0, %v2417_v53  ;;  %v2415_v57 = vpop.xlane.xlu0 %2414 }
 0x16f   : > { %2825 = vst.msk [vmem:[%s3299_s18 + $0x330] sm:$0xff] %vm2722_vm0, %v2415_v57 }
 0x170   : > { %2560 = vmax.xlane.f32.xlu1 %v838_v52  ;;  %v854_v52 = vmax.f32 %v533_v47, %v534_v48  ;;  %v565_v47 = vld [vmem:[%s3145_s14 + $0xcf0] sm:$0xff]  ;;  %v566_v48 = vld [vmem:[%s3145_s14 + $0xcf8] sm:$0xff] }
 0x171   : > { %2558 = vmax.xlane.f32.xlu0 %v837_v54  ;;  %v2421_v61 = vpop.xlane.xlu1 %2420  ;;  %v853_v54 = vmax.f32 %v531_v50, %v532_v51  ;;  %v563_v50 = vld [vmem:[%s3145_s14 + $0xce0] sm:$0xff]  ;;  %v564_v51 = vld [vmem:[%s3145_s14 + $0xce8] sm:$0xff] }
 0x172   : > { %2828 = vst.msk [vmem:[%s3299_s18 + $0x348] sm:$0xff] %vm2722_vm0, %v2421_v61  ;;  %v2419_v1 = vpop.xlane.xlu0 %2418 }
 0x173   : > { %2827 = vst.msk [vmem:[%s3299_s18 + $0x340] sm:$0xff] %vm2722_vm0, %v2419_v1 }
 0x174   : > { %2564 = vmax.xlane.f32.xlu1 %v840_v60  ;;  %v856_v60 = vmax.f32 %v537_v55, %v538_v56  ;;  %v569_v55 = vld [vmem:[%s3145_s14 + $0xd10] sm:$0xff]  ;;  %v570_v56 = vld [vmem:[%s3145_s14 + $0xd18] sm:$0xff] }
 0x175   : > { %2562 = vmax.xlane.f32.xlu0 %v839_v62  ;;  %v2425_v5 = vpop.xlane.xlu1 %2424  ;;  %v855_v62 = vmax.f32 %v535_v58, %v536_v59  ;;  %v567_v58 = vld [vmem:[%s3145_s14 + $0xd00] sm:$0xff]  ;;  %v568_v59 = vld [vmem:[%s3145_s14 + $0xd08] sm:$0xff] }
 0x176   : > { %2830 = vst.msk [vmem:[%s3299_s18 + $0x358] sm:$0xff] %vm2722_vm0, %v2425_v5  ;;  %v2423_v9 = vpop.xlane.xlu0 %2422 }
 0x177   : > { %2829 = vst.msk [vmem:[%s3299_s18 + $0x350] sm:$0xff] %vm2722_vm0, %v2423_v9 }
 0x178   : > { %2568 = vmax.xlane.f32.xlu1 %v842_v4  ;;  %v858_v4 = vmax.f32 %v541_v63, %v542_v0  ;;  %v573_v63 = vld [vmem:[%s3145_s14 + $0xd30] sm:$0xff]  ;;  %v574_v0 = vld [vmem:[%s3145_s14 + $0xd38] sm:$0xff] }
 0x179   : > { %2566 = vmax.xlane.f32.xlu0 %v841_v6  ;;  %v2429_v13 = vpop.xlane.xlu1 %2428  ;;  %v857_v6 = vmax.f32 %v539_v2, %v540_v3  ;;  %v571_v2 = vld [vmem:[%s3145_s14 + $0xd20] sm:$0xff]  ;;  %v572_v3 = vld [vmem:[%s3145_s14 + $0xd28] sm:$0xff] }
 0x17a   : > { %2832 = vst.msk [vmem:[%s3299_s18 + $0x368] sm:$0xff] %vm2722_vm0, %v2429_v13  ;;  %v2427_v17 = vpop.xlane.xlu0 %2426 }
 0x17b   : > { %2831 = vst.msk [vmem:[%s3299_s18 + $0x360] sm:$0xff] %vm2722_vm0, %v2427_v17 }
 0x17c   : > { %2572 = vmax.xlane.f32.xlu1 %v844_v12  ;;  %v860_v12 = vmax.f32 %v545_v7, %v546_v8  ;;  %v577_v7 = vld [vmem:[%s3145_s14 + $0xd50] sm:$0xff]  ;;  %v578_v8 = vld [vmem:[%s3145_s14 + $0xd58] sm:$0xff] }
 0x17d   : > { %2570 = vmax.xlane.f32.xlu0 %v843_v14  ;;  %v2433_v21 = vpop.xlane.xlu1 %2432  ;;  %v859_v14 = vmax.f32 %v543_v10, %v544_v11  ;;  %v575_v10 = vld [vmem:[%s3145_s14 + $0xd40] sm:$0xff]  ;;  %v576_v11 = vld [vmem:[%s3145_s14 + $0xd48] sm:$0xff] }
 0x17e   : > { %2834 = vst.msk [vmem:[%s3299_s18 + $0x378] sm:$0xff] %vm2722_vm0, %v2433_v21  ;;  %v2431_v25 = vpop.xlane.xlu0 %2430 }
 0x17f   : > { %2833 = vst.msk [vmem:[%s3299_s18 + $0x370] sm:$0xff] %vm2722_vm0, %v2431_v25 }
 0x180   : > { %2576 = vmax.xlane.f32.xlu1 %v846_v20  ;;  %v862_v20 = vmax.f32 %v549_v15, %v550_v16  ;;  %v581_v15 = vld [vmem:[%s3145_s14 + $0xd70] sm:$0xff]  ;;  %v582_v16 = vld [vmem:[%s3145_s14 + $0xd78] sm:$0xff] }
 0x181   : > { %2574 = vmax.xlane.f32.xlu0 %v845_v22  ;;  %v2437_v29 = vpop.xlane.xlu1 %2436  ;;  %v861_v22 = vmax.f32 %v547_v18, %v548_v19  ;;  %v579_v18 = vld [vmem:[%s3145_s14 + $0xd60] sm:$0xff]  ;;  %v580_v19 = vld [vmem:[%s3145_s14 + $0xd68] sm:$0xff] }
 0x182   : > { %2836 = vst.msk [vmem:[%s3299_s18 + $0x388] sm:$0xff] %vm2722_vm0, %v2437_v29  ;;  %v2435_v33 = vpop.xlane.xlu0 %2434 }
 0x183   : > { %2835 = vst.msk [vmem:[%s3299_s18 + $0x380] sm:$0xff] %vm2722_vm0, %v2435_v33 }
 0x184   : > { %2580 = vmax.xlane.f32.xlu1 %v848_v28  ;;  %v864_v28 = vmax.f32 %v553_v23, %v554_v24  ;;  %v585_v23 = vld [vmem:[%s3145_s14 + $0xd90] sm:$0xff]  ;;  %v586_v24 = vld [vmem:[%s3145_s14 + $0xd98] sm:$0xff] }
 0x185   : > { %2578 = vmax.xlane.f32.xlu0 %v847_v30  ;;  %v2441_v37 = vpop.xlane.xlu1 %2440  ;;  %v863_v30 = vmax.f32 %v551_v26, %v552_v27  ;;  %v583_v26 = vld [vmem:[%s3145_s14 + $0xd80] sm:$0xff]  ;;  %v584_v27 = vld [vmem:[%s3145_s14 + $0xd88] sm:$0xff] }
 0x186   : > { %2838 = vst.msk [vmem:[%s3299_s18 + $0x398] sm:$0xff] %vm2722_vm0, %v2441_v37  ;;  %v2439_v41 = vpop.xlane.xlu0 %2438 }
 0x187   : > { %2837 = vst.msk [vmem:[%s3299_s18 + $0x390] sm:$0xff] %vm2722_vm0, %v2439_v41 }
 0x188   : > { %2584 = vmax.xlane.f32.xlu1 %v850_v36  ;;  %v866_v36 = vmax.f32 %v557_v31, %v558_v32  ;;  %v589_v31 = vld [vmem:[%s3145_s14 + $0xdb0] sm:$0xff]  ;;  %v590_v32 = vld [vmem:[%s3145_s14 + $0xdb8] sm:$0xff] }
 0x189   : > { %2582 = vmax.xlane.f32.xlu0 %v849_v38  ;;  %v2445_v45 = vpop.xlane.xlu1 %2444  ;;  %v865_v38 = vmax.f32 %v555_v34, %v556_v35  ;;  %v587_v34 = vld [vmem:[%s3145_s14 + $0xda0] sm:$0xff]  ;;  %v588_v35 = vld [vmem:[%s3145_s14 + $0xda8] sm:$0xff] }
 0x18a   : > { %2840 = vst.msk [vmem:[%s3299_s18 + $0x3a8] sm:$0xff] %vm2722_vm0, %v2445_v45  ;;  %v2443_v49 = vpop.xlane.xlu0 %2442 }
 0x18b   : > { %2839 = vst.msk [vmem:[%s3299_s18 + $0x3a0] sm:$0xff] %vm2722_vm0, %v2443_v49 }
 0x18c   : > { %2588 = vmax.xlane.f32.xlu1 %v852_v44  ;;  %v868_v44 = vmax.f32 %v561_v39, %v562_v40  ;;  %v593_v39 = vld [vmem:[%s3145_s14 + $0xdd0] sm:$0xff]  ;;  %v594_v40 = vld [vmem:[%s3145_s14 + $0xdd8] sm:$0xff] }
 0x18d   : > { %2586 = vmax.xlane.f32.xlu0 %v851_v46  ;;  %v2449_v53 = vpop.xlane.xlu1 %2448  ;;  %v867_v46 = vmax.f32 %v559_v42, %v560_v43  ;;  %v591_v42 = vld [vmem:[%s3145_s14 + $0xdc0] sm:$0xff]  ;;  %v592_v43 = vld [vmem:[%s3145_s14 + $0xdc8] sm:$0xff] }
 0x18e   : > { %2842 = vst.msk [vmem:[%s3299_s18 + $0x3b8] sm:$0xff] %vm2722_vm0, %v2449_v53  ;;  %v2447_v57 = vpop.xlane.xlu0 %2446 }
 0x18f   : > { %2841 = vst.msk [vmem:[%s3299_s18 + $0x3b0] sm:$0xff] %vm2722_vm0, %v2447_v57 }
 0x190   : > { %2592 = vmax.xlane.f32.xlu1 %v854_v52  ;;  %v870_v52 = vmax.f32 %v565_v47, %v566_v48  ;;  %v597_v47 = vld [vmem:[%s3145_s14 + $0xdf0] sm:$0xff]  ;;  %v598_v48 = vld [vmem:[%s3145_s14 + $0xdf8] sm:$0xff] }
 0x191   : > { %2590 = vmax.xlane.f32.xlu0 %v853_v54  ;;  %v2453_v61 = vpop.xlane.xlu1 %2452  ;;  %v869_v54 = vmax.f32 %v563_v50, %v564_v51  ;;  %v595_v50 = vld [vmem:[%s3145_s14 + $0xde0] sm:$0xff]  ;;  %v596_v51 = vld [vmem:[%s3145_s14 + $0xde8] sm:$0xff] }
 0x192   : > { %2844 = vst.msk [vmem:[%s3299_s18 + $0x3c8] sm:$0xff] %vm2722_vm0, %v2453_v61  ;;  %v2451_v1 = vpop.xlane.xlu0 %2450 }
 0x193   : > { %2843 = vst.msk [vmem:[%s3299_s18 + $0x3c0] sm:$0xff] %vm2722_vm0, %v2451_v1 }
 0x194   : > { %2596 = vmax.xlane.f32.xlu1 %v856_v60  ;;  %v872_v60 = vmax.f32 %v569_v55, %v570_v56  ;;  %v601_v55 = vld [vmem:[%s3145_s14 + $0xe10] sm:$0xff]  ;;  %v602_v56 = vld [vmem:[%s3145_s14 + $0xe18] sm:$0xff] }
 0x195   : > { %2594 = vmax.xlane.f32.xlu0 %v855_v62  ;;  %v2457_v5 = vpop.xlane.xlu1 %2456  ;;  %v871_v62 = vmax.f32 %v567_v58, %v568_v59  ;;  %v599_v58 = vld [vmem:[%s3145_s14 + $0xe00] sm:$0xff]  ;;  %v600_v59 = vld [vmem:[%s3145_s14 + $0xe08] sm:$0xff] }
 0x196   : > { %2846 = vst.msk [vmem:[%s3299_s18 + $0x3d8] sm:$0xff] %vm2722_vm0, %v2457_v5  ;;  %v2455_v9 = vpop.xlane.xlu0 %2454 }
 0x197   : > { %2845 = vst.msk [vmem:[%s3299_s18 + $0x3d0] sm:$0xff] %vm2722_vm0, %v2455_v9 }
 0x198   : > { %2600 = vmax.xlane.f32.xlu1 %v858_v4  ;;  %v874_v4 = vmax.f32 %v573_v63, %v574_v0  ;;  %v605_v63 = vld [vmem:[%s3145_s14 + $0xe30] sm:$0xff]  ;;  %v606_v0 = vld [vmem:[%s3145_s14 + $0xe38] sm:$0xff] }
 0x199   : > { %2598 = vmax.xlane.f32.xlu0 %v857_v6  ;;  %v2461_v13 = vpop.xlane.xlu1 %2460  ;;  %v873_v6 = vmax.f32 %v571_v2, %v572_v3  ;;  %v603_v2 = vld [vmem:[%s3145_s14 + $0xe20] sm:$0xff]  ;;  %v604_v3 = vld [vmem:[%s3145_s14 + $0xe28] sm:$0xff] }
 0x19a   : > { %2848 = vst.msk [vmem:[%s3299_s18 + $0x3e8] sm:$0xff] %vm2722_vm0, %v2461_v13  ;;  %v2459_v17 = vpop.xlane.xlu0 %2458 }
 0x19b   : > { %2847 = vst.msk [vmem:[%s3299_s18 + $0x3e0] sm:$0xff] %vm2722_vm0, %v2459_v17 }
 0x19c   : > { %2604 = vmax.xlane.f32.xlu1 %v860_v12  ;;  %v876_v12 = vmax.f32 %v577_v7, %v578_v8  ;;  %v609_v7 = vld [vmem:[%s3145_s14 + $0xe50] sm:$0xff]  ;;  %v610_v8 = vld [vmem:[%s3145_s14 + $0xe58] sm:$0xff] }
 0x19d   : > { %2602 = vmax.xlane.f32.xlu0 %v859_v14  ;;  %v2465_v21 = vpop.xlane.xlu1 %2464  ;;  %v875_v14 = vmax.f32 %v575_v10, %v576_v11  ;;  %v607_v10 = vld [vmem:[%s3145_s14 + $0xe40] sm:$0xff]  ;;  %v608_v11 = vld [vmem:[%s3145_s14 + $0xe48] sm:$0xff] }
 0x19e   : > { %2850 = vst.msk [vmem:[%s3299_s18 + $0x3f8] sm:$0xff] %vm2722_vm0, %v2465_v21  ;;  %v2463_v25 = vpop.xlane.xlu0 %2462 }
 0x19f   : > { %2849 = vst.msk [vmem:[%s3299_s18 + $0x3f0] sm:$0xff] %vm2722_vm0, %v2463_v25 }
 0x1a0   : > { %2608 = vmax.xlane.f32.xlu1 %v862_v20  ;;  %v878_v20 = vmax.f32 %v581_v15, %v582_v16  ;;  %v613_v15 = vld [vmem:[%s3145_s14 + $0xe70] sm:$0xff]  ;;  %v614_v16 = vld [vmem:[%s3145_s14 + $0xe78] sm:$0xff] }
 0x1a1   : > { %2606 = vmax.xlane.f32.xlu0 %v861_v22  ;;  %v2469_v29 = vpop.xlane.xlu1 %2468  ;;  %v877_v22 = vmax.f32 %v579_v18, %v580_v19  ;;  %v611_v18 = vld [vmem:[%s3145_s14 + $0xe60] sm:$0xff]  ;;  %v612_v19 = vld [vmem:[%s3145_s14 + $0xe68] sm:$0xff] }
 0x1a2   : > { %2852 = vst.msk [vmem:[%s3299_s18 + $0x408] sm:$0xff] %vm2722_vm0, %v2469_v29  ;;  %v2467_v33 = vpop.xlane.xlu0 %2466 }
 0x1a3   : > { %2851 = vst.msk [vmem:[%s3299_s18 + $0x400] sm:$0xff] %vm2722_vm0, %v2467_v33 }
 0x1a4   : > { %2612 = vmax.xlane.f32.xlu1 %v864_v28  ;;  %v880_v28 = vmax.f32 %v585_v23, %v586_v24  ;;  %v617_v23 = vld [vmem:[%s3145_s14 + $0xe90] sm:$0xff]  ;;  %v618_v24 = vld [vmem:[%s3145_s14 + $0xe98] sm:$0xff] }
 0x1a5   : > { %2610 = vmax.xlane.f32.xlu0 %v863_v30  ;;  %v2473_v37 = vpop.xlane.xlu1 %2472  ;;  %v879_v30 = vmax.f32 %v583_v26, %v584_v27  ;;  %v615_v26 = vld [vmem:[%s3145_s14 + $0xe80] sm:$0xff]  ;;  %v616_v27 = vld [vmem:[%s3145_s14 + $0xe88] sm:$0xff] }
 0x1a6   : > { %2854 = vst.msk [vmem:[%s3299_s18 + $0x418] sm:$0xff] %vm2722_vm0, %v2473_v37  ;;  %v2471_v41 = vpop.xlane.xlu0 %2470 }
 0x1a7   : > { %2853 = vst.msk [vmem:[%s3299_s18 + $0x410] sm:$0xff] %vm2722_vm0, %v2471_v41 }
 0x1a8   : > { %2616 = vmax.xlane.f32.xlu1 %v866_v36  ;;  %v882_v36 = vmax.f32 %v589_v31, %v590_v32  ;;  %v621_v31 = vld [vmem:[%s3145_s14 + $0xeb0] sm:$0xff]  ;;  %v622_v32 = vld [vmem:[%s3145_s14 + $0xeb8] sm:$0xff] }
 0x1a9   : > { %2614 = vmax.xlane.f32.xlu0 %v865_v38  ;;  %v2477_v45 = vpop.xlane.xlu1 %2476  ;;  %v881_v38 = vmax.f32 %v587_v34, %v588_v35  ;;  %v619_v34 = vld [vmem:[%s3145_s14 + $0xea0] sm:$0xff]  ;;  %v620_v35 = vld [vmem:[%s3145_s14 + $0xea8] sm:$0xff] }
 0x1aa   : > { %2856 = vst.msk [vmem:[%s3299_s18 + $0x428] sm:$0xff] %vm2722_vm0, %v2477_v45  ;;  %v2475_v49 = vpop.xlane.xlu0 %2474 }
 0x1ab   : > { %2855 = vst.msk [vmem:[%s3299_s18 + $0x420] sm:$0xff] %vm2722_vm0, %v2475_v49 }
 0x1ac   : > { %2620 = vmax.xlane.f32.xlu1 %v868_v44  ;;  %v884_v44 = vmax.f32 %v593_v39, %v594_v40  ;;  %v625_v39 = vld [vmem:[%s3145_s14 + $0xed0] sm:$0xff]  ;;  %v626_v40 = vld [vmem:[%s3145_s14 + $0xed8] sm:$0xff] }
 0x1ad   : > { %2618 = vmax.xlane.f32.xlu0 %v867_v46  ;;  %v2481_v53 = vpop.xlane.xlu1 %2480  ;;  %v883_v46 = vmax.f32 %v591_v42, %v592_v43  ;;  %v623_v42 = vld [vmem:[%s3145_s14 + $0xec0] sm:$0xff]  ;;  %v624_v43 = vld [vmem:[%s3145_s14 + $0xec8] sm:$0xff] }
 0x1ae   : > { %2858 = vst.msk [vmem:[%s3299_s18 + $0x438] sm:$0xff] %vm2722_vm0, %v2481_v53  ;;  %v2479_v57 = vpop.xlane.xlu0 %2478 }
 0x1af   : > { %2857 = vst.msk [vmem:[%s3299_s18 + $0x430] sm:$0xff] %vm2722_vm0, %v2479_v57 }
 0x1b0   : > { %2624 = vmax.xlane.f32.xlu1 %v870_v52  ;;  %v886_v52 = vmax.f32 %v597_v47, %v598_v48  ;;  %v629_v47 = vld [vmem:[%s3145_s14 + $0xef0] sm:$0xff]  ;;  %v630_v48 = vld [vmem:[%s3145_s14 + $0xef8] sm:$0xff] }
 0x1b1   : > { %2622 = vmax.xlane.f32.xlu0 %v869_v54  ;;  %v2485_v61 = vpop.xlane.xlu1 %2484  ;;  %v885_v54 = vmax.f32 %v595_v50, %v596_v51  ;;  %v627_v50 = vld [vmem:[%s3145_s14 + $0xee0] sm:$0xff]  ;;  %v628_v51 = vld [vmem:[%s3145_s14 + $0xee8] sm:$0xff] }
 0x1b2   : > { %2860 = vst.msk [vmem:[%s3299_s18 + $0x448] sm:$0xff] %vm2722_vm0, %v2485_v61  ;;  %v2483_v1 = vpop.xlane.xlu0 %2482 }
 0x1b3   : > { %2859 = vst.msk [vmem:[%s3299_s18 + $0x440] sm:$0xff] %vm2722_vm0, %v2483_v1 }
 0x1b4   : > { %2628 = vmax.xlane.f32.xlu1 %v872_v60  ;;  %v888_v60 = vmax.f32 %v601_v55, %v602_v56  ;;  %v633_v55 = vld [vmem:[%s3145_s14 + $0xf10] sm:$0xff]  ;;  %v634_v56 = vld [vmem:[%s3145_s14 + $0xf18] sm:$0xff] }
 0x1b5   : > { %2626 = vmax.xlane.f32.xlu0 %v871_v62  ;;  %v2489_v5 = vpop.xlane.xlu1 %2488  ;;  %v887_v62 = vmax.f32 %v599_v58, %v600_v59  ;;  %v631_v58 = vld [vmem:[%s3145_s14 + $0xf00] sm:$0xff]  ;;  %v632_v59 = vld [vmem:[%s3145_s14 + $0xf08] sm:$0xff] }
 0x1b6   : > { %2862 = vst.msk [vmem:[%s3299_s18 + $0x458] sm:$0xff] %vm2722_vm0, %v2489_v5  ;;  %v2487_v9 = vpop.xlane.xlu0 %2486 }
 0x1b7   : > { %2861 = vst.msk [vmem:[%s3299_s18 + $0x450] sm:$0xff] %vm2722_vm0, %v2487_v9 }
 0x1b8   : > { %2632 = vmax.xlane.f32.xlu1 %v874_v4  ;;  %v890_v4 = vmax.f32 %v605_v63, %v606_v0  ;;  %v637_v63 = vld [vmem:[%s3145_s14 + $0xf30] sm:$0xff]  ;;  %v638_v0 = vld [vmem:[%s3145_s14 + $0xf38] sm:$0xff] }
 0x1b9   : > { %2630 = vmax.xlane.f32.xlu0 %v873_v6  ;;  %v2493_v13 = vpop.xlane.xlu1 %2492  ;;  %v889_v6 = vmax.f32 %v603_v2, %v604_v3  ;;  %v635_v2 = vld [vmem:[%s3145_s14 + $0xf20] sm:$0xff]  ;;  %v636_v3 = vld [vmem:[%s3145_s14 + $0xf28] sm:$0xff] }
 0x1ba   : > { %2864 = vst.msk [vmem:[%s3299_s18 + $0x468] sm:$0xff] %vm2722_vm0, %v2493_v13  ;;  %v2491_v17 = vpop.xlane.xlu0 %2490 }
 0x1bb   : > { %2863 = vst.msk [vmem:[%s3299_s18 + $0x460] sm:$0xff] %vm2722_vm0, %v2491_v17 }
 0x1bc   : > { %2636 = vmax.xlane.f32.xlu1 %v876_v12  ;;  %v892_v12 = vmax.f32 %v609_v7, %v610_v8  ;;  %v641_v7 = vld [vmem:[%s3145_s14 + $0xf50] sm:$0xff]  ;;  %v642_v8 = vld [vmem:[%s3145_s14 + $0xf58] sm:$0xff] }
 0x1bd   : > { %2634 = vmax.xlane.f32.xlu0 %v875_v14  ;;  %v2497_v21 = vpop.xlane.xlu1 %2496  ;;  %v891_v14 = vmax.f32 %v607_v10, %v608_v11  ;;  %v639_v10 = vld [vmem:[%s3145_s14 + $0xf40] sm:$0xff]  ;;  %v640_v11 = vld [vmem:[%s3145_s14 + $0xf48] sm:$0xff] }
 0x1be   : > { %2866 = vst.msk [vmem:[%s3299_s18 + $0x478] sm:$0xff] %vm2722_vm0, %v2497_v21  ;;  %v2495_v25 = vpop.xlane.xlu0 %2494 }
 0x1bf   : > { %2865 = vst.msk [vmem:[%s3299_s18 + $0x470] sm:$0xff] %vm2722_vm0, %v2495_v25 }
 0x1c0   : > { %2640 = vmax.xlane.f32.xlu1 %v878_v20  ;;  %v894_v20 = vmax.f32 %v613_v15, %v614_v16  ;;  %v645_v15 = vld [vmem:[%s3145_s14 + $0xf70] sm:$0xff]  ;;  %v646_v16 = vld [vmem:[%s3145_s14 + $0xf78] sm:$0xff] }
 0x1c1   : > { %2638 = vmax.xlane.f32.xlu0 %v877_v22  ;;  %v2501_v29 = vpop.xlane.xlu1 %2500  ;;  %v893_v22 = vmax.f32 %v611_v18, %v612_v19  ;;  %v643_v18 = vld [vmem:[%s3145_s14 + $0xf60] sm:$0xff]  ;;  %v644_v19 = vld [vmem:[%s3145_s14 + $0xf68] sm:$0xff] }
 0x1c2   : > { %2868 = vst.msk [vmem:[%s3299_s18 + $0x488] sm:$0xff] %vm2722_vm0, %v2501_v29  ;;  %v2499_v33 = vpop.xlane.xlu0 %2498 }
 0x1c3   : > { %2867 = vst.msk [vmem:[%s3299_s18 + $0x480] sm:$0xff] %vm2722_vm0, %v2499_v33 }
 0x1c4   : > { %2644 = vmax.xlane.f32.xlu1 %v880_v28  ;;  %v896_v28 = vmax.f32 %v617_v23, %v618_v24  ;;  %v649_v23 = vld [vmem:[%s3145_s14 + $0xf90] sm:$0xff]  ;;  %v650_v24 = vld [vmem:[%s3145_s14 + $0xf98] sm:$0xff] }
 0x1c5   : > { %2642 = vmax.xlane.f32.xlu0 %v879_v30  ;;  %v2505_v37 = vpop.xlane.xlu1 %2504  ;;  %v895_v30 = vmax.f32 %v615_v26, %v616_v27  ;;  %v647_v26 = vld [vmem:[%s3145_s14 + $0xf80] sm:$0xff]  ;;  %v648_v27 = vld [vmem:[%s3145_s14 + $0xf88] sm:$0xff] }
 0x1c6   : > { %2870 = vst.msk [vmem:[%s3299_s18 + $0x498] sm:$0xff] %vm2722_vm0, %v2505_v37  ;;  %v2503_v41 = vpop.xlane.xlu0 %2502 }
 0x1c7   : > { %2869 = vst.msk [vmem:[%s3299_s18 + $0x490] sm:$0xff] %vm2722_vm0, %v2503_v41 }
 0x1c8   : > { %2648 = vmax.xlane.f32.xlu1 %v882_v36  ;;  %v898_v36 = vmax.f32 %v621_v31, %v622_v32  ;;  %v653_v31 = vld [vmem:[%s3145_s14 + $0xfb0] sm:$0xff]  ;;  %v654_v32 = vld [vmem:[%s3145_s14 + $0xfb8] sm:$0xff] }
 0x1c9   : > { %2646 = vmax.xlane.f32.xlu0 %v881_v38  ;;  %v2509_v45 = vpop.xlane.xlu1 %2508  ;;  %v897_v38 = vmax.f32 %v619_v34, %v620_v35  ;;  %v651_v34 = vld [vmem:[%s3145_s14 + $0xfa0] sm:$0xff]  ;;  %v652_v35 = vld [vmem:[%s3145_s14 + $0xfa8] sm:$0xff] }
 0x1ca   : > { %2872 = vst.msk [vmem:[%s3299_s18 + $0x4a8] sm:$0xff] %vm2722_vm0, %v2509_v45  ;;  %v2507_v49 = vpop.xlane.xlu0 %2506 }
 0x1cb   : > { %2871 = vst.msk [vmem:[%s3299_s18 + $0x4a0] sm:$0xff] %vm2722_vm0, %v2507_v49 }
 0x1cc   : > { %2652 = vmax.xlane.f32.xlu1 %v884_v44  ;;  %v900_v44 = vmax.f32 %v625_v39, %v626_v40  ;;  %v657_v39 = vld [vmem:[%s3145_s14 + $0xfd0] sm:$0xff]  ;;  %v658_v40 = vld [vmem:[%s3145_s14 + $0xfd8] sm:$0xff] }
 0x1cd   : > { %2650 = vmax.xlane.f32.xlu0 %v883_v46  ;;  %v2513_v53 = vpop.xlane.xlu1 %2512  ;;  %v899_v46 = vmax.f32 %v623_v42, %v624_v43  ;;  %v655_v42 = vld [vmem:[%s3145_s14 + $0xfc0] sm:$0xff]  ;;  %v656_v43 = vld [vmem:[%s3145_s14 + $0xfc8] sm:$0xff] }
 0x1ce   : > { %2874 = vst.msk [vmem:[%s3299_s18 + $0x4b8] sm:$0xff] %vm2722_vm0, %v2513_v53  ;;  %v2511_v57 = vpop.xlane.xlu0 %2510 }
 0x1cf   : > { %2873 = vst.msk [vmem:[%s3299_s18 + $0x4b0] sm:$0xff] %vm2722_vm0, %v2511_v57 }
 0x1d0   : > { %2656 = vmax.xlane.f32.xlu1 %v886_v52  ;;  %v902_v52 = vmax.f32 %v629_v47, %v630_v48  ;;  %v661_v47 = vld [vmem:[%s3145_s14 + $0xff0] sm:$0xff]  ;;  %v662_v48 = vld [vmem:[%s3145_s14 + $0xff8] sm:$0xff] }
 0x1d1   : > { %2654 = vmax.xlane.f32.xlu0 %v885_v54  ;;  %v2517_v61 = vpop.xlane.xlu1 %2516  ;;  %v901_v54 = vmax.f32 %v627_v50, %v628_v51  ;;  %v659_v50 = vld [vmem:[%s3145_s14 + $0xfe0] sm:$0xff]  ;;  %v660_v51 = vld [vmem:[%s3145_s14 + $0xfe8] sm:$0xff] }
 0x1d2   : > { %2876 = vst.msk [vmem:[%s3299_s18 + $0x4c8] sm:$0xff] %vm2722_vm0, %v2517_v61  ;;  %v2515_v1 = vpop.xlane.xlu0 %2514 }
 0x1d3   : > { %2875 = vst.msk [vmem:[%s3299_s18 + $0x4c0] sm:$0xff] %vm2722_vm0, %v2515_v1 }
 0x1d4   : > { %2660 = vmax.xlane.f32.xlu1 %v888_v60  ;;  %v904_v60 = vmax.f32 %v633_v55, %v634_v56 }
 0x1d5   : > { %2658 = vmax.xlane.f32.xlu0 %v887_v62  ;;  %v2521_v5 = vpop.xlane.xlu1 %2520  ;;  %v903_v62 = vmax.f32 %v631_v58, %v632_v59 }
 0x1d6   : > { %2878 = vst.msk [vmem:[%s3299_s18 + $0x4d8] sm:$0xff] %vm2722_vm0, %v2521_v5  ;;  %v2519_v9 = vpop.xlane.xlu0 %2518 }
 0x1d7   : > { %2877 = vst.msk [vmem:[%s3299_s18 + $0x4d0] sm:$0xff] %vm2722_vm0, %v2519_v9 }
 0x1d8   : > { %2664 = vmax.xlane.f32.xlu1 %v890_v4  ;;  %v906_v4 = vmax.f32 %v637_v63, %v638_v0 }
 0x1d9   : > { %2662 = vmax.xlane.f32.xlu0 %v889_v6  ;;  %v2525_v13 = vpop.xlane.xlu1 %2524  ;;  %v905_v6 = vmax.f32 %v635_v2, %v636_v3 }
 0x1da   : > { %2880 = vst.msk [vmem:[%s3299_s18 + $0x4e8] sm:$0xff] %vm2722_vm0, %v2525_v13  ;;  %v2523_v17 = vpop.xlane.xlu0 %2522 }
 0x1db   : > { %2879 = vst.msk [vmem:[%s3299_s18 + $0x4e0] sm:$0xff] %vm2722_vm0, %v2523_v17 }
 0x1dc   : > { %2668 = vmax.xlane.f32.xlu1 %v892_v12  ;;  %v908_v12 = vmax.f32 %v641_v7, %v642_v8 }
 0x1dd   : > { %2666 = vmax.xlane.f32.xlu0 %v891_v14  ;;  %v2529_v21 = vpop.xlane.xlu1 %2528  ;;  %v907_v14 = vmax.f32 %v639_v10, %v640_v11 }
 0x1de   : > { %2882 = vst.msk [vmem:[%s3299_s18 + $0x4f8] sm:$0xff] %vm2722_vm0, %v2529_v21  ;;  %v2527_v25 = vpop.xlane.xlu0 %2526 }
 0x1df   : > { %2881 = vst.msk [vmem:[%s3299_s18 + $0x4f0] sm:$0xff] %vm2722_vm0, %v2527_v25 }
 0x1e0   : > { %2672 = vmax.xlane.f32.xlu1 %v894_v20  ;;  %v910_v20 = vmax.f32 %v645_v15, %v646_v16 }
 0x1e1   : > { %2670 = vmax.xlane.f32.xlu0 %v893_v22  ;;  %v2533_v29 = vpop.xlane.xlu1 %2532  ;;  %v909_v22 = vmax.f32 %v643_v18, %v644_v19 }
 0x1e2   : > { %2884 = vst.msk [vmem:[%s3299_s18 + $0x508] sm:$0xff] %vm2722_vm0, %v2533_v29  ;;  %v2531_v33 = vpop.xlane.xlu0 %2530 }
 0x1e3   : > { %2883 = vst.msk [vmem:[%s3299_s18 + $0x500] sm:$0xff] %vm2722_vm0, %v2531_v33 }
 0x1e4   : > { %2676 = vmax.xlane.f32.xlu1 %v896_v28  ;;  %v912_v28 = vmax.f32 %v649_v23, %v650_v24 }
 0x1e5   : > { %2674 = vmax.xlane.f32.xlu0 %v895_v30  ;;  %v2537_v37 = vpop.xlane.xlu1 %2536  ;;  %v911_v30 = vmax.f32 %v647_v26, %v648_v27 }
 0x1e6   : > { %2886 = vst.msk [vmem:[%s3299_s18 + $0x518] sm:$0xff] %vm2722_vm0, %v2537_v37  ;;  %v2535_v41 = vpop.xlane.xlu0 %2534 }
 0x1e7   : > { %2885 = vst.msk [vmem:[%s3299_s18 + $0x510] sm:$0xff] %vm2722_vm0, %v2535_v41 }
 0x1e8   : > { %2680 = vmax.xlane.f32.xlu1 %v898_v36  ;;  %v914_v36 = vmax.f32 %v653_v31, %v654_v32 }
 0x1e9   : > { %2678 = vmax.xlane.f32.xlu0 %v897_v38  ;;  %v2541_v45 = vpop.xlane.xlu1 %2540  ;;  %v913_v38 = vmax.f32 %v651_v34, %v652_v35 }
 0x1ea   : > { %2888 = vst.msk [vmem:[%s3299_s18 + $0x528] sm:$0xff] %vm2722_vm0, %v2541_v45  ;;  %v2539_v49 = vpop.xlane.xlu0 %2538 }
 0x1eb   : > { %2887 = vst.msk [vmem:[%s3299_s18 + $0x520] sm:$0xff] %vm2722_vm0, %v2539_v49 }
 0x1ec   : > { %2684 = vmax.xlane.f32.xlu1 %v900_v44  ;;  %v916_v44 = vmax.f32 %v657_v39, %v658_v40 }
 0x1ed   : > { %2682 = vmax.xlane.f32.xlu0 %v899_v46  ;;  %v2545_v53 = vpop.xlane.xlu1 %2544  ;;  %v915_v46 = vmax.f32 %v655_v42, %v656_v43 }
 0x1ee   : > { %2890 = vst.msk [vmem:[%s3299_s18 + $0x538] sm:$0xff] %vm2722_vm0, %v2545_v53  ;;  %v2543_v57 = vpop.xlane.xlu0 %2542 }
 0x1ef   : > { %2889 = vst.msk [vmem:[%s3299_s18 + $0x530] sm:$0xff] %vm2722_vm0, %v2543_v57 }
 0x1f0   : > { %2688 = vmax.xlane.f32.xlu1 %v902_v52  ;;  %v918_v52 = vmax.f32 %v661_v47, %v662_v48 }
 0x1f1   : > { %2686 = vmax.xlane.f32.xlu0 %v901_v54  ;;  %v2549_v61 = vpop.xlane.xlu1 %2548  ;;  %v917_v54 = vmax.f32 %v659_v50, %v660_v51 }
 0x1f2   : > { %2892 = vst.msk [vmem:[%s3299_s18 + $0x548] sm:$0xff] %vm2722_vm0, %v2549_v61  ;;  %v2547_v1 = vpop.xlane.xlu0 %2546 }
 0x1f3   : > { %2891 = vst.msk [vmem:[%s3299_s18 + $0x540] sm:$0xff] %vm2722_vm0, %v2547_v1 }
 0x1f4   : > { %2692 = vmax.xlane.f32.xlu1 %v904_v60 }
 0x1f5   : > { %2690 = vmax.xlane.f32.xlu0 %v903_v62  ;;  %v2553_v5 = vpop.xlane.xlu1 %2552 }
 0x1f6   : > { %2894 = vst.msk [vmem:[%s3299_s18 + $0x558] sm:$0xff] %vm2722_vm0, %v2553_v5  ;;  %v2551_v9 = vpop.xlane.xlu0 %2550 }
 0x1f7   : > { %2893 = vst.msk [vmem:[%s3299_s18 + $0x550] sm:$0xff] %vm2722_vm0, %v2551_v9 }
 0x1f8   : > { %2696 = vmax.xlane.f32.xlu1 %v906_v4 }
 0x1f9   : > { %2694 = vmax.xlane.f32.xlu0 %v905_v6  ;;  %v2557_v13 = vpop.xlane.xlu1 %2556 }
 0x1fa   : > { %2896 = vst.msk [vmem:[%s3299_s18 + $0x568] sm:$0xff] %vm2722_vm0, %v2557_v13  ;;  %v2555_v17 = vpop.xlane.xlu0 %2554 }
 0x1fb   : > { %2895 = vst.msk [vmem:[%s3299_s18 + $0x560] sm:$0xff] %vm2722_vm0, %v2555_v17 }
 0x1fc   : > { %2700 = vmax.xlane.f32.xlu1 %v908_v12 }
 0x1fd   : > { %2698 = vmax.xlane.f32.xlu0 %v907_v14  ;;  %v2561_v21 = vpop.xlane.xlu1 %2560 }
 0x1fe   : > { %2898 = vst.msk [vmem:[%s3299_s18 + $0x578] sm:$0xff] %vm2722_vm0, %v2561_v21  ;;  %v2559_v25 = vpop.xlane.xlu0 %2558 }
 0x1ff   : > { %2897 = vst.msk [vmem:[%s3299_s18 + $0x570] sm:$0xff] %vm2722_vm0, %v2559_v25 }
 0x200   : > { %2704 = vmax.xlane.f32.xlu1 %v910_v20 }
 0x201   : > { %2702 = vmax.xlane.f32.xlu0 %v909_v22  ;;  %v2565_v29 = vpop.xlane.xlu1 %2564 }
 0x202   : > { %2900 = vst.msk [vmem:[%s3299_s18 + $0x588] sm:$0xff] %vm2722_vm0, %v2565_v29  ;;  %v2563_v33 = vpop.xlane.xlu0 %2562 }
 0x203   : > { %2899 = vst.msk [vmem:[%s3299_s18 + $0x580] sm:$0xff] %vm2722_vm0, %v2563_v33 }
 0x204   : > { %2708 = vmax.xlane.f32.xlu1 %v912_v28 }
 0x205   : > { %2706 = vmax.xlane.f32.xlu0 %v911_v30  ;;  %v2569_v37 = vpop.xlane.xlu1 %2568 }
 0x206   : > { %2902 = vst.msk [vmem:[%s3299_s18 + $0x598] sm:$0xff] %vm2722_vm0, %v2569_v37  ;;  %v2567_v41 = vpop.xlane.xlu0 %2566 }
 0x207   : > { %2901 = vst.msk [vmem:[%s3299_s18 + $0x590] sm:$0xff] %vm2722_vm0, %v2567_v41 }
 0x208   : > { %2712 = vmax.xlane.f32.xlu1 %v914_v36 }
 0x209   : > { %2710 = vmax.xlane.f32.xlu0 %v913_v38  ;;  %v2573_v45 = vpop.xlane.xlu1 %2572 }
 0x20a   : > { %2904 = vst.msk [vmem:[%s3299_s18 + $0x5a8] sm:$0xff] %vm2722_vm0, %v2573_v45  ;;  %v2571_v49 = vpop.xlane.xlu0 %2570 }
 0x20b   : > { %2903 = vst.msk [vmem:[%s3299_s18 + $0x5a0] sm:$0xff] %vm2722_vm0, %v2571_v49 }
 0x20c   : > { %2716 = vmax.xlane.f32.xlu1 %v916_v44 }
 0x20d   : > { %2714 = vmax.xlane.f32.xlu0 %v915_v46  ;;  %v2577_v53 = vpop.xlane.xlu1 %2576 }
 0x20e   : > { %2906 = vst.msk [vmem:[%s3299_s18 + $0x5b8] sm:$0xff] %vm2722_vm0, %v2577_v53  ;;  %v2575_v55 = vpop.xlane.xlu0 %2574 }
 0x20f   : > { %2905 = vst.msk [vmem:[%s3299_s18 + $0x5b0] sm:$0xff] %vm2722_vm0, %v2575_v55 }
 0x210   : > { %2720 = vmax.xlane.f32.xlu1 %v918_v52 }
 0x211   : > { %2718 = vmax.xlane.f32.xlu0 %v917_v54  ;;  %v2581_v56 = vpop.xlane.xlu1 %2580 }
 0x212   : > { %2908 = vst.msk [vmem:[%s3299_s18 + $0x5c8] sm:$0xff] %vm2722_vm0, %v2581_v56  ;;  %v2579_v57 = vpop.xlane.xlu0 %2578 }
 0x213   : > { %2907 = vst.msk [vmem:[%s3299_s18 + $0x5c0] sm:$0xff] %vm2722_vm0, %v2579_v57 }
 0x215   : > { %v2585_v58 = vpop.xlane.xlu1 %2584 }
 0x216   : > { %2910 = vst.msk [vmem:[%s3299_s18 + $0x5d8] sm:$0xff] %vm2722_vm0, %v2585_v58  ;;  %v2583_v59 = vpop.xlane.xlu0 %2582 }
 0x217   : > { %2909 = vst.msk [vmem:[%s3299_s18 + $0x5d0] sm:$0xff] %vm2722_vm0, %v2583_v59 }
 0x219   : > { %v2589_v60 = vpop.xlane.xlu1 %2588 }
 0x21a   : > { %2912 = vst.msk [vmem:[%s3299_s18 + $0x5e8] sm:$0xff] %vm2722_vm0, %v2589_v60  ;;  %v2587_v61 = vpop.xlane.xlu0 %2586 }
 0x21b   : > { %2911 = vst.msk [vmem:[%s3299_s18 + $0x5e0] sm:$0xff] %vm2722_vm0, %v2587_v61 }
 0x21d   : > { %v2593_v62 = vpop.xlane.xlu1 %2592 }
 0x21e   : > { %2914 = vst.msk [vmem:[%s3299_s18 + $0x5f8] sm:$0xff] %vm2722_vm0, %v2593_v62  ;;  %v2591_v63 = vpop.xlane.xlu0 %2590 }
 0x21f   : > { %2913 = vst.msk [vmem:[%s3299_s18 + $0x5f0] sm:$0xff] %vm2722_vm0, %v2591_v63 }
 0x221   : > { %v2597_v0 = vpop.xlane.xlu1 %2596 }
 0x222   : > { %2916 = vst.msk [vmem:[%s3299_s18 + $0x608] sm:$0xff] %vm2722_vm0, %v2597_v0  ;;  %v2595_v1 = vpop.xlane.xlu0 %2594 }
 0x223   : > { %2915 = vst.msk [vmem:[%s3299_s18 + $0x600] sm:$0xff] %vm2722_vm0, %v2595_v1 }
 0x225   : > { %v2601_v2 = vpop.xlane.xlu1 %2600 }
 0x226   : > { %2918 = vst.msk [vmem:[%s3299_s18 + $0x618] sm:$0xff] %vm2722_vm0, %v2601_v2  ;;  %v2599_v3 = vpop.xlane.xlu0 %2598 }
 0x227   : > { %2917 = vst.msk [vmem:[%s3299_s18 + $0x610] sm:$0xff] %vm2722_vm0, %v2599_v3 }
 0x229   : > { %v2605_v4 = vpop.xlane.xlu1 %2604 }
 0x22a   : > { %2920 = vst.msk [vmem:[%s3299_s18 + $0x628] sm:$0xff] %vm2722_vm0, %v2605_v4  ;;  %v2603_v5 = vpop.xlane.xlu0 %2602 }
 0x22b   : > { %2919 = vst.msk [vmem:[%s3299_s18 + $0x620] sm:$0xff] %vm2722_vm0, %v2603_v5 }
 0x22d   : > { %v2609_v6 = vpop.xlane.xlu1 %2608 }
 0x22e   : > { %2922 = vst.msk [vmem:[%s3299_s18 + $0x638] sm:$0xff] %vm2722_vm0, %v2609_v6  ;;  %v2607_v7 = vpop.xlane.xlu0 %2606 }
 0x22f   : > { %2921 = vst.msk [vmem:[%s3299_s18 + $0x630] sm:$0xff] %vm2722_vm0, %v2607_v7 }
 0x231   : > { %v2613_v8 = vpop.xlane.xlu1 %2612 }
 0x232   : > { %2924 = vst.msk [vmem:[%s3299_s18 + $0x648] sm:$0xff] %vm2722_vm0, %v2613_v8  ;;  %v2611_v9 = vpop.xlane.xlu0 %2610 }
 0x233   : > { %2923 = vst.msk [vmem:[%s3299_s18 + $0x640] sm:$0xff] %vm2722_vm0, %v2611_v9 }
 0x235   : > { %v2617_v10 = vpop.xlane.xlu1 %2616 }
 0x236   : > { %2926 = vst.msk [vmem:[%s3299_s18 + $0x658] sm:$0xff] %vm2722_vm0, %v2617_v10  ;;  %v2615_v11 = vpop.xlane.xlu0 %2614 }
 0x237   : > { %2925 = vst.msk [vmem:[%s3299_s18 + $0x650] sm:$0xff] %vm2722_vm0, %v2615_v11 }
 0x239   : > { %v2621_v12 = vpop.xlane.xlu1 %2620 }
 0x23a   : > { %2928 = vst.msk [vmem:[%s3299_s18 + $0x668] sm:$0xff] %vm2722_vm0, %v2621_v12  ;;  %v2619_v13 = vpop.xlane.xlu0 %2618 }
 0x23b   : > { %2927 = vst.msk [vmem:[%s3299_s18 + $0x660] sm:$0xff] %vm2722_vm0, %v2619_v13 }
 0x23d   : > { %v2625_v14 = vpop.xlane.xlu1 %2624 }
 0x23e   : > { %2930 = vst.msk [vmem:[%s3299_s18 + $0x678] sm:$0xff] %vm2722_vm0, %v2625_v14  ;;  %v2623_v15 = vpop.xlane.xlu0 %2622 }
 0x23f   : > { %2929 = vst.msk [vmem:[%s3299_s18 + $0x670] sm:$0xff] %vm2722_vm0, %v2623_v15 }
 0x241   : > { %v2629_v16 = vpop.xlane.xlu1 %2628 }
 0x242   : > { %2932 = vst.msk [vmem:[%s3299_s18 + $0x688] sm:$0xff] %vm2722_vm0, %v2629_v16  ;;  %v2627_v17 = vpop.xlane.xlu0 %2626 }
 0x243   : > { %2931 = vst.msk [vmem:[%s3299_s18 + $0x680] sm:$0xff] %vm2722_vm0, %v2627_v17 }
 0x245   : > { %v2633_v18 = vpop.xlane.xlu1 %2632 }
 0x246   : > { %2934 = vst.msk [vmem:[%s3299_s18 + $0x698] sm:$0xff] %vm2722_vm0, %v2633_v18  ;;  %v2631_v19 = vpop.xlane.xlu0 %2630 }
 0x247   : > { %2933 = vst.msk [vmem:[%s3299_s18 + $0x690] sm:$0xff] %vm2722_vm0, %v2631_v19 }
 0x249   : > { %v2637_v20 = vpop.xlane.xlu1 %2636 }
 0x24a   : > { %2936 = vst.msk [vmem:[%s3299_s18 + $0x6a8] sm:$0xff] %vm2722_vm0, %v2637_v20  ;;  %v2635_v21 = vpop.xlane.xlu0 %2634 }
 0x24b   : > { %2935 = vst.msk [vmem:[%s3299_s18 + $0x6a0] sm:$0xff] %vm2722_vm0, %v2635_v21 }
 0x24d   : > { %v2641_v22 = vpop.xlane.xlu1 %2640 }
 0x24e   : > { %2938 = vst.msk [vmem:[%s3299_s18 + $0x6b8] sm:$0xff] %vm2722_vm0, %v2641_v22  ;;  %v2639_v23 = vpop.xlane.xlu0 %2638 }
 0x24f   : > { %2937 = vst.msk [vmem:[%s3299_s18 + $0x6b0] sm:$0xff] %vm2722_vm0, %v2639_v23 }
 0x251   : > { %v2645_v24 = vpop.xlane.xlu1 %2644 }
 0x252   : > { %2940 = vst.msk [vmem:[%s3299_s18 + $0x6c8] sm:$0xff] %vm2722_vm0, %v2645_v24  ;;  %v2643_v25 = vpop.xlane.xlu0 %2642 }
 0x253   : > { %2939 = vst.msk [vmem:[%s3299_s18 + $0x6c0] sm:$0xff] %vm2722_vm0, %v2643_v25 }
 0x255   : > { %v2649_v26 = vpop.xlane.xlu1 %2648 }
 0x256   : > { %2942 = vst.msk [vmem:[%s3299_s18 + $0x6d8] sm:$0xff] %vm2722_vm0, %v2649_v26  ;;  %v2647_v27 = vpop.xlane.xlu0 %2646 }
 0x257   : > { %2941 = vst.msk [vmem:[%s3299_s18 + $0x6d0] sm:$0xff] %vm2722_vm0, %v2647_v27 }
 0x259   : > { %v2653_v28 = vpop.xlane.xlu1 %2652 }
 0x25a   : > { %2944 = vst.msk [vmem:[%s3299_s18 + $0x6e8] sm:$0xff] %vm2722_vm0, %v2653_v28  ;;  %v2651_v29 = vpop.xlane.xlu0 %2650 }
 0x25b   : > { %2943 = vst.msk [vmem:[%s3299_s18 + $0x6e0] sm:$0xff] %vm2722_vm0, %v2651_v29 }
 0x25d   : > { %v2657_v30 = vpop.xlane.xlu1 %2656 }
 0x25e   : > { %2946 = vst.msk [vmem:[%s3299_s18 + $0x6f8] sm:$0xff] %vm2722_vm0, %v2657_v30  ;;  %v2655_v31 = vpop.xlane.xlu0 %2654 }
 0x25f   : > { %2945 = vst.msk [vmem:[%s3299_s18 + $0x6f0] sm:$0xff] %vm2722_vm0, %v2655_v31 }
 0x261   : > { %v2661_v32 = vpop.xlane.xlu1 %2660 }
 0x262   : > { %2948 = vst.msk [vmem:[%s3299_s18 + $0x708] sm:$0xff] %vm2722_vm0, %v2661_v32  ;;  %v2659_v33 = vpop.xlane.xlu0 %2658 }
 0x263   : > { %2947 = vst.msk [vmem:[%s3299_s18 + $0x700] sm:$0xff] %vm2722_vm0, %v2659_v33 }
 0x265   : > { %v2665_v34 = vpop.xlane.xlu1 %2664 }
 0x266   : > { %2950 = vst.msk [vmem:[%s3299_s18 + $0x718] sm:$0xff] %vm2722_vm0, %v2665_v34  ;;  %v2663_v35 = vpop.xlane.xlu0 %2662 }
 0x267   : > { %2949 = vst.msk [vmem:[%s3299_s18 + $0x710] sm:$0xff] %vm2722_vm0, %v2663_v35 }
 0x269   : > { %v2669_v36 = vpop.xlane.xlu1 %2668 }
 0x26a   : > { %2952 = vst.msk [vmem:[%s3299_s18 + $0x728] sm:$0xff] %vm2722_vm0, %v2669_v36  ;;  %v2667_v37 = vpop.xlane.xlu0 %2666 }
 0x26b   : > { %2951 = vst.msk [vmem:[%s3299_s18 + $0x720] sm:$0xff] %vm2722_vm0, %v2667_v37 }
 0x26d   : > { %v2673_v38 = vpop.xlane.xlu1 %2672 }
 0x26e   : > { %2954 = vst.msk [vmem:[%s3299_s18 + $0x738] sm:$0xff] %vm2722_vm0, %v2673_v38  ;;  %v2671_v39 = vpop.xlane.xlu0 %2670 }
 0x26f   : > { %2953 = vst.msk [vmem:[%s3299_s18 + $0x730] sm:$0xff] %vm2722_vm0, %v2671_v39 }
 0x271   : > { %v2677_v40 = vpop.xlane.xlu1 %2676 }
 0x272   : > { %2956 = vst.msk [vmem:[%s3299_s18 + $0x748] sm:$0xff] %vm2722_vm0, %v2677_v40  ;;  %v2675_v41 = vpop.xlane.xlu0 %2674 }
 0x273   : > { %2955 = vst.msk [vmem:[%s3299_s18 + $0x740] sm:$0xff] %vm2722_vm0, %v2675_v41 }
 0x275   : > { %v2681_v42 = vpop.xlane.xlu1 %2680 }
 0x276   : > { %2958 = vst.msk [vmem:[%s3299_s18 + $0x758] sm:$0xff] %vm2722_vm0, %v2681_v42  ;;  %v2679_v43 = vpop.xlane.xlu0 %2678 }
 0x277   : > { %2957 = vst.msk [vmem:[%s3299_s18 + $0x750] sm:$0xff] %vm2722_vm0, %v2679_v43 }
 0x279   : > { %v2685_v44 = vpop.xlane.xlu1 %2684 }
 0x27a   : > { %2960 = vst.msk [vmem:[%s3299_s18 + $0x768] sm:$0xff] %vm2722_vm0, %v2685_v44  ;;  %v2683_v45 = vpop.xlane.xlu0 %2682 }
 0x27b   : > { %2959 = vst.msk [vmem:[%s3299_s18 + $0x760] sm:$0xff] %vm2722_vm0, %v2683_v45 }
 0x27d   : > { %v2689_v46 = vpop.xlane.xlu1 %2688 }
 0x27e   : > { %2962 = vst.msk [vmem:[%s3299_s18 + $0x778] sm:$0xff] %vm2722_vm0, %v2689_v46  ;;  %v2687_v47 = vpop.xlane.xlu0 %2686 }
 0x27f   : > { %2961 = vst.msk [vmem:[%s3299_s18 + $0x770] sm:$0xff] %vm2722_vm0, %v2687_v47 }
 0x281   : > { %v2693_v48 = vpop.xlane.xlu1 %2692 }
 0x282   : > { %2964 = vst.msk [vmem:[%s3299_s18 + $0x788] sm:$0xff] %vm2722_vm0, %v2693_v48  ;;  %v2691_v49 = vpop.xlane.xlu0 %2690 }
 0x283   : > { %2963 = vst.msk [vmem:[%s3299_s18 + $0x780] sm:$0xff] %vm2722_vm0, %v2691_v49 }
 0x285   : > { %v2697_v50 = vpop.xlane.xlu1 %2696 }
 0x286   : > { %2966 = vst.msk [vmem:[%s3299_s18 + $0x798] sm:$0xff] %vm2722_vm0, %v2697_v50  ;;  %v2695_v51 = vpop.xlane.xlu0 %2694 }
 0x287   : > { %2965 = vst.msk [vmem:[%s3299_s18 + $0x790] sm:$0xff] %vm2722_vm0, %v2695_v51 }
 0x289   : > { %v2701_v52 = vpop.xlane.xlu1 %2700 }
 0x28a   : > { %2968 = vst.msk [vmem:[%s3299_s18 + $0x7a8] sm:$0xff] %vm2722_vm0, %v2701_v52  ;;  %v2699_v53 = vpop.xlane.xlu0 %2698 }
 0x28b   : > { %2967 = vst.msk [vmem:[%s3299_s18 + $0x7a0] sm:$0xff] %vm2722_vm0, %v2699_v53 }
 0x28d   : > { %v2705_v54 = vpop.xlane.xlu1 %2704 }
 0x28e   : > { %2970 = vst.msk [vmem:[%s3299_s18 + $0x7b8] sm:$0xff] %vm2722_vm0, %v2705_v54  ;;  %v2703_v55 = vpop.xlane.xlu0 %2702 }
 0x28f   : > { %2969 = vst.msk [vmem:[%s3299_s18 + $0x7b0] sm:$0xff] %vm2722_vm0, %v2703_v55 }
 0x291   : > { %v2709_v56 = vpop.xlane.xlu1 %2708 }
 0x292   : > { %2972 = vst.msk [vmem:[%s3299_s18 + $0x7c8] sm:$0xff] %vm2722_vm0, %v2709_v56  ;;  %v2707_v57 = vpop.xlane.xlu0 %2706 }
 0x293   : > { %2971 = vst.msk [vmem:[%s3299_s18 + $0x7c0] sm:$0xff] %vm2722_vm0, %v2707_v57 }
 0x295   : > { %v2713_v58 = vpop.xlane.xlu1 %2712 }
 0x296   : > { %2974 = vst.msk [vmem:[%s3299_s18 + $0x7d8] sm:$0xff] %vm2722_vm0, %v2713_v58  ;;  %v2711_v59 = vpop.xlane.xlu0 %2710 }
 0x297   : > { %2973 = vst.msk [vmem:[%s3299_s18 + $0x7d0] sm:$0xff] %vm2722_vm0, %v2711_v59 }
 0x299   : > { %v2717_v60 = vpop.xlane.xlu1 %2716 }
 0x29a   : > { %2976 = vst.msk [vmem:[%s3299_s18 + $0x7e8] sm:$0xff] %vm2722_vm0, %v2717_v60  ;;  %v2715_v61 = vpop.xlane.xlu0 %2714 }
 0x29b   : > { %2975 = vst.msk [vmem:[%s3299_s18 + $0x7e0] sm:$0xff] %vm2722_vm0, %v2715_v61 }
 0x29d   : > { %v2721_v62 = vpop.xlane.xlu1 %2720 }
 0x29e   : > { %2978 = vst.msk [vmem:[%s3299_s18 + $0x7f8] sm:$0xff] %vm2722_vm0, %v2721_v62  ;;  %v2719_v63 = vpop.xlane.xlu0 %2718 }
 0x29f   : > { %2977 = vst.msk [vmem:[%s3299_s18 + $0x7f0] sm:$0xff] %vm2722_vm0, %v2719_v63 }
 0x2a0 PF: > { %s11_s8 = sadd.s32 1, %s3109_s8   ;;  %s4188_s6 = smov %s3105_s7 }
 0x2a1   : > { %p8_p5 = scmp.ge.s32.totalorder %s11_s8, 6   ;;  %s4189_s7 = smov %s4191_s9 }
 0x2a3   :  { %10 = sbr.rel (!%p8_p5) target bundleno = 2 (0x2), region = 66 }

// kernel: squeeze.1
= control target key start
LH: loop header
LB: loop body
LE: loop exit
PB: predicated region body
PF: predicated region fallthrough
CT: control target
= control target key end

     0   :  { %s2265_s10 = smov 120   ;;  %s2266_s23 = smov 112   ;;  %vm3_vm0 = vcmask 64512   ;;  %s4642_s0 = inlined_call_operand.vmem [shape: f32[8192], index: 0, kind: input, shape index: {}]   ;;  %s4643_s1 = inlined_call_operand.vmem [shape: f32[2,512,8], index: 1, kind: output, shape index: {}]  }
   0x1   :  { %v2293_v0 = vld [vmem:[%s4642_s0 + $0x10] sm:$0xff]   ;;  %v2298_v1 = vld [vmem:[%s4642_s0] sm:$0xff]   ;;  %v2305_v2 = vld [vmem:[%s4642_s0 + $0x18] sm:$0xff]   ;;  %s2267_s24 = smov 104   ;;  %s2268_s25 = smov 96  }
   0x2   :  { %112 = vrot.lane.b32.xlu1 %v2293_v0, %s2265_s10  ;;  %86 = vrot.lane.b32.xlu0 %v2298_v1, %s2265_s10  ;;  %v2310_v3 = vld [vmem:[%s4642_s0 + $0x8] sm:$0xff]   ;;  %v2322_v5 = vld [vmem:[%s4642_s0 + $0x20] sm:$0xff]   ;;  %s2269_s26 = smov 88   ;;  %s2270_s27 = smov 80  }
   0x3   :  { %v2317_v4 = vld [vmem:[%s4642_s0 + $0x28] sm:$0xff]   ;;  %v2329_v6 = vld [vmem:[%s4642_s0 + $0x38] sm:$0xff]   ;;  %v2334_v7 = vld [vmem:[%s4642_s0 + $0x30] sm:$0xff]   ;;  %s2271_s3 = smov 72   ;;  %s2272_s22 = smov 64  }
   0x4   :  { %v2381_v8 = vld [vmem:[%s4642_s0 + $0x8] sm:$0xff]   ;;  %v2386_v9 = vld [vmem:[%s4642_s0] sm:$0xff]   ;;  %v2435_v10 = vld [vmem:[%s4642_s0 + $0x18] sm:$0xff]   ;;  %s2273_s28 = smov 56   ;;  %s2274_s6 = smov 48  }
   0x5   :  { %4 = vst.msk [vmem:[%s4643_s1] ss:$16 sm:$0x3] %vm3_vm0, %v2386_v9   ;;  %5 = vst.msk [vmem:[%s4643_s1] ss:$16 sm:$0xc] %vm3_vm0, %v2386_v9  }
   0x6   :  { %125 = vrot.lane.b32.xlu1 %v2305_v2, %s2265_s10  ;;  %99 = vrot.lane.b32.xlu0 %v2310_v3, %s2265_s10  ;;  %6 = vst.msk [vmem:[%s4643_s1] ss:$16 sm:$0x30] %vm3_vm0, %v2386_v9   ;;  %7 = vst.msk [vmem:[%s4643_s1] ss:$16 sm:$0xc0] %vm3_vm0, %v2386_v9  }
   0x7   :  { %1631 = vst.msk [vmem:[%s4643_s1 + $0x80] ss:$16 sm:$0x3] %vm3_vm0, %v2381_v8   ;;  %1632 = vst.msk [vmem:[%s4643_s1 + $0x80] ss:$16 sm:$0xc] %vm3_vm0, %v2381_v8  }
   0x8   :  { %1633 = vst.msk [vmem:[%s4643_s1 + $0x80] ss:$16 sm:$0x30] %vm3_vm0, %v2381_v8   ;;  %1634 = vst.msk [vmem:[%s4643_s1 + $0x80] ss:$16 sm:$0xc0] %vm3_vm0, %v2381_v8  }
   0x9   :  { %v2440_v11 = vld [vmem:[%s4642_s0 + $0x10] sm:$0xff]   ;;  %1641 = vst.msk [vmem:[%s4643_s1 + $0x180] ss:$16 sm:$0x3] %vm3_vm0, %v2435_v10   ;;  %v2489_v12 = vld [vmem:[%s4642_s0 + $0x28] sm:$0xff]   ;;  %v2494_v13 = vld [vmem:[%s4642_s0 + $0x20] sm:$0xff]  }
   0xa   :  { %151 = vrot.lane.b32.xlu1 %v2317_v4, %s2265_s10  ;;  %138 = vrot.lane.b32.xlu0 %v2322_v5, %s2265_s10  ;;  %1636 = vst.msk [vmem:[%s4643_s1 + $0x100] ss:$16 sm:$0x3] %vm3_vm0, %v2440_v11   ;;  %1637 = vst.msk [vmem:[%s4643_s1 + $0x100] ss:$16 sm:$0xc] %vm3_vm0, %v2440_v11  }
   0xb   :  { %1638 = vst.msk [vmem:[%s4643_s1 + $0x100] ss:$16 sm:$0x30] %vm3_vm0, %v2440_v11   ;;  %1639 = vst.msk [vmem:[%s4643_s1 + $0x100] ss:$16 sm:$0xc0] %vm3_vm0, %v2440_v11  }
   0xc   :  { %1642 = vst.msk [vmem:[%s4643_s1 + $0x180] ss:$16 sm:$0xc] %vm3_vm0, %v2435_v10   ;;  %1643 = vst.msk [vmem:[%s4643_s1 + $0x180] ss:$16 sm:$0x30] %vm3_vm0, %v2435_v10  }
   0xd   :  { %1644 = vst.msk [vmem:[%s4643_s1 + $0x180] ss:$16 sm:$0xc0] %vm3_vm0, %v2435_v10   ;;  %1646 = vst.msk [vmem:[%s4643_s1 + $0x200] ss:$16 sm:$0x3] %vm3_vm0, %v2494_v13  }
   0xe   :  { %177 = vrot.lane.b32.xlu1 %v2329_v6, %s2265_s10  ;;  %164 = vrot.lane.b32.xlu0 %v2334_v7, %s2265_s10  ;;  %1647 = vst.msk [vmem:[%s4643_s1 + $0x200] ss:$16 sm:$0xc] %vm3_vm0, %v2494_v13   ;;  %1648 = vst.msk [vmem:[%s4643_s1 + $0x200] ss:$16 sm:$0x30] %vm3_vm0, %v2494_v13  }
   0xf   :  { %1649 = vst.msk [vmem:[%s4643_s1 + $0x200] ss:$16 sm:$0xc0] %vm3_vm0, %v2494_v13   ;;  %1651 = vst.msk [vmem:[%s4643_s1 + $0x280] ss:$16 sm:$0x3] %vm3_vm0, %v2489_v12  }
  0x10   :  { %1652 = vst.msk [vmem:[%s4643_s1 + $0x280] ss:$16 sm:$0xc] %vm3_vm0, %v2489_v12   ;;  %1653 = vst.msk [vmem:[%s4643_s1 + $0x280] ss:$16 sm:$0x30] %vm3_vm0, %v2489_v12  }
  0x11   :  { %1654 = vst.msk [vmem:[%s4643_s1 + $0x280] ss:$16 sm:$0xc0] %vm3_vm0, %v2489_v12   ;;  %v2543_v14 = vld [vmem:[%s4642_s0 + $0x38] sm:$0xff]   ;;  %v2548_v15 = vld [vmem:[%s4642_s0 + $0x30] sm:$0xff]   ;;  %s2275_s10 = smov 40  }
  0x12   :  { %202 = vrot.lane.b32.xlu1 %v2310_v3, %s2266_s23  ;;  %189 = vrot.lane.b32.xlu0 %v2298_v1, %s2266_s23  ;;  %1656 = vst.msk [vmem:[%s4643_s1 + $0x300] ss:$16 sm:$0x3] %vm3_vm0, %v2548_v15   ;;  %1657 = vst.msk [vmem:[%s4643_s1 + $0x300] ss:$16 sm:$0xc] %vm3_vm0, %v2548_v15  }
  0x13   :  { %1658 = vst.msk [vmem:[%s4643_s1 + $0x300] ss:$16 sm:$0x30] %vm3_vm0, %v2548_v15   ;;  %1659 = vst.msk [vmem:[%s4643_s1 + $0x300] ss:$16 sm:$0xc0] %vm3_vm0, %v2548_v15  }
  0x14   :  { %1661 = vst.msk [vmem:[%s4643_s1 + $0x380] ss:$16 sm:$0x3] %vm3_vm0, %v2543_v14   ;;  %1662 = vst.msk [vmem:[%s4643_s1 + $0x380] ss:$16 sm:$0xc] %vm3_vm0, %v2543_v14  }
  0x15   :  { %1663 = vst.msk [vmem:[%s4643_s1 + $0x380] ss:$16 sm:$0x30] %vm3_vm0, %v2543_v14   ;;  %1664 = vst.msk [vmem:[%s4643_s1 + $0x380] ss:$16 sm:$0xc0] %vm3_vm0, %v2543_v14  }
  0x16   :  { %228 = vrot.lane.b32.xlu1 %v2305_v2, %s2266_s23  ;;  %215 = vrot.lane.b32.xlu0 %v2293_v0, %s2266_s23  ;;  %s2276_s15 = smov 32   ;;  %s2277_s20 = smov 24  }
  0x17   :  { %s2279_s4 = smov 8  }
  0x1a   :  { %254 = vrot.lane.b32.xlu1 %v2317_v4, %s2266_s23  ;;  %241 = vrot.lane.b32.xlu0 %v2322_v5, %s2266_s23 }
  0x1e   :  { %280 = vrot.lane.b32.xlu1 %v2329_v6, %s2266_s23  ;;  %267 = vrot.lane.b32.xlu0 %v2334_v7, %s2266_s23 }
  0x22   :  { %305 = vrot.lane.b32.xlu1 %v2310_v3, %s2267_s24  ;;  %292 = vrot.lane.b32.xlu0 %v2298_v1, %s2267_s24 }
  0x26   :  { %331 = vrot.lane.b32.xlu1 %v2305_v2, %s2267_s24  ;;  %318 = vrot.lane.b32.xlu0 %v2293_v0, %s2267_s24 }
  0x2a   :  { %357 = vrot.lane.b32.xlu1 %v2317_v4, %s2267_s24  ;;  %344 = vrot.lane.b32.xlu0 %v2322_v5, %s2267_s24 }
  0x2e   :  { %383 = vrot.lane.b32.xlu1 %v2329_v6, %s2267_s24  ;;  %370 = vrot.lane.b32.xlu0 %v2334_v7, %s2267_s24 }
  0x32   :  { %408 = vrot.lane.b32.xlu1 %v2310_v3, %s2268_s25  ;;  %395 = vrot.lane.b32.xlu0 %v2298_v1, %s2268_s25 }
  0x36   :  { %434 = vrot.lane.b32.xlu1 %v2305_v2, %s2268_s25  ;;  %421 = vrot.lane.b32.xlu0 %v2293_v0, %s2268_s25 }
  0x3a   :  { %460 = vrot.lane.b32.xlu1 %v2317_v4, %s2268_s25  ;;  %447 = vrot.lane.b32.xlu0 %v2322_v5, %s2268_s25 }
  0x3e   :  { %486 = vrot.lane.b32.xlu1 %v2329_v6, %s2268_s25  ;;  %473 = vrot.lane.b32.xlu0 %v2334_v7, %s2268_s25 }
  0x42   :  { %511 = vrot.lane.b32.xlu1 %v2310_v3, %s2269_s26  ;;  %498 = vrot.lane.b32.xlu0 %v2298_v1, %s2269_s26 }
  0x46   :  { %537 = vrot.lane.b32.xlu1 %v2305_v2, %s2269_s26  ;;  %524 = vrot.lane.b32.xlu0 %v2293_v0, %s2269_s26 }
  0x4a   :  { %563 = vrot.lane.b32.xlu1 %v2317_v4, %s2269_s26  ;;  %550 = vrot.lane.b32.xlu0 %v2322_v5, %s2269_s26 }
  0x4e   :  { %589 = vrot.lane.b32.xlu1 %v2329_v6, %s2269_s26  ;;  %576 = vrot.lane.b32.xlu0 %v2334_v7, %s2269_s26  ;;  %s2278_s26 = smov 16  }
  0x52   :  { %614 = vrot.lane.b32.xlu1 %v2310_v3, %s2270_s27  ;;  %601 = vrot.lane.b32.xlu0 %v2298_v1, %s2270_s27 }
  0x56   :  { %640 = vrot.lane.b32.xlu1 %v2305_v2, %s2270_s27  ;;  %627 = vrot.lane.b32.xlu0 %v2293_v0, %s2270_s27 }
  0x5a   :  { %666 = vrot.lane.b32.xlu1 %v2317_v4, %s2270_s27  ;;  %653 = vrot.lane.b32.xlu0 %v2322_v5, %s2270_s27 }
  0x5e   :  { %692 = vrot.lane.b32.xlu1 %v2329_v6, %s2270_s27  ;;  %679 = vrot.lane.b32.xlu0 %v2334_v7, %s2270_s27 }
  0x62   :  { %717 = vrot.lane.b32.xlu1 %v2310_v3, %s2271_s3  ;;  %704 = vrot.lane.b32.xlu0 %v2298_v1, %s2271_s3 }
  0x66   :  { %743 = vrot.lane.b32.xlu1 %v2305_v2, %s2271_s3  ;;  %730 = vrot.lane.b32.xlu0 %v2293_v0, %s2271_s3 }
  0x6a   :  { %769 = vrot.lane.b32.xlu1 %v2317_v4, %s2271_s3  ;;  %756 = vrot.lane.b32.xlu0 %v2322_v5, %s2271_s3 }
  0x6e   :  { %795 = vrot.lane.b32.xlu1 %v2329_v6, %s2271_s3  ;;  %782 = vrot.lane.b32.xlu0 %v2334_v7, %s2271_s3 }
  0x72   :  { %820 = vrot.lane.b32.xlu1 %v2310_v3, %s2272_s22  ;;  %807 = vrot.lane.b32.xlu0 %v2298_v1, %s2272_s22 }
  0x74   :  { %v113_v16 = vpop.permute.xlu1 %112   ;;  %v87_v17 = vpop.permute.xlu0 %86  }
  0x75   :  { %1675 = vst.msk [vmem:[%s4643_s1 + $0x101] ss:$16 sm:$0x3] %vm3_vm0, %v113_v16   ;;  %1676 = vst.msk [vmem:[%s4643_s1 + $0x101] ss:$16 sm:$0xc] %vm3_vm0, %v113_v16  }
  0x76   :  { %1677 = vst.msk [vmem:[%s4643_s1 + $0x101] ss:$16 sm:$0x30] %vm3_vm0, %v113_v16   ;;  %1678 = vst.msk [vmem:[%s4643_s1 + $0x101] ss:$16 sm:$0xc0] %vm3_vm0, %v113_v16   ;;  %846 = vrot.lane.b32.xlu1 %v2305_v2, %s2272_s22  ;;  %833 = vrot.lane.b32.xlu0 %v2293_v0, %s2272_s22 }
  0x77   :  { %1665 = vst.msk [vmem:[%s4643_s1 + $0x1] ss:$16 sm:$0x3] %vm3_vm0, %v87_v17   ;;  %1666 = vst.msk [vmem:[%s4643_s1 + $0x1] ss:$16 sm:$0xc] %vm3_vm0, %v87_v17  }
  0x78   :  { %1667 = vst.msk [vmem:[%s4643_s1 + $0x1] ss:$16 sm:$0x30] %vm3_vm0, %v87_v17   ;;  %1668 = vst.msk [vmem:[%s4643_s1 + $0x1] ss:$16 sm:$0xc0] %vm3_vm0, %v87_v17   ;;  %v126_v18 = vpop.permute.xlu1 %125   ;;  %v100_v19 = vpop.permute.xlu0 %99  }
  0x79   :  { %1680 = vst.msk [vmem:[%s4643_s1 + $0x181] ss:$16 sm:$0x3] %vm3_vm0, %v126_v18   ;;  %1681 = vst.msk [vmem:[%s4643_s1 + $0x181] ss:$16 sm:$0xc] %vm3_vm0, %v126_v18  }
  0x7a   :  { %1682 = vst.msk [vmem:[%s4643_s1 + $0x181] ss:$16 sm:$0x30] %vm3_vm0, %v126_v18   ;;  %1683 = vst.msk [vmem:[%s4643_s1 + $0x181] ss:$16 sm:$0xc0] %vm3_vm0, %v126_v18   ;;  %872 = vrot.lane.b32.xlu1 %v2317_v4, %s2272_s22  ;;  %859 = vrot.lane.b32.xlu0 %v2322_v5, %s2272_s22 }
  0x7b   :  { %1670 = vst.msk [vmem:[%s4643_s1 + $0x81] ss:$16 sm:$0x3] %vm3_vm0, %v100_v19   ;;  %1671 = vst.msk [vmem:[%s4643_s1 + $0x81] ss:$16 sm:$0xc] %vm3_vm0, %v100_v19  }
  0x7c   :  { %1672 = vst.msk [vmem:[%s4643_s1 + $0x81] ss:$16 sm:$0x30] %vm3_vm0, %v100_v19   ;;  %1673 = vst.msk [vmem:[%s4643_s1 + $0x81] ss:$16 sm:$0xc0] %vm3_vm0, %v100_v19   ;;  %v152_v20 = vpop.permute.xlu1 %151   ;;  %v139_v21 = vpop.permute.xlu0 %138  }
  0x7d   :  { %1690 = vst.msk [vmem:[%s4643_s1 + $0x281] ss:$16 sm:$0x3] %vm3_vm0, %v152_v20   ;;  %1691 = vst.msk [vmem:[%s4643_s1 + $0x281] ss:$16 sm:$0xc] %vm3_vm0, %v152_v20  }
  0x7e   :  { %1692 = vst.msk [vmem:[%s4643_s1 + $0x281] ss:$16 sm:$0x30] %vm3_vm0, %v152_v20   ;;  %1693 = vst.msk [vmem:[%s4643_s1 + $0x281] ss:$16 sm:$0xc0] %vm3_vm0, %v152_v20   ;;  %898 = vrot.lane.b32.xlu1 %v2329_v6, %s2272_s22  ;;  %885 = vrot.lane.b32.xlu0 %v2334_v7, %s2272_s22 }
  0x7f   :  { %1685 = vst.msk [vmem:[%s4643_s1 + $0x201] ss:$16 sm:$0x3] %vm3_vm0, %v139_v21   ;;  %1686 = vst.msk [vmem:[%s4643_s1 + $0x201] ss:$16 sm:$0xc] %vm3_vm0, %v139_v21  }
  0x80   :  { %1687 = vst.msk [vmem:[%s4643_s1 + $0x201] ss:$16 sm:$0x30] %vm3_vm0, %v139_v21   ;;  %1688 = vst.msk [vmem:[%s4643_s1 + $0x201] ss:$16 sm:$0xc0] %vm3_vm0, %v139_v21   ;;  %v178_v22 = vpop.permute.xlu1 %177   ;;  %v165_v23 = vpop.permute.xlu0 %164  }
  0x81   :  { %1700 = vst.msk [vmem:[%s4643_s1 + $0x381] ss:$16 sm:$0x3] %vm3_vm0, %v178_v22   ;;  %1701 = vst.msk [vmem:[%s4643_s1 + $0x381] ss:$16 sm:$0xc] %vm3_vm0, %v178_v22  }
  0x82   :  { %1702 = vst.msk [vmem:[%s4643_s1 + $0x381] ss:$16 sm:$0x30] %vm3_vm0, %v178_v22   ;;  %1703 = vst.msk [vmem:[%s4643_s1 + $0x381] ss:$16 sm:$0xc0] %vm3_vm0, %v178_v22   ;;  %923 = vrot.lane.b32.xlu1 %v2310_v3, %s2273_s28  ;;  %910 = vrot.lane.b32.xlu0 %v2298_v1, %s2273_s28 }
  0x83   :  { %1695 = vst.msk [vmem:[%s4643_s1 + $0x301] ss:$16 sm:$0x3] %vm3_vm0, %v165_v23   ;;  %1696 = vst.msk [vmem:[%s4643_s1 + $0x301] ss:$16 sm:$0xc] %vm3_vm0, %v165_v23  }
  0x84   :  { %1697 = vst.msk [vmem:[%s4643_s1 + $0x301] ss:$16 sm:$0x30] %vm3_vm0, %v165_v23   ;;  %1698 = vst.msk [vmem:[%s4643_s1 + $0x301] ss:$16 sm:$0xc0] %vm3_vm0, %v165_v23   ;;  %v203_v24 = vpop.permute.xlu1 %202   ;;  %v190_v25 = vpop.permute.xlu0 %189  }
  0x85   :  { %1709 = vst.msk [vmem:[%s4643_s1 + $0x82] ss:$16 sm:$0x3] %vm3_vm0, %v203_v24   ;;  %1710 = vst.msk [vmem:[%s4643_s1 + $0x82] ss:$16 sm:$0xc] %vm3_vm0, %v203_v24  }
  0x86   :  { %1711 = vst.msk [vmem:[%s4643_s1 + $0x82] ss:$16 sm:$0x30] %vm3_vm0, %v203_v24   ;;  %1712 = vst.msk [vmem:[%s4643_s1 + $0x82] ss:$16 sm:$0xc0] %vm3_vm0, %v203_v24   ;;  %949 = vrot.lane.b32.xlu1 %v2305_v2, %s2273_s28  ;;  %936 = vrot.lane.b32.xlu0 %v2293_v0, %s2273_s28 }
  0x87   :  { %1704 = vst.msk [vmem:[%s4643_s1 + $0x2] ss:$16 sm:$0x3] %vm3_vm0, %v190_v25   ;;  %1705 = vst.msk [vmem:[%s4643_s1 + $0x2] ss:$16 sm:$0xc] %vm3_vm0, %v190_v25  }
  0x88   :  { %1706 = vst.msk [vmem:[%s4643_s1 + $0x2] ss:$16 sm:$0x30] %vm3_vm0, %v190_v25   ;;  %1707 = vst.msk [vmem:[%s4643_s1 + $0x2] ss:$16 sm:$0xc0] %vm3_vm0, %v190_v25   ;;  %v229_v26 = vpop.permute.xlu1 %228   ;;  %v216_v27 = vpop.permute.xlu0 %215  }
  0x89   :  { %1719 = vst.msk [vmem:[%s4643_s1 + $0x182] ss:$16 sm:$0x3] %vm3_vm0, %v229_v26   ;;  %1720 = vst.msk [vmem:[%s4643_s1 + $0x182] ss:$16 sm:$0xc] %vm3_vm0, %v229_v26  }
  0x8a   :  { %1721 = vst.msk [vmem:[%s4643_s1 + $0x182] ss:$16 sm:$0x30] %vm3_vm0, %v229_v26   ;;  %1722 = vst.msk [vmem:[%s4643_s1 + $0x182] ss:$16 sm:$0xc0] %vm3_vm0, %v229_v26   ;;  %975 = vrot.lane.b32.xlu1 %v2317_v4, %s2273_s28  ;;  %962 = vrot.lane.b32.xlu0 %v2322_v5, %s2273_s28 }
  0x8b   :  { %1714 = vst.msk [vmem:[%s4643_s1 + $0x102] ss:$16 sm:$0x3] %vm3_vm0, %v216_v27   ;;  %1715 = vst.msk [vmem:[%s4643_s1 + $0x102] ss:$16 sm:$0xc] %vm3_vm0, %v216_v27  }
  0x8c   :  { %1716 = vst.msk [vmem:[%s4643_s1 + $0x102] ss:$16 sm:$0x30] %vm3_vm0, %v216_v27   ;;  %1717 = vst.msk [vmem:[%s4643_s1 + $0x102] ss:$16 sm:$0xc0] %vm3_vm0, %v216_v27   ;;  %v255_v28 = vpop.permute.xlu1 %254   ;;  %v242_v29 = vpop.permute.xlu0 %241  }
  0x8d   :  { %1729 = vst.msk [vmem:[%s4643_s1 + $0x282] ss:$16 sm:$0x3] %vm3_vm0, %v255_v28   ;;  %1730 = vst.msk [vmem:[%s4643_s1 + $0x282] ss:$16 sm:$0xc] %vm3_vm0, %v255_v28  }
  0x8e   :  { %1731 = vst.msk [vmem:[%s4643_s1 + $0x282] ss:$16 sm:$0x30] %vm3_vm0, %v255_v28   ;;  %1732 = vst.msk [vmem:[%s4643_s1 + $0x282] ss:$16 sm:$0xc0] %vm3_vm0, %v255_v28   ;;  %1001 = vrot.lane.b32.xlu1 %v2329_v6, %s2273_s28  ;;  %988 = vrot.lane.b32.xlu0 %v2334_v7, %s2273_s28 }
  0x8f   :  { %1724 = vst.msk [vmem:[%s4643_s1 + $0x202] ss:$16 sm:$0x3] %vm3_vm0, %v242_v29   ;;  %1725 = vst.msk [vmem:[%s4643_s1 + $0x202] ss:$16 sm:$0xc] %vm3_vm0, %v242_v29  }
  0x90   :  { %1726 = vst.msk [vmem:[%s4643_s1 + $0x202] ss:$16 sm:$0x30] %vm3_vm0, %v242_v29   ;;  %1727 = vst.msk [vmem:[%s4643_s1 + $0x202] ss:$16 sm:$0xc0] %vm3_vm0, %v242_v29   ;;  %v281_v30 = vpop.permute.xlu1 %280   ;;  %v268_v31 = vpop.permute.xlu0 %267  }
  0x91   :  { %1739 = vst.msk [vmem:[%s4643_s1 + $0x382] ss:$16 sm:$0x3] %vm3_vm0, %v281_v30   ;;  %1740 = vst.msk [vmem:[%s4643_s1 + $0x382] ss:$16 sm:$0xc] %vm3_vm0, %v281_v30  }
  0x92   :  { %1741 = vst.msk [vmem:[%s4643_s1 + $0x382] ss:$16 sm:$0x30] %vm3_vm0, %v281_v30   ;;  %1742 = vst.msk [vmem:[%s4643_s1 + $0x382] ss:$16 sm:$0xc0] %vm3_vm0, %v281_v30   ;;  %1026 = vrot.lane.b32.xlu1 %v2310_v3, %s2274_s6  ;;  %1013 = vrot.lane.b32.xlu0 %v2298_v1, %s2274_s6 }
  0x93   :  { %1734 = vst.msk [vmem:[%s4643_s1 + $0x302] ss:$16 sm:$0x3] %vm3_vm0, %v268_v31   ;;  %1735 = vst.msk [vmem:[%s4643_s1 + $0x302] ss:$16 sm:$0xc] %vm3_vm0, %v268_v31  }
  0x94   :  { %1736 = vst.msk [vmem:[%s4643_s1 + $0x302] ss:$16 sm:$0x30] %vm3_vm0, %v268_v31   ;;  %1737 = vst.msk [vmem:[%s4643_s1 + $0x302] ss:$16 sm:$0xc0] %vm3_vm0, %v268_v31   ;;  %v306_v32 = vpop.permute.xlu1 %305   ;;  %v293_v33 = vpop.permute.xlu0 %292  }
  0x95   :  { %1748 = vst.msk [vmem:[%s4643_s1 + $0x83] ss:$16 sm:$0x3] %vm3_vm0, %v306_v32   ;;  %1749 = vst.msk [vmem:[%s4643_s1 + $0x83] ss:$16 sm:$0xc] %vm3_vm0, %v306_v32  }
  0x96   :  { %1750 = vst.msk [vmem:[%s4643_s1 + $0x83] ss:$16 sm:$0x30] %vm3_vm0, %v306_v32   ;;  %1751 = vst.msk [vmem:[%s4643_s1 + $0x83] ss:$16 sm:$0xc0] %vm3_vm0, %v306_v32   ;;  %1052 = vrot.lane.b32.xlu1 %v2305_v2, %s2274_s6  ;;  %1039 = vrot.lane.b32.xlu0 %v2293_v0, %s2274_s6 }
  0x97   :  { %1743 = vst.msk [vmem:[%s4643_s1 + $0x3] ss:$16 sm:$0x3] %vm3_vm0, %v293_v33   ;;  %1744 = vst.msk [vmem:[%s4643_s1 + $0x3] ss:$16 sm:$0xc] %vm3_vm0, %v293_v33  }
  0x98   :  { %1745 = vst.msk [vmem:[%s4643_s1 + $0x3] ss:$16 sm:$0x30] %vm3_vm0, %v293_v33   ;;  %1746 = vst.msk [vmem:[%s4643_s1 + $0x3] ss:$16 sm:$0xc0] %vm3_vm0, %v293_v33   ;;  %v332_v34 = vpop.permute.xlu1 %331   ;;  %v319_v35 = vpop.permute.xlu0 %318  }
  0x99   :  { %1758 = vst.msk [vmem:[%s4643_s1 + $0x183] ss:$16 sm:$0x3] %vm3_vm0, %v332_v34   ;;  %1759 = vst.msk [vmem:[%s4643_s1 + $0x183] ss:$16 sm:$0xc] %vm3_vm0, %v332_v34  }
  0x9a   :  { %1760 = vst.msk [vmem:[%s4643_s1 + $0x183] ss:$16 sm:$0x30] %vm3_vm0, %v332_v34   ;;  %1761 = vst.msk [vmem:[%s4643_s1 + $0x183] ss:$16 sm:$0xc0] %vm3_vm0, %v332_v34   ;;  %1078 = vrot.lane.b32.xlu1 %v2317_v4, %s2274_s6  ;;  %1065 = vrot.lane.b32.xlu0 %v2322_v5, %s2274_s6 }
  0x9b   :  { %1753 = vst.msk [vmem:[%s4643_s1 + $0x103] ss:$16 sm:$0x3] %vm3_vm0, %v319_v35   ;;  %1754 = vst.msk [vmem:[%s4643_s1 + $0x103] ss:$16 sm:$0xc] %vm3_vm0, %v319_v35  }
  0x9c   :  { %1755 = vst.msk [vmem:[%s4643_s1 + $0x103] ss:$16 sm:$0x30] %vm3_vm0, %v319_v35   ;;  %1756 = vst.msk [vmem:[%s4643_s1 + $0x103] ss:$16 sm:$0xc0] %vm3_vm0, %v319_v35   ;;  %v358_v36 = vpop.permute.xlu1 %357   ;;  %v345_v37 = vpop.permute.xlu0 %344  }
  0x9d   :  { %1768 = vst.msk [vmem:[%s4643_s1 + $0x283] ss:$16 sm:$0x3] %vm3_vm0, %v358_v36   ;;  %1769 = vst.msk [vmem:[%s4643_s1 + $0x283] ss:$16 sm:$0xc] %vm3_vm0, %v358_v36  }
  0x9e   :  { %1770 = vst.msk [vmem:[%s4643_s1 + $0x283] ss:$16 sm:$0x30] %vm3_vm0, %v358_v36   ;;  %1771 = vst.msk [vmem:[%s4643_s1 + $0x283] ss:$16 sm:$0xc0] %vm3_vm0, %v358_v36   ;;  %1104 = vrot.lane.b32.xlu1 %v2329_v6, %s2274_s6  ;;  %1091 = vrot.lane.b32.xlu0 %v2334_v7, %s2274_s6 }
  0x9f   :  { %1763 = vst.msk [vmem:[%s4643_s1 + $0x203] ss:$16 sm:$0x3] %vm3_vm0, %v345_v37   ;;  %1764 = vst.msk [vmem:[%s4643_s1 + $0x203] ss:$16 sm:$0xc] %vm3_vm0, %v345_v37  }
  0xa0   :  { %1765 = vst.msk [vmem:[%s4643_s1 + $0x203] ss:$16 sm:$0x30] %vm3_vm0, %v345_v37   ;;  %1766 = vst.msk [vmem:[%s4643_s1 + $0x203] ss:$16 sm:$0xc0] %vm3_vm0, %v345_v37   ;;  %v384_v38 = vpop.permute.xlu1 %383   ;;  %v371_v39 = vpop.permute.xlu0 %370  }
  0xa1   :  { %1778 = vst.msk [vmem:[%s4643_s1 + $0x383] ss:$16 sm:$0x3] %vm3_vm0, %v384_v38   ;;  %1779 = vst.msk [vmem:[%s4643_s1 + $0x383] ss:$16 sm:$0xc] %vm3_vm0, %v384_v38  }
  0xa2   :  { %1780 = vst.msk [vmem:[%s4643_s1 + $0x383] ss:$16 sm:$0x30] %vm3_vm0, %v384_v38   ;;  %1781 = vst.msk [vmem:[%s4643_s1 + $0x383] ss:$16 sm:$0xc0] %vm3_vm0, %v384_v38   ;;  %1129 = vrot.lane.b32.xlu1 %v2310_v3, %s2275_s10  ;;  %1116 = vrot.lane.b32.xlu0 %v2298_v1, %s2275_s10 }
  0xa3   :  { %1773 = vst.msk [vmem:[%s4643_s1 + $0x303] ss:$16 sm:$0x3] %vm3_vm0, %v371_v39   ;;  %1774 = vst.msk [vmem:[%s4643_s1 + $0x303] ss:$16 sm:$0xc] %vm3_vm0, %v371_v39  }
  0xa4   :  { %1775 = vst.msk [vmem:[%s4643_s1 + $0x303] ss:$16 sm:$0x30] %vm3_vm0, %v371_v39   ;;  %1776 = vst.msk [vmem:[%s4643_s1 + $0x303] ss:$16 sm:$0xc0] %vm3_vm0, %v371_v39   ;;  %v409_v40 = vpop.permute.xlu1 %408   ;;  %v396_v41 = vpop.permute.xlu0 %395  }
  0xa5   :  { %1787 = vst.msk [vmem:[%s4643_s1 + $0x84] ss:$16 sm:$0x3] %vm3_vm0, %v409_v40   ;;  %1788 = vst.msk [vmem:[%s4643_s1 + $0x84] ss:$16 sm:$0xc] %vm3_vm0, %v409_v40  }
  0xa6   :  { %1789 = vst.msk [vmem:[%s4643_s1 + $0x84] ss:$16 sm:$0x30] %vm3_vm0, %v409_v40   ;;  %1790 = vst.msk [vmem:[%s4643_s1 + $0x84] ss:$16 sm:$0xc0] %vm3_vm0, %v409_v40   ;;  %1155 = vrot.lane.b32.xlu1 %v2305_v2, %s2275_s10  ;;  %1142 = vrot.lane.b32.xlu0 %v2293_v0, %s2275_s10 }
  0xa7   :  { %1782 = vst.msk [vmem:[%s4643_s1 + $0x4] ss:$16 sm:$0x3] %vm3_vm0, %v396_v41   ;;  %1783 = vst.msk [vmem:[%s4643_s1 + $0x4] ss:$16 sm:$0xc] %vm3_vm0, %v396_v41  }
  0xa8   :  { %1784 = vst.msk [vmem:[%s4643_s1 + $0x4] ss:$16 sm:$0x30] %vm3_vm0, %v396_v41   ;;  %1785 = vst.msk [vmem:[%s4643_s1 + $0x4] ss:$16 sm:$0xc0] %vm3_vm0, %v396_v41   ;;  %v435_v42 = vpop.permute.xlu1 %434   ;;  %v422_v43 = vpop.permute.xlu0 %421  }
  0xa9   :  { %1797 = vst.msk [vmem:[%s4643_s1 + $0x184] ss:$16 sm:$0x3] %vm3_vm0, %v435_v42   ;;  %1798 = vst.msk [vmem:[%s4643_s1 + $0x184] ss:$16 sm:$0xc] %vm3_vm0, %v435_v42  }
  0xaa   :  { %1799 = vst.msk [vmem:[%s4643_s1 + $0x184] ss:$16 sm:$0x30] %vm3_vm0, %v435_v42   ;;  %1800 = vst.msk [vmem:[%s4643_s1 + $0x184] ss:$16 sm:$0xc0] %vm3_vm0, %v435_v42   ;;  %1181 = vrot.lane.b32.xlu1 %v2317_v4, %s2275_s10  ;;  %1168 = vrot.lane.b32.xlu0 %v2322_v5, %s2275_s10 }
  0xab   :  { %1792 = vst.msk [vmem:[%s4643_s1 + $0x104] ss:$16 sm:$0x3] %vm3_vm0, %v422_v43   ;;  %1793 = vst.msk [vmem:[%s4643_s1 + $0x104] ss:$16 sm:$0xc] %vm3_vm0, %v422_v43  }
  0xac   :  { %1794 = vst.msk [vmem:[%s4643_s1 + $0x104] ss:$16 sm:$0x30] %vm3_vm0, %v422_v43   ;;  %1795 = vst.msk [vmem:[%s4643_s1 + $0x104] ss:$16 sm:$0xc0] %vm3_vm0, %v422_v43   ;;  %v461_v44 = vpop.permute.xlu1 %460   ;;  %v448_v45 = vpop.permute.xlu0 %447  }
  0xad   :  { %1807 = vst.msk [vmem:[%s4643_s1 + $0x284] ss:$16 sm:$0x3] %vm3_vm0, %v461_v44   ;;  %1808 = vst.msk [vmem:[%s4643_s1 + $0x284] ss:$16 sm:$0xc] %vm3_vm0, %v461_v44  }
  0xae   :  { %1809 = vst.msk [vmem:[%s4643_s1 + $0x284] ss:$16 sm:$0x30] %vm3_vm0, %v461_v44   ;;  %1810 = vst.msk [vmem:[%s4643_s1 + $0x284] ss:$16 sm:$0xc0] %vm3_vm0, %v461_v44   ;;  %1207 = vrot.lane.b32.xlu1 %v2329_v6, %s2275_s10  ;;  %1194 = vrot.lane.b32.xlu0 %v2334_v7, %s2275_s10 }
  0xaf   :  { %1802 = vst.msk [vmem:[%s4643_s1 + $0x204] ss:$16 sm:$0x3] %vm3_vm0, %v448_v45   ;;  %1803 = vst.msk [vmem:[%s4643_s1 + $0x204] ss:$16 sm:$0xc] %vm3_vm0, %v448_v45  }
  0xb0   :  { %1804 = vst.msk [vmem:[%s4643_s1 + $0x204] ss:$16 sm:$0x30] %vm3_vm0, %v448_v45   ;;  %1805 = vst.msk [vmem:[%s4643_s1 + $0x204] ss:$16 sm:$0xc0] %vm3_vm0, %v448_v45   ;;  %v487_v46 = vpop.permute.xlu1 %486   ;;  %v474_v47 = vpop.permute.xlu0 %473  }
  0xb1   :  { %1817 = vst.msk [vmem:[%s4643_s1 + $0x384] ss:$16 sm:$0x3] %vm3_vm0, %v487_v46   ;;  %1818 = vst.msk [vmem:[%s4643_s1 + $0x384] ss:$16 sm:$0xc] %vm3_vm0, %v487_v46  }
  0xb2   :  { %1819 = vst.msk [vmem:[%s4643_s1 + $0x384] ss:$16 sm:$0x30] %vm3_vm0, %v487_v46   ;;  %1820 = vst.msk [vmem:[%s4643_s1 + $0x384] ss:$16 sm:$0xc0] %vm3_vm0, %v487_v46   ;;  %1232 = vrot.lane.b32.xlu1 %v2310_v3, %s2276_s15  ;;  %1219 = vrot.lane.b32.xlu0 %v2298_v1, %s2276_s15 }
  0xb3   :  { %1812 = vst.msk [vmem:[%s4643_s1 + $0x304] ss:$16 sm:$0x3] %vm3_vm0, %v474_v47   ;;  %1813 = vst.msk [vmem:[%s4643_s1 + $0x304] ss:$16 sm:$0xc] %vm3_vm0, %v474_v47  }
  0xb4   :  { %1814 = vst.msk [vmem:[%s4643_s1 + $0x304] ss:$16 sm:$0x30] %vm3_vm0, %v474_v47   ;;  %1815 = vst.msk [vmem:[%s4643_s1 + $0x304] ss:$16 sm:$0xc0] %vm3_vm0, %v474_v47   ;;  %v512_v48 = vpop.permute.xlu1 %511   ;;  %v499_v49 = vpop.permute.xlu0 %498  }
  0xb5   :  { %1826 = vst.msk [vmem:[%s4643_s1 + $0x85] ss:$16 sm:$0x3] %vm3_vm0, %v512_v48   ;;  %1827 = vst.msk [vmem:[%s4643_s1 + $0x85] ss:$16 sm:$0xc] %vm3_vm0, %v512_v48  }
  0xb6   :  { %1828 = vst.msk [vmem:[%s4643_s1 + $0x85] ss:$16 sm:$0x30] %vm3_vm0, %v512_v48   ;;  %1829 = vst.msk [vmem:[%s4643_s1 + $0x85] ss:$16 sm:$0xc0] %vm3_vm0, %v512_v48   ;;  %1258 = vrot.lane.b32.xlu1 %v2305_v2, %s2276_s15  ;;  %1245 = vrot.lane.b32.xlu0 %v2293_v0, %s2276_s15 }
  0xb7   :  { %1821 = vst.msk [vmem:[%s4643_s1 + $0x5] ss:$16 sm:$0x3] %vm3_vm0, %v499_v49   ;;  %1822 = vst.msk [vmem:[%s4643_s1 + $0x5] ss:$16 sm:$0xc] %vm3_vm0, %v499_v49  }
  0xb8   :  { %1823 = vst.msk [vmem:[%s4643_s1 + $0x5] ss:$16 sm:$0x30] %vm3_vm0, %v499_v49   ;;  %1824 = vst.msk [vmem:[%s4643_s1 + $0x5] ss:$16 sm:$0xc0] %vm3_vm0, %v499_v49   ;;  %v538_v50 = vpop.permute.xlu1 %537   ;;  %v525_v51 = vpop.permute.xlu0 %524  }
  0xb9   :  { %1836 = vst.msk [vmem:[%s4643_s1 + $0x185] ss:$16 sm:$0x3] %vm3_vm0, %v538_v50   ;;  %1837 = vst.msk [vmem:[%s4643_s1 + $0x185] ss:$16 sm:$0xc] %vm3_vm0, %v538_v50  }
  0xba   :  { %1838 = vst.msk [vmem:[%s4643_s1 + $0x185] ss:$16 sm:$0x30] %vm3_vm0, %v538_v50   ;;  %1839 = vst.msk [vmem:[%s4643_s1 + $0x185] ss:$16 sm:$0xc0] %vm3_vm0, %v538_v50   ;;  %1284 = vrot.lane.b32.xlu1 %v2317_v4, %s2276_s15  ;;  %1271 = vrot.lane.b32.xlu0 %v2322_v5, %s2276_s15 }
  0xbb   :  { %1831 = vst.msk [vmem:[%s4643_s1 + $0x105] ss:$16 sm:$0x3] %vm3_vm0, %v525_v51   ;;  %1832 = vst.msk [vmem:[%s4643_s1 + $0x105] ss:$16 sm:$0xc] %vm3_vm0, %v525_v51  }
  0xbc   :  { %1833 = vst.msk [vmem:[%s4643_s1 + $0x105] ss:$16 sm:$0x30] %vm3_vm0, %v525_v51   ;;  %1834 = vst.msk [vmem:[%s4643_s1 + $0x105] ss:$16 sm:$0xc0] %vm3_vm0, %v525_v51   ;;  %v564_v52 = vpop.permute.xlu1 %563   ;;  %v551_v53 = vpop.permute.xlu0 %550  }
  0xbd   :  { %1846 = vst.msk [vmem:[%s4643_s1 + $0x285] ss:$16 sm:$0x3] %vm3_vm0, %v564_v52   ;;  %1847 = vst.msk [vmem:[%s4643_s1 + $0x285] ss:$16 sm:$0xc] %vm3_vm0, %v564_v52  }
  0xbe   :  { %1848 = vst.msk [vmem:[%s4643_s1 + $0x285] ss:$16 sm:$0x30] %vm3_vm0, %v564_v52   ;;  %1849 = vst.msk [vmem:[%s4643_s1 + $0x285] ss:$16 sm:$0xc0] %vm3_vm0, %v564_v52   ;;  %1310 = vrot.lane.b32.xlu1 %v2329_v6, %s2276_s15  ;;  %1297 = vrot.lane.b32.xlu0 %v2334_v7, %s2276_s15 }
  0xbf   :  { %1841 = vst.msk [vmem:[%s4643_s1 + $0x205] ss:$16 sm:$0x3] %vm3_vm0, %v551_v53   ;;  %1842 = vst.msk [vmem:[%s4643_s1 + $0x205] ss:$16 sm:$0xc] %vm3_vm0, %v551_v53  }
  0xc0   :  { %1843 = vst.msk [vmem:[%s4643_s1 + $0x205] ss:$16 sm:$0x30] %vm3_vm0, %v551_v53   ;;  %1844 = vst.msk [vmem:[%s4643_s1 + $0x205] ss:$16 sm:$0xc0] %vm3_vm0, %v551_v53   ;;  %v590_v54 = vpop.permute.xlu1 %589   ;;  %v577_v55 = vpop.permute.xlu0 %576  }
  0xc1   :  { %1856 = vst.msk [vmem:[%s4643_s1 + $0x385] ss:$16 sm:$0x3] %vm3_vm0, %v590_v54   ;;  %1857 = vst.msk [vmem:[%s4643_s1 + $0x385] ss:$16 sm:$0xc] %vm3_vm0, %v590_v54  }
  0xc2   :  { %1858 = vst.msk [vmem:[%s4643_s1 + $0x385] ss:$16 sm:$0x30] %vm3_vm0, %v590_v54   ;;  %1859 = vst.msk [vmem:[%s4643_s1 + $0x385] ss:$16 sm:$0xc0] %vm3_vm0, %v590_v54   ;;  %1335 = vrot.lane.b32.xlu1 %v2310_v3, %s2277_s20  ;;  %1322 = vrot.lane.b32.xlu0 %v2298_v1, %s2277_s20 }
  0xc3   :  { %1851 = vst.msk [vmem:[%s4643_s1 + $0x305] ss:$16 sm:$0x3] %vm3_vm0, %v577_v55   ;;  %1852 = vst.msk [vmem:[%s4643_s1 + $0x305] ss:$16 sm:$0xc] %vm3_vm0, %v577_v55  }
  0xc4   :  { %1853 = vst.msk [vmem:[%s4643_s1 + $0x305] ss:$16 sm:$0x30] %vm3_vm0, %v577_v55   ;;  %1854 = vst.msk [vmem:[%s4643_s1 + $0x305] ss:$16 sm:$0xc0] %vm3_vm0, %v577_v55   ;;  %v615_v56 = vpop.permute.xlu1 %614   ;;  %v602_v57 = vpop.permute.xlu0 %601  }
  0xc5   :  { %1865 = vst.msk [vmem:[%s4643_s1 + $0x86] ss:$16 sm:$0x3] %vm3_vm0, %v615_v56   ;;  %1866 = vst.msk [vmem:[%s4643_s1 + $0x86] ss:$16 sm:$0xc] %vm3_vm0, %v615_v56  }
  0xc6   :  { %1867 = vst.msk [vmem:[%s4643_s1 + $0x86] ss:$16 sm:$0x30] %vm3_vm0, %v615_v56   ;;  %1868 = vst.msk [vmem:[%s4643_s1 + $0x86] ss:$16 sm:$0xc0] %vm3_vm0, %v615_v56   ;;  %1361 = vrot.lane.b32.xlu1 %v2305_v2, %s2277_s20  ;;  %1348 = vrot.lane.b32.xlu0 %v2293_v0, %s2277_s20 }
  0xc7   :  { %1860 = vst.msk [vmem:[%s4643_s1 + $0x6] ss:$16 sm:$0x3] %vm3_vm0, %v602_v57   ;;  %1861 = vst.msk [vmem:[%s4643_s1 + $0x6] ss:$16 sm:$0xc] %vm3_vm0, %v602_v57  }
  0xc8   :  { %1862 = vst.msk [vmem:[%s4643_s1 + $0x6] ss:$16 sm:$0x30] %vm3_vm0, %v602_v57   ;;  %1863 = vst.msk [vmem:[%s4643_s1 + $0x6] ss:$16 sm:$0xc0] %vm3_vm0, %v602_v57   ;;  %v641_v58 = vpop.permute.xlu1 %640   ;;  %v628_v59 = vpop.permute.xlu0 %627  }
  0xc9   :  { %1875 = vst.msk [vmem:[%s4643_s1 + $0x186] ss:$16 sm:$0x3] %vm3_vm0, %v641_v58   ;;  %1876 = vst.msk [vmem:[%s4643_s1 + $0x186] ss:$16 sm:$0xc] %vm3_vm0, %v641_v58  }
  0xca   :  { %1877 = vst.msk [vmem:[%s4643_s1 + $0x186] ss:$16 sm:$0x30] %vm3_vm0, %v641_v58   ;;  %1878 = vst.msk [vmem:[%s4643_s1 + $0x186] ss:$16 sm:$0xc0] %vm3_vm0, %v641_v58   ;;  %1387 = vrot.lane.b32.xlu1 %v2317_v4, %s2277_s20  ;;  %1374 = vrot.lane.b32.xlu0 %v2322_v5, %s2277_s20 }
  0xcb   :  { %1870 = vst.msk [vmem:[%s4643_s1 + $0x106] ss:$16 sm:$0x3] %vm3_vm0, %v628_v59   ;;  %1871 = vst.msk [vmem:[%s4643_s1 + $0x106] ss:$16 sm:$0xc] %vm3_vm0, %v628_v59  }
  0xcc   :  { %1872 = vst.msk [vmem:[%s4643_s1 + $0x106] ss:$16 sm:$0x30] %vm3_vm0, %v628_v59   ;;  %1873 = vst.msk [vmem:[%s4643_s1 + $0x106] ss:$16 sm:$0xc0] %vm3_vm0, %v628_v59   ;;  %v667_v60 = vpop.permute.xlu1 %666   ;;  %v654_v61 = vpop.permute.xlu0 %653  }
  0xcd   :  { %1885 = vst.msk [vmem:[%s4643_s1 + $0x286] ss:$16 sm:$0x3] %vm3_vm0, %v667_v60   ;;  %1886 = vst.msk [vmem:[%s4643_s1 + $0x286] ss:$16 sm:$0xc] %vm3_vm0, %v667_v60  }
  0xce   :  { %1887 = vst.msk [vmem:[%s4643_s1 + $0x286] ss:$16 sm:$0x30] %vm3_vm0, %v667_v60   ;;  %1888 = vst.msk [vmem:[%s4643_s1 + $0x286] ss:$16 sm:$0xc0] %vm3_vm0, %v667_v60   ;;  %1413 = vrot.lane.b32.xlu1 %v2329_v6, %s2277_s20  ;;  %1400 = vrot.lane.b32.xlu0 %v2334_v7, %s2277_s20 }
  0xcf   :  { %1880 = vst.msk [vmem:[%s4643_s1 + $0x206] ss:$16 sm:$0x3] %vm3_vm0, %v654_v61   ;;  %1881 = vst.msk [vmem:[%s4643_s1 + $0x206] ss:$16 sm:$0xc] %vm3_vm0, %v654_v61  }
  0xd0   :  { %1882 = vst.msk [vmem:[%s4643_s1 + $0x206] ss:$16 sm:$0x30] %vm3_vm0, %v654_v61   ;;  %1883 = vst.msk [vmem:[%s4643_s1 + $0x206] ss:$16 sm:$0xc0] %vm3_vm0, %v654_v61   ;;  %v693_v62 = vpop.permute.xlu1 %692   ;;  %v680_v63 = vpop.permute.xlu0 %679  }
  0xd1   :  { %1895 = vst.msk [vmem:[%s4643_s1 + $0x386] ss:$16 sm:$0x3] %vm3_vm0, %v693_v62   ;;  %1896 = vst.msk [vmem:[%s4643_s1 + $0x386] ss:$16 sm:$0xc] %vm3_vm0, %v693_v62  }
  0xd2   :  { %1897 = vst.msk [vmem:[%s4643_s1 + $0x386] ss:$16 sm:$0x30] %vm3_vm0, %v693_v62   ;;  %1898 = vst.msk [vmem:[%s4643_s1 + $0x386] ss:$16 sm:$0xc0] %vm3_vm0, %v693_v62   ;;  %1438 = vrot.lane.b32.xlu1 %v2310_v3, %s2278_s26  ;;  %1425 = vrot.lane.b32.xlu0 %v2298_v1, %s2278_s26 }
  0xd3   :  { %1890 = vst.msk [vmem:[%s4643_s1 + $0x306] ss:$16 sm:$0x3] %vm3_vm0, %v680_v63   ;;  %1891 = vst.msk [vmem:[%s4643_s1 + $0x306] ss:$16 sm:$0xc] %vm3_vm0, %v680_v63  }
  0xd4   :  { %1892 = vst.msk [vmem:[%s4643_s1 + $0x306] ss:$16 sm:$0x30] %vm3_vm0, %v680_v63   ;;  %1893 = vst.msk [vmem:[%s4643_s1 + $0x306] ss:$16 sm:$0xc0] %vm3_vm0, %v680_v63   ;;  %v718_v1 = vpop.permute.xlu1 %717   ;;  %v705_v3 = vpop.permute.xlu0 %704  }
  0xd5   :  { %1904 = vst.msk [vmem:[%s4643_s1 + $0x87] ss:$16 sm:$0x3] %vm3_vm0, %v718_v1   ;;  %1905 = vst.msk [vmem:[%s4643_s1 + $0x87] ss:$16 sm:$0xc] %vm3_vm0, %v718_v1  }
  0xd6   :  { %1906 = vst.msk [vmem:[%s4643_s1 + $0x87] ss:$16 sm:$0x30] %vm3_vm0, %v718_v1   ;;  %1907 = vst.msk [vmem:[%s4643_s1 + $0x87] ss:$16 sm:$0xc0] %vm3_vm0, %v718_v1   ;;  %1464 = vrot.lane.b32.xlu1 %v2305_v2, %s2278_s26  ;;  %1451 = vrot.lane.b32.xlu0 %v2293_v0, %s2278_s26 }
  0xd7   :  { %1899 = vst.msk [vmem:[%s4643_s1 + $0x7] ss:$16 sm:$0x3] %vm3_vm0, %v705_v3   ;;  %1900 = vst.msk [vmem:[%s4643_s1 + $0x7] ss:$16 sm:$0xc] %vm3_vm0, %v705_v3  }
  0xd8   :  { %1901 = vst.msk [vmem:[%s4643_s1 + $0x7] ss:$16 sm:$0x30] %vm3_vm0, %v705_v3   ;;  %1902 = vst.msk [vmem:[%s4643_s1 + $0x7] ss:$16 sm:$0xc0] %vm3_vm0, %v705_v3   ;;  %v744_v0 = vpop.permute.xlu1 %743   ;;  %v731_v2 = vpop.permute.xlu0 %730  }
  0xd9   :  { %1914 = vst.msk [vmem:[%s4643_s1 + $0x187] ss:$16 sm:$0x3] %vm3_vm0, %v744_v0   ;;  %1915 = vst.msk [vmem:[%s4643_s1 + $0x187] ss:$16 sm:$0xc] %vm3_vm0, %v744_v0  }
  0xda   :  { %1916 = vst.msk [vmem:[%s4643_s1 + $0x187] ss:$16 sm:$0x30] %vm3_vm0, %v744_v0   ;;  %1917 = vst.msk [vmem:[%s4643_s1 + $0x187] ss:$16 sm:$0xc0] %vm3_vm0, %v744_v0   ;;  %1490 = vrot.lane.b32.xlu1 %v2317_v4, %s2278_s26  ;;  %1477 = vrot.lane.b32.xlu0 %v2322_v5, %s2278_s26 }
  0xdb   :  { %1909 = vst.msk [vmem:[%s4643_s1 + $0x107] ss:$16 sm:$0x3] %vm3_vm0, %v731_v2   ;;  %1910 = vst.msk [vmem:[%s4643_s1 + $0x107] ss:$16 sm:$0xc] %vm3_vm0, %v731_v2  }
  0xdc   :  { %1911 = vst.msk [vmem:[%s4643_s1 + $0x107] ss:$16 sm:$0x30] %vm3_vm0, %v731_v2   ;;  %1912 = vst.msk [vmem:[%s4643_s1 + $0x107] ss:$16 sm:$0xc0] %vm3_vm0, %v731_v2   ;;  %v770_v4 = vpop.permute.xlu1 %769   ;;  %v757_v5 = vpop.permute.xlu0 %756  }
  0xdd   :  { %1924 = vst.msk [vmem:[%s4643_s1 + $0x287] ss:$16 sm:$0x3] %vm3_vm0, %v770_v4   ;;  %1925 = vst.msk [vmem:[%s4643_s1 + $0x287] ss:$16 sm:$0xc] %vm3_vm0, %v770_v4  }
  0xde   :  { %1926 = vst.msk [vmem:[%s4643_s1 + $0x287] ss:$16 sm:$0x30] %vm3_vm0, %v770_v4   ;;  %1927 = vst.msk [vmem:[%s4643_s1 + $0x287] ss:$16 sm:$0xc0] %vm3_vm0, %v770_v4   ;;  %1516 = vrot.lane.b32.xlu1 %v2329_v6, %s2278_s26  ;;  %1503 = vrot.lane.b32.xlu0 %v2334_v7, %s2278_s26 }
  0xdf   :  { %1919 = vst.msk [vmem:[%s4643_s1 + $0x207] ss:$16 sm:$0x3] %vm3_vm0, %v757_v5   ;;  %1920 = vst.msk [vmem:[%s4643_s1 + $0x207] ss:$16 sm:$0xc] %vm3_vm0, %v757_v5  }
  0xe0   :  { %1921 = vst.msk [vmem:[%s4643_s1 + $0x207] ss:$16 sm:$0x30] %vm3_vm0, %v757_v5   ;;  %1922 = vst.msk [vmem:[%s4643_s1 + $0x207] ss:$16 sm:$0xc0] %vm3_vm0, %v757_v5   ;;  %v796_v6 = vpop.permute.xlu1 %795   ;;  %v783_v7 = vpop.permute.xlu0 %782  }
  0xe1   :  { %1934 = vst.msk [vmem:[%s4643_s1 + $0x387] ss:$16 sm:$0x3] %vm3_vm0, %v796_v6   ;;  %1935 = vst.msk [vmem:[%s4643_s1 + $0x387] ss:$16 sm:$0xc] %vm3_vm0, %v796_v6  }
  0xe2   :  { %1936 = vst.msk [vmem:[%s4643_s1 + $0x387] ss:$16 sm:$0x30] %vm3_vm0, %v796_v6   ;;  %1937 = vst.msk [vmem:[%s4643_s1 + $0x387] ss:$16 sm:$0xc0] %vm3_vm0, %v796_v6   ;;  %1541 = vrot.lane.b32.xlu1 %v2381_v8, %s2279_s4  ;;  %1528 = vrot.lane.b32.xlu0 %v2386_v9, %s2279_s4 }
  0xe3   :  { %1929 = vst.msk [vmem:[%s4643_s1 + $0x307] ss:$16 sm:$0x3] %vm3_vm0, %v783_v7   ;;  %1930 = vst.msk [vmem:[%s4643_s1 + $0x307] ss:$16 sm:$0xc] %vm3_vm0, %v783_v7  }
  0xe4   :  { %1931 = vst.msk [vmem:[%s4643_s1 + $0x307] ss:$16 sm:$0x30] %vm3_vm0, %v783_v7   ;;  %1932 = vst.msk [vmem:[%s4643_s1 + $0x307] ss:$16 sm:$0xc0] %vm3_vm0, %v783_v7   ;;  %v821_v8 = vpop.permute.xlu1 %820   ;;  %v808_v9 = vpop.permute.xlu0 %807  }
  0xe5   :  { %1943 = vst.msk [vmem:[%s4643_s1 + $0x88] ss:$16 sm:$0x3] %vm3_vm0, %v821_v8   ;;  %1944 = vst.msk [vmem:[%s4643_s1 + $0x88] ss:$16 sm:$0xc] %vm3_vm0, %v821_v8  }
  0xe6   :  { %1945 = vst.msk [vmem:[%s4643_s1 + $0x88] ss:$16 sm:$0x30] %vm3_vm0, %v821_v8   ;;  %1946 = vst.msk [vmem:[%s4643_s1 + $0x88] ss:$16 sm:$0xc0] %vm3_vm0, %v821_v8   ;;  %1567 = vrot.lane.b32.xlu1 %v2435_v10, %s2279_s4  ;;  %1554 = vrot.lane.b32.xlu0 %v2440_v11, %s2279_s4 }
  0xe7   :  { %1938 = vst.msk [vmem:[%s4643_s1 + $0x8] ss:$16 sm:$0x3] %vm3_vm0, %v808_v9   ;;  %1939 = vst.msk [vmem:[%s4643_s1 + $0x8] ss:$16 sm:$0xc] %vm3_vm0, %v808_v9  }
  0xe8   :  { %1940 = vst.msk [vmem:[%s4643_s1 + $0x8] ss:$16 sm:$0x30] %vm3_vm0, %v808_v9   ;;  %1941 = vst.msk [vmem:[%s4643_s1 + $0x8] ss:$16 sm:$0xc0] %vm3_vm0, %v808_v9   ;;  %v847_v10 = vpop.permute.xlu1 %846   ;;  %v834_v11 = vpop.permute.xlu0 %833  }
  0xe9   :  { %1953 = vst.msk [vmem:[%s4643_s1 + $0x188] ss:$16 sm:$0x3] %vm3_vm0, %v847_v10   ;;  %1954 = vst.msk [vmem:[%s4643_s1 + $0x188] ss:$16 sm:$0xc] %vm3_vm0, %v847_v10  }
  0xea   :  { %1955 = vst.msk [vmem:[%s4643_s1 + $0x188] ss:$16 sm:$0x30] %vm3_vm0, %v847_v10   ;;  %1956 = vst.msk [vmem:[%s4643_s1 + $0x188] ss:$16 sm:$0xc0] %vm3_vm0, %v847_v10   ;;  %1593 = vrot.lane.b32.xlu1 %v2489_v12, %s2279_s4  ;;  %1580 = vrot.lane.b32.xlu0 %v2494_v13, %s2279_s4 }
  0xeb   :  { %1948 = vst.msk [vmem:[%s4643_s1 + $0x108] ss:$16 sm:$0x3] %vm3_vm0, %v834_v11   ;;  %1949 = vst.msk [vmem:[%s4643_s1 + $0x108] ss:$16 sm:$0xc] %vm3_vm0, %v834_v11  }
  0xec   :  { %1950 = vst.msk [vmem:[%s4643_s1 + $0x108] ss:$16 sm:$0x30] %vm3_vm0, %v834_v11   ;;  %1951 = vst.msk [vmem:[%s4643_s1 + $0x108] ss:$16 sm:$0xc0] %vm3_vm0, %v834_v11   ;;  %v873_v12 = vpop.permute.xlu1 %872   ;;  %v860_v13 = vpop.permute.xlu0 %859  }
  0xed   :  { %1963 = vst.msk [vmem:[%s4643_s1 + $0x288] ss:$16 sm:$0x3] %vm3_vm0, %v873_v12   ;;  %1964 = vst.msk [vmem:[%s4643_s1 + $0x288] ss:$16 sm:$0xc] %vm3_vm0, %v873_v12  }
  0xee   :  { %1965 = vst.msk [vmem:[%s4643_s1 + $0x288] ss:$16 sm:$0x30] %vm3_vm0, %v873_v12   ;;  %1966 = vst.msk [vmem:[%s4643_s1 + $0x288] ss:$16 sm:$0xc0] %vm3_vm0, %v873_v12   ;;  %1619 = vrot.lane.b32.xlu1 %v2543_v14, %s2279_s4  ;;  %1606 = vrot.lane.b32.xlu0 %v2548_v15, %s2279_s4 }
  0xef   :  { %1958 = vst.msk [vmem:[%s4643_s1 + $0x208] ss:$16 sm:$0x3] %vm3_vm0, %v860_v13   ;;  %1959 = vst.msk [vmem:[%s4643_s1 + $0x208] ss:$16 sm:$0xc] %vm3_vm0, %v860_v13  }
  0xf0   :  { %1960 = vst.msk [vmem:[%s4643_s1 + $0x208] ss:$16 sm:$0x30] %vm3_vm0, %v860_v13   ;;  %1961 = vst.msk [vmem:[%s4643_s1 + $0x208] ss:$16 sm:$0xc0] %vm3_vm0, %v860_v13   ;;  %v899_v14 = vpop.permute.xlu1 %898   ;;  %v886_v15 = vpop.permute.xlu0 %885  }
  0xf1   :  { %1973 = vst.msk [vmem:[%s4643_s1 + $0x388] ss:$16 sm:$0x3] %vm3_vm0, %v899_v14   ;;  %1974 = vst.msk [vmem:[%s4643_s1 + $0x388] ss:$16 sm:$0xc] %vm3_vm0, %v899_v14  }
  0xf2   :  { %1975 = vst.msk [vmem:[%s4643_s1 + $0x388] ss:$16 sm:$0x30] %vm3_vm0, %v899_v14   ;;  %1976 = vst.msk [vmem:[%s4643_s1 + $0x388] ss:$16 sm:$0xc0] %vm3_vm0, %v899_v14  }
  0xf3   :  { %1968 = vst.msk [vmem:[%s4643_s1 + $0x308] ss:$16 sm:$0x3] %vm3_vm0, %v886_v15   ;;  %1969 = vst.msk [vmem:[%s4643_s1 + $0x308] ss:$16 sm:$0xc] %vm3_vm0, %v886_v15  }
  0xf4   :  { %1970 = vst.msk [vmem:[%s4643_s1 + $0x308] ss:$16 sm:$0x30] %vm3_vm0, %v886_v15   ;;  %1971 = vst.msk [vmem:[%s4643_s1 + $0x308] ss:$16 sm:$0xc0] %vm3_vm0, %v886_v15   ;;  %v924_v16 = vpop.permute.xlu1 %923   ;;  %v911_v17 = vpop.permute.xlu0 %910  }
  0xf5   :  { %1982 = vst.msk [vmem:[%s4643_s1 + $0x89] ss:$16 sm:$0x3] %vm3_vm0, %v924_v16   ;;  %1983 = vst.msk [vmem:[%s4643_s1 + $0x89] ss:$16 sm:$0xc] %vm3_vm0, %v924_v16  }
  0xf6   :  { %1984 = vst.msk [vmem:[%s4643_s1 + $0x89] ss:$16 sm:$0x30] %vm3_vm0, %v924_v16   ;;  %1985 = vst.msk [vmem:[%s4643_s1 + $0x89] ss:$16 sm:$0xc0] %vm3_vm0, %v924_v16  }
  0xf7   :  { %1977 = vst.msk [vmem:[%s4643_s1 + $0x9] ss:$16 sm:$0x3] %vm3_vm0, %v911_v17   ;;  %1978 = vst.msk [vmem:[%s4643_s1 + $0x9] ss:$16 sm:$0xc] %vm3_vm0, %v911_v17  }
  0xf8   :  { %1979 = vst.msk [vmem:[%s4643_s1 + $0x9] ss:$16 sm:$0x30] %vm3_vm0, %v911_v17   ;;  %1980 = vst.msk [vmem:[%s4643_s1 + $0x9] ss:$16 sm:$0xc0] %vm3_vm0, %v911_v17   ;;  %v950_v18 = vpop.permute.xlu1 %949   ;;  %v937_v19 = vpop.permute.xlu0 %936  }
  0xf9   :  { %1992 = vst.msk [vmem:[%s4643_s1 + $0x189] ss:$16 sm:$0x3] %vm3_vm0, %v950_v18   ;;  %1993 = vst.msk [vmem:[%s4643_s1 + $0x189] ss:$16 sm:$0xc] %vm3_vm0, %v950_v18  }
  0xfa   :  { %1994 = vst.msk [vmem:[%s4643_s1 + $0x189] ss:$16 sm:$0x30] %vm3_vm0, %v950_v18   ;;  %1995 = vst.msk [vmem:[%s4643_s1 + $0x189] ss:$16 sm:$0xc0] %vm3_vm0, %v950_v18  }
  0xfb   :  { %1987 = vst.msk [vmem:[%s4643_s1 + $0x109] ss:$16 sm:$0x3] %vm3_vm0, %v937_v19   ;;  %1988 = vst.msk [vmem:[%s4643_s1 + $0x109] ss:$16 sm:$0xc] %vm3_vm0, %v937_v19  }
  0xfc   :  { %1989 = vst.msk [vmem:[%s4643_s1 + $0x109] ss:$16 sm:$0x30] %vm3_vm0, %v937_v19   ;;  %1990 = vst.msk [vmem:[%s4643_s1 + $0x109] ss:$16 sm:$0xc0] %vm3_vm0, %v937_v19   ;;  %v976_v20 = vpop.permute.xlu1 %975   ;;  %v963_v21 = vpop.permute.xlu0 %962  }
  0xfd   :  { %2002 = vst.msk [vmem:[%s4643_s1 + $0x289] ss:$16 sm:$0x3] %vm3_vm0, %v976_v20   ;;  %2003 = vst.msk [vmem:[%s4643_s1 + $0x289] ss:$16 sm:$0xc] %vm3_vm0, %v976_v20  }
  0xfe   :  { %2004 = vst.msk [vmem:[%s4643_s1 + $0x289] ss:$16 sm:$0x30] %vm3_vm0, %v976_v20   ;;  %2005 = vst.msk [vmem:[%s4643_s1 + $0x289] ss:$16 sm:$0xc0] %vm3_vm0, %v976_v20  }
  0xff   :  { %1997 = vst.msk [vmem:[%s4643_s1 + $0x209] ss:$16 sm:$0x3] %vm3_vm0, %v963_v21   ;;  %1998 = vst.msk [vmem:[%s4643_s1 + $0x209] ss:$16 sm:$0xc] %vm3_vm0, %v963_v21  }
 0x100   :  { %1999 = vst.msk [vmem:[%s4643_s1 + $0x209] ss:$16 sm:$0x30] %vm3_vm0, %v963_v21   ;;  %2000 = vst.msk [vmem:[%s4643_s1 + $0x209] ss:$16 sm:$0xc0] %vm3_vm0, %v963_v21   ;;  %v1002_v22 = vpop.permute.xlu1 %1001   ;;  %v989_v23 = vpop.permute.xlu0 %988  }
 0x101   :  { %2012 = vst.msk [vmem:[%s4643_s1 + $0x389] ss:$16 sm:$0x3] %vm3_vm0, %v1002_v22   ;;  %2013 = vst.msk [vmem:[%s4643_s1 + $0x389] ss:$16 sm:$0xc] %vm3_vm0, %v1002_v22  }
 0x102   :  { %2014 = vst.msk [vmem:[%s4643_s1 + $0x389] ss:$16 sm:$0x30] %vm3_vm0, %v1002_v22   ;;  %2015 = vst.msk [vmem:[%s4643_s1 + $0x389] ss:$16 sm:$0xc0] %vm3_vm0, %v1002_v22  }
 0x103   :  { %2007 = vst.msk [vmem:[%s4643_s1 + $0x309] ss:$16 sm:$0x3] %vm3_vm0, %v989_v23   ;;  %2008 = vst.msk [vmem:[%s4643_s1 + $0x309] ss:$16 sm:$0xc] %vm3_vm0, %v989_v23  }
 0x104   :  { %2009 = vst.msk [vmem:[%s4643_s1 + $0x309] ss:$16 sm:$0x30] %vm3_vm0, %v989_v23   ;;  %2010 = vst.msk [vmem:[%s4643_s1 + $0x309] ss:$16 sm:$0xc0] %vm3_vm0, %v989_v23   ;;  %v1027_v24 = vpop.permute.xlu1 %1026   ;;  %v1014_v25 = vpop.permute.xlu0 %1013  }
 0x105   :  { %2021 = vst.msk [vmem:[%s4643_s1 + $0x8a] ss:$16 sm:$0x3] %vm3_vm0, %v1027_v24   ;;  %2022 = vst.msk [vmem:[%s4643_s1 + $0x8a] ss:$16 sm:$0xc] %vm3_vm0, %v1027_v24  }
 0x106   :  { %2023 = vst.msk [vmem:[%s4643_s1 + $0x8a] ss:$16 sm:$0x30] %vm3_vm0, %v1027_v24   ;;  %2024 = vst.msk [vmem:[%s4643_s1 + $0x8a] ss:$16 sm:$0xc0] %vm3_vm0, %v1027_v24  }
 0x107   :  { %2016 = vst.msk [vmem:[%s4643_s1 + $0xa] ss:$16 sm:$0x3] %vm3_vm0, %v1014_v25   ;;  %2017 = vst.msk [vmem:[%s4643_s1 + $0xa] ss:$16 sm:$0xc] %vm3_vm0, %v1014_v25  }
 0x108   :  { %2018 = vst.msk [vmem:[%s4643_s1 + $0xa] ss:$16 sm:$0x30] %vm3_vm0, %v1014_v25   ;;  %2019 = vst.msk [vmem:[%s4643_s1 + $0xa] ss:$16 sm:$0xc0] %vm3_vm0, %v1014_v25   ;;  %v1053_v26 = vpop.permute.xlu1 %1052   ;;  %v1040_v27 = vpop.permute.xlu0 %1039  }
 0x109   :  { %2031 = vst.msk [vmem:[%s4643_s1 + $0x18a] ss:$16 sm:$0x3] %vm3_vm0, %v1053_v26   ;;  %2032 = vst.msk [vmem:[%s4643_s1 + $0x18a] ss:$16 sm:$0xc] %vm3_vm0, %v1053_v26  }
 0x10a   :  { %2033 = vst.msk [vmem:[%s4643_s1 + $0x18a] ss:$16 sm:$0x30] %vm3_vm0, %v1053_v26   ;;  %2034 = vst.msk [vmem:[%s4643_s1 + $0x18a] ss:$16 sm:$0xc0] %vm3_vm0, %v1053_v26  }
 0x10b   :  { %2026 = vst.msk [vmem:[%s4643_s1 + $0x10a] ss:$16 sm:$0x3] %vm3_vm0, %v1040_v27   ;;  %2027 = vst.msk [vmem:[%s4643_s1 + $0x10a] ss:$16 sm:$0xc] %vm3_vm0, %v1040_v27  }
 0x10c   :  { %2028 = vst.msk [vmem:[%s4643_s1 + $0x10a] ss:$16 sm:$0x30] %vm3_vm0, %v1040_v27   ;;  %2029 = vst.msk [vmem:[%s4643_s1 + $0x10a] ss:$16 sm:$0xc0] %vm3_vm0, %v1040_v27   ;;  %v1079_v28 = vpop.permute.xlu1 %1078   ;;  %v1066_v29 = vpop.permute.xlu0 %1065  }
 0x10d   :  { %2041 = vst.msk [vmem:[%s4643_s1 + $0x28a] ss:$16 sm:$0x3] %vm3_vm0, %v1079_v28   ;;  %2042 = vst.msk [vmem:[%s4643_s1 + $0x28a] ss:$16 sm:$0xc] %vm3_vm0, %v1079_v28  }
 0x10e   :  { %2043 = vst.msk [vmem:[%s4643_s1 + $0x28a] ss:$16 sm:$0x30] %vm3_vm0, %v1079_v28   ;;  %2044 = vst.msk [vmem:[%s4643_s1 + $0x28a] ss:$16 sm:$0xc0] %vm3_vm0, %v1079_v28  }
 0x10f   :  { %2036 = vst.msk [vmem:[%s4643_s1 + $0x20a] ss:$16 sm:$0x3] %vm3_vm0, %v1066_v29   ;;  %2037 = vst.msk [vmem:[%s4643_s1 + $0x20a] ss:$16 sm:$0xc] %vm3_vm0, %v1066_v29  }
 0x110   :  { %2038 = vst.msk [vmem:[%s4643_s1 + $0x20a] ss:$16 sm:$0x30] %vm3_vm0, %v1066_v29   ;;  %2039 = vst.msk [vmem:[%s4643_s1 + $0x20a] ss:$16 sm:$0xc0] %vm3_vm0, %v1066_v29   ;;  %v1105_v30 = vpop.permute.xlu1 %1104   ;;  %v1092_v31 = vpop.permute.xlu0 %1091  }
 0x111   :  { %2051 = vst.msk [vmem:[%s4643_s1 + $0x38a] ss:$16 sm:$0x3] %vm3_vm0, %v1105_v30   ;;  %2052 = vst.msk [vmem:[%s4643_s1 + $0x38a] ss:$16 sm:$0xc] %vm3_vm0, %v1105_v30  }
 0x112   :  { %2053 = vst.msk [vmem:[%s4643_s1 + $0x38a] ss:$16 sm:$0x30] %vm3_vm0, %v1105_v30   ;;  %2054 = vst.msk [vmem:[%s4643_s1 + $0x38a] ss:$16 sm:$0xc0] %vm3_vm0, %v1105_v30  }
 0x113   :  { %2046 = vst.msk [vmem:[%s4643_s1 + $0x30a] ss:$16 sm:$0x3] %vm3_vm0, %v1092_v31   ;;  %2047 = vst.msk [vmem:[%s4643_s1 + $0x30a] ss:$16 sm:$0xc] %vm3_vm0, %v1092_v31  }
 0x114   :  { %2048 = vst.msk [vmem:[%s4643_s1 + $0x30a] ss:$16 sm:$0x30] %vm3_vm0, %v1092_v31   ;;  %2049 = vst.msk [vmem:[%s4643_s1 + $0x30a] ss:$16 sm:$0xc0] %vm3_vm0, %v1092_v31   ;;  %v1130_v32 = vpop.permute.xlu1 %1129   ;;  %v1117_v33 = vpop.permute.xlu0 %1116  }
 0x115   :  { %2060 = vst.msk [vmem:[%s4643_s1 + $0x8b] ss:$16 sm:$0x3] %vm3_vm0, %v1130_v32   ;;  %2061 = vst.msk [vmem:[%s4643_s1 + $0x8b] ss:$16 sm:$0xc] %vm3_vm0, %v1130_v32  }
 0x116   :  { %2062 = vst.msk [vmem:[%s4643_s1 + $0x8b] ss:$16 sm:$0x30] %vm3_vm0, %v1130_v32   ;;  %2063 = vst.msk [vmem:[%s4643_s1 + $0x8b] ss:$16 sm:$0xc0] %vm3_vm0, %v1130_v32  }
 0x117   :  { %2055 = vst.msk [vmem:[%s4643_s1 + $0xb] ss:$16 sm:$0x3] %vm3_vm0, %v1117_v33   ;;  %2056 = vst.msk [vmem:[%s4643_s1 + $0xb] ss:$16 sm:$0xc] %vm3_vm0, %v1117_v33  }
 0x118   :  { %2057 = vst.msk [vmem:[%s4643_s1 + $0xb] ss:$16 sm:$0x30] %vm3_vm0, %v1117_v33   ;;  %2058 = vst.msk [vmem:[%s4643_s1 + $0xb] ss:$16 sm:$0xc0] %vm3_vm0, %v1117_v33   ;;  %v1156_v34 = vpop.permute.xlu1 %1155   ;;  %v1143_v35 = vpop.permute.xlu0 %1142  }
 0x119   :  { %2070 = vst.msk [vmem:[%s4643_s1 + $0x18b] ss:$16 sm:$0x3] %vm3_vm0, %v1156_v34   ;;  %2071 = vst.msk [vmem:[%s4643_s1 + $0x18b] ss:$16 sm:$0xc] %vm3_vm0, %v1156_v34  }
 0x11a   :  { %2072 = vst.msk [vmem:[%s4643_s1 + $0x18b] ss:$16 sm:$0x30] %vm3_vm0, %v1156_v34   ;;  %2073 = vst.msk [vmem:[%s4643_s1 + $0x18b] ss:$16 sm:$0xc0] %vm3_vm0, %v1156_v34  }
 0x11b   :  { %2065 = vst.msk [vmem:[%s4643_s1 + $0x10b] ss:$16 sm:$0x3] %vm3_vm0, %v1143_v35   ;;  %2066 = vst.msk [vmem:[%s4643_s1 + $0x10b] ss:$16 sm:$0xc] %vm3_vm0, %v1143_v35  }
 0x11c   :  { %2067 = vst.msk [vmem:[%s4643_s1 + $0x10b] ss:$16 sm:$0x30] %vm3_vm0, %v1143_v35   ;;  %2068 = vst.msk [vmem:[%s4643_s1 + $0x10b] ss:$16 sm:$0xc0] %vm3_vm0, %v1143_v35   ;;  %v1182_v36 = vpop.permute.xlu1 %1181   ;;  %v1169_v37 = vpop.permute.xlu0 %1168  }
 0x11d   :  { %2080 = vst.msk [vmem:[%s4643_s1 + $0x28b] ss:$16 sm:$0x3] %vm3_vm0, %v1182_v36   ;;  %2081 = vst.msk [vmem:[%s4643_s1 + $0x28b] ss:$16 sm:$0xc] %vm3_vm0, %v1182_v36  }
 0x11e   :  { %2082 = vst.msk [vmem:[%s4643_s1 + $0x28b] ss:$16 sm:$0x30] %vm3_vm0, %v1182_v36   ;;  %2083 = vst.msk [vmem:[%s4643_s1 + $0x28b] ss:$16 sm:$0xc0] %vm3_vm0, %v1182_v36  }
 0x11f   :  { %2075 = vst.msk [vmem:[%s4643_s1 + $0x20b] ss:$16 sm:$0x3] %vm3_vm0, %v1169_v37   ;;  %2076 = vst.msk [vmem:[%s4643_s1 + $0x20b] ss:$16 sm:$0xc] %vm3_vm0, %v1169_v37  }
 0x120   :  { %2077 = vst.msk [vmem:[%s4643_s1 + $0x20b] ss:$16 sm:$0x30] %vm3_vm0, %v1169_v37   ;;  %2078 = vst.msk [vmem:[%s4643_s1 + $0x20b] ss:$16 sm:$0xc0] %vm3_vm0, %v1169_v37   ;;  %v1208_v38 = vpop.permute.xlu1 %1207   ;;  %v1195_v39 = vpop.permute.xlu0 %1194  }
 0x121   :  { %2090 = vst.msk [vmem:[%s4643_s1 + $0x38b] ss:$16 sm:$0x3] %vm3_vm0, %v1208_v38   ;;  %2091 = vst.msk [vmem:[%s4643_s1 + $0x38b] ss:$16 sm:$0xc] %vm3_vm0, %v1208_v38  }
 0x122   :  { %2092 = vst.msk [vmem:[%s4643_s1 + $0x38b] ss:$16 sm:$0x30] %vm3_vm0, %v1208_v38   ;;  %2093 = vst.msk [vmem:[%s4643_s1 + $0x38b] ss:$16 sm:$0xc0] %vm3_vm0, %v1208_v38  }
 0x123   :  { %2085 = vst.msk [vmem:[%s4643_s1 + $0x30b] ss:$16 sm:$0x3] %vm3_vm0, %v1195_v39   ;;  %2086 = vst.msk [vmem:[%s4643_s1 + $0x30b] ss:$16 sm:$0xc] %vm3_vm0, %v1195_v39  }
 0x124   :  { %2087 = vst.msk [vmem:[%s4643_s1 + $0x30b] ss:$16 sm:$0x30] %vm3_vm0, %v1195_v39   ;;  %2088 = vst.msk [vmem:[%s4643_s1 + $0x30b] ss:$16 sm:$0xc0] %vm3_vm0, %v1195_v39   ;;  %v1233_v40 = vpop.permute.xlu1 %1232   ;;  %v1220_v41 = vpop.permute.xlu0 %1219  }
 0x125   :  { %2099 = vst.msk [vmem:[%s4643_s1 + $0x8c] ss:$16 sm:$0x3] %vm3_vm0, %v1233_v40   ;;  %2100 = vst.msk [vmem:[%s4643_s1 + $0x8c] ss:$16 sm:$0xc] %vm3_vm0, %v1233_v40  }
 0x126   :  { %2101 = vst.msk [vmem:[%s4643_s1 + $0x8c] ss:$16 sm:$0x30] %vm3_vm0, %v1233_v40   ;;  %2102 = vst.msk [vmem:[%s4643_s1 + $0x8c] ss:$16 sm:$0xc0] %vm3_vm0, %v1233_v40  }
 0x127   :  { %2094 = vst.msk [vmem:[%s4643_s1 + $0xc] ss:$16 sm:$0x3] %vm3_vm0, %v1220_v41   ;;  %2095 = vst.msk [vmem:[%s4643_s1 + $0xc] ss:$16 sm:$0xc] %vm3_vm0, %v1220_v41  }
 0x128   :  { %2096 = vst.msk [vmem:[%s4643_s1 + $0xc] ss:$16 sm:$0x30] %vm3_vm0, %v1220_v41   ;;  %2097 = vst.msk [vmem:[%s4643_s1 + $0xc] ss:$16 sm:$0xc0] %vm3_vm0, %v1220_v41   ;;  %v1259_v42 = vpop.permute.xlu1 %1258   ;;  %v1246_v43 = vpop.permute.xlu0 %1245  }
 0x129   :  { %2109 = vst.msk [vmem:[%s4643_s1 + $0x18c] ss:$16 sm:$0x3] %vm3_vm0, %v1259_v42   ;;  %2110 = vst.msk [vmem:[%s4643_s1 + $0x18c] ss:$16 sm:$0xc] %vm3_vm0, %v1259_v42  }
 0x12a   :  { %2111 = vst.msk [vmem:[%s4643_s1 + $0x18c] ss:$16 sm:$0x30] %vm3_vm0, %v1259_v42   ;;  %2112 = vst.msk [vmem:[%s4643_s1 + $0x18c] ss:$16 sm:$0xc0] %vm3_vm0, %v1259_v42  }
 0x12b   :  { %2104 = vst.msk [vmem:[%s4643_s1 + $0x10c] ss:$16 sm:$0x3] %vm3_vm0, %v1246_v43   ;;  %2105 = vst.msk [vmem:[%s4643_s1 + $0x10c] ss:$16 sm:$0xc] %vm3_vm0, %v1246_v43  }
 0x12c   :  { %2106 = vst.msk [vmem:[%s4643_s1 + $0x10c] ss:$16 sm:$0x30] %vm3_vm0, %v1246_v43   ;;  %2107 = vst.msk [vmem:[%s4643_s1 + $0x10c] ss:$16 sm:$0xc0] %vm3_vm0, %v1246_v43   ;;  %v1285_v44 = vpop.permute.xlu1 %1284   ;;  %v1272_v45 = vpop.permute.xlu0 %1271  }
 0x12d   :  { %2119 = vst.msk [vmem:[%s4643_s1 + $0x28c] ss:$16 sm:$0x3] %vm3_vm0, %v1285_v44   ;;  %2120 = vst.msk [vmem:[%s4643_s1 + $0x28c] ss:$16 sm:$0xc] %vm3_vm0, %v1285_v44  }
 0x12e   :  { %2121 = vst.msk [vmem:[%s4643_s1 + $0x28c] ss:$16 sm:$0x30] %vm3_vm0, %v1285_v44   ;;  %2122 = vst.msk [vmem:[%s4643_s1 + $0x28c] ss:$16 sm:$0xc0] %vm3_vm0, %v1285_v44  }
 0x12f   :  { %2114 = vst.msk [vmem:[%s4643_s1 + $0x20c] ss:$16 sm:$0x3] %vm3_vm0, %v1272_v45   ;;  %2115 = vst.msk [vmem:[%s4643_s1 + $0x20c] ss:$16 sm:$0xc] %vm3_vm0, %v1272_v45  }
 0x130   :  { %2116 = vst.msk [vmem:[%s4643_s1 + $0x20c] ss:$16 sm:$0x30] %vm3_vm0, %v1272_v45   ;;  %2117 = vst.msk [vmem:[%s4643_s1 + $0x20c] ss:$16 sm:$0xc0] %vm3_vm0, %v1272_v45   ;;  %v1311_v46 = vpop.permute.xlu1 %1310   ;;  %v1298_v47 = vpop.permute.xlu0 %1297  }
 0x131   :  { %2129 = vst.msk [vmem:[%s4643_s1 + $0x38c] ss:$16 sm:$0x3] %vm3_vm0, %v1311_v46   ;;  %2130 = vst.msk [vmem:[%s4643_s1 + $0x38c] ss:$16 sm:$0xc] %vm3_vm0, %v1311_v46  }
 0x132   :  { %2131 = vst.msk [vmem:[%s4643_s1 + $0x38c] ss:$16 sm:$0x30] %vm3_vm0, %v1311_v46   ;;  %2132 = vst.msk [vmem:[%s4643_s1 + $0x38c] ss:$16 sm:$0xc0] %vm3_vm0, %v1311_v46  }
 0x133   :  { %2124 = vst.msk [vmem:[%s4643_s1 + $0x30c] ss:$16 sm:$0x3] %vm3_vm0, %v1298_v47   ;;  %2125 = vst.msk [vmem:[%s4643_s1 + $0x30c] ss:$16 sm:$0xc] %vm3_vm0, %v1298_v47  }
 0x134   :  { %2126 = vst.msk [vmem:[%s4643_s1 + $0x30c] ss:$16 sm:$0x30] %vm3_vm0, %v1298_v47   ;;  %2127 = vst.msk [vmem:[%s4643_s1 + $0x30c] ss:$16 sm:$0xc0] %vm3_vm0, %v1298_v47   ;;  %v1336_v48 = vpop.permute.xlu1 %1335   ;;  %v1323_v49 = vpop.permute.xlu0 %1322  }
 0x135   :  { %2138 = vst.msk [vmem:[%s4643_s1 + $0x8d] ss:$16 sm:$0x3] %vm3_vm0, %v1336_v48   ;;  %2139 = vst.msk [vmem:[%s4643_s1 + $0x8d] ss:$16 sm:$0xc] %vm3_vm0, %v1336_v48  }
 0x136   :  { %2140 = vst.msk [vmem:[%s4643_s1 + $0x8d] ss:$16 sm:$0x30] %vm3_vm0, %v1336_v48   ;;  %2141 = vst.msk [vmem:[%s4643_s1 + $0x8d] ss:$16 sm:$0xc0] %vm3_vm0, %v1336_v48  }
 0x137   :  { %2133 = vst.msk [vmem:[%s4643_s1 + $0xd] ss:$16 sm:$0x3] %vm3_vm0, %v1323_v49   ;;  %2134 = vst.msk [vmem:[%s4643_s1 + $0xd] ss:$16 sm:$0xc] %vm3_vm0, %v1323_v49  }
 0x138   :  { %2135 = vst.msk [vmem:[%s4643_s1 + $0xd] ss:$16 sm:$0x30] %vm3_vm0, %v1323_v49   ;;  %2136 = vst.msk [vmem:[%s4643_s1 + $0xd] ss:$16 sm:$0xc0] %vm3_vm0, %v1323_v49   ;;  %v1362_v50 = vpop.permute.xlu1 %1361   ;;  %v1349_v51 = vpop.permute.xlu0 %1348  }
 0x139   :  { %2148 = vst.msk [vmem:[%s4643_s1 + $0x18d] ss:$16 sm:$0x3] %vm3_vm0, %v1362_v50   ;;  %2149 = vst.msk [vmem:[%s4643_s1 + $0x18d] ss:$16 sm:$0xc] %vm3_vm0, %v1362_v50  }
 0x13a   :  { %2150 = vst.msk [vmem:[%s4643_s1 + $0x18d] ss:$16 sm:$0x30] %vm3_vm0, %v1362_v50   ;;  %2151 = vst.msk [vmem:[%s4643_s1 + $0x18d] ss:$16 sm:$0xc0] %vm3_vm0, %v1362_v50  }
 0x13b   :  { %2143 = vst.msk [vmem:[%s4643_s1 + $0x10d] ss:$16 sm:$0x3] %vm3_vm0, %v1349_v51   ;;  %2144 = vst.msk [vmem:[%s4643_s1 + $0x10d] ss:$16 sm:$0xc] %vm3_vm0, %v1349_v51  }
 0x13c   :  { %2145 = vst.msk [vmem:[%s4643_s1 + $0x10d] ss:$16 sm:$0x30] %vm3_vm0, %v1349_v51   ;;  %2146 = vst.msk [vmem:[%s4643_s1 + $0x10d] ss:$16 sm:$0xc0] %vm3_vm0, %v1349_v51   ;;  %v1388_v52 = vpop.permute.xlu1 %1387   ;;  %v1375_v53 = vpop.permute.xlu0 %1374  }
 0x13d   :  { %2158 = vst.msk [vmem:[%s4643_s1 + $0x28d] ss:$16 sm:$0x3] %vm3_vm0, %v1388_v52   ;;  %2159 = vst.msk [vmem:[%s4643_s1 + $0x28d] ss:$16 sm:$0xc] %vm3_vm0, %v1388_v52  }
 0x13e   :  { %2160 = vst.msk [vmem:[%s4643_s1 + $0x28d] ss:$16 sm:$0x30] %vm3_vm0, %v1388_v52   ;;  %2161 = vst.msk [vmem:[%s4643_s1 + $0x28d] ss:$16 sm:$0xc0] %vm3_vm0, %v1388_v52  }
 0x13f   :  { %2153 = vst.msk [vmem:[%s4643_s1 + $0x20d] ss:$16 sm:$0x3] %vm3_vm0, %v1375_v53   ;;  %2154 = vst.msk [vmem:[%s4643_s1 + $0x20d] ss:$16 sm:$0xc] %vm3_vm0, %v1375_v53  }
 0x140   :  { %2155 = vst.msk [vmem:[%s4643_s1 + $0x20d] ss:$16 sm:$0x30] %vm3_vm0, %v1375_v53   ;;  %2156 = vst.msk [vmem:[%s4643_s1 + $0x20d] ss:$16 sm:$0xc0] %vm3_vm0, %v1375_v53   ;;  %v1414_v54 = vpop.permute.xlu1 %1413   ;;  %v1401_v55 = vpop.permute.xlu0 %1400  }
 0x141   :  { %2168 = vst.msk [vmem:[%s4643_s1 + $0x38d] ss:$16 sm:$0x3] %vm3_vm0, %v1414_v54   ;;  %2169 = vst.msk [vmem:[%s4643_s1 + $0x38d] ss:$16 sm:$0xc] %vm3_vm0, %v1414_v54  }
 0x142   :  { %2170 = vst.msk [vmem:[%s4643_s1 + $0x38d] ss:$16 sm:$0x30] %vm3_vm0, %v1414_v54   ;;  %2171 = vst.msk [vmem:[%s4643_s1 + $0x38d] ss:$16 sm:$0xc0] %vm3_vm0, %v1414_v54  }
 0x143   :  { %2163 = vst.msk [vmem:[%s4643_s1 + $0x30d] ss:$16 sm:$0x3] %vm3_vm0, %v1401_v55   ;;  %2164 = vst.msk [vmem:[%s4643_s1 + $0x30d] ss:$16 sm:$0xc] %vm3_vm0, %v1401_v55  }
 0x144   :  { %2165 = vst.msk [vmem:[%s4643_s1 + $0x30d] ss:$16 sm:$0x30] %vm3_vm0, %v1401_v55   ;;  %2166 = vst.msk [vmem:[%s4643_s1 + $0x30d] ss:$16 sm:$0xc0] %vm3_vm0, %v1401_v55   ;;  %v1439_v56 = vpop.permute.xlu1 %1438   ;;  %v1426_v57 = vpop.permute.xlu0 %1425  }
 0x145   :  { %2177 = vst.msk [vmem:[%s4643_s1 + $0x8e] ss:$16 sm:$0x3] %vm3_vm0, %v1439_v56   ;;  %2178 = vst.msk [vmem:[%s4643_s1 + $0x8e] ss:$16 sm:$0xc] %vm3_vm0, %v1439_v56  }
 0x146   :  { %2179 = vst.msk [vmem:[%s4643_s1 + $0x8e] ss:$16 sm:$0x30] %vm3_vm0, %v1439_v56   ;;  %2180 = vst.msk [vmem:[%s4643_s1 + $0x8e] ss:$16 sm:$0xc0] %vm3_vm0, %v1439_v56  }
 0x147   :  { %2172 = vst.msk [vmem:[%s4643_s1 + $0xe] ss:$16 sm:$0x3] %vm3_vm0, %v1426_v57   ;;  %2173 = vst.msk [vmem:[%s4643_s1 + $0xe] ss:$16 sm:$0xc] %vm3_vm0, %v1426_v57  }
 0x148   :  { %2174 = vst.msk [vmem:[%s4643_s1 + $0xe] ss:$16 sm:$0x30] %vm3_vm0, %v1426_v57   ;;  %2175 = vst.msk [vmem:[%s4643_s1 + $0xe] ss:$16 sm:$0xc0] %vm3_vm0, %v1426_v57   ;;  %v1465_v58 = vpop.permute.xlu1 %1464   ;;  %v1452_v59 = vpop.permute.xlu0 %1451  }
 0x149   :  { %2187 = vst.msk [vmem:[%s4643_s1 + $0x18e] ss:$16 sm:$0x3] %vm3_vm0, %v1465_v58   ;;  %2188 = vst.msk [vmem:[%s4643_s1 + $0x18e] ss:$16 sm:$0xc] %vm3_vm0, %v1465_v58  }
 0x14a   :  { %2189 = vst.msk [vmem:[%s4643_s1 + $0x18e] ss:$16 sm:$0x30] %vm3_vm0, %v1465_v58   ;;  %2190 = vst.msk [vmem:[%s4643_s1 + $0x18e] ss:$16 sm:$0xc0] %vm3_vm0, %v1465_v58  }
 0x14b   :  { %2182 = vst.msk [vmem:[%s4643_s1 + $0x10e] ss:$16 sm:$0x3] %vm3_vm0, %v1452_v59   ;;  %2183 = vst.msk [vmem:[%s4643_s1 + $0x10e] ss:$16 sm:$0xc] %vm3_vm0, %v1452_v59  }
 0x14c   :  { %2184 = vst.msk [vmem:[%s4643_s1 + $0x10e] ss:$16 sm:$0x30] %vm3_vm0, %v1452_v59   ;;  %2185 = vst.msk [vmem:[%s4643_s1 + $0x10e] ss:$16 sm:$0xc0] %vm3_vm0, %v1452_v59   ;;  %v1491_v60 = vpop.permute.xlu1 %1490   ;;  %v1478_v61 = vpop.permute.xlu0 %1477  }
 0x14d   :  { %2197 = vst.msk [vmem:[%s4643_s1 + $0x28e] ss:$16 sm:$0x3] %vm3_vm0, %v1491_v60   ;;  %2198 = vst.msk [vmem:[%s4643_s1 + $0x28e] ss:$16 sm:$0xc] %vm3_vm0, %v1491_v60  }
 0x14e   :  { %2199 = vst.msk [vmem:[%s4643_s1 + $0x28e] ss:$16 sm:$0x30] %vm3_vm0, %v1491_v60   ;;  %2200 = vst.msk [vmem:[%s4643_s1 + $0x28e] ss:$16 sm:$0xc0] %vm3_vm0, %v1491_v60  }
 0x14f   :  { %2192 = vst.msk [vmem:[%s4643_s1 + $0x20e] ss:$16 sm:$0x3] %vm3_vm0, %v1478_v61   ;;  %2193 = vst.msk [vmem:[%s4643_s1 + $0x20e] ss:$16 sm:$0xc] %vm3_vm0, %v1478_v61  }
 0x150   :  { %2194 = vst.msk [vmem:[%s4643_s1 + $0x20e] ss:$16 sm:$0x30] %vm3_vm0, %v1478_v61   ;;  %2195 = vst.msk [vmem:[%s4643_s1 + $0x20e] ss:$16 sm:$0xc0] %vm3_vm0, %v1478_v61   ;;  %v1517_v62 = vpop.permute.xlu1 %1516   ;;  %v1504_v63 = vpop.permute.xlu0 %1503  }
 0x151   :  { %2207 = vst.msk [vmem:[%s4643_s1 + $0x38e] ss:$16 sm:$0x3] %vm3_vm0, %v1517_v62   ;;  %2208 = vst.msk [vmem:[%s4643_s1 + $0x38e] ss:$16 sm:$0xc] %vm3_vm0, %v1517_v62  }
 0x152   :  { %2209 = vst.msk [vmem:[%s4643_s1 + $0x38e] ss:$16 sm:$0x30] %vm3_vm0, %v1517_v62   ;;  %2210 = vst.msk [vmem:[%s4643_s1 + $0x38e] ss:$16 sm:$0xc0] %vm3_vm0, %v1517_v62  }
 0x153   :  { %2202 = vst.msk [vmem:[%s4643_s1 + $0x30e] ss:$16 sm:$0x3] %vm3_vm0, %v1504_v63   ;;  %2203 = vst.msk [vmem:[%s4643_s1 + $0x30e] ss:$16 sm:$0xc] %vm3_vm0, %v1504_v63  }
 0x154   :  { %2204 = vst.msk [vmem:[%s4643_s1 + $0x30e] ss:$16 sm:$0x30] %vm3_vm0, %v1504_v63   ;;  %2205 = vst.msk [vmem:[%s4643_s1 + $0x30e] ss:$16 sm:$0xc0] %vm3_vm0, %v1504_v63   ;;  %v1542_v1 = vpop.permute.xlu1 %1541   ;;  %v1529_v3 = vpop.permute.xlu0 %1528  }
 0x155   :  { %2216 = vst.msk [vmem:[%s4643_s1 + $0x8f] ss:$16 sm:$0x3] %vm3_vm0, %v1542_v1   ;;  %2217 = vst.msk [vmem:[%s4643_s1 + $0x8f] ss:$16 sm:$0xc] %vm3_vm0, %v1542_v1  }
 0x156   :  { %2218 = vst.msk [vmem:[%s4643_s1 + $0x8f] ss:$16 sm:$0x30] %vm3_vm0, %v1542_v1   ;;  %2219 = vst.msk [vmem:[%s4643_s1 + $0x8f] ss:$16 sm:$0xc0] %vm3_vm0, %v1542_v1  }
 0x157   :  { %2211 = vst.msk [vmem:[%s4643_s1 + $0xf] ss:$16 sm:$0x3] %vm3_vm0, %v1529_v3   ;;  %2212 = vst.msk [vmem:[%s4643_s1 + $0xf] ss:$16 sm:$0xc] %vm3_vm0, %v1529_v3  }
 0x158   :  { %2213 = vst.msk [vmem:[%s4643_s1 + $0xf] ss:$16 sm:$0x30] %vm3_vm0, %v1529_v3   ;;  %2214 = vst.msk [vmem:[%s4643_s1 + $0xf] ss:$16 sm:$0xc0] %vm3_vm0, %v1529_v3   ;;  %v1568_v0 = vpop.permute.xlu1 %1567   ;;  %v1555_v2 = vpop.permute.xlu0 %1554  }
 0x159   :  { %2226 = vst.msk [vmem:[%s4643_s1 + $0x18f] ss:$16 sm:$0x3] %vm3_vm0, %v1568_v0   ;;  %2227 = vst.msk [vmem:[%s4643_s1 + $0x18f] ss:$16 sm:$0xc] %vm3_vm0, %v1568_v0  }
 0x15a   :  { %2228 = vst.msk [vmem:[%s4643_s1 + $0x18f] ss:$16 sm:$0x30] %vm3_vm0, %v1568_v0   ;;  %2229 = vst.msk [vmem:[%s4643_s1 + $0x18f] ss:$16 sm:$0xc0] %vm3_vm0, %v1568_v0  }
 0x15b   :  { %2221 = vst.msk [vmem:[%s4643_s1 + $0x10f] ss:$16 sm:$0x3] %vm3_vm0, %v1555_v2   ;;  %2222 = vst.msk [vmem:[%s4643_s1 + $0x10f] ss:$16 sm:$0xc] %vm3_vm0, %v1555_v2  }
 0x15c   :  { %2223 = vst.msk [vmem:[%s4643_s1 + $0x10f] ss:$16 sm:$0x30] %vm3_vm0, %v1555_v2   ;;  %2224 = vst.msk [vmem:[%s4643_s1 + $0x10f] ss:$16 sm:$0xc0] %vm3_vm0, %v1555_v2   ;;  %v1594_v4 = vpop.permute.xlu1 %1593   ;;  %v1581_v5 = vpop.permute.xlu0 %1580  }
 0x15d   :  { %2236 = vst.msk [vmem:[%s4643_s1 + $0x28f] ss:$16 sm:$0x3] %vm3_vm0, %v1594_v4   ;;  %2237 = vst.msk [vmem:[%s4643_s1 + $0x28f] ss:$16 sm:$0xc] %vm3_vm0, %v1594_v4  }
 0x15e   :  { %2238 = vst.msk [vmem:[%s4643_s1 + $0x28f] ss:$16 sm:$0x30] %vm3_vm0, %v1594_v4   ;;  %2239 = vst.msk [vmem:[%s4643_s1 + $0x28f] ss:$16 sm:$0xc0] %vm3_vm0, %v1594_v4  }
 0x15f   :  { %2231 = vst.msk [vmem:[%s4643_s1 + $0x20f] ss:$16 sm:$0x3] %vm3_vm0, %v1581_v5   ;;  %2232 = vst.msk [vmem:[%s4643_s1 + $0x20f] ss:$16 sm:$0xc] %vm3_vm0, %v1581_v5  }
 0x160   :  { %2233 = vst.msk [vmem:[%s4643_s1 + $0x20f] ss:$16 sm:$0x30] %vm3_vm0, %v1581_v5   ;;  %2234 = vst.msk [vmem:[%s4643_s1 + $0x20f] ss:$16 sm:$0xc0] %vm3_vm0, %v1581_v5   ;;  %v1620_v6 = vpop.permute.xlu1 %1619   ;;  %v1607_v7 = vpop.permute.xlu0 %1606  }
 0x161   :  { %2246 = vst.msk [vmem:[%s4643_s1 + $0x38f] ss:$16 sm:$0x3] %vm3_vm0, %v1620_v6   ;;  %2247 = vst.msk [vmem:[%s4643_s1 + $0x38f] ss:$16 sm:$0xc] %vm3_vm0, %v1620_v6  }
 0x162   :  { %2248 = vst.msk [vmem:[%s4643_s1 + $0x38f] ss:$16 sm:$0x30] %vm3_vm0, %v1620_v6   ;;  %2249 = vst.msk [vmem:[%s4643_s1 + $0x38f] ss:$16 sm:$0xc0] %vm3_vm0, %v1620_v6  }
 0x163   :  { %2241 = vst.msk [vmem:[%s4643_s1 + $0x30f] ss:$16 sm:$0x3] %vm3_vm0, %v1607_v7   ;;  %2242 = vst.msk [vmem:[%s4643_s1 + $0x30f] ss:$16 sm:$0xc] %vm3_vm0, %v1607_v7  }
 0x164   :  { %2243 = vst.msk [vmem:[%s4643_s1 + $0x30f] ss:$16 sm:$0x30] %vm3_vm0, %v1607_v7   ;;  %2244 = vst.msk [vmem:[%s4643_s1 + $0x30f] ss:$16 sm:$0xc0] %vm3_vm0, %v1607_v7  }

// kernel: multi_attention_pool_2.3
= control target key start
LH: loop header
LB: loop body
LE: loop exit
PB: predicated region body
PF: predicated region fallthrough
CT: control target
= control target key end

     0   :  { %s21021_s0 = inlined_call_operand.vmem [shape: bf16[16,5632], index: 0, kind: input, shape index: {}]   ;;  %s21022_s1 = inlined_call_operand.vmem [shape: bf16[5632,512], index: 1, kind: input, shape index: {}]   ;;  %s21023_s2 = inlined_call_operand.vmem [shape: f32[1,1,512], index: 2, kind: input, shape index: {}]   ;;  %s21024_s3 = inlined_call_operand.<no memory space> [shape: f32[1,1,1], index: 3, kind: input, shape index: {}]   ;;  %s21025_s4 = inlined_call_operand.vmem [shape: bf16[512,512], index: 4, kind: input, shape index: {}]   ;;  %s21026_s5 = inlined_call_operand.vmem [shape: f32[1,512], index: 5, kind: input, shape index: {}]   ;;  %s21027_s6 = inlined_call_operand.vmem [shape: f32[2,8,1], index: 6, kind: output, shape index: {0}]   ;;  %s21028_s7 = inlined_call_operand.vmem [shape: f32[2,8,1], index: 7, kind: output, shape index: {1}]   ;;  %s21029_s8 = inlined_call_operand.hbm [shape: f32[2,512], index: 8, kind: output, shape index: {2}]   ;;  %s21030_s9 = inlined_call_operand.hbm [shape: f32[2,512], index: 9, kind: output, shape index: {3}]  }
   0x1   :  { %v15_v0 = vstv %s21024_s3 }
   0x2   :  { %16 = vst [vmem:[#allocation2] sm:$0x1] %v15_v0 }
   0x3   :  { %17 = vsyncpa [#allocation4], 0  ;;  %v13672_v1 = vld [vmem:[%s21022_s1 + $0x4] ss:$16 sps:$4 sm:$0xff]   ;;  %v13674_v2 = vld [vmem:[%s21022_s1 + $0xc] ss:$16 sps:$4 sm:$0xff]  }
   0x4   :  { %8743 = vmatprep.subr.bf16.mxu0 %v13672_v1  ;;  %v13676_v3 = vld [vmem:[%s21022_s1] ss:$16 sps:$4 sm:$0xff]   ;;  %v13677_v4 = vld [vmem:[%s21022_s1 + $0x8] ss:$16 sps:$4 sm:$0xff]   ;;  %9689 = vmatprep.subr.bf16.mxu1 %v13674_v2  ;;  %v13678_v5 = vld [vmem:[%s21022_s1 + $0x24] ss:$16 sps:$4 sm:$0xff]  }
   0x5   :  { %8744 = vmatpush1.bf16.msra.mxu0 %v13676_v3  ;;  %9690 = vmatpush1.bf16.msra.mxu1 %v13677_v4  ;;  %v13680_v6 = vld [vmem:[%s21022_s1 + $0x2c] ss:$16 sps:$4 sm:$0xff]   ;;  %v13682_v7 = vld [vmem:[%s21022_s1 + $0x20] ss:$16 sps:$4 sm:$0xff]   ;;  %v13683_v8 = vld [vmem:[%s21022_s1 + $0x28] ss:$16 sps:$4 sm:$0xff]  }
   0x6   :  { %8745 = vmatprep.subr.bf16.mxu0 %v13678_v5  ;;  %9691 = vmatprep.subr.bf16.mxu1 %v13680_v6  ;;  %v13684_v9 = vld [vmem:[%s21022_s1 + $0x44] ss:$16 sps:$4 sm:$0xff]   ;;  %v13686_v10 = vld [vmem:[%s21022_s1 + $0x4c] ss:$16 sps:$4 sm:$0xff]   ;;  %v13688_v11 = vld [vmem:[%s21022_s1 + $0x40] ss:$16 sps:$4 sm:$0xff]  }
   0x7   :  { %v13689_v12 = vld [vmem:[%s21022_s1 + $0x48] ss:$16 sps:$4 sm:$0xff]   ;;  %v13690_v13 = vld [vmem:[%s21022_s1 + $0x64] ss:$16 sps:$4 sm:$0xff]   ;;  %v13692_v14 = vld [vmem:[%s21022_s1 + $0x6c] ss:$16 sps:$4 sm:$0xff]  }
   0x8   :  { %v13694_v15 = vld [vmem:[%s21022_s1 + $0x60] ss:$16 sps:$4 sm:$0xff]   ;;  %v13695_v16 = vld [vmem:[%s21022_s1 + $0x68] ss:$16 sps:$4 sm:$0xff]   ;;  %v13696_v17 = vld [vmem:[%s21022_s1 + $0x84] ss:$16 sps:$4 sm:$0xff]  }
   0x9   :  { %8746 = vmatpush1.bf16.msra.mxu0 %v13682_v7  ;;  %9692 = vmatpush1.bf16.msra.mxu1 %v13683_v8  ;;  %v13698_v18 = vld [vmem:[%s21022_s1 + $0x8c] ss:$16 sps:$4 sm:$0xff]   ;;  %v13700_v19 = vld [vmem:[%s21022_s1 + $0x80] ss:$16 sps:$4 sm:$0xff]   ;;  %v13701_v20 = vld [vmem:[%s21022_s1 + $0x88] ss:$16 sps:$4 sm:$0xff]  }
   0xa   :  { %8747 = vmatprep.subr.bf16.mxu0 %v13684_v9  ;;  %9693 = vmatprep.subr.bf16.mxu1 %v13686_v10  ;;  %v13702_v21 = vld [vmem:[%s21022_s1 + $0xa4] ss:$16 sps:$4 sm:$0xff]   ;;  %v13704_v22 = vld [vmem:[%s21022_s1 + $0xac] ss:$16 sps:$4 sm:$0xff]   ;;  %v13706_v23 = vld [vmem:[%s21022_s1 + $0xa0] ss:$16 sps:$4 sm:$0xff]  }
   0xb   :  { %v13707_v24 = vld [vmem:[%s21022_s1 + $0xa8] ss:$16 sps:$4 sm:$0xff]   ;;  %v13708_v25 = vld [vmem:[%s21022_s1 + $0xc4] ss:$16 sps:$4 sm:$0xff]   ;;  %v13710_v26 = vld [vmem:[%s21022_s1 + $0xcc] ss:$16 sps:$4 sm:$0xff]  }
   0xc   :  { %v13712_v27 = vld [vmem:[%s21022_s1 + $0xc0] ss:$16 sps:$4 sm:$0xff]   ;;  %v13713_v28 = vld [vmem:[%s21022_s1 + $0xc8] ss:$16 sps:$4 sm:$0xff]   ;;  %v13714_v29 = vld [vmem:[%s21022_s1 + $0xe4] ss:$16 sps:$4 sm:$0xff]  }
   0xd   :  { %8748 = vmatpush1.bf16.msra.mxu0 %v13688_v11  ;;  %9694 = vmatpush1.bf16.msra.mxu1 %v13689_v12  ;;  %v13716_v30 = vld [vmem:[%s21022_s1 + $0xec] ss:$16 sps:$4 sm:$0xff]   ;;  %v13718_v31 = vld [vmem:[%s21022_s1 + $0xe0] ss:$16 sps:$4 sm:$0xff]   ;;  %v13719_v32 = vld [vmem:[%s21022_s1 + $0xe8] ss:$16 sps:$4 sm:$0xff]  }
   0xe   :  { %8749 = vmatprep.subr.bf16.mxu0 %v13690_v13  ;;  %9695 = vmatprep.subr.bf16.mxu1 %v13692_v14  ;;  %v13720_v33 = vld [vmem:[%s21022_s1 + $0x104] ss:$16 sps:$4 sm:$0xff]   ;;  %v13722_v34 = vld [vmem:[%s21022_s1 + $0x10c] ss:$16 sps:$4 sm:$0xff]   ;;  %v13724_v35 = vld [vmem:[%s21022_s1 + $0x100] ss:$16 sps:$4 sm:$0xff]  }
   0xf   :  { %v13725_v36 = vld [vmem:[%s21022_s1 + $0x108] ss:$16 sps:$4 sm:$0xff]   ;;  %v13726_v37 = vld [vmem:[%s21022_s1 + $0x124] ss:$16 sps:$4 sm:$0xff]   ;;  %v13728_v38 = vld [vmem:[%s21022_s1 + $0x12c] ss:$16 sps:$4 sm:$0xff]  }
  0x10   :  { %v13730_v39 = vld [vmem:[%s21022_s1 + $0x120] ss:$16 sps:$4 sm:$0xff]   ;;  %v13731_v40 = vld [vmem:[%s21022_s1 + $0x128] ss:$16 sps:$4 sm:$0xff]   ;;  %v13732_v41 = vld [vmem:[%s21022_s1 + $0x144] ss:$16 sps:$4 sm:$0xff]  }
  0x11   :  { %8750 = vmatpush1.bf16.msra.mxu0 %v13694_v15  ;;  %9696 = vmatpush1.bf16.msra.mxu1 %v13695_v16  ;;  %v13734_v42 = vld [vmem:[%s21022_s1 + $0x14c] ss:$16 sps:$4 sm:$0xff]   ;;  %v13736_v43 = vld [vmem:[%s21022_s1 + $0x140] ss:$16 sps:$4 sm:$0xff]   ;;  %v13737_v44 = vld [vmem:[%s21022_s1 + $0x148] ss:$16 sps:$4 sm:$0xff]  }
  0x12   :  { %8751 = vmatprep.subr.bf16.mxu0 %v13696_v17  ;;  %9697 = vmatprep.subr.bf16.mxu1 %v13698_v18  ;;  %v13738_v45 = vld [vmem:[%s21022_s1 + $0x164] ss:$16 sps:$4 sm:$0xff]   ;;  %v13740_v46 = vld [vmem:[%s21022_s1 + $0x16c] ss:$16 sps:$4 sm:$0xff]   ;;  %v13742_v47 = vld [vmem:[%s21022_s1 + $0x160] ss:$16 sps:$4 sm:$0xff]  }
  0x13   :  { %v13743_v48 = vld [vmem:[%s21022_s1 + $0x168] ss:$16 sps:$4 sm:$0xff]   ;;  %v13770_v49 = vld [vmem:[%s21021_s0 + $0x4] ss:$176 sps:$4 sm:$0xff]   ;;  %v13746_v51 = vld [vmem:[%s21022_s1 + $0x18c] ss:$16 sps:$4 sm:$0xff]  }
  0x14   :  { %v13744_v50 = vld [vmem:[%s21022_s1 + $0x184] ss:$16 sps:$4 sm:$0xff]   ;;  %8775 = vmatprep.mubr.bf16.mxu0 %v13770_v49  ;;  %9721 = vmatprep.mubr.bf16.mxu1 %v13770_v49  ;;  %v13748_v52 = vld [vmem:[%s21022_s1 + $0x180] ss:$16 sps:$4 sm:$0xff]   ;;  %v13749_v53 = vld [vmem:[%s21022_s1 + $0x188] ss:$16 sps:$4 sm:$0xff]  }
  0x15   :  { %8752 = vmatpush1.bf16.msra.mxu0 %v13700_v19  ;;  %9698 = vmatpush1.bf16.msra.mxu1 %v13701_v20  ;;  %v13750_v54 = vld [vmem:[%s21022_s1 + $0x1a4] ss:$16 sps:$4 sm:$0xff]   ;;  %v13752_v55 = vld [vmem:[%s21022_s1 + $0x1ac] ss:$16 sps:$4 sm:$0xff]   ;;  %v13754_v56 = vld [vmem:[%s21022_s1 + $0x1a0] ss:$16 sps:$4 sm:$0xff]  }
  0x16   :  { %8753 = vmatprep.subr.bf16.mxu0 %v13702_v21  ;;  %9699 = vmatprep.subr.bf16.mxu1 %v13704_v22  ;;  %v13755_v57 = vld [vmem:[%s21022_s1 + $0x1a8] ss:$16 sps:$4 sm:$0xff]   ;;  %v13756_v58 = vld [vmem:[%s21022_s1 + $0x1c4] ss:$16 sps:$4 sm:$0xff]   ;;  %v13758_v59 = vld [vmem:[%s21022_s1 + $0x1cc] ss:$16 sps:$4 sm:$0xff]  }
  0x17   :  { %v13760_v60 = vld [vmem:[%s21022_s1 + $0x1c0] ss:$16 sps:$4 sm:$0xff]   ;;  %v13761_v61 = vld [vmem:[%s21022_s1 + $0x1c8] ss:$16 sps:$4 sm:$0xff]   ;;  %v13762_v62 = vld [vmem:[%s21022_s1 + $0x1e4] ss:$16 sps:$4 sm:$0xff]  }
  0x18   :  { %v13764_v63 = vld [vmem:[%s21022_s1 + $0x1ec] ss:$16 sps:$4 sm:$0xff]   ;;  %v13766_v0 = vld [vmem:[%s21022_s1 + $0x1e0] ss:$16 sps:$4 sm:$0xff]   ;;  %v13767_v1 = vld [vmem:[%s21022_s1 + $0x1e8] ss:$16 sps:$4 sm:$0xff]  }
  0x19   :  { %8754 = vmatpush1.bf16.msra.mxu0 %v13706_v23  ;;  %9700 = vmatpush1.bf16.msra.mxu1 %v13707_v24  ;;  %v13773_v2 = vld [vmem:[%s21022_s1 + $0x204] ss:$16 sps:$4 sm:$0xff]   ;;  %v13776_v3 = vld [vmem:[%s21022_s1 + $0x20c] ss:$16 sps:$4 sm:$0xff]   ;;  %v13768_v4 = vld [vmem:[%s21021_s0] ss:$176 sps:$4 sm:$0xff]  }
  0x1a   :  { %8755 = vmatprep.subr.bf16.mxu0 %v13708_v25  ;;  %9701 = vmatprep.subr.bf16.mxu1 %v13710_v26  ;;  %v13771_v5 = vld [vmem:[%s21022_s1 + $0x200] ss:$16 sps:$4 sm:$0xff]   ;;  %v13774_v6 = vld [vmem:[%s21022_s1 + $0x208] ss:$16 sps:$4 sm:$0xff]   ;;  %v13779_v7 = vld [vmem:[%s21022_s1 + $0x224] ss:$16 sps:$4 sm:$0xff]  }
  0x1b   :  { %v13782_v8 = vld [vmem:[%s21022_s1 + $0x22c] ss:$16 sps:$4 sm:$0xff]   ;;  %v13777_v9 = vld [vmem:[%s21022_s1 + $0x220] ss:$16 sps:$4 sm:$0xff]   ;;  %v13780_v10 = vld [vmem:[%s21022_s1 + $0x228] ss:$16 sps:$4 sm:$0xff]  }
  0x1c   :  { %v13785_v11 = vld [vmem:[%s21022_s1 + $0x244] ss:$16 sps:$4 sm:$0xff]   ;;  %v13788_v12 = vld [vmem:[%s21022_s1 + $0x24c] ss:$16 sps:$4 sm:$0xff]   ;;  %v13783_v13 = vld [vmem:[%s21022_s1 + $0x240] ss:$16 sps:$4 sm:$0xff]  }
  0x1d   :  { %8756 = vmatpush1.bf16.msra.mxu0 %v13712_v27  ;;  %9702 = vmatpush1.bf16.msra.mxu1 %v13713_v28  ;;  %v13786_v14 = vld [vmem:[%s21022_s1 + $0x248] ss:$16 sps:$4 sm:$0xff]   ;;  %v13791_v15 = vld [vmem:[%s21022_s1 + $0x264] ss:$16 sps:$4 sm:$0xff]   ;;  %v13794_v16 = vld [vmem:[%s21022_s1 + $0x26c] ss:$16 sps:$4 sm:$0xff]  }
  0x1e   :  { %8757 = vmatprep.subr.bf16.mxu0 %v13714_v29  ;;  %9703 = vmatprep.subr.bf16.mxu1 %v13716_v30  ;;  %v13789_v17 = vld [vmem:[%s21022_s1 + $0x260] ss:$16 sps:$4 sm:$0xff]   ;;  %v13792_v18 = vld [vmem:[%s21022_s1 + $0x268] ss:$16 sps:$4 sm:$0xff]   ;;  %v13797_v19 = vld [vmem:[%s21022_s1 + $0x284] ss:$16 sps:$4 sm:$0xff]  }
  0x1f   :  { %v13800_v20 = vld [vmem:[%s21022_s1 + $0x28c] ss:$16 sps:$4 sm:$0xff]   ;;  %v13795_v21 = vld [vmem:[%s21022_s1 + $0x280] ss:$16 sps:$4 sm:$0xff]   ;;  %v13798_v22 = vld [vmem:[%s21022_s1 + $0x288] ss:$16 sps:$4 sm:$0xff]  }
  0x20   :  { %v13803_v23 = vld [vmem:[%s21022_s1 + $0x2a4] ss:$16 sps:$4 sm:$0xff]   ;;  %v13806_v24 = vld [vmem:[%s21022_s1 + $0x2ac] ss:$16 sps:$4 sm:$0xff]   ;;  %v13801_v25 = vld [vmem:[%s21022_s1 + $0x2a0] ss:$16 sps:$4 sm:$0xff]  }
  0x21   :  { %8758 = vmatpush1.bf16.msra.mxu0 %v13718_v31  ;;  %9704 = vmatpush1.bf16.msra.mxu1 %v13719_v32  ;;  %v13804_v26 = vld [vmem:[%s21022_s1 + $0x2a8] ss:$16 sps:$4 sm:$0xff]   ;;  %v13809_v27 = vld [vmem:[%s21022_s1 + $0x2c4] ss:$16 sps:$4 sm:$0xff]   ;;  %v13812_v28 = vld [vmem:[%s21022_s1 + $0x2cc] ss:$16 sps:$4 sm:$0xff]  }
  0x22   :  { %8759 = vmatprep.subr.bf16.mxu0 %v13720_v33  ;;  %9705 = vmatprep.subr.bf16.mxu1 %v13722_v34  ;;  %v13807_v29 = vld [vmem:[%s21022_s1 + $0x2c0] ss:$16 sps:$4 sm:$0xff]   ;;  %v13810_v30 = vld [vmem:[%s21022_s1 + $0x2c8] ss:$16 sps:$4 sm:$0xff]   ;;  %v13869_v31 = vld [vmem:[%s21021_s0 + $0xc] ss:$176 sps:$4 sm:$0xff]  }
  0x23   :  { %v13815_v32 = vld [vmem:[%s21022_s1 + $0x2e4] ss:$16 sps:$4 sm:$0xff]   ;;  %v13818_v33 = vld [vmem:[%s21022_s1 + $0x2ec] ss:$16 sps:$4 sm:$0xff]   ;;  %v13813_v34 = vld [vmem:[%s21022_s1 + $0x2e0] ss:$16 sps:$4 sm:$0xff]  }
  0x24   :  { %v13842_v49 = vld [vmem:[%s21022_s1 + $0x36c] ss:$16 sps:$4 sm:$0xff]  }
  0x25   :  { %8760 = vmatpush1.bf16.msra.mxu0 %v13724_v35  ;;  %9706 = vmatpush1.bf16.msra.mxu1 %v13725_v36  ;;  %v13816_v35 = vld [vmem:[%s21022_s1 + $0x2e8] ss:$16 sps:$4 sm:$0xff]   ;;  %v13821_v36 = vld [vmem:[%s21022_s1 + $0x304] ss:$16 sps:$4 sm:$0xff]  }
  0x26   :  { %8761 = vmatprep.subr.bf16.mxu0 %v13726_v37  ;;  %9707 = vmatprep.subr.bf16.mxu1 %v13728_v38  ;;  %v13824_v37 = vld [vmem:[%s21022_s1 + $0x30c] ss:$16 sps:$4 sm:$0xff]   ;;  %v13819_v38 = vld [vmem:[%s21022_s1 + $0x300] ss:$16 sps:$4 sm:$0xff]  }
  0x29   :  { %8762 = vmatpush1.bf16.msra.mxu0 %v13730_v39  ;;  %9708 = vmatpush1.bf16.msra.mxu1 %v13731_v40  ;;  %v13822_v39 = vld [vmem:[%s21022_s1 + $0x308] ss:$16 sps:$4 sm:$0xff]   ;;  %v13827_v40 = vld [vmem:[%s21022_s1 + $0x324] ss:$16 sps:$4 sm:$0xff]  }
  0x2a   :  { %8763 = vmatprep.subr.bf16.mxu0 %v13732_v41  ;;  %9709 = vmatprep.subr.bf16.mxu1 %v13734_v42  ;;  %v13830_v41 = vld [vmem:[%s21022_s1 + $0x32c] ss:$16 sps:$4 sm:$0xff]   ;;  %v13825_v42 = vld [vmem:[%s21022_s1 + $0x320] ss:$16 sps:$4 sm:$0xff]  }
  0x2d   :  { %8764 = vmatpush1.bf16.msra.mxu0 %v13736_v43  ;;  %9710 = vmatpush1.bf16.msra.mxu1 %v13737_v44  ;;  %v13828_v43 = vld [vmem:[%s21022_s1 + $0x328] ss:$16 sps:$4 sm:$0xff]   ;;  %v13833_v44 = vld [vmem:[%s21022_s1 + $0x344] ss:$16 sps:$4 sm:$0xff]  }
  0x2e   :  { %8765 = vmatprep.subr.bf16.mxu0 %v13738_v45  ;;  %9711 = vmatprep.subr.bf16.mxu1 %v13740_v46  ;;  %v13836_v45 = vld [vmem:[%s21022_s1 + $0x34c] ss:$16 sps:$4 sm:$0xff]   ;;  %v13831_v46 = vld [vmem:[%s21022_s1 + $0x340] ss:$16 sps:$4 sm:$0xff]  }
  0x31   :  { %8766 = vmatpush1.bf16.msra.mxu0 %v13742_v47  ;;  %9712 = vmatpush1.bf16.msra.mxu1 %v13743_v48  ;;  %v13834_v47 = vld [vmem:[%s21022_s1 + $0x348] ss:$16 sps:$4 sm:$0xff]   ;;  %v13839_v48 = vld [vmem:[%s21022_s1 + $0x364] ss:$16 sps:$4 sm:$0xff]  }
  0x32   :  { %8767 = vmatprep.subr.bf16.mxu0 %v13744_v50  ;;  %9713 = vmatprep.subr.bf16.mxu1 %v13746_v51  ;;  %v13837_v50 = vld [vmem:[%s21022_s1 + $0x360] ss:$16 sps:$4 sm:$0xff]   ;;  %v13840_v51 = vld [vmem:[%s21022_s1 + $0x368] ss:$16 sps:$4 sm:$0xff]  }
  0x35   :  { %8768 = vmatpush1.bf16.msra.mxu0 %v13748_v52  ;;  %9714 = vmatpush1.bf16.msra.mxu1 %v13749_v53  ;;  %v13845_v52 = vld [vmem:[%s21022_s1 + $0x384] ss:$16 sps:$4 sm:$0xff]   ;;  %v13848_v53 = vld [vmem:[%s21022_s1 + $0x38c] ss:$16 sps:$4 sm:$0xff]  }
  0x36   :  { %8769 = vmatprep.subr.bf16.mxu0 %v13750_v54  ;;  %9715 = vmatprep.subr.bf16.mxu1 %v13752_v55  ;;  %v13843_v54 = vld [vmem:[%s21022_s1 + $0x380] ss:$16 sps:$4 sm:$0xff]   ;;  %v13846_v55 = vld [vmem:[%s21022_s1 + $0x388] ss:$16 sps:$4 sm:$0xff]  }
  0x39   :  { %8770 = vmatpush1.bf16.msra.mxu0 %v13754_v56  ;;  %9716 = vmatpush1.bf16.msra.mxu1 %v13755_v57  ;;  %v13851_v56 = vld [vmem:[%s21022_s1 + $0x3a4] ss:$16 sps:$4 sm:$0xff]   ;;  %v13854_v57 = vld [vmem:[%s21022_s1 + $0x3ac] ss:$16 sps:$4 sm:$0xff]  }
  0x3a   :  { %8771 = vmatprep.subr.bf16.mxu0 %v13756_v58  ;;  %9717 = vmatprep.subr.bf16.mxu1 %v13758_v59  ;;  %v13849_v58 = vld [vmem:[%s21022_s1 + $0x3a0] ss:$16 sps:$4 sm:$0xff]   ;;  %v13852_v59 = vld [vmem:[%s21022_s1 + $0x3a8] ss:$16 sps:$4 sm:$0xff]  }
  0x3d   :  { %8772 = vmatpush1.bf16.msra.mxu0 %v13760_v60  ;;  %9718 = vmatpush1.bf16.msra.mxu1 %v13761_v61  ;;  %v13857_v60 = vld [vmem:[%s21022_s1 + $0x3c4] ss:$16 sps:$4 sm:$0xff]   ;;  %v13860_v61 = vld [vmem:[%s21022_s1 + $0x3cc] ss:$16 sps:$4 sm:$0xff]  }
  0x3e   :  { %8773 = vmatprep.subr.bf16.mxu0 %v13762_v62  ;;  %9719 = vmatprep.subr.bf16.mxu1 %v13764_v63  ;;  %v13855_v62 = vld [vmem:[%s21022_s1 + $0x3c0] ss:$16 sps:$4 sm:$0xff]   ;;  %v13858_v63 = vld [vmem:[%s21022_s1 + $0x3c8] ss:$16 sps:$4 sm:$0xff]  }
  0x41   :  { %8774 = vmatpush1.bf16.msra.mxu0 %v13766_v0  ;;  %9720 = vmatpush1.bf16.msra.mxu1 %v13767_v1  ;;  %v13863_v0 = vld [vmem:[%s21022_s1 + $0x3e4] ss:$16 sps:$4 sm:$0xff]   ;;  %v13866_v1 = vld [vmem:[%s21022_s1 + $0x3ec] ss:$16 sps:$4 sm:$0xff]  }
  0x42   :  { %8786 = vmatprep.subr.bf16.mxu0 %v13773_v2  ;;  %9732 = vmatprep.subr.bf16.mxu1 %v13776_v3  ;;  %v13861_v2 = vld [vmem:[%s21022_s1 + $0x3e0] ss:$16 sps:$4 sm:$0xff]   ;;  %v13864_v3 = vld [vmem:[%s21022_s1 + $0x3e8] ss:$16 sps:$4 sm:$0xff]  }
  0x44   :  { %8776 = vmatmul.mubr.bf16.vlgmr.msra.gmra.mrb[0].mxu0 %v13768_v4  ;;  %9722 = vmatmul.mubr.bf16.vlgmr.msra.gmra.mrb[0].mxu1 %v13768_v4  ;;  %v13872_v4 = vld [vmem:[%s21022_s1 + $0x404] ss:$16 sps:$4 sm:$0xff]  }
  0x45   :  { %8787 = vmatpush1.bf16.msra.mxu0 %v13771_v5  ;;  %9733 = vmatpush1.bf16.msra.mxu1 %v13774_v6  ;;  %v13875_v5 = vld [vmem:[%s21022_s1 + $0x40c] ss:$16 sps:$4 sm:$0xff]   ;;  %v13867_v6 = vld [vmem:[%s21021_s0 + $0x8] ss:$176 sps:$4 sm:$0xff]  }
  0x46   :  { %8788 = vmatprep.subr.bf16.mxu0 %v13779_v7  ;;  %9734 = vmatprep.subr.bf16.mxu1 %v13782_v8  ;;  %v13870_v7 = vld [vmem:[%s21022_s1 + $0x400] ss:$16 sps:$4 sm:$0xff]   ;;  %v13873_v8 = vld [vmem:[%s21022_s1 + $0x408] ss:$16 sps:$4 sm:$0xff]  }
  0x47   :  { %8818 = vmatprep.mubr.bf16.mxu0 %v13869_v31  ;;  %9764 = vmatprep.mubr.bf16.mxu1 %v13869_v31  ;;  %v13911_v31 = vld [vmem:[%s21022_s1 + $0x4cc] ss:$16 sps:$4 sm:$0xff]  }
  0x49   :  { %8789 = vmatpush1.bf16.msra.mxu0 %v13777_v9  ;;  %9735 = vmatpush1.bf16.msra.mxu1 %v13780_v10  ;;  %v13878_v9 = vld [vmem:[%s21022_s1 + $0x424] ss:$16 sps:$4 sm:$0xff]   ;;  %v13881_v10 = vld [vmem:[%s21022_s1 + $0x42c] ss:$16 sps:$4 sm:$0xff]  }
  0x4a   :  { %8790 = vmatprep.subr.bf16.mxu0 %v13785_v11  ;;  %9736 = vmatprep.subr.bf16.mxu1 %v13788_v12  ;;  %v13876_v11 = vld [vmem:[%s21022_s1 + $0x420] ss:$16 sps:$4 sm:$0xff]   ;;  %v13879_v12 = vld [vmem:[%s21022_s1 + $0x428] ss:$16 sps:$4 sm:$0xff]  }
  0x4d   :  { %8791 = vmatpush1.bf16.msra.mxu0 %v13783_v13  ;;  %9737 = vmatpush1.bf16.msra.mxu1 %v13786_v14  ;;  %v13968_v13 = vld [vmem:[%s21021_s0 + $0x14] ss:$176 sps:$4 sm:$0xff]  }
  0x4e   :  { %8792 = vmatprep.subr.bf16.mxu0 %v13791_v15  ;;  %9738 = vmatprep.subr.bf16.mxu1 %v13794_v16  ;;  %v13884_v14 = vld [vmem:[%s21022_s1 + $0x444] ss:$16 sps:$4 sm:$0xff]   ;;  %v13887_v15 = vld [vmem:[%s21022_s1 + $0x44c] ss:$16 sps:$4 sm:$0xff]   ;;  %v13882_v16 = vld [vmem:[%s21022_s1 + $0x440] ss:$16 sps:$4 sm:$0xff]  }
  0x51   :  { %8793 = vmatpush1.bf16.msra.mxu0 %v13789_v17  ;;  %9739 = vmatpush1.bf16.msra.mxu1 %v13792_v18  ;;  %v13885_v17 = vld [vmem:[%s21022_s1 + $0x448] ss:$16 sps:$4 sm:$0xff]   ;;  %v13890_v18 = vld [vmem:[%s21022_s1 + $0x464] ss:$16 sps:$4 sm:$0xff]  }
  0x52   :  { %8794 = vmatprep.subr.bf16.mxu0 %v13797_v19  ;;  %9740 = vmatprep.subr.bf16.mxu1 %v13800_v20  ;;  %v13893_v19 = vld [vmem:[%s21022_s1 + $0x46c] ss:$16 sps:$4 sm:$0xff]   ;;  %v13888_v20 = vld [vmem:[%s21022_s1 + $0x460] ss:$16 sps:$4 sm:$0xff]  }
  0x55   :  { %8795 = vmatpush1.bf16.msra.mxu0 %v13795_v21  ;;  %9741 = vmatpush1.bf16.msra.mxu1 %v13798_v22  ;;  %v13891_v21 = vld [vmem:[%s21022_s1 + $0x468] ss:$16 sps:$4 sm:$0xff]   ;;  %v13896_v22 = vld [vmem:[%s21022_s1 + $0x484] ss:$16 sps:$4 sm:$0xff]  }
  0x56   :  { %8796 = vmatprep.subr.bf16.mxu0 %v13803_v23  ;;  %9742 = vmatprep.subr.bf16.mxu1 %v13806_v24  ;;  %v13899_v23 = vld [vmem:[%s21022_s1 + $0x48c] ss:$16 sps:$4 sm:$0xff]   ;;  %v13894_v24 = vld [vmem:[%s21022_s1 + $0x480] ss:$16 sps:$4 sm:$0xff]  }
  0x59   :  { %8797 = vmatpush1.bf16.msra.mxu0 %v13801_v25  ;;  %9743 = vmatpush1.bf16.msra.mxu1 %v13804_v26  ;;  %v13897_v25 = vld [vmem:[%s21022_s1 + $0x488] ss:$16 sps:$4 sm:$0xff]   ;;  %v13902_v26 = vld [vmem:[%s21022_s1 + $0x4a4] ss:$16 sps:$4 sm:$0xff]  }
  0x5a   :  { %8798 = vmatprep.subr.bf16.mxu0 %v13809_v27  ;;  %9744 = vmatprep.subr.bf16.mxu1 %v13812_v28  ;;  %v13905_v27 = vld [vmem:[%s21022_s1 + $0x4ac] ss:$16 sps:$4 sm:$0xff]   ;;  %v13900_v28 = vld [vmem:[%s21022_s1 + $0x4a0] ss:$16 sps:$4 sm:$0xff]  }
  0x5d   :  { %8799 = vmatpush1.bf16.msra.mxu0 %v13807_v29  ;;  %9745 = vmatpush1.bf16.msra.mxu1 %v13810_v30  ;;  %v13903_v29 = vld [vmem:[%s21022_s1 + $0x4a8] ss:$16 sps:$4 sm:$0xff]   ;;  %v13908_v30 = vld [vmem:[%s21022_s1 + $0x4c4] ss:$16 sps:$4 sm:$0xff]  }
  0x5e   :  { %8800 = vmatprep.subr.bf16.mxu0 %v13815_v32  ;;  %9746 = vmatprep.subr.bf16.mxu1 %v13818_v33  ;;  %v13906_v32 = vld [vmem:[%s21022_s1 + $0x4c0] ss:$16 sps:$4 sm:$0xff]   ;;  %v13909_v33 = vld [vmem:[%s21022_s1 + $0x4c8] ss:$16 sps:$4 sm:$0xff]  }
  0x61   :  { %8801 = vmatpush1.bf16.msra.mxu0 %v13813_v34  ;;  %9747 = vmatpush1.bf16.msra.mxu1 %v13816_v35  ;;  %v13914_v34 = vld [vmem:[%s21022_s1 + $0x4e4] ss:$16 sps:$4 sm:$0xff]   ;;  %v13917_v35 = vld [vmem:[%s21022_s1 + $0x4ec] ss:$16 sps:$4 sm:$0xff]  }
  0x62   :  { %8802 = vmatprep.subr.bf16.mxu0 %v13821_v36  ;;  %9748 = vmatprep.subr.bf16.mxu1 %v13824_v37  ;;  %v13912_v36 = vld [vmem:[%s21022_s1 + $0x4e0] ss:$16 sps:$4 sm:$0xff]   ;;  %v13915_v37 = vld [vmem:[%s21022_s1 + $0x4e8] ss:$16 sps:$4 sm:$0xff]  }
  0x65   :  { %8803 = vmatpush1.bf16.msra.mxu0 %v13819_v38  ;;  %9749 = vmatpush1.bf16.msra.mxu1 %v13822_v39  ;;  %v13920_v38 = vld [vmem:[%s21022_s1 + $0x504] ss:$16 sps:$4 sm:$0xff]   ;;  %v13923_v39 = vld [vmem:[%s21022_s1 + $0x50c] ss:$16 sps:$4 sm:$0xff]  }
  0x66   :  { %8804 = vmatprep.subr.bf16.mxu0 %v13827_v40  ;;  %9750 = vmatprep.subr.bf16.mxu1 %v13830_v41  ;;  %v13918_v40 = vld [vmem:[%s21022_s1 + $0x500] ss:$16 sps:$4 sm:$0xff]   ;;  %v13921_v41 = vld [vmem:[%s21022_s1 + $0x508] ss:$16 sps:$4 sm:$0xff]  }
  0x69   :  { %8805 = vmatpush1.bf16.msra.mxu0 %v13825_v42  ;;  %9751 = vmatpush1.bf16.msra.mxu1 %v13828_v43  ;;  %v13926_v42 = vld [vmem:[%s21022_s1 + $0x524] ss:$16 sps:$4 sm:$0xff]   ;;  %v13929_v43 = vld [vmem:[%s21022_s1 + $0x52c] ss:$16 sps:$4 sm:$0xff]  }
  0x6a   :  { %8806 = vmatprep.subr.bf16.mxu0 %v13833_v44  ;;  %9752 = vmatprep.subr.bf16.mxu1 %v13836_v45  ;;  %v13924_v44 = vld [vmem:[%s21022_s1 + $0x520] ss:$16 sps:$4 sm:$0xff]   ;;  %v13927_v45 = vld [vmem:[%s21022_s1 + $0x528] ss:$16 sps:$4 sm:$0xff]  }
  0x6d   :  { %8807 = vmatpush1.bf16.msra.mxu0 %v13831_v46  ;;  %9753 = vmatpush1.bf16.msra.mxu1 %v13834_v47  ;;  %v13932_v46 = vld [vmem:[%s21022_s1 + $0x544] ss:$16 sps:$4 sm:$0xff]   ;;  %v13935_v47 = vld [vmem:[%s21022_s1 + $0x54c] ss:$16 sps:$4 sm:$0xff]  }
  0x6e   :  { %8808 = vmatprep.subr.bf16.mxu0 %v13839_v48  ;;  %9754 = vmatprep.subr.bf16.mxu1 %v13842_v49  ;;  %v13930_v48 = vld [vmem:[%s21022_s1 + $0x540] ss:$16 sps:$4 sm:$0xff]   ;;  %v13933_v49 = vld [vmem:[%s21022_s1 + $0x548] ss:$16 sps:$4 sm:$0xff]  }
  0x71   :  { %8809 = vmatpush1.bf16.msra.mxu0 %v13837_v50  ;;  %9755 = vmatpush1.bf16.msra.mxu1 %v13840_v51  ;;  %v13938_v50 = vld [vmem:[%s21022_s1 + $0x564] ss:$16 sps:$4 sm:$0xff]   ;;  %v13941_v51 = vld [vmem:[%s21022_s1 + $0x56c] ss:$16 sps:$4 sm:$0xff]  }
  0x72   :  { %8810 = vmatprep.subr.bf16.mxu0 %v13845_v52  ;;  %9756 = vmatprep.subr.bf16.mxu1 %v13848_v53  ;;  %v13936_v52 = vld [vmem:[%s21022_s1 + $0x560] ss:$16 sps:$4 sm:$0xff]   ;;  %v13939_v53 = vld [vmem:[%s21022_s1 + $0x568] ss:$16 sps:$4 sm:$0xff]  }
  0x75   :  { %8811 = vmatpush1.bf16.msra.mxu0 %v13843_v54  ;;  %9757 = vmatpush1.bf16.msra.mxu1 %v13846_v55  ;;  %v13944_v54 = vld [vmem:[%s21022_s1 + $0x584] ss:$16 sps:$4 sm:$0xff]   ;;  %v13947_v55 = vld [vmem:[%s21022_s1 + $0x58c] ss:$16 sps:$4 sm:$0xff]  }
  0x76   :  { %8812 = vmatprep.subr.bf16.mxu0 %v13851_v56  ;;  %9758 = vmatprep.subr.bf16.mxu1 %v13854_v57  ;;  %v13942_v56 = vld [vmem:[%s21022_s1 + $0x580] ss:$16 sps:$4 sm:$0xff]   ;;  %v13945_v57 = vld [vmem:[%s21022_s1 + $0x588] ss:$16 sps:$4 sm:$0xff]  }
  0x79   :  { %8813 = vmatpush1.bf16.msra.mxu0 %v13849_v58  ;;  %9759 = vmatpush1.bf16.msra.mxu1 %v13852_v59  ;;  %v13950_v58 = vld [vmem:[%s21022_s1 + $0x5a4] ss:$16 sps:$4 sm:$0xff]   ;;  %v13953_v59 = vld [vmem:[%s21022_s1 + $0x5ac] ss:$16 sps:$4 sm:$0xff]  }
  0x7a   :  { %8814 = vmatprep.subr.bf16.mxu0 %v13857_v60  ;;  %9760 = vmatprep.subr.bf16.mxu1 %v13860_v61  ;;  %v13948_v60 = vld [vmem:[%s21022_s1 + $0x5a0] ss:$16 sps:$4 sm:$0xff]   ;;  %v13951_v61 = vld [vmem:[%s21022_s1 + $0x5a8] ss:$16 sps:$4 sm:$0xff]  }
  0x7d   :  { %8815 = vmatpush1.bf16.msra.mxu0 %v13855_v62  ;;  %9761 = vmatpush1.bf16.msra.mxu1 %v13858_v63  ;;  %v13956_v62 = vld [vmem:[%s21022_s1 + $0x5c4] ss:$16 sps:$4 sm:$0xff]   ;;  %v13959_v63 = vld [vmem:[%s21022_s1 + $0x5cc] ss:$16 sps:$4 sm:$0xff]  }
  0x7e   :  { %8816 = vmatprep.subr.bf16.mxu0 %v13863_v0  ;;  %9762 = vmatprep.subr.bf16.mxu1 %v13866_v1  ;;  %v13954_v0 = vld [vmem:[%s21022_s1 + $0x5c0] ss:$16 sps:$4 sm:$0xff]   ;;  %v13957_v1 = vld [vmem:[%s21022_s1 + $0x5c8] ss:$16 sps:$4 sm:$0xff]  }
  0x81   :  { %8817 = vmatpush1.bf16.msra.mxu0 %v13861_v2  ;;  %9763 = vmatpush1.bf16.msra.mxu1 %v13864_v3  ;;  %v13962_v2 = vld [vmem:[%s21022_s1 + $0x5e4] ss:$16 sps:$4 sm:$0xff]   ;;  %v13965_v3 = vld [vmem:[%s21022_s1 + $0x5ec] ss:$16 sps:$4 sm:$0xff]  }
  0x82   :  { %8829 = vmatprep.subr.bf16.mxu0 %v13872_v4  ;;  %9775 = vmatprep.subr.bf16.mxu1 %v13875_v5  ;;  %v13960_v4 = vld [vmem:[%s21022_s1 + $0x5e0] ss:$16 sps:$4 sm:$0xff]   ;;  %v13963_v5 = vld [vmem:[%s21022_s1 + $0x5e8] ss:$16 sps:$4 sm:$0xff]  }
  0x84   :  { %8819 = vmatmul.mubr.bf16.vlgmr.msra.gmra.mrb[0].mxu0 %v13867_v6  ;;  %9765 = vmatmul.mubr.bf16.vlgmr.msra.gmra.mrb[0].mxu1 %v13867_v6  ;;  %v13971_v6 = vld [vmem:[%s21022_s1 + $0x604] ss:$16 sps:$4 sm:$0xff]  }
  0x85   :  { %8830 = vmatpush1.bf16.msra.mxu0 %v13870_v7  ;;  %9776 = vmatpush1.bf16.msra.mxu1 %v13873_v8  ;;  %v13974_v7 = vld [vmem:[%s21022_s1 + $0x60c] ss:$16 sps:$4 sm:$0xff]   ;;  %v13966_v8 = vld [vmem:[%s21021_s0 + $0x10] ss:$176 sps:$4 sm:$0xff]  }
  0x86   :  { %8831 = vmatprep.subr.bf16.mxu0 %v13878_v9  ;;  %9777 = vmatprep.subr.bf16.mxu1 %v13881_v10  ;;  %v13969_v9 = vld [vmem:[%s21022_s1 + $0x600] ss:$16 sps:$4 sm:$0xff]   ;;  %v13972_v10 = vld [vmem:[%s21022_s1 + $0x608] ss:$16 sps:$4 sm:$0xff]  }
  0x87   :  { %8861 = vmatprep.mubr.bf16.mxu0 %v13968_v13  ;;  %9807 = vmatprep.mubr.bf16.mxu1 %v13968_v13  ;;  %v14067_v13 = vld [vmem:[%s21021_s0 + $0x1c] ss:$176 sps:$4 sm:$0xff]  }
  0x89   :  { %8832 = vmatpush1.bf16.msra.mxu0 %v13876_v11  ;;  %9778 = vmatpush1.bf16.msra.mxu1 %v13879_v12  ;;  %v13977_v11 = vld [vmem:[%s21022_s1 + $0x624] ss:$16 sps:$4 sm:$0xff]   ;;  %v13980_v12 = vld [vmem:[%s21022_s1 + $0x62c] ss:$16 sps:$4 sm:$0xff]  }
  0x8a   :  { %8833 = vmatprep.subr.bf16.mxu0 %v13884_v14  ;;  %9779 = vmatprep.subr.bf16.mxu1 %v13887_v15  ;;  %v13975_v14 = vld [vmem:[%s21022_s1 + $0x620] ss:$16 sps:$4 sm:$0xff]   ;;  %v13978_v15 = vld [vmem:[%s21022_s1 + $0x628] ss:$16 sps:$4 sm:$0xff]  }
  0x8d   :  { %8834 = vmatpush1.bf16.msra.mxu0 %v13882_v16  ;;  %9780 = vmatpush1.bf16.msra.mxu1 %v13885_v17  ;;  %v13983_v16 = vld [vmem:[%s21022_s1 + $0x644] ss:$16 sps:$4 sm:$0xff]   ;;  %v13986_v17 = vld [vmem:[%s21022_s1 + $0x64c] ss:$16 sps:$4 sm:$0xff]  }
  0x8e   :  { %8835 = vmatprep.subr.bf16.mxu0 %v13890_v18  ;;  %9781 = vmatprep.subr.bf16.mxu1 %v13893_v19  ;;  %v13981_v18 = vld [vmem:[%s21022_s1 + $0x640] ss:$16 sps:$4 sm:$0xff]   ;;  %v13984_v19 = vld [vmem:[%s21022_s1 + $0x648] ss:$16 sps:$4 sm:$0xff]  }
  0x91   :  { %8836 = vmatpush1.bf16.msra.mxu0 %v13888_v20  ;;  %9782 = vmatpush1.bf16.msra.mxu1 %v13891_v21  ;;  %v13989_v20 = vld [vmem:[%s21022_s1 + $0x664] ss:$16 sps:$4 sm:$0xff]   ;;  %v13992_v21 = vld [vmem:[%s21022_s1 + $0x66c] ss:$16 sps:$4 sm:$0xff]  }
  0x92   :  { %8837 = vmatprep.subr.bf16.mxu0 %v13896_v22  ;;  %9783 = vmatprep.subr.bf16.mxu1 %v13899_v23  ;;  %v13987_v22 = vld [vmem:[%s21022_s1 + $0x660] ss:$16 sps:$4 sm:$0xff]   ;;  %v13990_v23 = vld [vmem:[%s21022_s1 + $0x668] ss:$16 sps:$4 sm:$0xff]  }
  0x95   :  { %8838 = vmatpush1.bf16.msra.mxu0 %v13894_v24  ;;  %9784 = vmatpush1.bf16.msra.mxu1 %v13897_v25  ;;  %v13995_v24 = vld [vmem:[%s21022_s1 + $0x684] ss:$16 sps:$4 sm:$0xff]   ;;  %v13998_v25 = vld [vmem:[%s21022_s1 + $0x68c] ss:$16 sps:$4 sm:$0xff]  }
  0x96   :  { %8839 = vmatprep.subr.bf16.mxu0 %v13902_v26  ;;  %9785 = vmatprep.subr.bf16.mxu1 %v13905_v27  ;;  %v13993_v26 = vld [vmem:[%s21022_s1 + $0x680] ss:$16 sps:$4 sm:$0xff]   ;;  %v13996_v27 = vld [vmem:[%s21022_s1 + $0x688] ss:$16 sps:$4 sm:$0xff]  }
  0x99   :  { %8840 = vmatpush1.bf16.msra.mxu0 %v13900_v28  ;;  %9786 = vmatpush1.bf16.msra.mxu1 %v13903_v29  ;;  %v14001_v28 = vld [vmem:[%s21022_s1 + $0x6a4] ss:$16 sps:$4 sm:$0xff]   ;;  %v14004_v29 = vld [vmem:[%s21022_s1 + $0x6ac] ss:$16 sps:$4 sm:$0xff]  }
  0x9a   :  { %8841 = vmatprep.subr.bf16.mxu0 %v13908_v30  ;;  %9787 = vmatprep.subr.bf16.mxu1 %v13911_v31  ;;  %v13999_v30 = vld [vmem:[%s21022_s1 + $0x6a0] ss:$16 sps:$4 sm:$0xff]   ;;  %v14002_v31 = vld [vmem:[%s21022_s1 + $0x6a8] ss:$16 sps:$4 sm:$0xff]  }
  0x9d   :  { %8842 = vmatpush1.bf16.msra.mxu0 %v13906_v32  ;;  %9788 = vmatpush1.bf16.msra.mxu1 %v13909_v33  ;;  %v14007_v32 = vld [vmem:[%s21022_s1 + $0x6c4] ss:$16 sps:$4 sm:$0xff]   ;;  %v14010_v33 = vld [vmem:[%s21022_s1 + $0x6cc] ss:$16 sps:$4 sm:$0xff]  }
  0x9e   :  { %8843 = vmatprep.subr.bf16.mxu0 %v13914_v34  ;;  %9789 = vmatprep.subr.bf16.mxu1 %v13917_v35  ;;  %v14005_v34 = vld [vmem:[%s21022_s1 + $0x6c0] ss:$16 sps:$4 sm:$0xff]   ;;  %v14008_v35 = vld [vmem:[%s21022_s1 + $0x6c8] ss:$16 sps:$4 sm:$0xff]  }
  0xa1   :  { %8844 = vmatpush1.bf16.msra.mxu0 %v13912_v36  ;;  %9790 = vmatpush1.bf16.msra.mxu1 %v13915_v37  ;;  %v14013_v36 = vld [vmem:[%s21022_s1 + $0x6e4] ss:$16 sps:$4 sm:$0xff]   ;;  %v14016_v37 = vld [vmem:[%s21022_s1 + $0x6ec] ss:$16 sps:$4 sm:$0xff]  }
  0xa2   :  { %8845 = vmatprep.subr.bf16.mxu0 %v13920_v38  ;;  %9791 = vmatprep.subr.bf16.mxu1 %v13923_v39  ;;  %v14011_v38 = vld [vmem:[%s21022_s1 + $0x6e0] ss:$16 sps:$4 sm:$0xff]   ;;  %v14014_v39 = vld [vmem:[%s21022_s1 + $0x6e8] ss:$16 sps:$4 sm:$0xff]  }
  0xa5   :  { %8846 = vmatpush1.bf16.msra.mxu0 %v13918_v40  ;;  %9792 = vmatpush1.bf16.msra.mxu1 %v13921_v41  ;;  %v14019_v40 = vld [vmem:[%s21022_s1 + $0x704] ss:$16 sps:$4 sm:$0xff]   ;;  %v14022_v41 = vld [vmem:[%s21022_s1 + $0x70c] ss:$16 sps:$4 sm:$0xff]  }
  0xa6   :  { %8847 = vmatprep.subr.bf16.mxu0 %v13926_v42  ;;  %9793 = vmatprep.subr.bf16.mxu1 %v13929_v43  ;;  %v14017_v42 = vld [vmem:[%s21022_s1 + $0x700] ss:$16 sps:$4 sm:$0xff]   ;;  %v14020_v43 = vld [vmem:[%s21022_s1 + $0x708] ss:$16 sps:$4 sm:$0xff]  }
  0xa9   :  { %8848 = vmatpush1.bf16.msra.mxu0 %v13924_v44  ;;  %9794 = vmatpush1.bf16.msra.mxu1 %v13927_v45  ;;  %v14025_v44 = vld [vmem:[%s21022_s1 + $0x724] ss:$16 sps:$4 sm:$0xff]   ;;  %v14028_v45 = vld [vmem:[%s21022_s1 + $0x72c] ss:$16 sps:$4 sm:$0xff]  }
  0xaa   :  { %8849 = vmatprep.subr.bf16.mxu0 %v13932_v46  ;;  %9795 = vmatprep.subr.bf16.mxu1 %v13935_v47  ;;  %v14023_v46 = vld [vmem:[%s21022_s1 + $0x720] ss:$16 sps:$4 sm:$0xff]   ;;  %v14026_v47 = vld [vmem:[%s21022_s1 + $0x728] ss:$16 sps:$4 sm:$0xff]  }
  0xad   :  { %8850 = vmatpush1.bf16.msra.mxu0 %v13930_v48  ;;  %9796 = vmatpush1.bf16.msra.mxu1 %v13933_v49  ;;  %v14031_v48 = vld [vmem:[%s21022_s1 + $0x744] ss:$16 sps:$4 sm:$0xff]   ;;  %v14034_v49 = vld [vmem:[%s21022_s1 + $0x74c] ss:$16 sps:$4 sm:$0xff]  }
  0xae   :  { %8851 = vmatprep.subr.bf16.mxu0 %v13938_v50  ;;  %9797 = vmatprep.subr.bf16.mxu1 %v13941_v51  ;;  %v14029_v50 = vld [vmem:[%s21022_s1 + $0x740] ss:$16 sps:$4 sm:$0xff]   ;;  %v14032_v51 = vld [vmem:[%s21022_s1 + $0x748] ss:$16 sps:$4 sm:$0xff]  }
  0xb1   :  { %8852 = vmatpush1.bf16.msra.mxu0 %v13936_v52  ;;  %9798 = vmatpush1.bf16.msra.mxu1 %v13939_v53  ;;  %v14037_v52 = vld [vmem:[%s21022_s1 + $0x764] ss:$16 sps:$4 sm:$0xff]   ;;  %v14040_v53 = vld [vmem:[%s21022_s1 + $0x76c] ss:$16 sps:$4 sm:$0xff]  }
  0xb2   :  { %8853 = vmatprep.subr.bf16.mxu0 %v13944_v54  ;;  %9799 = vmatprep.subr.bf16.mxu1 %v13947_v55  ;;  %v14035_v54 = vld [vmem:[%s21022_s1 + $0x760] ss:$16 sps:$4 sm:$0xff]   ;;  %v14038_v55 = vld [vmem:[%s21022_s1 + $0x768] ss:$16 sps:$4 sm:$0xff]  }
  0xb5   :  { %8854 = vmatpush1.bf16.msra.mxu0 %v13942_v56  ;;  %9800 = vmatpush1.bf16.msra.mxu1 %v13945_v57  ;;  %v14043_v56 = vld [vmem:[%s21022_s1 + $0x784] ss:$16 sps:$4 sm:$0xff]   ;;  %v14046_v57 = vld [vmem:[%s21022_s1 + $0x78c] ss:$16 sps:$4 sm:$0xff]  }
  0xb6   :  { %8855 = vmatprep.subr.bf16.mxu0 %v13950_v58  ;;  %9801 = vmatprep.subr.bf16.mxu1 %v13953_v59  ;;  %v14041_v58 = vld [vmem:[%s21022_s1 + $0x780] ss:$16 sps:$4 sm:$0xff]   ;;  %v14044_v59 = vld [vmem:[%s21022_s1 + $0x788] ss:$16 sps:$4 sm:$0xff]  }
  0xb9   :  { %8856 = vmatpush1.bf16.msra.mxu0 %v13948_v60  ;;  %9802 = vmatpush1.bf16.msra.mxu1 %v13951_v61  ;;  %v14049_v60 = vld [vmem:[%s21022_s1 + $0x7a4] ss:$16 sps:$4 sm:$0xff]   ;;  %v14052_v61 = vld [vmem:[%s21022_s1 + $0x7ac] ss:$16 sps:$4 sm:$0xff]  }
  0xba   :  { %8857 = vmatprep.subr.bf16.mxu0 %v13956_v62  ;;  %9803 = vmatprep.subr.bf16.mxu1 %v13959_v63  ;;  %v14047_v62 = vld [vmem:[%s21022_s1 + $0x7a0] ss:$16 sps:$4 sm:$0xff]   ;;  %v14050_v63 = vld [vmem:[%s21022_s1 + $0x7a8] ss:$16 sps:$4 sm:$0xff]  }
  0xbd   :  { %8858 = vmatpush1.bf16.msra.mxu0 %v13954_v0  ;;  %9804 = vmatpush1.bf16.msra.mxu1 %v13957_v1  ;;  %v14055_v0 = vld [vmem:[%s21022_s1 + $0x7c4] ss:$16 sps:$4 sm:$0xff]   ;;  %v14058_v1 = vld [vmem:[%s21022_s1 + $0x7cc] ss:$16 sps:$4 sm:$0xff]  }
  0xbe   :  { %8859 = vmatprep.subr.bf16.mxu0 %v13962_v2  ;;  %9805 = vmatprep.subr.bf16.mxu1 %v13965_v3  ;;  %v14053_v2 = vld [vmem:[%s21022_s1 + $0x7c0] ss:$16 sps:$4 sm:$0xff]   ;;  %v14056_v3 = vld [vmem:[%s21022_s1 + $0x7c8] ss:$16 sps:$4 sm:$0xff]  }
  0xc1   :  { %8860 = vmatpush1.bf16.msra.mxu0 %v13960_v4  ;;  %9806 = vmatpush1.bf16.msra.mxu1 %v13963_v5  ;;  %v14061_v4 = vld [vmem:[%s21022_s1 + $0x7e4] ss:$16 sps:$4 sm:$0xff]   ;;  %v14064_v5 = vld [vmem:[%s21022_s1 + $0x7ec] ss:$16 sps:$4 sm:$0xff]  }
  0xc2   :  { %8872 = vmatprep.subr.bf16.mxu0 %v13971_v6  ;;  %9818 = vmatprep.subr.bf16.mxu1 %v13974_v7  ;;  %v14059_v6 = vld [vmem:[%s21022_s1 + $0x7e0] ss:$16 sps:$4 sm:$0xff]   ;;  %v14062_v7 = vld [vmem:[%s21022_s1 + $0x7e8] ss:$16 sps:$4 sm:$0xff]  }
  0xc4   :  { %8862 = vmatmul.mubr.bf16.vlgmr.msra.gmra.mrb[0].mxu0 %v13966_v8  ;;  %9808 = vmatmul.mubr.bf16.vlgmr.msra.gmra.mrb[0].mxu1 %v13966_v8  ;;  %v14070_v8 = vld [vmem:[%s21022_s1 + $0x804] ss:$16 sps:$4 sm:$0xff]  }
  0xc5   :  { %8873 = vmatpush1.bf16.msra.mxu0 %v13969_v9  ;;  %9819 = vmatpush1.bf16.msra.mxu1 %v13972_v10  ;;  %v14073_v9 = vld [vmem:[%s21022_s1 + $0x80c] ss:$16 sps:$4 sm:$0xff]   ;;  %v14065_v10 = vld [vmem:[%s21021_s0 + $0x18] ss:$176 sps:$4 sm:$0xff]  }
  0xc6   :  { %8874 = vmatprep.subr.bf16.mxu0 %v13977_v11  ;;  %9820 = vmatprep.subr.bf16.mxu1 %v13980_v12  ;;  %v14068_v11 = vld [vmem:[%s21022_s1 + $0x800] ss:$16 sps:$4 sm:$0xff]   ;;  %v14071_v12 = vld [vmem:[%s21022_s1 + $0x808] ss:$16 sps:$4 sm:$0xff]  }
  0xc7   :  { %8904 = vmatprep.mubr.bf16.mxu0 %v14067_v13  ;;  %9850 = vmatprep.mubr.bf16.mxu1 %v14067_v13  ;;  %v14076_v13 = vld [vmem:[%s21022_s1 + $0x824] ss:$16 sps:$4 sm:$0xff]  }
  0xc9   :  { %8875 = vmatpush1.bf16.msra.mxu0 %v13975_v14  ;;  %9821 = vmatpush1.bf16.msra.mxu1 %v13978_v15  ;;  %v14079_v14 = vld [vmem:[%s21022_s1 + $0x82c] ss:$16 sps:$4 sm:$0xff]   ;;  %v14166_v15 = vld [vmem:[%s21021_s0 + $0x24] ss:$176 sps:$4 sm:$0xff]  }
  0xca   :  { %8876 = vmatprep.subr.bf16.mxu0 %v13983_v16  ;;  %9822 = vmatprep.subr.bf16.mxu1 %v13986_v17  ;;  %v14074_v16 = vld [vmem:[%s21022_s1 + $0x820] ss:$16 sps:$4 sm:$0xff]   ;;  %v14077_v17 = vld [vmem:[%s21022_s1 + $0x828] ss:$16 sps:$4 sm:$0xff]  }
  0xcd   :  { %8877 = vmatpush1.bf16.msra.mxu0 %v13981_v18  ;;  %9823 = vmatpush1.bf16.msra.mxu1 %v13984_v19  ;;  %v14082_v18 = vld [vmem:[%s21022_s1 + $0x844] ss:$16 sps:$4 sm:$0xff]   ;;  %v14085_v19 = vld [vmem:[%s21022_s1 + $0x84c] ss:$16 sps:$4 sm:$0xff]  }
  0xce   :  { %8878 = vmatprep.subr.bf16.mxu0 %v13989_v20  ;;  %9824 = vmatprep.subr.bf16.mxu1 %v13992_v21  ;;  %v14080_v20 = vld [vmem:[%s21022_s1 + $0x840] ss:$16 sps:$4 sm:$0xff]   ;;  %v14083_v21 = vld [vmem:[%s21022_s1 + $0x848] ss:$16 sps:$4 sm:$0xff]  }
  0xd1   :  { %8879 = vmatpush1.bf16.msra.mxu0 %v13987_v22  ;;  %9825 = vmatpush1.bf16.msra.mxu1 %v13990_v23  ;;  %v14088_v22 = vld [vmem:[%s21022_s1 + $0x864] ss:$16 sps:$4 sm:$0xff]   ;;  %v14091_v23 = vld [vmem:[%s21022_s1 + $0x86c] ss:$16 sps:$4 sm:$0xff]  }
  0xd2   :  { %8880 = vmatprep.subr.bf16.mxu0 %v13995_v24  ;;  %9826 = vmatprep.subr.bf16.mxu1 %v13998_v25  ;;  %v14086_v24 = vld [vmem:[%s21022_s1 + $0x860] ss:$16 sps:$4 sm:$0xff]   ;;  %v14089_v25 = vld [vmem:[%s21022_s1 + $0x868] ss:$16 sps:$4 sm:$0xff]  }
  0xd5   :  { %8881 = vmatpush1.bf16.msra.mxu0 %v13993_v26  ;;  %9827 = vmatpush1.bf16.msra.mxu1 %v13996_v27  ;;  %v14094_v26 = vld [vmem:[%s21022_s1 + $0x884] ss:$16 sps:$4 sm:$0xff]   ;;  %v14097_v27 = vld [vmem:[%s21022_s1 + $0x88c] ss:$16 sps:$4 sm:$0xff]  }
  0xd6   :  { %8882 = vmatprep.subr.bf16.mxu0 %v14001_v28  ;;  %9828 = vmatprep.subr.bf16.mxu1 %v14004_v29  ;;  %v14092_v28 = vld [vmem:[%s21022_s1 + $0x880] ss:$16 sps:$4 sm:$0xff]   ;;  %v14095_v29 = vld [vmem:[%s21022_s1 + $0x888] ss:$16 sps:$4 sm:$0xff]  }
  0xd9   :  { %8883 = vmatpush1.bf16.msra.mxu0 %v13999_v30  ;;  %9829 = vmatpush1.bf16.msra.mxu1 %v14002_v31  ;;  %v14100_v30 = vld [vmem:[%s21022_s1 + $0x8a4] ss:$16 sps:$4 sm:$0xff]   ;;  %v14103_v31 = vld [vmem:[%s21022_s1 + $0x8ac] ss:$16 sps:$4 sm:$0xff]  }
  0xda   :  { %8884 = vmatprep.subr.bf16.mxu0 %v14007_v32  ;;  %9830 = vmatprep.subr.bf16.mxu1 %v14010_v33  ;;  %v14098_v32 = vld [vmem:[%s21022_s1 + $0x8a0] ss:$16 sps:$4 sm:$0xff]   ;;  %v14101_v33 = vld [vmem:[%s21022_s1 + $0x8a8] ss:$16 sps:$4 sm:$0xff]  }
  0xdd   :  { %8885 = vmatpush1.bf16.msra.mxu0 %v14005_v34  ;;  %9831 = vmatpush1.bf16.msra.mxu1 %v14008_v35  ;;  %v14106_v34 = vld [vmem:[%s21022_s1 + $0x8c4] ss:$16 sps:$4 sm:$0xff]   ;;  %v14109_v35 = vld [vmem:[%s21022_s1 + $0x8cc] ss:$16 sps:$4 sm:$0xff]  }
  0xde   :  { %8886 = vmatprep.subr.bf16.mxu0 %v14013_v36  ;;  %9832 = vmatprep.subr.bf16.mxu1 %v14016_v37  ;;  %v14104_v36 = vld [vmem:[%s21022_s1 + $0x8c0] ss:$16 sps:$4 sm:$0xff]   ;;  %v14107_v37 = vld [vmem:[%s21022_s1 + $0x8c8] ss:$16 sps:$4 sm:$0xff]  }
  0xe1   :  { %8887 = vmatpush1.bf16.msra.mxu0 %v14011_v38  ;;  %9833 = vmatpush1.bf16.msra.mxu1 %v14014_v39  ;;  %v14112_v38 = vld [vmem:[%s21022_s1 + $0x8e4] ss:$16 sps:$4 sm:$0xff]   ;;  %v14115_v39 = vld [vmem:[%s21022_s1 + $0x8ec] ss:$16 sps:$4 sm:$0xff]  }
  0xe2   :  { %8888 = vmatprep.subr.bf16.mxu0 %v14019_v40  ;;  %9834 = vmatprep.subr.bf16.mxu1 %v14022_v41  ;;  %v14110_v40 = vld [vmem:[%s21022_s1 + $0x8e0] ss:$16 sps:$4 sm:$0xff]   ;;  %v14113_v41 = vld [vmem:[%s21022_s1 + $0x8e8] ss:$16 sps:$4 sm:$0xff]  }
  0xe5   :  { %8889 = vmatpush1.bf16.msra.mxu0 %v14017_v42  ;;  %9835 = vmatpush1.bf16.msra.mxu1 %v14020_v43  ;;  %v14118_v42 = vld [vmem:[%s21022_s1 + $0x904] ss:$16 sps:$4 sm:$0xff]   ;;  %v14121_v43 = vld [vmem:[%s21022_s1 + $0x90c] ss:$16 sps:$4 sm:$0xff]  }
  0xe6   :  { %8890 = vmatprep.subr.bf16.mxu0 %v14025_v44  ;;  %9836 = vmatprep.subr.bf16.mxu1 %v14028_v45  ;;  %v14116_v44 = vld [vmem:[%s21022_s1 + $0x900] ss:$16 sps:$4 sm:$0xff]   ;;  %v14119_v45 = vld [vmem:[%s21022_s1 + $0x908] ss:$16 sps:$4 sm:$0xff]  }
  0xe9   :  { %8891 = vmatpush1.bf16.msra.mxu0 %v14023_v46  ;;  %9837 = vmatpush1.bf16.msra.mxu1 %v14026_v47  ;;  %v14124_v46 = vld [vmem:[%s21022_s1 + $0x924] ss:$16 sps:$4 sm:$0xff]   ;;  %v14127_v47 = vld [vmem:[%s21022_s1 + $0x92c] ss:$16 sps:$4 sm:$0xff]  }
  0xea   :  { %8892 = vmatprep.subr.bf16.mxu0 %v14031_v48  ;;  %9838 = vmatprep.subr.bf16.mxu1 %v14034_v49  ;;  %v14122_v48 = vld [vmem:[%s21022_s1 + $0x920] ss:$16 sps:$4 sm:$0xff]   ;;  %v14125_v49 = vld [vmem:[%s21022_s1 + $0x928] ss:$16 sps:$4 sm:$0xff]  }
  0xed   :  { %8893 = vmatpush1.bf16.msra.mxu0 %v14029_v50  ;;  %9839 = vmatpush1.bf16.msra.mxu1 %v14032_v51  ;;  %v14130_v50 = vld [vmem:[%s21022_s1 + $0x944] ss:$16 sps:$4 sm:$0xff]   ;;  %v14133_v51 = vld [vmem:[%s21022_s1 + $0x94c] ss:$16 sps:$4 sm:$0xff]  }
  0xee   :  { %8894 = vmatprep.subr.bf16.mxu0 %v14037_v52  ;;  %9840 = vmatprep.subr.bf16.mxu1 %v14040_v53  ;;  %v14128_v52 = vld [vmem:[%s21022_s1 + $0x940] ss:$16 sps:$4 sm:$0xff]   ;;  %v14131_v53 = vld [vmem:[%s21022_s1 + $0x948] ss:$16 sps:$4 sm:$0xff]  }
  0xf1   :  { %8895 = vmatpush1.bf16.msra.mxu0 %v14035_v54  ;;  %9841 = vmatpush1.bf16.msra.mxu1 %v14038_v55  ;;  %v14136_v54 = vld [vmem:[%s21022_s1 + $0x964] ss:$16 sps:$4 sm:$0xff]   ;;  %v14139_v55 = vld [vmem:[%s21022_s1 + $0x96c] ss:$16 sps:$4 sm:$0xff]  }
  0xf2   :  { %8896 = vmatprep.subr.bf16.mxu0 %v14043_v56  ;;  %9842 = vmatprep.subr.bf16.mxu1 %v14046_v57  ;;  %v14134_v56 = vld [vmem:[%s21022_s1 + $0x960] ss:$16 sps:$4 sm:$0xff]   ;;  %v14137_v57 = vld [vmem:[%s21022_s1 + $0x968] ss:$16 sps:$4 sm:$0xff]  }
  0xf5   :  { %8897 = vmatpush1.bf16.msra.mxu0 %v14041_v58  ;;  %9843 = vmatpush1.bf16.msra.mxu1 %v14044_v59  ;;  %v14142_v58 = vld [vmem:[%s21022_s1 + $0x984] ss:$16 sps:$4 sm:$0xff]   ;;  %v14145_v59 = vld [vmem:[%s21022_s1 + $0x98c] ss:$16 sps:$4 sm:$0xff]  }
  0xf6   :  { %8898 = vmatprep.subr.bf16.mxu0 %v14049_v60  ;;  %9844 = vmatprep.subr.bf16.mxu1 %v14052_v61  ;;  %v14140_v60 = vld [vmem:[%s21022_s1 + $0x980] ss:$16 sps:$4 sm:$0xff]   ;;  %v14143_v61 = vld [vmem:[%s21022_s1 + $0x988] ss:$16 sps:$4 sm:$0xff]  }
  0xf9   :  { %8899 = vmatpush1.bf16.msra.mxu0 %v14047_v62  ;;  %9845 = vmatpush1.bf16.msra.mxu1 %v14050_v63  ;;  %v14148_v62 = vld [vmem:[%s21022_s1 + $0x9a4] ss:$16 sps:$4 sm:$0xff]   ;;  %v14151_v63 = vld [vmem:[%s21022_s1 + $0x9ac] ss:$16 sps:$4 sm:$0xff]  }
  0xfa   :  { %8900 = vmatprep.subr.bf16.mxu0 %v14055_v0  ;;  %9846 = vmatprep.subr.bf16.mxu1 %v14058_v1  ;;  %v14146_v0 = vld [vmem:[%s21022_s1 + $0x9a0] ss:$16 sps:$4 sm:$0xff]   ;;  %v14149_v1 = vld [vmem:[%s21022_s1 + $0x9a8] ss:$16 sps:$4 sm:$0xff]  }
  0xfd   :  { %8901 = vmatpush1.bf16.msra.mxu0 %v14053_v2  ;;  %9847 = vmatpush1.bf16.msra.mxu1 %v14056_v3  ;;  %v14154_v2 = vld [vmem:[%s21022_s1 + $0x9c4] ss:$16 sps:$4 sm:$0xff]   ;;  %v14157_v3 = vld [vmem:[%s21022_s1 + $0x9cc] ss:$16 sps:$4 sm:$0xff]  }
  0xfe   :  { %8902 = vmatprep.subr.bf16.mxu0 %v14061_v4  ;;  %9848 = vmatprep.subr.bf16.mxu1 %v14064_v5  ;;  %v14152_v4 = vld [vmem:[%s21022_s1 + $0x9c0] ss:$16 sps:$4 sm:$0xff]   ;;  %v14155_v5 = vld [vmem:[%s21022_s1 + $0x9c8] ss:$16 sps:$4 sm:$0xff]  }
 0x101   :  { %8903 = vmatpush1.bf16.msra.mxu0 %v14059_v6  ;;  %9849 = vmatpush1.bf16.msra.mxu1 %v14062_v7  ;;  %v14160_v6 = vld [vmem:[%s21022_s1 + $0x9e4] ss:$16 sps:$4 sm:$0xff]   ;;  %v14163_v7 = vld [vmem:[%s21022_s1 + $0x9ec] ss:$16 sps:$4 sm:$0xff]  }
 0x102   :  { %8915 = vmatprep.subr.bf16.mxu0 %v14070_v8  ;;  %9861 = vmatprep.subr.bf16.mxu1 %v14073_v9  ;;  %v14158_v8 = vld [vmem:[%s21022_s1 + $0x9e0] ss:$16 sps:$4 sm:$0xff]   ;;  %v14161_v9 = vld [vmem:[%s21022_s1 + $0x9e8] ss:$16 sps:$4 sm:$0xff]  }
 0x104   :  { %8905 = vmatmul.mubr.bf16.vlgmr.msra.gmra.mrb[0].mxu0 %v14065_v10  ;;  %9851 = vmatmul.mubr.bf16.vlgmr.msra.gmra.mrb[0].mxu1 %v14065_v10  ;;  %v14164_v10 = vld [vmem:[%s21021_s0 + $0x20] ss:$176 sps:$4 sm:$0xff]  }
 0x105   :  { %8916 = vmatpush1.bf16.msra.mxu0 %v14068_v11  ;;  %9862 = vmatpush1.bf16.msra.mxu1 %v14071_v12  ;;  %v14169_v11 = vld [vmem:[%s21022_s1 + $0xa04] ss:$16 sps:$4 sm:$0xff]   ;;  %v14172_v12 = vld [vmem:[%s21022_s1 + $0xa0c] ss:$16 sps:$4 sm:$0xff]  }
 0x106   :  { %8917 = vmatprep.subr.bf16.mxu0 %v14076_v13  ;;  %9863 = vmatprep.subr.bf16.mxu1 %v14079_v14  ;;  %v14167_v13 = vld [vmem:[%s21022_s1 + $0xa00] ss:$16 sps:$4 sm:$0xff]   ;;  %v14170_v14 = vld [vmem:[%s21022_s1 + $0xa08] ss:$16 sps:$4 sm:$0xff]  }
 0x107   :  { %8947 = vmatprep.mubr.bf16.mxu0 %v14166_v15  ;;  %9893 = vmatprep.mubr.bf16.mxu1 %v14166_v15  ;;  %v14175_v15 = vld [vmem:[%s21022_s1 + $0xa24] ss:$16 sps:$4 sm:$0xff]  }
 0x109   :  { %8918 = vmatpush1.bf16.msra.mxu0 %v14074_v16  ;;  %9864 = vmatpush1.bf16.msra.mxu1 %v14077_v17  ;;  %v14178_v16 = vld [vmem:[%s21022_s1 + $0xa2c] ss:$16 sps:$4 sm:$0xff]  }
 0x10a   :  { %8919 = vmatprep.subr.bf16.mxu0 %v14082_v18  ;;  %9865 = vmatprep.subr.bf16.mxu1 %v14085_v19  ;;  %v14265_v17 = vld [vmem:[%s21021_s0 + $0x2c] ss:$176 sps:$4 sm:$0xff]   ;;  %v14173_v18 = vld [vmem:[%s21022_s1 + $0xa20] ss:$16 sps:$4 sm:$0xff]   ;;  %v14176_v19 = vld [vmem:[%s21022_s1 + $0xa28] ss:$16 sps:$4 sm:$0xff]  }
 0x10d   :  { %8920 = vmatpush1.bf16.msra.mxu0 %v14080_v20  ;;  %9866 = vmatpush1.bf16.msra.mxu1 %v14083_v21  ;;  %v14181_v20 = vld [vmem:[%s21022_s1 + $0xa44] ss:$16 sps:$4 sm:$0xff]   ;;  %v14184_v21 = vld [vmem:[%s21022_s1 + $0xa4c] ss:$16 sps:$4 sm:$0xff]  }
 0x10e   :  { %8921 = vmatprep.subr.bf16.mxu0 %v14088_v22  ;;  %9867 = vmatprep.subr.bf16.mxu1 %v14091_v23  ;;  %v14179_v22 = vld [vmem:[%s21022_s1 + $0xa40] ss:$16 sps:$4 sm:$0xff]   ;;  %v14182_v23 = vld [vmem:[%s21022_s1 + $0xa48] ss:$16 sps:$4 sm:$0xff]  }
 0x111   :  { %8922 = vmatpush1.bf16.msra.mxu0 %v14086_v24  ;;  %9868 = vmatpush1.bf16.msra.mxu1 %v14089_v25  ;;  %v14187_v24 = vld [vmem:[%s21022_s1 + $0xa64] ss:$16 sps:$4 sm:$0xff]   ;;  %v14190_v25 = vld [vmem:[%s21022_s1 + $0xa6c] ss:$16 sps:$4 sm:$0xff]  }
 0x112   :  { %8923 = vmatprep.subr.bf16.mxu0 %v14094_v26  ;;  %9869 = vmatprep.subr.bf16.mxu1 %v14097_v27  ;;  %v14185_v26 = vld [vmem:[%s21022_s1 + $0xa60] ss:$16 sps:$4 sm:$0xff]   ;;  %v14188_v27 = vld [vmem:[%s21022_s1 + $0xa68] ss:$16 sps:$4 sm:$0xff]  }
 0x115   :  { %8924 = vmatpush1.bf16.msra.mxu0 %v14092_v28  ;;  %9870 = vmatpush1.bf16.msra.mxu1 %v14095_v29  ;;  %v14193_v28 = vld [vmem:[%s21022_s1 + $0xa84] ss:$16 sps:$4 sm:$0xff]   ;;  %v14196_v29 = vld [vmem:[%s21022_s1 + $0xa8c] ss:$16 sps:$4 sm:$0xff]  }
 0x116   :  { %8925 = vmatprep.subr.bf16.mxu0 %v14100_v30  ;;  %9871 = vmatprep.subr.bf16.mxu1 %v14103_v31  ;;  %v14191_v30 = vld [vmem:[%s21022_s1 + $0xa80] ss:$16 sps:$4 sm:$0xff]   ;;  %v14194_v31 = vld [vmem:[%s21022_s1 + $0xa88] ss:$16 sps:$4 sm:$0xff]  }
 0x119   :  { %8926 = vmatpush1.bf16.msra.mxu0 %v14098_v32  ;;  %9872 = vmatpush1.bf16.msra.mxu1 %v14101_v33  ;;  %v14199_v32 = vld [vmem:[%s21022_s1 + $0xaa4] ss:$16 sps:$4 sm:$0xff]   ;;  %v14202_v33 = vld [vmem:[%s21022_s1 + $0xaac] ss:$16 sps:$4 sm:$0xff]  }
 0x11a   :  { %8927 = vmatprep.subr.bf16.mxu0 %v14106_v34  ;;  %9873 = vmatprep.subr.bf16.mxu1 %v14109_v35  ;;  %v14197_v34 = vld [vmem:[%s21022_s1 + $0xaa0] ss:$16 sps:$4 sm:$0xff]   ;;  %v14200_v35 = vld [vmem:[%s21022_s1 + $0xaa8] ss:$16 sps:$4 sm:$0xff]  }
 0x11d   :  { %8928 = vmatpush1.bf16.msra.mxu0 %v14104_v36  ;;  %9874 = vmatpush1.bf16.msra.mxu1 %v14107_v37  ;;  %v14205_v36 = vld [vmem:[%s21022_s1 + $0xac4] ss:$16 sps:$4 sm:$0xff]   ;;  %v14208_v37 = vld [vmem:[%s21022_s1 + $0xacc] ss:$16 sps:$4 sm:$0xff]  }
 0x11e   :  { %8929 = vmatprep.subr.bf16.mxu0 %v14112_v38  ;;  %9875 = vmatprep.subr.bf16.mxu1 %v14115_v39  ;;  %v14203_v38 = vld [vmem:[%s21022_s1 + $0xac0] ss:$16 sps:$4 sm:$0xff]   ;;  %v14206_v39 = vld [vmem:[%s21022_s1 + $0xac8] ss:$16 sps:$4 sm:$0xff]  }
 0x121   :  { %8930 = vmatpush1.bf16.msra.mxu0 %v14110_v40  ;;  %9876 = vmatpush1.bf16.msra.mxu1 %v14113_v41  ;;  %v14211_v40 = vld [vmem:[%s21022_s1 + $0xae4] ss:$16 sps:$4 sm:$0xff]   ;;  %v14214_v41 = vld [vmem:[%s21022_s1 + $0xaec] ss:$16 sps:$4 sm:$0xff]  }
 0x122   :  { %8931 = vmatprep.subr.bf16.mxu0 %v14118_v42  ;;  %9877 = vmatprep.subr.bf16.mxu1 %v14121_v43  ;;  %v14209_v42 = vld [vmem:[%s21022_s1 + $0xae0] ss:$16 sps:$4 sm:$0xff]   ;;  %v14212_v43 = vld [vmem:[%s21022_s1 + $0xae8] ss:$16 sps:$4 sm:$0xff]  }
 0x125   :  { %8932 = vmatpush1.bf16.msra.mxu0 %v14116_v44  ;;  %9878 = vmatpush1.bf16.msra.mxu1 %v14119_v45  ;;  %v14217_v44 = vld [vmem:[%s21022_s1 + $0xb04] ss:$16 sps:$4 sm:$0xff]   ;;  %v14220_v45 = vld [vmem:[%s21022_s1 + $0xb0c] ss:$16 sps:$4 sm:$0xff]  }
 0x126   :  { %8933 = vmatprep.subr.bf16.mxu0 %v14124_v46  ;;  %9879 = vmatprep.subr.bf16.mxu1 %v14127_v47  ;;  %v14215_v46 = vld [vmem:[%s21022_s1 + $0xb00] ss:$16 sps:$4 sm:$0xff]   ;;  %v14218_v47 = vld [vmem:[%s21022_s1 + $0xb08] ss:$16 sps:$4 sm:$0xff]  }
 0x129   :  { %8934 = vmatpush1.bf16.msra.mxu0 %v14122_v48  ;;  %9880 = vmatpush1.bf16.msra.mxu1 %v14125_v49  ;;  %v14223_v48 = vld [vmem:[%s21022_s1 + $0xb24] ss:$16 sps:$4 sm:$0xff]   ;;  %v14226_v49 = vld [vmem:[%s21022_s1 + $0xb2c] ss:$16 sps:$4 sm:$0xff]  }
 0x12a   :  { %8935 = vmatprep.subr.bf16.mxu0 %v14130_v50  ;;  %9881 = vmatprep.subr.bf16.mxu1 %v14133_v51  ;;  %v14221_v50 = vld [vmem:[%s21022_s1 + $0xb20] ss:$16 sps:$4 sm:$0xff]   ;;  %v14224_v51 = vld [vmem:[%s21022_s1 + $0xb28] ss:$16 sps:$4 sm:$0xff]  }
 0x12d   :  { %8936 = vmatpush1.bf16.msra.mxu0 %v14128_v52  ;;  %9882 = vmatpush1.bf16.msra.mxu1 %v14131_v53  ;;  %v14229_v52 = vld [vmem:[%s21022_s1 + $0xb44] ss:$16 sps:$4 sm:$0xff]   ;;  %v14232_v53 = vld [vmem:[%s21022_s1 + $0xb4c] ss:$16 sps:$4 sm:$0xff]  }
 0x12e   :  { %8937 = vmatprep.subr.bf16.mxu0 %v14136_v54  ;;  %9883 = vmatprep.subr.bf16.mxu1 %v14139_v55  ;;  %v14227_v54 = vld [vmem:[%s21022_s1 + $0xb40] ss:$16 sps:$4 sm:$0xff]   ;;  %v14230_v55 = vld [vmem:[%s21022_s1 + $0xb48] ss:$16 sps:$4 sm:$0xff]  }
 0x131   :  { %8938 = vmatpush1.bf16.msra.mxu0 %v14134_v56  ;;  %9884 = vmatpush1.bf16.msra.mxu1 %v14137_v57  ;;  %v14235_v56 = vld [vmem:[%s21022_s1 + $0xb64] ss:$16 sps:$4 sm:$0xff]   ;;  %v14238_v57 = vld [vmem:[%s21022_s1 + $0xb6c] ss:$16 sps:$4 sm:$0xff]  }
 0x132   :  { %8939 = vmatprep.subr.bf16.mxu0 %v14142_v58  ;;  %9885 = vmatprep.subr.bf16.mxu1 %v14145_v59  ;;  %v14233_v58 = vld [vmem:[%s21022_s1 + $0xb60] ss:$16 sps:$4 sm:$0xff]   ;;  %v14236_v59 = vld [vmem:[%s21022_s1 + $0xb68] ss:$16 sps:$4 sm:$0xff]  }
 0x135   :  { %8940 = vmatpush1.bf16.msra.mxu0 %v14140_v60  ;;  %9886 = vmatpush1.bf16.msra.mxu1 %v14143_v61  ;;  %v14241_v60 = vld [vmem:[%s21022_s1 + $0xb84] ss:$16 sps:$4 sm:$0xff]   ;;  %v14244_v61 = vld [vmem:[%s21022_s1 + $0xb8c] ss:$16 sps:$4 sm:$0xff]  }
 0x136   :  { %8941 = vmatprep.subr.bf16.mxu0 %v14148_v62  ;;  %9887 = vmatprep.subr.bf16.mxu1 %v14151_v63  ;;  %v14239_v62 = vld [vmem:[%s21022_s1 + $0xb80] ss:$16 sps:$4 sm:$0xff]   ;;  %v14242_v63 = vld [vmem:[%s21022_s1 + $0xb88] ss:$16 sps:$4 sm:$0xff]  }
 0x139   :  { %8942 = vmatpush1.bf16.msra.mxu0 %v14146_v0  ;;  %9888 = vmatpush1.bf16.msra.mxu1 %v14149_v1  ;;  %v14247_v0 = vld [vmem:[%s21022_s1 + $0xba4] ss:$16 sps:$4 sm:$0xff]   ;;  %v14250_v1 = vld [vmem:[%s21022_s1 + $0xbac] ss:$16 sps:$4 sm:$0xff]  }
 0x13a   :  { %8943 = vmatprep.subr.bf16.mxu0 %v14154_v2  ;;  %9889 = vmatprep.subr.bf16.mxu1 %v14157_v3  ;;  %v14245_v2 = vld [vmem:[%s21022_s1 + $0xba0] ss:$16 sps:$4 sm:$0xff]   ;;  %v14248_v3 = vld [vmem:[%s21022_s1 + $0xba8] ss:$16 sps:$4 sm:$0xff]  }
 0x13d   :  { %8944 = vmatpush1.bf16.msra.mxu0 %v14152_v4  ;;  %9890 = vmatpush1.bf16.msra.mxu1 %v14155_v5  ;;  %v14253_v4 = vld [vmem:[%s21022_s1 + $0xbc4] ss:$16 sps:$4 sm:$0xff]   ;;  %v14256_v5 = vld [vmem:[%s21022_s1 + $0xbcc] ss:$16 sps:$4 sm:$0xff]  }
 0x13e   :  { %8945 = vmatprep.subr.bf16.mxu0 %v14160_v6  ;;  %9891 = vmatprep.subr.bf16.mxu1 %v14163_v7  ;;  %v14251_v6 = vld [vmem:[%s21022_s1 + $0xbc0] ss:$16 sps:$4 sm:$0xff]   ;;  %v14254_v7 = vld [vmem:[%s21022_s1 + $0xbc8] ss:$16 sps:$4 sm:$0xff]  }
 0x141   :  { %8946 = vmatpush1.bf16.msra.mxu0 %v14158_v8  ;;  %9892 = vmatpush1.bf16.msra.mxu1 %v14161_v9  ;;  %v14259_v8 = vld [vmem:[%s21022_s1 + $0xbe4] ss:$16 sps:$4 sm:$0xff]   ;;  %v14262_v9 = vld [vmem:[%s21022_s1 + $0xbec] ss:$16 sps:$4 sm:$0xff]  }
 0x142   :  { %8958 = vmatprep.subr.bf16.mxu0 %v14169_v11  ;;  %9904 = vmatprep.subr.bf16.mxu1 %v14172_v12  ;;  %v14260_v11 = vld [vmem:[%s21022_s1 + $0xbe8] ss:$16 sps:$4 sm:$0xff]  }
 0x143   :  { %v14263_v12 = vld [vmem:[%s21021_s0 + $0x28] ss:$176 sps:$4 sm:$0xff]  }
 0x144   :  { %8948 = vmatmul.mubr.bf16.vlgmr.msra.gmra.mrb[0].mxu0 %v14164_v10  ;;  %9894 = vmatmul.mubr.bf16.vlgmr.msra.gmra.mrb[0].mxu1 %v14164_v10  ;;  %v14257_v10 = vld [vmem:[%s21022_s1 + $0xbe0] ss:$16 sps:$4 sm:$0xff]  }
 0x145   :  { %8959 = vmatpush1.bf16.msra.mxu0 %v14167_v13  ;;  %9905 = vmatpush1.bf16.msra.mxu1 %v14170_v14  ;;  %v14268_v13 = vld [vmem:[%s21022_s1 + $0xc04] ss:$16 sps:$4 sm:$0xff]   ;;  %v14271_v14 = vld [vmem:[%s21022_s1 + $0xc0c] ss:$16 sps:$4 sm:$0xff]  }
 0x146   :  { %8960 = vmatprep.subr.bf16.mxu0 %v14175_v15  ;;  %9906 = vmatprep.subr.bf16.mxu1 %v14178_v16  ;;  %v14266_v15 = vld [vmem:[%s21022_s1 + $0xc00] ss:$16 sps:$4 sm:$0xff]   ;;  %v14269_v16 = vld [vmem:[%s21022_s1 + $0xc08] ss:$16 sps:$4 sm:$0xff]  }
 0x147   :  { %8990 = vmatprep.mubr.bf16.mxu0 %v14265_v17  ;;  %9936 = vmatprep.mubr.bf16.mxu1 %v14265_v17  ;;  %v14274_v17 = vld [vmem:[%s21022_s1 + $0xc24] ss:$16 sps:$4 sm:$0xff]  }
 0x149   :  { %8961 = vmatpush1.bf16.msra.mxu0 %v14173_v18  ;;  %9907 = vmatpush1.bf16.msra.mxu1 %v14176_v19  ;;  %v14277_v18 = vld [vmem:[%s21022_s1 + $0xc2c] ss:$16 sps:$4 sm:$0xff]   ;;  %v14364_v19 = vld [vmem:[%s21021_s0 + $0x34] ss:$176 sps:$4 sm:$0xff]  }
 0x14a   :  { %8962 = vmatprep.subr.bf16.mxu0 %v14181_v20  ;;  %9908 = vmatprep.subr.bf16.mxu1 %v14184_v21  ;;  %v14272_v20 = vld [vmem:[%s21022_s1 + $0xc20] ss:$16 sps:$4 sm:$0xff]   ;;  %v14275_v21 = vld [vmem:[%s21022_s1 + $0xc28] ss:$16 sps:$4 sm:$0xff]  }
 0x14d   :  { %8963 = vmatpush1.bf16.msra.mxu0 %v14179_v22  ;;  %9909 = vmatpush1.bf16.msra.mxu1 %v14182_v23  ;;  %v14280_v22 = vld [vmem:[%s21022_s1 + $0xc44] ss:$16 sps:$4 sm:$0xff]   ;;  %v14283_v23 = vld [vmem:[%s21022_s1 + $0xc4c] ss:$16 sps:$4 sm:$0xff]  }
 0x14e   :  { %8964 = vmatprep.subr.bf16.mxu0 %v14187_v24  ;;  %9910 = vmatprep.subr.bf16.mxu1 %v14190_v25  ;;  %v14278_v24 = vld [vmem:[%s21022_s1 + $0xc40] ss:$16 sps:$4 sm:$0xff]   ;;  %v14281_v25 = vld [vmem:[%s21022_s1 + $0xc48] ss:$16 sps:$4 sm:$0xff]  }
 0x151   :  { %8965 = vmatpush1.bf16.msra.mxu0 %v14185_v26  ;;  %9911 = vmatpush1.bf16.msra.mxu1 %v14188_v27  ;;  %v14286_v26 = vld [vmem:[%s21022_s1 + $0xc64] ss:$16 sps:$4 sm:$0xff]   ;;  %v14289_v27 = vld [vmem:[%s21022_s1 + $0xc6c] ss:$16 sps:$4 sm:$0xff]  }
 0x152   :  { %8966 = vmatprep.subr.bf16.mxu0 %v14193_v28  ;;  %9912 = vmatprep.subr.bf16.mxu1 %v14196_v29  ;;  %v14284_v28 = vld [vmem:[%s21022_s1 + $0xc60] ss:$16 sps:$4 sm:$0xff]   ;;  %v14287_v29 = vld [vmem:[%s21022_s1 + $0xc68] ss:$16 sps:$4 sm:$0xff]  }
 0x155   :  { %8967 = vmatpush1.bf16.msra.mxu0 %v14191_v30  ;;  %9913 = vmatpush1.bf16.msra.mxu1 %v14194_v31  ;;  %v14292_v30 = vld [vmem:[%s21022_s1 + $0xc84] ss:$16 sps:$4 sm:$0xff]   ;;  %v14295_v31 = vld [vmem:[%s21022_s1 + $0xc8c] ss:$16 sps:$4 sm:$0xff]  }
 0x156   :  { %8968 = vmatprep.subr.bf16.mxu0 %v14199_v32  ;;  %9914 = vmatprep.subr.bf16.mxu1 %v14202_v33  ;;  %v14290_v32 = vld [vmem:[%s21022_s1 + $0xc80] ss:$16 sps:$4 sm:$0xff]   ;;  %v14293_v33 = vld [vmem:[%s21022_s1 + $0xc88] ss:$16 sps:$4 sm:$0xff]  }
 0x159   :  { %8969 = vmatpush1.bf16.msra.mxu0 %v14197_v34  ;;  %9915 = vmatpush1.bf16.msra.mxu1 %v14200_v35  ;;  %v14298_v34 = vld [vmem:[%s21022_s1 + $0xca4] ss:$16 sps:$4 sm:$0xff]   ;;  %v14301_v35 = vld [vmem:[%s21022_s1 + $0xcac] ss:$16 sps:$4 sm:$0xff]  }
 0x15a   :  { %8970 = vmatprep.subr.bf16.mxu0 %v14205_v36  ;;  %9916 = vmatprep.subr.bf16.mxu1 %v14208_v37  ;;  %v14296_v36 = vld [vmem:[%s21022_s1 + $0xca0] ss:$16 sps:$4 sm:$0xff]   ;;  %v14299_v37 = vld [vmem:[%s21022_s1 + $0xca8] ss:$16 sps:$4 sm:$0xff]  }
 0x15d   :  { %8971 = vmatpush1.bf16.msra.mxu0 %v14203_v38  ;;  %9917 = vmatpush1.bf16.msra.mxu1 %v14206_v39  ;;  %v14304_v38 = vld [vmem:[%s21022_s1 + $0xcc4] ss:$16 sps:$4 sm:$0xff]   ;;  %v14307_v39 = vld [vmem:[%s21022_s1 + $0xccc] ss:$16 sps:$4 sm:$0xff]  }
 0x15e   :  { %8972 = vmatprep.subr.bf16.mxu0 %v14211_v40  ;;  %9918 = vmatprep.subr.bf16.mxu1 %v14214_v41  ;;  %v14302_v40 = vld [vmem:[%s21022_s1 + $0xcc0] ss:$16 sps:$4 sm:$0xff]   ;;  %v14305_v41 = vld [vmem:[%s21022_s1 + $0xcc8] ss:$16 sps:$4 sm:$0xff]  }
 0x161   :  { %8973 = vmatpush1.bf16.msra.mxu0 %v14209_v42  ;;  %9919 = vmatpush1.bf16.msra.mxu1 %v14212_v43  ;;  %v14310_v42 = vld [vmem:[%s21022_s1 + $0xce4] ss:$16 sps:$4 sm:$0xff]   ;;  %v14313_v43 = vld [vmem:[%s21022_s1 + $0xcec] ss:$16 sps:$4 sm:$0xff]  }
 0x162   :  { %8974 = vmatprep.subr.bf16.mxu0 %v14217_v44  ;;  %9920 = vmatprep.subr.bf16.mxu1 %v14220_v45  ;;  %v14308_v44 = vld [vmem:[%s21022_s1 + $0xce0] ss:$16 sps:$4 sm:$0xff]   ;;  %v14311_v45 = vld [vmem:[%s21022_s1 + $0xce8] ss:$16 sps:$4 sm:$0xff]  }
 0x165   :  { %8975 = vmatpush1.bf16.msra.mxu0 %v14215_v46  ;;  %9921 = vmatpush1.bf16.msra.mxu1 %v14218_v47  ;;  %v14316_v46 = vld [vmem:[%s21022_s1 + $0xd04] ss:$16 sps:$4 sm:$0xff]   ;;  %v14319_v47 = vld [vmem:[%s21022_s1 + $0xd0c] ss:$16 sps:$4 sm:$0xff]  }
 0x166   :  { %8976 = vmatprep.subr.bf16.mxu0 %v14223_v48  ;;  %9922 = vmatprep.subr.bf16.mxu1 %v14226_v49  ;;  %v14314_v48 = vld [vmem:[%s21022_s1 + $0xd00] ss:$16 sps:$4 sm:$0xff]   ;;  %v14317_v49 = vld [vmem:[%s21022_s1 + $0xd08] ss:$16 sps:$4 sm:$0xff]  }
 0x169   :  { %8977 = vmatpush1.bf16.msra.mxu0 %v14221_v50  ;;  %9923 = vmatpush1.bf16.msra.mxu1 %v14224_v51  ;;  %v14322_v50 = vld [vmem:[%s21022_s1 + $0xd24] ss:$16 sps:$4 sm:$0xff]   ;;  %v14325_v51 = vld [vmem:[%s21022_s1 + $0xd2c] ss:$16 sps:$4 sm:$0xff]  }
 0x16a   :  { %8978 = vmatprep.subr.bf16.mxu0 %v14229_v52  ;;  %9924 = vmatprep.subr.bf16.mxu1 %v14232_v53  ;;  %v14320_v52 = vld [vmem:[%s21022_s1 + $0xd20] ss:$16 sps:$4 sm:$0xff]   ;;  %v14323_v53 = vld [vmem:[%s21022_s1 + $0xd28] ss:$16 sps:$4 sm:$0xff]  }
 0x16d   :  { %8979 = vmatpush1.bf16.msra.mxu0 %v14227_v54  ;;  %9925 = vmatpush1.bf16.msra.mxu1 %v14230_v55  ;;  %v14328_v54 = vld [vmem:[%s21022_s1 + $0xd44] ss:$16 sps:$4 sm:$0xff]   ;;  %v14331_v55 = vld [vmem:[%s21022_s1 + $0xd4c] ss:$16 sps:$4 sm:$0xff]  }
 0x16e   :  { %8980 = vmatprep.subr.bf16.mxu0 %v14235_v56  ;;  %9926 = vmatprep.subr.bf16.mxu1 %v14238_v57  ;;  %v14326_v56 = vld [vmem:[%s21022_s1 + $0xd40] ss:$16 sps:$4 sm:$0xff]   ;;  %v14329_v57 = vld [vmem:[%s21022_s1 + $0xd48] ss:$16 sps:$4 sm:$0xff]  }
 0x171   :  { %8981 = vmatpush1.bf16.msra.mxu0 %v14233_v58  ;;  %9927 = vmatpush1.bf16.msra.mxu1 %v14236_v59  ;;  %v14334_v58 = vld [vmem:[%s21022_s1 + $0xd64] ss:$16 sps:$4 sm:$0xff]   ;;  %v14337_v59 = vld [vmem:[%s21022_s1 + $0xd6c] ss:$16 sps:$4 sm:$0xff]  }
 0x172   :  { %8982 = vmatprep.subr.bf16.mxu0 %v14241_v60  ;;  %9928 = vmatprep.subr.bf16.mxu1 %v14244_v61  ;;  %v14332_v60 = vld [vmem:[%s21022_s1 + $0xd60] ss:$16 sps:$4 sm:$0xff]   ;;  %v14335_v61 = vld [vmem:[%s21022_s1 + $0xd68] ss:$16 sps:$4 sm:$0xff]  }
 0x175   :  { %8983 = vmatpush1.bf16.msra.mxu0 %v14239_v62  ;;  %9929 = vmatpush1.bf16.msra.mxu1 %v14242_v63  ;;  %v14340_v62 = vld [vmem:[%s21022_s1 + $0xd84] ss:$16 sps:$4 sm:$0xff]   ;;  %v14343_v63 = vld [vmem:[%s21022_s1 + $0xd8c] ss:$16 sps:$4 sm:$0xff]  }
 0x176   :  { %8984 = vmatprep.subr.bf16.mxu0 %v14247_v0  ;;  %9930 = vmatprep.subr.bf16.mxu1 %v14250_v1  ;;  %v14338_v0 = vld [vmem:[%s21022_s1 + $0xd80] ss:$16 sps:$4 sm:$0xff]   ;;  %v14341_v1 = vld [vmem:[%s21022_s1 + $0xd88] ss:$16 sps:$4 sm:$0xff]  }
 0x179   :  { %8985 = vmatpush1.bf16.msra.mxu0 %v14245_v2  ;;  %9931 = vmatpush1.bf16.msra.mxu1 %v14248_v3  ;;  %v14346_v2 = vld [vmem:[%s21022_s1 + $0xda4] ss:$16 sps:$4 sm:$0xff]   ;;  %v14349_v3 = vld [vmem:[%s21022_s1 + $0xdac] ss:$16 sps:$4 sm:$0xff]  }
 0x17a   :  { %8986 = vmatprep.subr.bf16.mxu0 %v14253_v4  ;;  %9932 = vmatprep.subr.bf16.mxu1 %v14256_v5  ;;  %v14344_v4 = vld [vmem:[%s21022_s1 + $0xda0] ss:$16 sps:$4 sm:$0xff]   ;;  %v14347_v5 = vld [vmem:[%s21022_s1 + $0xda8] ss:$16 sps:$4 sm:$0xff]  }
 0x17d   :  { %8987 = vmatpush1.bf16.msra.mxu0 %v14251_v6  ;;  %9933 = vmatpush1.bf16.msra.mxu1 %v14254_v7  ;;  %v14352_v6 = vld [vmem:[%s21022_s1 + $0xdc4] ss:$16 sps:$4 sm:$0xff]   ;;  %v14355_v7 = vld [vmem:[%s21022_s1 + $0xdcc] ss:$16 sps:$4 sm:$0xff]  }
 0x17e   :  { %8988 = vmatprep.subr.bf16.mxu0 %v14259_v8  ;;  %9934 = vmatprep.subr.bf16.mxu1 %v14262_v9  ;;  %v14350_v8 = vld [vmem:[%s21022_s1 + $0xdc0] ss:$16 sps:$4 sm:$0xff]   ;;  %v14353_v9 = vld [vmem:[%s21022_s1 + $0xdc8] ss:$16 sps:$4 sm:$0xff]  }
 0x181   :  { %8989 = vmatpush1.bf16.msra.mxu0 %v14257_v10  ;;  %9935 = vmatpush1.bf16.msra.mxu1 %v14260_v11  ;;  %v14358_v10 = vld [vmem:[%s21022_s1 + $0xde4] ss:$16 sps:$4 sm:$0xff]   ;;  %v14361_v11 = vld [vmem:[%s21022_s1 + $0xdec] ss:$16 sps:$4 sm:$0xff]  }
 0x182   :  { %9001 = vmatprep.subr.bf16.mxu0 %v14268_v13  ;;  %9947 = vmatprep.subr.bf16.mxu1 %v14271_v14  ;;  %v14359_v13 = vld [vmem:[%s21022_s1 + $0xde8] ss:$16 sps:$4 sm:$0xff]   ;;  %v14362_v14 = vld [vmem:[%s21021_s0 + $0x30] ss:$176 sps:$4 sm:$0xff]  }
 0x184   :  { %8991 = vmatmul.mubr.bf16.vlgmr.msra.gmra.mrb[0].mxu0 %v14263_v12  ;;  %9937 = vmatmul.mubr.bf16.vlgmr.msra.gmra.mrb[0].mxu1 %v14263_v12  ;;  %v14356_v12 = vld [vmem:[%s21022_s1 + $0xde0] ss:$16 sps:$4 sm:$0xff]  }
 0x185   :  { %9002 = vmatpush1.bf16.msra.mxu0 %v14266_v15  ;;  %9948 = vmatpush1.bf16.msra.mxu1 %v14269_v16  ;;  %v14367_v15 = vld [vmem:[%s21022_s1 + $0xe04] ss:$16 sps:$4 sm:$0xff]   ;;  %v14370_v16 = vld [vmem:[%s21022_s1 + $0xe0c] ss:$16 sps:$4 sm:$0xff]  }
 0x186   :  { %9003 = vmatprep.subr.bf16.mxu0 %v14274_v17  ;;  %9949 = vmatprep.subr.bf16.mxu1 %v14277_v18  ;;  %v14365_v17 = vld [vmem:[%s21022_s1 + $0xe00] ss:$16 sps:$4 sm:$0xff]   ;;  %v14368_v18 = vld [vmem:[%s21022_s1 + $0xe08] ss:$16 sps:$4 sm:$0xff]  }
 0x187   :  { %9033 = vmatprep.mubr.bf16.mxu0 %v14364_v19  ;;  %9979 = vmatprep.mubr.bf16.mxu1 %v14364_v19  ;;  %v14373_v19 = vld [vmem:[%s21022_s1 + $0xe24] ss:$16 sps:$4 sm:$0xff]  }
 0x189   :  { %9004 = vmatpush1.bf16.msra.mxu0 %v14272_v20  ;;  %9950 = vmatpush1.bf16.msra.mxu1 %v14275_v21  ;;  %v14376_v20 = vld [vmem:[%s21022_s1 + $0xe2c] ss:$16 sps:$4 sm:$0xff]  }
 0x18a   :  { %9005 = vmatprep.subr.bf16.mxu0 %v14280_v22  ;;  %9951 = vmatprep.subr.bf16.mxu1 %v14283_v23  ;;  %v14463_v21 = vld [vmem:[%s21021_s0 + $0x3c] ss:$176 sps:$4 sm:$0xff]   ;;  %v14371_v22 = vld [vmem:[%s21022_s1 + $0xe20] ss:$16 sps:$4 sm:$0xff]   ;;  %v14374_v23 = vld [vmem:[%s21022_s1 + $0xe28] ss:$16 sps:$4 sm:$0xff]  }
 0x18d   :  { %9006 = vmatpush1.bf16.msra.mxu0 %v14278_v24  ;;  %9952 = vmatpush1.bf16.msra.mxu1 %v14281_v25  ;;  %v14379_v24 = vld [vmem:[%s21022_s1 + $0xe44] ss:$16 sps:$4 sm:$0xff]   ;;  %v14382_v25 = vld [vmem:[%s21022_s1 + $0xe4c] ss:$16 sps:$4 sm:$0xff]  }
 0x18e   :  { %9007 = vmatprep.subr.bf16.mxu0 %v14286_v26  ;;  %9953 = vmatprep.subr.bf16.mxu1 %v14289_v27  ;;  %v14377_v26 = vld [vmem:[%s21022_s1 + $0xe40] ss:$16 sps:$4 sm:$0xff]   ;;  %v14380_v27 = vld [vmem:[%s21022_s1 + $0xe48] ss:$16 sps:$4 sm:$0xff]  }
 0x191   :  { %9008 = vmatpush1.bf16.msra.mxu0 %v14284_v28  ;;  %9954 = vmatpush1.bf16.msra.mxu1 %v14287_v29  ;;  %v14385_v28 = vld [vmem:[%s21022_s1 + $0xe64] ss:$16 sps:$4 sm:$0xff]   ;;  %v14388_v29 = vld [vmem:[%s21022_s1 + $0xe6c] ss:$16 sps:$4 sm:$0xff]  }
 0x192   :  { %9009 = vmatprep.subr.bf16.mxu0 %v14292_v30  ;;  %9955 = vmatprep.subr.bf16.mxu1 %v14295_v31  ;;  %v14383_v30 = vld [vmem:[%s21022_s1 + $0xe60] ss:$16 sps:$4 sm:$0xff]   ;;  %v14386_v31 = vld [vmem:[%s21022_s1 + $0xe68] ss:$16 sps:$4 sm:$0xff]  }
 0x195   :  { %9010 = vmatpush1.bf16.msra.mxu0 %v14290_v32  ;;  %9956 = vmatpush1.bf16.msra.mxu1 %v14293_v33  ;;  %v14391_v32 = vld [vmem:[%s21022_s1 + $0xe84] ss:$16 sps:$4 sm:$0xff]   ;;  %v14394_v33 = vld [vmem:[%s21022_s1 + $0xe8c] ss:$16 sps:$4 sm:$0xff]  }
 0x196   :  { %9011 = vmatprep.subr.bf16.mxu0 %v14298_v34  ;;  %9957 = vmatprep.subr.bf16.mxu1 %v14301_v35  ;;  %v14389_v34 = vld [vmem:[%s21022_s1 + $0xe80] ss:$16 sps:$4 sm:$0xff]   ;;  %v14392_v35 = vld [vmem:[%s21022_s1 + $0xe88] ss:$16 sps:$4 sm:$0xff]  }
 0x199   :  { %9012 = vmatpush1.bf16.msra.mxu0 %v14296_v36  ;;  %9958 = vmatpush1.bf16.msra.mxu1 %v14299_v37  ;;  %v14397_v36 = vld [vmem:[%s21022_s1 + $0xea4] ss:$16 sps:$4 sm:$0xff]   ;;  %v14400_v37 = vld [vmem:[%s21022_s1 + $0xeac] ss:$16 sps:$4 sm:$0xff]  }
 0x19a   :  { %9013 = vmatprep.subr.bf16.mxu0 %v14304_v38  ;;  %9959 = vmatprep.subr.bf16.mxu1 %v14307_v39  ;;  %v14395_v38 = vld [vmem:[%s21022_s1 + $0xea0] ss:$16 sps:$4 sm:$0xff]   ;;  %v14398_v39 = vld [vmem:[%s21022_s1 + $0xea8] ss:$16 sps:$4 sm:$0xff]  }
 0x19d   :  { %9014 = vmatpush1.bf16.msra.mxu0 %v14302_v40  ;;  %9960 = vmatpush1.bf16.msra.mxu1 %v14305_v41  ;;  %v14403_v40 = vld [vmem:[%s21022_s1 + $0xec4] ss:$16 sps:$4 sm:$0xff]   ;;  %v14406_v41 = vld [vmem:[%s21022_s1 + $0xecc] ss:$16 sps:$4 sm:$0xff]  }
 0x19e   :  { %9015 = vmatprep.subr.bf16.mxu0 %v14310_v42  ;;  %9961 = vmatprep.subr.bf16.mxu1 %v14313_v43  ;;  %v14401_v42 = vld [vmem:[%s21022_s1 + $0xec0] ss:$16 sps:$4 sm:$0xff]   ;;  %v14404_v43 = vld [vmem:[%s21022_s1 + $0xec8] ss:$16 sps:$4 sm:$0xff]  }
 0x1a1   :  { %9016 = vmatpush1.bf16.msra.mxu0 %v14308_v44  ;;  %9962 = vmatpush1.bf16.msra.mxu1 %v14311_v45  ;;  %v14409_v44 = vld [vmem:[%s21022_s1 + $0xee4] ss:$16 sps:$4 sm:$0xff]   ;;  %v14412_v45 = vld [vmem:[%s21022_s1 + $0xeec] ss:$16 sps:$4 sm:$0xff]  }
 0x1a2   :  { %9017 = vmatprep.subr.bf16.mxu0 %v14316_v46  ;;  %9963 = vmatprep.subr.bf16.mxu1 %v14319_v47  ;;  %v14407_v46 = vld [vmem:[%s21022_s1 + $0xee0] ss:$16 sps:$4 sm:$0xff]   ;;  %v14410_v47 = vld [vmem:[%s21022_s1 + $0xee8] ss:$16 sps:$4 sm:$0xff]  }
 0x1a5   :  { %9018 = vmatpush1.bf16.msra.mxu0 %v14314_v48  ;;  %9964 = vmatpush1.bf16.msra.mxu1 %v14317_v49  ;;  %v14415_v48 = vld [vmem:[%s21022_s1 + $0xf04] ss:$16 sps:$4 sm:$0xff]   ;;  %v14418_v49 = vld [vmem:[%s21022_s1 + $0xf0c] ss:$16 sps:$4 sm:$0xff]  }
 0x1a6   :  { %9019 = vmatprep.subr.bf16.mxu0 %v14322_v50  ;;  %9965 = vmatprep.subr.bf16.mxu1 %v14325_v51  ;;  %v14413_v50 = vld [vmem:[%s21022_s1 + $0xf00] ss:$16 sps:$4 sm:$0xff]   ;;  %v14416_v51 = vld [vmem:[%s21022_s1 + $0xf08] ss:$16 sps:$4 sm:$0xff]  }
 0x1a9   :  { %9020 = vmatpush1.bf16.msra.mxu0 %v14320_v52  ;;  %9966 = vmatpush1.bf16.msra.mxu1 %v14323_v53  ;;  %v14421_v52 = vld [vmem:[%s21022_s1 + $0xf24] ss:$16 sps:$4 sm:$0xff]   ;;  %v14424_v53 = vld [vmem:[%s21022_s1 + $0xf2c] ss:$16 sps:$4 sm:$0xff]  }
 0x1aa   :  { %9021 = vmatprep.subr.bf16.mxu0 %v14328_v54  ;;  %9967 = vmatprep.subr.bf16.mxu1 %v14331_v55  ;;  %v14419_v54 = vld [vmem:[%s21022_s1 + $0xf20] ss:$16 sps:$4 sm:$0xff]   ;;  %v14422_v55 = vld [vmem:[%s21022_s1 + $0xf28] ss:$16 sps:$4 sm:$0xff]  }
 0x1ad   :  { %9022 = vmatpush1.bf16.msra.mxu0 %v14326_v56  ;;  %9968 = vmatpush1.bf16.msra.mxu1 %v14329_v57  ;;  %v14427_v56 = vld [vmem:[%s21022_s1 + $0xf44] ss:$16 sps:$4 sm:$0xff]   ;;  %v14430_v57 = vld [vmem:[%s21022_s1 + $0xf4c] ss:$16 sps:$4 sm:$0xff]  }
 0x1ae   :  { %9023 = vmatprep.subr.bf16.mxu0 %v14334_v58  ;;  %9969 = vmatprep.subr.bf16.mxu1 %v14337_v59  ;;  %v14425_v58 = vld [vmem:[%s21022_s1 + $0xf40] ss:$16 sps:$4 sm:$0xff]   ;;  %v14428_v59 = vld [vmem:[%s21022_s1 + $0xf48] ss:$16 sps:$4 sm:$0xff]  }
 0x1b1   :  { %9024 = vmatpush1.bf16.msra.mxu0 %v14332_v60  ;;  %9970 = vmatpush1.bf16.msra.mxu1 %v14335_v61  ;;  %v14433_v60 = vld [vmem:[%s21022_s1 + $0xf64] ss:$16 sps:$4 sm:$0xff]   ;;  %v14436_v61 = vld [vmem:[%s21022_s1 + $0xf6c] ss:$16 sps:$4 sm:$0xff]  }
 0x1b2   :  { %9025 = vmatprep.subr.bf16.mxu0 %v14340_v62  ;;  %9971 = vmatprep.subr.bf16.mxu1 %v14343_v63  ;;  %v14431_v62 = vld [vmem:[%s21022_s1 + $0xf60] ss:$16 sps:$4 sm:$0xff]   ;;  %v14434_v63 = vld [vmem:[%s21022_s1 + $0xf68] ss:$16 sps:$4 sm:$0xff]  }
 0x1b5   :  { %9026 = vmatpush1.bf16.msra.mxu0 %v14338_v0  ;;  %9972 = vmatpush1.bf16.msra.mxu1 %v14341_v1  ;;  %v14439_v0 = vld [vmem:[%s21022_s1 + $0xf84] ss:$16 sps:$4 sm:$0xff]   ;;  %v14442_v1 = vld [vmem:[%s21022_s1 + $0xf8c] ss:$16 sps:$4 sm:$0xff]  }
 0x1b6   :  { %9027 = vmatprep.subr.bf16.mxu0 %v14346_v2  ;;  %9973 = vmatprep.subr.bf16.mxu1 %v14349_v3  ;;  %v14437_v2 = vld [vmem:[%s21022_s1 + $0xf80] ss:$16 sps:$4 sm:$0xff]   ;;  %v14440_v3 = vld [vmem:[%s21022_s1 + $0xf88] ss:$16 sps:$4 sm:$0xff]  }
 0x1b9   :  { %9028 = vmatpush1.bf16.msra.mxu0 %v14344_v4  ;;  %9974 = vmatpush1.bf16.msra.mxu1 %v14347_v5  ;;  %v14445_v4 = vld [vmem:[%s21022_s1 + $0xfa4] ss:$16 sps:$4 sm:$0xff]   ;;  %v14448_v5 = vld [vmem:[%s21022_s1 + $0xfac] ss:$16 sps:$4 sm:$0xff]  }
 0x1ba   :  { %9029 = vmatprep.subr.bf16.mxu0 %v14352_v6  ;;  %9975 = vmatprep.subr.bf16.mxu1 %v14355_v7  ;;  %v14443_v6 = vld [vmem:[%s21022_s1 + $0xfa0] ss:$16 sps:$4 sm:$0xff]   ;;  %v14446_v7 = vld [vmem:[%s21022_s1 + $0xfa8] ss:$16 sps:$4 sm:$0xff]  }
 0x1bd   :  { %9030 = vmatpush1.bf16.msra.mxu0 %v14350_v8  ;;  %9976 = vmatpush1.bf16.msra.mxu1 %v14353_v9  ;;  %v14451_v8 = vld [vmem:[%s21022_s1 + $0xfc4] ss:$16 sps:$4 sm:$0xff]   ;;  %v14454_v9 = vld [vmem:[%s21022_s1 + $0xfcc] ss:$16 sps:$4 sm:$0xff]  }
 0x1be   :  { %9031 = vmatprep.subr.bf16.mxu0 %v14358_v10  ;;  %9977 = vmatprep.subr.bf16.mxu1 %v14361_v11  ;;  %v14449_v10 = vld [vmem:[%s21022_s1 + $0xfc0] ss:$16 sps:$4 sm:$0xff]   ;;  %v14452_v11 = vld [vmem:[%s21022_s1 + $0xfc8] ss:$16 sps:$4 sm:$0xff]  }
 0x1c1   :  { %9032 = vmatpush1.bf16.msra.mxu0 %v14356_v12  ;;  %9978 = vmatpush1.bf16.msra.mxu1 %v14359_v13  ;;  %v14457_v12 = vld [vmem:[%s21022_s1 + $0xfe4] ss:$16 sps:$4 sm:$0xff]   ;;  %v14460_v13 = vld [vmem:[%s21022_s1 + $0xfec] ss:$16 sps:$4 sm:$0xff]  }
 0x1c2   :  { %9044 = vmatprep.subr.bf16.mxu0 %v14367_v15  ;;  %9990 = vmatprep.subr.bf16.mxu1 %v14370_v16  ;;  %v14458_v15 = vld [vmem:[%s21022_s1 + $0xfe8] ss:$16 sps:$4 sm:$0xff]  }
 0x1c3   :  { %v14461_v16 = vld [vmem:[%s21021_s0 + $0x38] ss:$176 sps:$4 sm:$0xff]  }
 0x1c4   :  { %9034 = vmatmul.mubr.bf16.vlgmr.msra.gmra.mrb[0].mxu0 %v14362_v14  ;;  %9980 = vmatmul.mubr.bf16.vlgmr.msra.gmra.mrb[0].mxu1 %v14362_v14  ;;  %v14455_v14 = vld [vmem:[%s21022_s1 + $0xfe0] ss:$16 sps:$4 sm:$0xff]  }
 0x1c5   :  { %9045 = vmatpush1.bf16.msra.mxu0 %v14365_v17  ;;  %9991 = vmatpush1.bf16.msra.mxu1 %v14368_v18  ;;  %v14466_v17 = vld [vmem:[%s21022_s1 + $0x1004] ss:$16 sps:$4 sm:$0xff]   ;;  %v14469_v18 = vld [vmem:[%s21022_s1 + $0x100c] ss:$16 sps:$4 sm:$0xff]  }
 0x1c6   :  { %9046 = vmatprep.subr.bf16.mxu0 %v14373_v19  ;;  %9992 = vmatprep.subr.bf16.mxu1 %v14376_v20  ;;  %v14464_v19 = vld [vmem:[%s21022_s1 + $0x1000] ss:$16 sps:$4 sm:$0xff]   ;;  %v14467_v20 = vld [vmem:[%s21022_s1 + $0x1008] ss:$16 sps:$4 sm:$0xff]  }
 0x1c7   :  { %9076 = vmatprep.mubr.bf16.mxu0 %v14463_v21  ;;  %10022 = vmatprep.mubr.bf16.mxu1 %v14463_v21  ;;  %v14472_v21 = vld [vmem:[%s21022_s1 + $0x1024] ss:$16 sps:$4 sm:$0xff]  }
 0x1c9   :  { %9047 = vmatpush1.bf16.msra.mxu0 %v14371_v22  ;;  %9993 = vmatpush1.bf16.msra.mxu1 %v14374_v23  ;;  %v14475_v22 = vld [vmem:[%s21022_s1 + $0x102c] ss:$16 sps:$4 sm:$0xff]   ;;  %v14562_v23 = vld [vmem:[%s21021_s0 + $0x44] ss:$176 sps:$4 sm:$0xff]  }
 0x1ca   :  { %9048 = vmatprep.subr.bf16.mxu0 %v14379_v24  ;;  %9994 = vmatprep.subr.bf16.mxu1 %v14382_v25  ;;  %v14470_v24 = vld [vmem:[%s21022_s1 + $0x1020] ss:$16 sps:$4 sm:$0xff]   ;;  %v14473_v25 = vld [vmem:[%s21022_s1 + $0x1028] ss:$16 sps:$4 sm:$0xff]  }
 0x1cd   :  { %9049 = vmatpush1.bf16.msra.mxu0 %v14377_v26  ;;  %9995 = vmatpush1.bf16.msra.mxu1 %v14380_v27  ;;  %v14478_v26 = vld [vmem:[%s21022_s1 + $0x1044] ss:$16 sps:$4 sm:$0xff]   ;;  %v14481_v27 = vld [vmem:[%s21022_s1 + $0x104c] ss:$16 sps:$4 sm:$0xff]  }
 0x1ce   :  { %9050 = vmatprep.subr.bf16.mxu0 %v14385_v28  ;;  %9996 = vmatprep.subr.bf16.mxu1 %v14388_v29  ;;  %v14476_v28 = vld [vmem:[%s21022_s1 + $0x1040] ss:$16 sps:$4 sm:$0xff]   ;;  %v14479_v29 = vld [vmem:[%s21022_s1 + $0x1048] ss:$16 sps:$4 sm:$0xff]  }
 0x1d1   :  { %9051 = vmatpush1.bf16.msra.mxu0 %v14383_v30  ;;  %9997 = vmatpush1.bf16.msra.mxu1 %v14386_v31  ;;  %v14484_v30 = vld [vmem:[%s21022_s1 + $0x1064] ss:$16 sps:$4 sm:$0xff]   ;;  %v14487_v31 = vld [vmem:[%s21022_s1 + $0x106c] ss:$16 sps:$4 sm:$0xff]  }
 0x1d2   :  { %9052 = vmatprep.subr.bf16.mxu0 %v14391_v32  ;;  %9998 = vmatprep.subr.bf16.mxu1 %v14394_v33  ;;  %v14482_v32 = vld [vmem:[%s21022_s1 + $0x1060] ss:$16 sps:$4 sm:$0xff]   ;;  %v14485_v33 = vld [vmem:[%s21022_s1 + $0x1068] ss:$16 sps:$4 sm:$0xff]  }
 0x1d5   :  { %9053 = vmatpush1.bf16.msra.mxu0 %v14389_v34  ;;  %9999 = vmatpush1.bf16.msra.mxu1 %v14392_v35  ;;  %v14490_v34 = vld [vmem:[%s21022_s1 + $0x1084] ss:$16 sps:$4 sm:$0xff]   ;;  %v14493_v35 = vld [vmem:[%s21022_s1 + $0x108c] ss:$16 sps:$4 sm:$0xff]  }
 0x1d6   :  { %9054 = vmatprep.subr.bf16.mxu0 %v14397_v36  ;;  %10000 = vmatprep.subr.bf16.mxu1 %v14400_v37  ;;  %v14488_v36 = vld [vmem:[%s21022_s1 + $0x1080] ss:$16 sps:$4 sm:$0xff]   ;;  %v14491_v37 = vld [vmem:[%s21022_s1 + $0x1088] ss:$16 sps:$4 sm:$0xff]  }
 0x1d9   :  { %9055 = vmatpush1.bf16.msra.mxu0 %v14395_v38  ;;  %10001 = vmatpush1.bf16.msra.mxu1 %v14398_v39  ;;  %v14496_v38 = vld [vmem:[%s21022_s1 + $0x10a4] ss:$16 sps:$4 sm:$0xff]   ;;  %v14499_v39 = vld [vmem:[%s21022_s1 + $0x10ac] ss:$16 sps:$4 sm:$0xff]  }
 0x1da   :  { %9056 = vmatprep.subr.bf16.mxu0 %v14403_v40  ;;  %10002 = vmatprep.subr.bf16.mxu1 %v14406_v41  ;;  %v14494_v40 = vld [vmem:[%s21022_s1 + $0x10a0] ss:$16 sps:$4 sm:$0xff]   ;;  %v14497_v41 = vld [vmem:[%s21022_s1 + $0x10a8] ss:$16 sps:$4 sm:$0xff]  }
 0x1dd   :  { %9057 = vmatpush1.bf16.msra.mxu0 %v14401_v42  ;;  %10003 = vmatpush1.bf16.msra.mxu1 %v14404_v43  ;;  %v14502_v42 = vld [vmem:[%s21022_s1 + $0x10c4] ss:$16 sps:$4 sm:$0xff]   ;;  %v14505_v43 = vld [vmem:[%s21022_s1 + $0x10cc] ss:$16 sps:$4 sm:$0xff]  }
 0x1de   :  { %9058 = vmatprep.subr.bf16.mxu0 %v14409_v44  ;;  %10004 = vmatprep.subr.bf16.mxu1 %v14412_v45  ;;  %v14500_v44 = vld [vmem:[%s21022_s1 + $0x10c0] ss:$16 sps:$4 sm:$0xff]   ;;  %v14503_v45 = vld [vmem:[%s21022_s1 + $0x10c8] ss:$16 sps:$4 sm:$0xff]  }
 0x1e1   :  { %9059 = vmatpush1.bf16.msra.mxu0 %v14407_v46  ;;  %10005 = vmatpush1.bf16.msra.mxu1 %v14410_v47  ;;  %v14508_v46 = vld [vmem:[%s21022_s1 + $0x10e4] ss:$16 sps:$4 sm:$0xff]   ;;  %v14511_v47 = vld [vmem:[%s21022_s1 + $0x10ec] ss:$16 sps:$4 sm:$0xff]  }
 0x1e2   :  { %9060 = vmatprep.subr.bf16.mxu0 %v14415_v48  ;;  %10006 = vmatprep.subr.bf16.mxu1 %v14418_v49  ;;  %v14506_v48 = vld [vmem:[%s21022_s1 + $0x10e0] ss:$16 sps:$4 sm:$0xff]   ;;  %v14509_v49 = vld [vmem:[%s21022_s1 + $0x10e8] ss:$16 sps:$4 sm:$0xff]  }
 0x1e5   :  { %9061 = vmatpush1.bf16.msra.mxu0 %v14413_v50  ;;  %10007 = vmatpush1.bf16.msra.mxu1 %v14416_v51  ;;  %v14514_v50 = vld [vmem:[%s21022_s1 + $0x1104] ss:$16 sps:$4 sm:$0xff]   ;;  %v14517_v51 = vld [vmem:[%s21022_s1 + $0x110c] ss:$16 sps:$4 sm:$0xff]  }
 0x1e6   :  { %9062 = vmatprep.subr.bf16.mxu0 %v14421_v52  ;;  %10008 = vmatprep.subr.bf16.mxu1 %v14424_v53  ;;  %v14512_v52 = vld [vmem:[%s21022_s1 + $0x1100] ss:$16 sps:$4 sm:$0xff]   ;;  %v14515_v53 = vld [vmem:[%s21022_s1 + $0x1108] ss:$16 sps:$4 sm:$0xff]  }
 0x1e9   :  { %9063 = vmatpush1.bf16.msra.mxu0 %v14419_v54  ;;  %10009 = vmatpush1.bf16.msra.mxu1 %v14422_v55  ;;  %v14520_v54 = vld [vmem:[%s21022_s1 + $0x1124] ss:$16 sps:$4 sm:$0xff]   ;;  %v14523_v55 = vld [vmem:[%s21022_s1 + $0x112c] ss:$16 sps:$4 sm:$0xff]  }
 0x1ea   :  { %9064 = vmatprep.subr.bf16.mxu0 %v14427_v56  ;;  %10010 = vmatprep.subr.bf16.mxu1 %v14430_v57  ;;  %v14518_v56 = vld [vmem:[%s21022_s1 + $0x1120] ss:$16 sps:$4 sm:$0xff]   ;;  %v14521_v57 = vld [vmem:[%s21022_s1 + $0x1128] ss:$16 sps:$4 sm:$0xff]  }
 0x1ed   :  { %9065 = vmatpush1.bf16.msra.mxu0 %v14425_v58  ;;  %10011 = vmatpush1.bf16.msra.mxu1 %v14428_v59  ;;  %v14526_v58 = vld [vmem:[%s21022_s1 + $0x1144] ss:$16 sps:$4 sm:$0xff]   ;;  %v14529_v59 = vld [vmem:[%s21022_s1 + $0x114c] ss:$16 sps:$4 sm:$0xff]  }
 0x1ee   :  { %9066 = vmatprep.subr.bf16.mxu0 %v14433_v60  ;;  %10012 = vmatprep.subr.bf16.mxu1 %v14436_v61  ;;  %v14524_v60 = vld [vmem:[%s21022_s1 + $0x1140] ss:$16 sps:$4 sm:$0xff]   ;;  %v14527_v61 = vld [vmem:[%s21022_s1 + $0x1148] ss:$16 sps:$4 sm:$0xff]  }
 0x1f1   :  { %9067 = vmatpush1.bf16.msra.mxu0 %v14431_v62  ;;  %10013 = vmatpush1.bf16.msra.mxu1 %v14434_v63  ;;  %v14532_v62 = vld [vmem:[%s21022_s1 + $0x1164] ss:$16 sps:$4 sm:$0xff]   ;;  %v14535_v63 = vld [vmem:[%s21022_s1 + $0x116c] ss:$16 sps:$4 sm:$0xff]  }
 0x1f2   :  { %9068 = vmatprep.subr.bf16.mxu0 %v14439_v0  ;;  %10014 = vmatprep.subr.bf16.mxu1 %v14442_v1  ;;  %v14530_v0 = vld [vmem:[%s21022_s1 + $0x1160] ss:$16 sps:$4 sm:$0xff]   ;;  %v14533_v1 = vld [vmem:[%s21022_s1 + $0x1168] ss:$16 sps:$4 sm:$0xff]  }
 0x1f5   :  { %9069 = vmatpush1.bf16.msra.mxu0 %v14437_v2  ;;  %10015 = vmatpush1.bf16.msra.mxu1 %v14440_v3  ;;  %v14538_v2 = vld [vmem:[%s21022_s1 + $0x1184] ss:$16 sps:$4 sm:$0xff]   ;;  %v14541_v3 = vld [vmem:[%s21022_s1 + $0x118c] ss:$16 sps:$4 sm:$0xff]  }
 0x1f6   :  { %9070 = vmatprep.subr.bf16.mxu0 %v14445_v4  ;;  %10016 = vmatprep.subr.bf16.mxu1 %v14448_v5  ;;  %v14536_v4 = vld [vmem:[%s21022_s1 + $0x1180] ss:$16 sps:$4 sm:$0xff]   ;;  %v14539_v5 = vld [vmem:[%s21022_s1 + $0x1188] ss:$16 sps:$4 sm:$0xff]  }
 0x1f9   :  { %9071 = vmatpush1.bf16.msra.mxu0 %v14443_v6  ;;  %10017 = vmatpush1.bf16.msra.mxu1 %v14446_v7  ;;  %v14544_v6 = vld [vmem:[%s21022_s1 + $0x11a4] ss:$16 sps:$4 sm:$0xff]   ;;  %v14547_v7 = vld [vmem:[%s21022_s1 + $0x11ac] ss:$16 sps:$4 sm:$0xff]  }
 0x1fa   :  { %9072 = vmatprep.subr.bf16.mxu0 %v14451_v8  ;;  %10018 = vmatprep.subr.bf16.mxu1 %v14454_v9  ;;  %v14542_v8 = vld [vmem:[%s21022_s1 + $0x11a0] ss:$16 sps:$4 sm:$0xff]   ;;  %v14545_v9 = vld [vmem:[%s21022_s1 + $0x11a8] ss:$16 sps:$4 sm:$0xff]  }
 0x1fd   :  { %9073 = vmatpush1.bf16.msra.mxu0 %v14449_v10  ;;  %10019 = vmatpush1.bf16.msra.mxu1 %v14452_v11  ;;  %v14550_v10 = vld [vmem:[%s21022_s1 + $0x11c4] ss:$16 sps:$4 sm:$0xff]   ;;  %v14553_v11 = vld [vmem:[%s21022_s1 + $0x11cc] ss:$16 sps:$4 sm:$0xff]  }
 0x1fe   :  { %9074 = vmatprep.subr.bf16.mxu0 %v14457_v12  ;;  %10020 = vmatprep.subr.bf16.mxu1 %v14460_v13  ;;  %v14548_v12 = vld [vmem:[%s21022_s1 + $0x11c0] ss:$16 sps:$4 sm:$0xff]   ;;  %v14551_v13 = vld [vmem:[%s21022_s1 + $0x11c8] ss:$16 sps:$4 sm:$0xff]  }
 0x201   :  { %9075 = vmatpush1.bf16.msra.mxu0 %v14455_v14  ;;  %10021 = vmatpush1.bf16.msra.mxu1 %v14458_v15  ;;  %v14556_v14 = vld [vmem:[%s21022_s1 + $0x11e4] ss:$16 sps:$4 sm:$0xff]   ;;  %v14559_v15 = vld [vmem:[%s21022_s1 + $0x11ec] ss:$16 sps:$4 sm:$0xff]  }
 0x202   :  { %9087 = vmatprep.subr.bf16.mxu0 %v14466_v17  ;;  %10033 = vmatprep.subr.bf16.mxu1 %v14469_v18  ;;  %v14557_v17 = vld [vmem:[%s21022_s1 + $0x11e8] ss:$16 sps:$4 sm:$0xff]   ;;  %v14560_v18 = vld [vmem:[%s21021_s0 + $0x40] ss:$176 sps:$4 sm:$0xff]  }
 0x204   :  { %9077 = vmatmul.mubr.bf16.vlgmr.msra.gmra.mrb[0].mxu0 %v14461_v16  ;;  %10023 = vmatmul.mubr.bf16.vlgmr.msra.gmra.mrb[0].mxu1 %v14461_v16  ;;  %v14554_v16 = vld [vmem:[%s21022_s1 + $0x11e0] ss:$16 sps:$4 sm:$0xff]  }
 0x205   :  { %9088 = vmatpush1.bf16.msra.mxu0 %v14464_v19  ;;  %10034 = vmatpush1.bf16.msra.mxu1 %v14467_v20  ;;  %v14565_v19 = vld [vmem:[%s21022_s1 + $0x1204] ss:$16 sps:$4 sm:$0xff]   ;;  %v14568_v20 = vld [vmem:[%s21022_s1 + $0x120c] ss:$16 sps:$4 sm:$0xff]  }
 0x206   :  { %9089 = vmatprep.subr.bf16.mxu0 %v14472_v21  ;;  %10035 = vmatprep.subr.bf16.mxu1 %v14475_v22  ;;  %v14563_v21 = vld [vmem:[%s21022_s1 + $0x1200] ss:$16 sps:$4 sm:$0xff]   ;;  %v14566_v22 = vld [vmem:[%s21022_s1 + $0x1208] ss:$16 sps:$4 sm:$0xff]  }
 0x207   :  { %9119 = vmatprep.mubr.bf16.mxu0 %v14562_v23  ;;  %10065 = vmatprep.mubr.bf16.mxu1 %v14562_v23  ;;  %v14571_v23 = vld [vmem:[%s21022_s1 + $0x1224] ss:$16 sps:$4 sm:$0xff]  }
 0x209   :  { %9090 = vmatpush1.bf16.msra.mxu0 %v14470_v24  ;;  %10036 = vmatpush1.bf16.msra.mxu1 %v14473_v25  ;;  %v14574_v24 = vld [vmem:[%s21022_s1 + $0x122c] ss:$16 sps:$4 sm:$0xff]  }
 0x20a   :  { %9091 = vmatprep.subr.bf16.mxu0 %v14478_v26  ;;  %10037 = vmatprep.subr.bf16.mxu1 %v14481_v27  ;;  %v14661_v25 = vld [vmem:[%s21021_s0 + $0x4c] ss:$176 sps:$4 sm:$0xff]   ;;  %v14569_v26 = vld [vmem:[%s21022_s1 + $0x1220] ss:$16 sps:$4 sm:$0xff]   ;;  %v14572_v27 = vld [vmem:[%s21022_s1 + $0x1228] ss:$16 sps:$4 sm:$0xff]  }
 0x20d   :  { %9092 = vmatpush1.bf16.msra.mxu0 %v14476_v28  ;;  %10038 = vmatpush1.bf16.msra.mxu1 %v14479_v29  ;;  %v14577_v28 = vld [vmem:[%s21022_s1 + $0x1244] ss:$16 sps:$4 sm:$0xff]   ;;  %v14580_v29 = vld [vmem:[%s21022_s1 + $0x124c] ss:$16 sps:$4 sm:$0xff]  }
 0x20e   :  { %9093 = vmatprep.subr.bf16.mxu0 %v14484_v30  ;;  %10039 = vmatprep.subr.bf16.mxu1 %v14487_v31  ;;  %v14575_v30 = vld [vmem:[%s21022_s1 + $0x1240] ss:$16 sps:$4 sm:$0xff]   ;;  %v14578_v31 = vld [vmem:[%s21022_s1 + $0x1248] ss:$16 sps:$4 sm:$0xff]  }
 0x211   :  { %9094 = vmatpush1.bf16.msra.mxu0 %v14482_v32  ;;  %10040 = vmatpush1.bf16.msra.mxu1 %v14485_v33  ;;  %v14583_v32 = vld [vmem:[%s21022_s1 + $0x1264] ss:$16 sps:$4 sm:$0xff]   ;;  %v14586_v33 = vld [vmem:[%s21022_s1 + $0x126c] ss:$16 sps:$4 sm:$0xff]  }
 0x212   :  { %9095 = vmatprep.subr.bf16.mxu0 %v14490_v34  ;;  %10041 = vmatprep.subr.bf16.mxu1 %v14493_v35  ;;  %v14581_v34 = vld [vmem:[%s21022_s1 + $0x1260] ss:$16 sps:$4 sm:$0xff]   ;;  %v14584_v35 = vld [vmem:[%s21022_s1 + $0x1268] ss:$16 sps:$4 sm:$0xff]  }
 0x215   :  { %9096 = vmatpush1.bf16.msra.mxu0 %v14488_v36  ;;  %10042 = vmatpush1.bf16.msra.mxu1 %v14491_v37  ;;  %v14589_v36 = vld [vmem:[%s21022_s1 + $0x1284] ss:$16 sps:$4 sm:$0xff]   ;;  %v14592_v37 = vld [vmem:[%s21022_s1 + $0x128c] ss:$16 sps:$4 sm:$0xff]  }
 0x216   :  { %9097 = vmatprep.subr.bf16.mxu0 %v14496_v38  ;;  %10043 = vmatprep.subr.bf16.mxu1 %v14499_v39  ;;  %v14587_v38 = vld [vmem:[%s21022_s1 + $0x1280] ss:$16 sps:$4 sm:$0xff]   ;;  %v14590_v39 = vld [vmem:[%s21022_s1 + $0x1288] ss:$16 sps:$4 sm:$0xff]  }
 0x219   :  { %9098 = vmatpush1.bf16.msra.mxu0 %v14494_v40  ;;  %10044 = vmatpush1.bf16.msra.mxu1 %v14497_v41  ;;  %v14595_v40 = vld [vmem:[%s21022_s1 + $0x12a4] ss:$16 sps:$4 sm:$0xff]   ;;  %v14598_v41 = vld [vmem:[%s21022_s1 + $0x12ac] ss:$16 sps:$4 sm:$0xff]  }
 0x21a   :  { %9099 = vmatprep.subr.bf16.mxu0 %v14502_v42  ;;  %10045 = vmatprep.subr.bf16.mxu1 %v14505_v43  ;;  %v14593_v42 = vld [vmem:[%s21022_s1 + $0x12a0] ss:$16 sps:$4 sm:$0xff]   ;;  %v14596_v43 = vld [vmem:[%s21022_s1 + $0x12a8] ss:$16 sps:$4 sm:$0xff]  }
 0x21d   :  { %9100 = vmatpush1.bf16.msra.mxu0 %v14500_v44  ;;  %10046 = vmatpush1.bf16.msra.mxu1 %v14503_v45  ;;  %v14601_v44 = vld [vmem:[%s21022_s1 + $0x12c4] ss:$16 sps:$4 sm:$0xff]   ;;  %v14604_v45 = vld [vmem:[%s21022_s1 + $0x12cc] ss:$16 sps:$4 sm:$0xff]  }
 0x21e   :  { %9101 = vmatprep.subr.bf16.mxu0 %v14508_v46  ;;  %10047 = vmatprep.subr.bf16.mxu1 %v14511_v47  ;;  %v14599_v46 = vld [vmem:[%s21022_s1 + $0x12c0] ss:$16 sps:$4 sm:$0xff]   ;;  %v14602_v47 = vld [vmem:[%s21022_s1 + $0x12c8] ss:$16 sps:$4 sm:$0xff]  }
 0x221   :  { %9102 = vmatpush1.bf16.msra.mxu0 %v14506_v48  ;;  %10048 = vmatpush1.bf16.msra.mxu1 %v14509_v49  ;;  %v14607_v48 = vld [vmem:[%s21022_s1 + $0x12e4] ss:$16 sps:$4 sm:$0xff]   ;;  %v14610_v49 = vld [vmem:[%s21022_s1 + $0x12ec] ss:$16 sps:$4 sm:$0xff]  }
 0x222   :  { %9103 = vmatprep.subr.bf16.mxu0 %v14514_v50  ;;  %10049 = vmatprep.subr.bf16.mxu1 %v14517_v51  ;;  %v14605_v50 = vld [vmem:[%s21022_s1 + $0x12e0] ss:$16 sps:$4 sm:$0xff]   ;;  %v14608_v51 = vld [vmem:[%s21022_s1 + $0x12e8] ss:$16 sps:$4 sm:$0xff]  }
 0x225   :  { %9104 = vmatpush1.bf16.msra.mxu0 %v14512_v52  ;;  %10050 = vmatpush1.bf16.msra.mxu1 %v14515_v53  ;;  %v14613_v52 = vld [vmem:[%s21022_s1 + $0x1304] ss:$16 sps:$4 sm:$0xff]   ;;  %v14616_v53 = vld [vmem:[%s21022_s1 + $0x130c] ss:$16 sps:$4 sm:$0xff]  }
 0x226   :  { %9105 = vmatprep.subr.bf16.mxu0 %v14520_v54  ;;  %10051 = vmatprep.subr.bf16.mxu1 %v14523_v55  ;;  %v14611_v54 = vld [vmem:[%s21022_s1 + $0x1300] ss:$16 sps:$4 sm:$0xff]   ;;  %v14614_v55 = vld [vmem:[%s21022_s1 + $0x1308] ss:$16 sps:$4 sm:$0xff]  }
 0x229   :  { %9106 = vmatpush1.bf16.msra.mxu0 %v14518_v56  ;;  %10052 = vmatpush1.bf16.msra.mxu1 %v14521_v57  ;;  %v14619_v56 = vld [vmem:[%s21022_s1 + $0x1324] ss:$16 sps:$4 sm:$0xff]   ;;  %v14622_v57 = vld [vmem:[%s21022_s1 + $0x132c] ss:$16 sps:$4 sm:$0xff]  }
 0x22a   :  { %9107 = vmatprep.subr.bf16.mxu0 %v14526_v58  ;;  %10053 = vmatprep.subr.bf16.mxu1 %v14529_v59  ;;  %v14617_v58 = vld [vmem:[%s21022_s1 + $0x1320] ss:$16 sps:$4 sm:$0xff]   ;;  %v14620_v59 = vld [vmem:[%s21022_s1 + $0x1328] ss:$16 sps:$4 sm:$0xff]  }
 0x22d   :  { %9108 = vmatpush1.bf16.msra.mxu0 %v14524_v60  ;;  %10054 = vmatpush1.bf16.msra.mxu1 %v14527_v61  ;;  %v14625_v60 = vld [vmem:[%s21022_s1 + $0x1344] ss:$16 sps:$4 sm:$0xff]   ;;  %v14628_v61 = vld [vmem:[%s21022_s1 + $0x134c] ss:$16 sps:$4 sm:$0xff]  }
 0x22e   :  { %9109 = vmatprep.subr.bf16.mxu0 %v14532_v62  ;;  %10055 = vmatprep.subr.bf16.mxu1 %v14535_v63  ;;  %v14623_v62 = vld [vmem:[%s21022_s1 + $0x1340] ss:$16 sps:$4 sm:$0xff]   ;;  %v14626_v63 = vld [vmem:[%s21022_s1 + $0x1348] ss:$16 sps:$4 sm:$0xff]  }
 0x231   :  { %9110 = vmatpush1.bf16.msra.mxu0 %v14530_v0  ;;  %10056 = vmatpush1.bf16.msra.mxu1 %v14533_v1  ;;  %v14631_v0 = vld [vmem:[%s21022_s1 + $0x1364] ss:$16 sps:$4 sm:$0xff]   ;;  %v14634_v1 = vld [vmem:[%s21022_s1 + $0x136c] ss:$16 sps:$4 sm:$0xff]  }
 0x232   :  { %9111 = vmatprep.subr.bf16.mxu0 %v14538_v2  ;;  %10057 = vmatprep.subr.bf16.mxu1 %v14541_v3  ;;  %v14629_v2 = vld [vmem:[%s21022_s1 + $0x1360] ss:$16 sps:$4 sm:$0xff]   ;;  %v14632_v3 = vld [vmem:[%s21022_s1 + $0x1368] ss:$16 sps:$4 sm:$0xff]  }
 0x235   :  { %9112 = vmatpush1.bf16.msra.mxu0 %v14536_v4  ;;  %10058 = vmatpush1.bf16.msra.mxu1 %v14539_v5  ;;  %v14637_v4 = vld [vmem:[%s21022_s1 + $0x1384] ss:$16 sps:$4 sm:$0xff]   ;;  %v14640_v5 = vld [vmem:[%s21022_s1 + $0x138c] ss:$16 sps:$4 sm:$0xff]  }
 0x236   :  { %9113 = vmatprep.subr.bf16.mxu0 %v14544_v6  ;;  %10059 = vmatprep.subr.bf16.mxu1 %v14547_v7  ;;  %v14635_v6 = vld [vmem:[%s21022_s1 + $0x1380] ss:$16 sps:$4 sm:$0xff]   ;;  %v14638_v7 = vld [vmem:[%s21022_s1 + $0x1388] ss:$16 sps:$4 sm:$0xff]  }
 0x239   :  { %9114 = vmatpush1.bf16.msra.mxu0 %v14542_v8  ;;  %10060 = vmatpush1.bf16.msra.mxu1 %v14545_v9  ;;  %v14643_v8 = vld [vmem:[%s21022_s1 + $0x13a4] ss:$16 sps:$4 sm:$0xff]   ;;  %v14646_v9 = vld [vmem:[%s21022_s1 + $0x13ac] ss:$16 sps:$4 sm:$0xff]  }
 0x23a   :  { %9115 = vmatprep.subr.bf16.mxu0 %v14550_v10  ;;  %10061 = vmatprep.subr.bf16.mxu1 %v14553_v11  ;;  %v14641_v10 = vld [vmem:[%s21022_s1 + $0x13a0] ss:$16 sps:$4 sm:$0xff]   ;;  %v14644_v11 = vld [vmem:[%s21022_s1 + $0x13a8] ss:$16 sps:$4 sm:$0xff]  }
 0x23d   :  { %9116 = vmatpush1.bf16.msra.mxu0 %v14548_v12  ;;  %10062 = vmatpush1.bf16.msra.mxu1 %v14551_v13  ;;  %v14649_v12 = vld [vmem:[%s21022_s1 + $0x13c4] ss:$16 sps:$4 sm:$0xff]   ;;  %v14652_v13 = vld [vmem:[%s21022_s1 + $0x13cc] ss:$16 sps:$4 sm:$0xff]  }
 0x23e   :  { %9117 = vmatprep.subr.bf16.mxu0 %v14556_v14  ;;  %10063 = vmatprep.subr.bf16.mxu1 %v14559_v15  ;;  %v14647_v14 = vld [vmem:[%s21022_s1 + $0x13c0] ss:$16 sps:$4 sm:$0xff]   ;;  %v14650_v15 = vld [vmem:[%s21022_s1 + $0x13c8] ss:$16 sps:$4 sm:$0xff]  }
 0x241   :  { %9118 = vmatpush1.bf16.msra.mxu0 %v14554_v16  ;;  %10064 = vmatpush1.bf16.msra.mxu1 %v14557_v17  ;;  %v14655_v16 = vld [vmem:[%s21022_s1 + $0x13e4] ss:$16 sps:$4 sm:$0xff]   ;;  %v14658_v17 = vld [vmem:[%s21022_s1 + $0x13ec] ss:$16 sps:$4 sm:$0xff]  }
 0x242   :  { %9130 = vmatprep.subr.bf16.mxu0 %v14565_v19  ;;  %10076 = vmatprep.subr.bf16.mxu1 %v14568_v20  ;;  %v14656_v19 = vld [vmem:[%s21022_s1 + $0x13e8] ss:$16 sps:$4 sm:$0xff]  }
 0x243   :  { %v14659_v20 = vld [vmem:[%s21021_s0 + $0x48] ss:$176 sps:$4 sm:$0xff]  }
 0x244   :  { %9120 = vmatmul.mubr.bf16.vlgmr.msra.gmra.mrb[0].mxu0 %v14560_v18  ;;  %10066 = vmatmul.mubr.bf16.vlgmr.msra.gmra.mrb[0].mxu1 %v14560_v18  ;;  %v14653_v18 = vld [vmem:[%s21022_s1 + $0x13e0] ss:$16 sps:$4 sm:$0xff]  }
 0x245   :  { %9131 = vmatpush1.bf16.msra.mxu0 %v14563_v21  ;;  %10077 = vmatpush1.bf16.msra.mxu1 %v14566_v22  ;;  %v14664_v21 = vld [vmem:[%s21022_s1 + $0x1404] ss:$16 sps:$4 sm:$0xff]   ;;  %v14667_v22 = vld [vmem:[%s21022_s1 + $0x140c] ss:$16 sps:$4 sm:$0xff]  }
 0x246   :  { %9132 = vmatprep.subr.bf16.mxu0 %v14571_v23  ;;  %10078 = vmatprep.subr.bf16.mxu1 %v14574_v24  ;;  %v14662_v23 = vld [vmem:[%s21022_s1 + $0x1400] ss:$16 sps:$4 sm:$0xff]   ;;  %v14665_v24 = vld [vmem:[%s21022_s1 + $0x1408] ss:$16 sps:$4 sm:$0xff]  }
 0x247   :  { %9162 = vmatprep.mubr.bf16.mxu0 %v14661_v25  ;;  %10108 = vmatprep.mubr.bf16.mxu1 %v14661_v25  ;;  %v14670_v25 = vld [vmem:[%s21022_s1 + $0x1424] ss:$16 sps:$4 sm:$0xff]  }
 0x249   :  { %9133 = vmatpush1.bf16.msra.mxu0 %v14569_v26  ;;  %10079 = vmatpush1.bf16.msra.mxu1 %v14572_v27  ;;  %v14673_v26 = vld [vmem:[%s21022_s1 + $0x142c] ss:$16 sps:$4 sm:$0xff]   ;;  %v14760_v27 = vld [vmem:[%s21021_s0 + $0x54] ss:$176 sps:$4 sm:$0xff]  }
 0x24a   :  { %9134 = vmatprep.subr.bf16.mxu0 %v14577_v28  ;;  %10080 = vmatprep.subr.bf16.mxu1 %v14580_v29  ;;  %v14668_v28 = vld [vmem:[%s21022_s1 + $0x1420] ss:$16 sps:$4 sm:$0xff]   ;;  %v14671_v29 = vld [vmem:[%s21022_s1 + $0x1428] ss:$16 sps:$4 sm:$0xff]  }
 0x24d   :  { %9135 = vmatpush1.bf16.msra.mxu0 %v14575_v30  ;;  %10081 = vmatpush1.bf16.msra.mxu1 %v14578_v31  ;;  %v14676_v30 = vld [vmem:[%s21022_s1 + $0x1444] ss:$16 sps:$4 sm:$0xff]   ;;  %v14679_v31 = vld [vmem:[%s21022_s1 + $0x144c] ss:$16 sps:$4 sm:$0xff]  }
 0x24e   :  { %9136 = vmatprep.subr.bf16.mxu0 %v14583_v32  ;;  %10082 = vmatprep.subr.bf16.mxu1 %v14586_v33  ;;  %v14674_v32 = vld [vmem:[%s21022_s1 + $0x1440] ss:$16 sps:$4 sm:$0xff]   ;;  %v14677_v33 = vld [vmem:[%s21022_s1 + $0x1448] ss:$16 sps:$4 sm:$0xff]  }
 0x251   :  { %9137 = vmatpush1.bf16.msra.mxu0 %v14581_v34  ;;  %10083 = vmatpush1.bf16.msra.mxu1 %v14584_v35  ;;  %v14682_v34 = vld [vmem:[%s21022_s1 + $0x1464] ss:$16 sps:$4 sm:$0xff]   ;;  %v14685_v35 = vld [vmem:[%s21022_s1 + $0x146c] ss:$16 sps:$4 sm:$0xff]  }
 0x252   :  { %9138 = vmatprep.subr.bf16.mxu0 %v14589_v36  ;;  %10084 = vmatprep.subr.bf16.mxu1 %v14592_v37  ;;  %v14680_v36 = vld [vmem:[%s21022_s1 + $0x1460] ss:$16 sps:$4 sm:$0xff]   ;;  %v14683_v37 = vld [vmem:[%s21022_s1 + $0x1468] ss:$16 sps:$4 sm:$0xff]  }
 0x255   :  { %9139 = vmatpush1.bf16.msra.mxu0 %v14587_v38  ;;  %10085 = vmatpush1.bf16.msra.mxu1 %v14590_v39  ;;  %v14688_v38 = vld [vmem:[%s21022_s1 + $0x1484] ss:$16 sps:$4 sm:$0xff]   ;;  %v14691_v39 = vld [vmem:[%s21022_s1 + $0x148c] ss:$16 sps:$4 sm:$0xff]  }
 0x256   :  { %9140 = vmatprep.subr.bf16.mxu0 %v14595_v40  ;;  %10086 = vmatprep.subr.bf16.mxu1 %v14598_v41  ;;  %v14686_v40 = vld [vmem:[%s21022_s1 + $0x1480] ss:$16 sps:$4 sm:$0xff]   ;;  %v14689_v41 = vld [vmem:[%s21022_s1 + $0x1488] ss:$16 sps:$4 sm:$0xff]  }
 0x259   :  { %9141 = vmatpush1.bf16.msra.mxu0 %v14593_v42  ;;  %10087 = vmatpush1.bf16.msra.mxu1 %v14596_v43  ;;  %v14694_v42 = vld [vmem:[%s21022_s1 + $0x14a4] ss:$16 sps:$4 sm:$0xff]   ;;  %v14697_v43 = vld [vmem:[%s21022_s1 + $0x14ac] ss:$16 sps:$4 sm:$0xff]  }
 0x25a   :  { %9142 = vmatprep.subr.bf16.mxu0 %v14601_v44  ;;  %10088 = vmatprep.subr.bf16.mxu1 %v14604_v45  ;;  %v14692_v44 = vld [vmem:[%s21022_s1 + $0x14a0] ss:$16 sps:$4 sm:$0xff]   ;;  %v14695_v45 = vld [vmem:[%s21022_s1 + $0x14a8] ss:$16 sps:$4 sm:$0xff]  }
 0x25d   :  { %9143 = vmatpush1.bf16.msra.mxu0 %v14599_v46  ;;  %10089 = vmatpush1.bf16.msra.mxu1 %v14602_v47  ;;  %v14700_v46 = vld [vmem:[%s21022_s1 + $0x14c4] ss:$16 sps:$4 sm:$0xff]   ;;  %v14703_v47 = vld [vmem:[%s21022_s1 + $0x14cc] ss:$16 sps:$4 sm:$0xff]  }
 0x25e   :  { %9144 = vmatprep.subr.bf16.mxu0 %v14607_v48  ;;  %10090 = vmatprep.subr.bf16.mxu1 %v14610_v49  ;;  %v14698_v48 = vld [vmem:[%s21022_s1 + $0x14c0] ss:$16 sps:$4 sm:$0xff]   ;;  %v14701_v49 = vld [vmem:[%s21022_s1 + $0x14c8] ss:$16 sps:$4 sm:$0xff]  }
 0x261   :  { %9145 = vmatpush1.bf16.msra.mxu0 %v14605_v50  ;;  %10091 = vmatpush1.bf16.msra.mxu1 %v14608_v51  ;;  %v14706_v50 = vld [vmem:[%s21022_s1 + $0x14e4] ss:$16 sps:$4 sm:$0xff]   ;;  %v14709_v51 = vld [vmem:[%s21022_s1 + $0x14ec] ss:$16 sps:$4 sm:$0xff]  }
 0x262   :  { %9146 = vmatprep.subr.bf16.mxu0 %v14613_v52  ;;  %10092 = vmatprep.subr.bf16.mxu1 %v14616_v53  ;;  %v14704_v52 = vld [vmem:[%s21022_s1 + $0x14e0] ss:$16 sps:$4 sm:$0xff]   ;;  %v14707_v53 = vld [vmem:[%s21022_s1 + $0x14e8] ss:$16 sps:$4 sm:$0xff]  }
 0x265   :  { %9147 = vmatpush1.bf16.msra.mxu0 %v14611_v54  ;;  %10093 = vmatpush1.bf16.msra.mxu1 %v14614_v55  ;;  %v14712_v54 = vld [vmem:[%s21022_s1 + $0x1504] ss:$16 sps:$4 sm:$0xff]   ;;  %v14715_v55 = vld [vmem:[%s21022_s1 + $0x150c] ss:$16 sps:$4 sm:$0xff]  }
 0x266   :  { %9148 = vmatprep.subr.bf16.mxu0 %v14619_v56  ;;  %10094 = vmatprep.subr.bf16.mxu1 %v14622_v57  ;;  %v14710_v56 = vld [vmem:[%s21022_s1 + $0x1500] ss:$16 sps:$4 sm:$0xff]   ;;  %v14713_v57 = vld [vmem:[%s21022_s1 + $0x1508] ss:$16 sps:$4 sm:$0xff]  }
 0x269   :  { %9149 = vmatpush1.bf16.msra.mxu0 %v14617_v58  ;;  %10095 = vmatpush1.bf16.msra.mxu1 %v14620_v59  ;;  %v14718_v58 = vld [vmem:[%s21022_s1 + $0x1524] ss:$16 sps:$4 sm:$0xff]   ;;  %v14721_v59 = vld [vmem:[%s21022_s1 + $0x152c] ss:$16 sps:$4 sm:$0xff]  }
 0x26a   :  { %9150 = vmatprep.subr.bf16.mxu0 %v14625_v60  ;;  %10096 = vmatprep.subr.bf16.mxu1 %v14628_v61  ;;  %v14716_v60 = vld [vmem:[%s21022_s1 + $0x1520] ss:$16 sps:$4 sm:$0xff]   ;;  %v14719_v61 = vld [vmem:[%s21022_s1 + $0x1528] ss:$16 sps:$4 sm:$0xff]  }
 0x26d   :  { %9151 = vmatpush1.bf16.msra.mxu0 %v14623_v62  ;;  %10097 = vmatpush1.bf16.msra.mxu1 %v14626_v63  ;;  %v14724_v62 = vld [vmem:[%s21022_s1 + $0x1544] ss:$16 sps:$4 sm:$0xff]   ;;  %v14727_v63 = vld [vmem:[%s21022_s1 + $0x154c] ss:$16 sps:$4 sm:$0xff]  }
 0x26e   :  { %9152 = vmatprep.subr.bf16.mxu0 %v14631_v0  ;;  %10098 = vmatprep.subr.bf16.mxu1 %v14634_v1  ;;  %v14722_v0 = vld [vmem:[%s21022_s1 + $0x1540] ss:$16 sps:$4 sm:$0xff]   ;;  %v14725_v1 = vld [vmem:[%s21022_s1 + $0x1548] ss:$16 sps:$4 sm:$0xff]  }
 0x271   :  { %9153 = vmatpush1.bf16.msra.mxu0 %v14629_v2  ;;  %10099 = vmatpush1.bf16.msra.mxu1 %v14632_v3  ;;  %v14730_v2 = vld [vmem:[%s21022_s1 + $0x1564] ss:$16 sps:$4 sm:$0xff]   ;;  %v14733_v3 = vld [vmem:[%s21022_s1 + $0x156c] ss:$16 sps:$4 sm:$0xff]  }
 0x272   :  { %9154 = vmatprep.subr.bf16.mxu0 %v14637_v4  ;;  %10100 = vmatprep.subr.bf16.mxu1 %v14640_v5  ;;  %v14728_v4 = vld [vmem:[%s21022_s1 + $0x1560] ss:$16 sps:$4 sm:$0xff]   ;;  %v14731_v5 = vld [vmem:[%s21022_s1 + $0x1568] ss:$16 sps:$4 sm:$0xff]  }
 0x275   :  { %9155 = vmatpush1.bf16.msra.mxu0 %v14635_v6  ;;  %10101 = vmatpush1.bf16.msra.mxu1 %v14638_v7  ;;  %v14736_v6 = vld [vmem:[%s21022_s1 + $0x1584] ss:$16 sps:$4 sm:$0xff]   ;;  %v14739_v7 = vld [vmem:[%s21022_s1 + $0x158c] ss:$16 sps:$4 sm:$0xff]  }
 0x276   :  { %9156 = vmatprep.subr.bf16.mxu0 %v14643_v8  ;;  %10102 = vmatprep.subr.bf16.mxu1 %v14646_v9  ;;  %v14734_v8 = vld [vmem:[%s21022_s1 + $0x1580] ss:$16 sps:$4 sm:$0xff]   ;;  %v14737_v9 = vld [vmem:[%s21022_s1 + $0x1588] ss:$16 sps:$4 sm:$0xff]  }
 0x279   :  { %9157 = vmatpush1.bf16.msra.mxu0 %v14641_v10  ;;  %10103 = vmatpush1.bf16.msra.mxu1 %v14644_v11  ;;  %v14742_v10 = vld [vmem:[%s21022_s1 + $0x15a4] ss:$16 sps:$4 sm:$0xff]   ;;  %v14745_v11 = vld [vmem:[%s21022_s1 + $0x15ac] ss:$16 sps:$4 sm:$0xff]  }
 0x27a   :  { %9158 = vmatprep.subr.bf16.mxu0 %v14649_v12  ;;  %10104 = vmatprep.subr.bf16.mxu1 %v14652_v13  ;;  %v14740_v12 = vld [vmem:[%s21022_s1 + $0x15a0] ss:$16 sps:$4 sm:$0xff]   ;;  %v14743_v13 = vld [vmem:[%s21022_s1 + $0x15a8] ss:$16 sps:$4 sm:$0xff]  }
 0x27d   :  { %9159 = vmatpush1.bf16.msra.mxu0 %v14647_v14  ;;  %10105 = vmatpush1.bf16.msra.mxu1 %v14650_v15  ;;  %v14748_v14 = vld [vmem:[%s21022_s1 + $0x15c4] ss:$16 sps:$4 sm:$0xff]   ;;  %v14751_v15 = vld [vmem:[%s21022_s1 + $0x15cc] ss:$16 sps:$4 sm:$0xff]  }
 0x27e   :  { %9160 = vmatprep.subr.bf16.mxu0 %v14655_v16  ;;  %10106 = vmatprep.subr.bf16.mxu1 %v14658_v17  ;;  %v14746_v16 = vld [vmem:[%s21022_s1 + $0x15c0] ss:$16 sps:$4 sm:$0xff]   ;;  %v14749_v17 = vld [vmem:[%s21022_s1 + $0x15c8] ss:$16 sps:$4 sm:$0xff]  }
 0x281   :  { %9161 = vmatpush1.bf16.msra.mxu0 %v14653_v18  ;;  %10107 = vmatpush1.bf16.msra.mxu1 %v14656_v19  ;;  %v14754_v18 = vld [vmem:[%s21022_s1 + $0x15e4] ss:$16 sps:$4 sm:$0xff]   ;;  %v14757_v19 = vld [vmem:[%s21022_s1 + $0x15ec] ss:$16 sps:$4 sm:$0xff]  }
 0x282   :  { %9173 = vmatprep.subr.bf16.mxu0 %v14664_v21  ;;  %10119 = vmatprep.subr.bf16.mxu1 %v14667_v22  ;;  %v14755_v21 = vld [vmem:[%s21022_s1 + $0x15e8] ss:$16 sps:$4 sm:$0xff]   ;;  %v14758_v22 = vld [vmem:[%s21021_s0 + $0x50] ss:$176 sps:$4 sm:$0xff]  }
 0x284   :  { %9163 = vmatmul.mubr.bf16.vlgmr.msra.gmra.mrb[0].mxu0 %v14659_v20  ;;  %10109 = vmatmul.mubr.bf16.vlgmr.msra.gmra.mrb[0].mxu1 %v14659_v20  ;;  %v14752_v20 = vld [vmem:[%s21022_s1 + $0x15e0] ss:$16 sps:$4 sm:$0xff]  }
 0x285   :  { %9174 = vmatpush1.bf16.msra.mxu0 %v14662_v23  ;;  %10120 = vmatpush1.bf16.msra.mxu1 %v14665_v24  ;;  %v14763_v23 = vld [vmem:[%s21022_s1 + $0x1604] ss:$16 sps:$4 sm:$0xff]   ;;  %v14766_v24 = vld [vmem:[%s21022_s1 + $0x160c] ss:$16 sps:$4 sm:$0xff]  }
 0x286   :  { %9175 = vmatprep.subr.bf16.mxu0 %v14670_v25  ;;  %10121 = vmatprep.subr.bf16.mxu1 %v14673_v26  ;;  %v14761_v25 = vld [vmem:[%s21022_s1 + $0x1600] ss:$16 sps:$4 sm:$0xff]   ;;  %v14764_v26 = vld [vmem:[%s21022_s1 + $0x1608] ss:$16 sps:$4 sm:$0xff]  }
 0x287   :  { %9205 = vmatprep.mubr.bf16.mxu0 %v14760_v27  ;;  %10151 = vmatprep.mubr.bf16.mxu1 %v14760_v27  ;;  %v14769_v27 = vld [vmem:[%s21022_s1 + $0x1624] ss:$16 sps:$4 sm:$0xff]  }
 0x289   :  { %9176 = vmatpush1.bf16.msra.mxu0 %v14668_v28  ;;  %10122 = vmatpush1.bf16.msra.mxu1 %v14671_v29  ;;  %v14772_v28 = vld [vmem:[%s21022_s1 + $0x162c] ss:$16 sps:$4 sm:$0xff]  }
 0x28a   :  { %9177 = vmatprep.subr.bf16.mxu0 %v14676_v30  ;;  %10123 = vmatprep.subr.bf16.mxu1 %v14679_v31  ;;  %v14859_v29 = vld [vmem:[%s21021_s0 + $0x5c] ss:$176 sps:$4 sm:$0xff]   ;;  %v14767_v30 = vld [vmem:[%s21022_s1 + $0x1620] ss:$16 sps:$4 sm:$0xff]   ;;  %v14770_v31 = vld [vmem:[%s21022_s1 + $0x1628] ss:$16 sps:$4 sm:$0xff]  }
 0x28d   :  { %9178 = vmatpush1.bf16.msra.mxu0 %v14674_v32  ;;  %10124 = vmatpush1.bf16.msra.mxu1 %v14677_v33  ;;  %v14775_v32 = vld [vmem:[%s21022_s1 + $0x1644] ss:$16 sps:$4 sm:$0xff]   ;;  %v14778_v33 = vld [vmem:[%s21022_s1 + $0x164c] ss:$16 sps:$4 sm:$0xff]  }
 0x28e   :  { %9179 = vmatprep.subr.bf16.mxu0 %v14682_v34  ;;  %10125 = vmatprep.subr.bf16.mxu1 %v14685_v35  ;;  %v14773_v34 = vld [vmem:[%s21022_s1 + $0x1640] ss:$16 sps:$4 sm:$0xff]   ;;  %v14776_v35 = vld [vmem:[%s21022_s1 + $0x1648] ss:$16 sps:$4 sm:$0xff]  }
 0x291   :  { %9180 = vmatpush1.bf16.msra.mxu0 %v14680_v36  ;;  %10126 = vmatpush1.bf16.msra.mxu1 %v14683_v37  ;;  %v14781_v36 = vld [vmem:[%s21022_s1 + $0x1664] ss:$16 sps:$4 sm:$0xff]   ;;  %v14784_v37 = vld [vmem:[%s21022_s1 + $0x166c] ss:$16 sps:$4 sm:$0xff]  }
 0x292   :  { %9181 = vmatprep.subr.bf16.mxu0 %v14688_v38  ;;  %10127 = vmatprep.subr.bf16.mxu1 %v14691_v39  ;;  %v14779_v38 = vld [vmem:[%s21022_s1 + $0x1660] ss:$16 sps:$4 sm:$0xff]   ;;  %v14782_v39 = vld [vmem:[%s21022_s1 + $0x1668] ss:$16 sps:$4 sm:$0xff]  }
 0x295   :  { %9182 = vmatpush1.bf16.msra.mxu0 %v14686_v40  ;;  %10128 = vmatpush1.bf16.msra.mxu1 %v14689_v41  ;;  %v14787_v40 = vld [vmem:[%s21022_s1 + $0x1684] ss:$16 sps:$4 sm:$0xff]   ;;  %v14790_v41 = vld [vmem:[%s21022_s1 + $0x168c] ss:$16 sps:$4 sm:$0xff]  }
 0x296   :  { %9183 = vmatprep.subr.bf16.mxu0 %v14694_v42  ;;  %10129 = vmatprep.subr.bf16.mxu1 %v14697_v43  ;;  %v14785_v42 = vld [vmem:[%s21022_s1 + $0x1680] ss:$16 sps:$4 sm:$0xff]   ;;  %v14788_v43 = vld [vmem:[%s21022_s1 + $0x1688] ss:$16 sps:$4 sm:$0xff]  }
 0x299   :  { %9184 = vmatpush1.bf16.msra.mxu0 %v14692_v44  ;;  %10130 = vmatpush1.bf16.msra.mxu1 %v14695_v45  ;;  %v14793_v44 = vld [vmem:[%s21022_s1 + $0x16a4] ss:$16 sps:$4 sm:$0xff]   ;;  %v14796_v45 = vld [vmem:[%s21022_s1 + $0x16ac] ss:$16 sps:$4 sm:$0xff]  }
 0x29a   :  { %9185 = vmatprep.subr.bf16.mxu0 %v14700_v46  ;;  %10131 = vmatprep.subr.bf16.mxu1 %v14703_v47  ;;  %v14791_v46 = vld [vmem:[%s21022_s1 + $0x16a0] ss:$16 sps:$4 sm:$0xff]   ;;  %v14794_v47 = vld [vmem:[%s21022_s1 + $0x16a8] ss:$16 sps:$4 sm:$0xff]  }
 0x29d   :  { %9186 = vmatpush1.bf16.msra.mxu0 %v14698_v48  ;;  %10132 = vmatpush1.bf16.msra.mxu1 %v14701_v49  ;;  %v14799_v48 = vld [vmem:[%s21022_s1 + $0x16c4] ss:$16 sps:$4 sm:$0xff]   ;;  %v14802_v49 = vld [vmem:[%s21022_s1 + $0x16cc] ss:$16 sps:$4 sm:$0xff]  }
 0x29e   :  { %9187 = vmatprep.subr.bf16.mxu0 %v14706_v50  ;;  %10133 = vmatprep.subr.bf16.mxu1 %v14709_v51  ;;  %v14797_v50 = vld [vmem:[%s21022_s1 + $0x16c0] ss:$16 sps:$4 sm:$0xff]   ;;  %v14800_v51 = vld [vmem:[%s21022_s1 + $0x16c8] ss:$16 sps:$4 sm:$0xff]  }
 0x2a1   :  { %9188 = vmatpush1.bf16.msra.mxu0 %v14704_v52  ;;  %10134 = vmatpush1.bf16.msra.mxu1 %v14707_v53  ;;  %v14805_v52 = vld [vmem:[%s21022_s1 + $0x16e4] ss:$16 sps:$4 sm:$0xff]   ;;  %v14808_v53 = vld [vmem:[%s21022_s1 + $0x16ec] ss:$16 sps:$4 sm:$0xff]  }
 0x2a2   :  { %9189 = vmatprep.subr.bf16.mxu0 %v14712_v54  ;;  %10135 = vmatprep.subr.bf16.mxu1 %v14715_v55  ;;  %v14803_v54 = vld [vmem:[%s21022_s1 + $0x16e0] ss:$16 sps:$4 sm:$0xff]   ;;  %v14806_v55 = vld [vmem:[%s21022_s1 + $0x16e8] ss:$16 sps:$4 sm:$0xff]  }
 0x2a5   :  { %9190 = vmatpush1.bf16.msra.mxu0 %v14710_v56  ;;  %10136 = vmatpush1.bf16.msra.mxu1 %v14713_v57  ;;  %v14811_v56 = vld [vmem:[%s21022_s1 + $0x1704] ss:$16 sps:$4 sm:$0xff]   ;;  %v14814_v57 = vld [vmem:[%s21022_s1 + $0x170c] ss:$16 sps:$4 sm:$0xff]  }
 0x2a6   :  { %9191 = vmatprep.subr.bf16.mxu0 %v14718_v58  ;;  %10137 = vmatprep.subr.bf16.mxu1 %v14721_v59  ;;  %v14809_v58 = vld [vmem:[%s21022_s1 + $0x1700] ss:$16 sps:$4 sm:$0xff]   ;;  %v14812_v59 = vld [vmem:[%s21022_s1 + $0x1708] ss:$16 sps:$4 sm:$0xff]  }
 0x2a9   :  { %9192 = vmatpush1.bf16.msra.mxu0 %v14716_v60  ;;  %10138 = vmatpush1.bf16.msra.mxu1 %v14719_v61  ;;  %v14817_v60 = vld [vmem:[%s21022_s1 + $0x1724] ss:$16 sps:$4 sm:$0xff]   ;;  %v14820_v61 = vld [vmem:[%s21022_s1 + $0x172c] ss:$16 sps:$4 sm:$0xff]  }
 0x2aa   :  { %9193 = vmatprep.subr.bf16.mxu0 %v14724_v62  ;;  %10139 = vmatprep.subr.bf16.mxu1 %v14727_v63  ;;  %v14815_v62 = vld [vmem:[%s21022_s1 + $0x1720] ss:$16 sps:$4 sm:$0xff]   ;;  %v14818_v63 = vld [vmem:[%s21022_s1 + $0x1728] ss:$16 sps:$4 sm:$0xff]  }
 0x2ad   :  { %9194 = vmatpush1.bf16.msra.mxu0 %v14722_v0  ;;  %10140 = vmatpush1.bf16.msra.mxu1 %v14725_v1  ;;  %v14823_v0 = vld [vmem:[%s21022_s1 + $0x1744] ss:$16 sps:$4 sm:$0xff]   ;;  %v14826_v1 = vld [vmem:[%s21022_s1 + $0x174c] ss:$16 sps:$4 sm:$0xff]  }
 0x2ae   :  { %9195 = vmatprep.subr.bf16.mxu0 %v14730_v2  ;;  %10141 = vmatprep.subr.bf16.mxu1 %v14733_v3  ;;  %v14821_v2 = vld [vmem:[%s21022_s1 + $0x1740] ss:$16 sps:$4 sm:$0xff]   ;;  %v14824_v3 = vld [vmem:[%s21022_s1 + $0x1748] ss:$16 sps:$4 sm:$0xff]  }
 0x2b1   :  { %9196 = vmatpush1.bf16.msra.mxu0 %v14728_v4  ;;  %10142 = vmatpush1.bf16.msra.mxu1 %v14731_v5  ;;  %v14829_v4 = vld [vmem:[%s21022_s1 + $0x1764] ss:$16 sps:$4 sm:$0xff]   ;;  %v14832_v5 = vld [vmem:[%s21022_s1 + $0x176c] ss:$16 sps:$4 sm:$0xff]  }
 0x2b2   :  { %9197 = vmatprep.subr.bf16.mxu0 %v14736_v6  ;;  %10143 = vmatprep.subr.bf16.mxu1 %v14739_v7  ;;  %v14827_v6 = vld [vmem:[%s21022_s1 + $0x1760] ss:$16 sps:$4 sm:$0xff]   ;;  %v14830_v7 = vld [vmem:[%s21022_s1 + $0x1768] ss:$16 sps:$4 sm:$0xff]  }
 0x2b5   :  { %9198 = vmatpush1.bf16.msra.mxu0 %v14734_v8  ;;  %10144 = vmatpush1.bf16.msra.mxu1 %v14737_v9  ;;  %v14835_v8 = vld [vmem:[%s21022_s1 + $0x1784] ss:$16 sps:$4 sm:$0xff]   ;;  %v14838_v9 = vld [vmem:[%s21022_s1 + $0x178c] ss:$16 sps:$4 sm:$0xff]  }
 0x2b6   :  { %9199 = vmatprep.subr.bf16.mxu0 %v14742_v10  ;;  %10145 = vmatprep.subr.bf16.mxu1 %v14745_v11  ;;  %v14833_v10 = vld [vmem:[%s21022_s1 + $0x1780] ss:$16 sps:$4 sm:$0xff]   ;;  %v14836_v11 = vld [vmem:[%s21022_s1 + $0x1788] ss:$16 sps:$4 sm:$0xff]  }
 0x2b9   :  { %9200 = vmatpush1.bf16.msra.mxu0 %v14740_v12  ;;  %10146 = vmatpush1.bf16.msra.mxu1 %v14743_v13  ;;  %v14841_v12 = vld [vmem:[%s21022_s1 + $0x17a4] ss:$16 sps:$4 sm:$0xff]   ;;  %v14844_v13 = vld [vmem:[%s21022_s1 + $0x17ac] ss:$16 sps:$4 sm:$0xff]  }
 0x2ba   :  { %9201 = vmatprep.subr.bf16.mxu0 %v14748_v14  ;;  %10147 = vmatprep.subr.bf16.mxu1 %v14751_v15  ;;  %v14839_v14 = vld [vmem:[%s21022_s1 + $0x17a0] ss:$16 sps:$4 sm:$0xff]   ;;  %v14842_v15 = vld [vmem:[%s21022_s1 + $0x17a8] ss:$16 sps:$4 sm:$0xff]  }
 0x2bd   :  { %9202 = vmatpush1.bf16.msra.mxu0 %v14746_v16  ;;  %10148 = vmatpush1.bf16.msra.mxu1 %v14749_v17  ;;  %v14847_v16 = vld [vmem:[%s21022_s1 + $0x17c4] ss:$16 sps:$4 sm:$0xff]   ;;  %v14850_v17 = vld [vmem:[%s21022_s1 + $0x17cc] ss:$16 sps:$4 sm:$0xff]  }
 0x2be   :  { %9203 = vmatprep.subr.bf16.mxu0 %v14754_v18  ;;  %10149 = vmatprep.subr.bf16.mxu1 %v14757_v19  ;;  %v14845_v18 = vld [vmem:[%s21022_s1 + $0x17c0] ss:$16 sps:$4 sm:$0xff]   ;;  %v14848_v19 = vld [vmem:[%s21022_s1 + $0x17c8] ss:$16 sps:$4 sm:$0xff]  }
 0x2c1   :  { %9204 = vmatpush1.bf16.msra.mxu0 %v14752_v20  ;;  %10150 = vmatpush1.bf16.msra.mxu1 %v14755_v21  ;;  %v14853_v20 = vld [vmem:[%s21022_s1 + $0x17e4] ss:$16 sps:$4 sm:$0xff]   ;;  %v14856_v21 = vld [vmem:[%s21022_s1 + $0x17ec] ss:$16 sps:$4 sm:$0xff]  }
 0x2c2   :  { %9216 = vmatprep.subr.bf16.mxu0 %v14763_v23  ;;  %10162 = vmatprep.subr.bf16.mxu1 %v14766_v24  ;;  %v14854_v23 = vld [vmem:[%s21022_s1 + $0x17e8] ss:$16 sps:$4 sm:$0xff]  }
 0x2c3   :  { %v14857_v24 = vld [vmem:[%s21021_s0 + $0x58] ss:$176 sps:$4 sm:$0xff]  }
 0x2c4   :  { %9206 = vmatmul.mubr.bf16.vlgmr.msra.gmra.mrb[0].mxu0 %v14758_v22  ;;  %10152 = vmatmul.mubr.bf16.vlgmr.msra.gmra.mrb[0].mxu1 %v14758_v22  ;;  %v14851_v22 = vld [vmem:[%s21022_s1 + $0x17e0] ss:$16 sps:$4 sm:$0xff]  }
 0x2c5   :  { %9217 = vmatpush1.bf16.msra.mxu0 %v14761_v25  ;;  %10163 = vmatpush1.bf16.msra.mxu1 %v14764_v26  ;;  %v14862_v25 = vld [vmem:[%s21022_s1 + $0x1804] ss:$16 sps:$4 sm:$0xff]   ;;  %v14865_v26 = vld [vmem:[%s21022_s1 + $0x180c] ss:$16 sps:$4 sm:$0xff]  }
 0x2c6   :  { %9218 = vmatprep.subr.bf16.mxu0 %v14769_v27  ;;  %10164 = vmatprep.subr.bf16.mxu1 %v14772_v28  ;;  %v14860_v27 = vld [vmem:[%s21022_s1 + $0x1800] ss:$16 sps:$4 sm:$0xff]   ;;  %v14863_v28 = vld [vmem:[%s21022_s1 + $0x1808] ss:$16 sps:$4 sm:$0xff]  }
 0x2c7   :  { %9248 = vmatprep.mubr.bf16.mxu0 %v14859_v29  ;;  %10194 = vmatprep.mubr.bf16.mxu1 %v14859_v29  ;;  %v14868_v29 = vld [vmem:[%s21022_s1 + $0x1824] ss:$16 sps:$4 sm:$0xff]  }
 0x2c9   :  { %9219 = vmatpush1.bf16.msra.mxu0 %v14767_v30  ;;  %10165 = vmatpush1.bf16.msra.mxu1 %v14770_v31  ;;  %v14871_v30 = vld [vmem:[%s21022_s1 + $0x182c] ss:$16 sps:$4 sm:$0xff]   ;;  %v14958_v31 = vld [vmem:[%s21021_s0 + $0x64] ss:$176 sps:$4 sm:$0xff]  }
 0x2ca   :  { %9220 = vmatprep.subr.bf16.mxu0 %v14775_v32  ;;  %10166 = vmatprep.subr.bf16.mxu1 %v14778_v33  ;;  %v14866_v32 = vld [vmem:[%s21022_s1 + $0x1820] ss:$16 sps:$4 sm:$0xff]   ;;  %v14869_v33 = vld [vmem:[%s21022_s1 + $0x1828] ss:$16 sps:$4 sm:$0xff]  }
 0x2cd   :  { %9221 = vmatpush1.bf16.msra.mxu0 %v14773_v34  ;;  %10167 = vmatpush1.bf16.msra.mxu1 %v14776_v35  ;;  %v14874_v34 = vld [vmem:[%s21022_s1 + $0x1844] ss:$16 sps:$4 sm:$0xff]   ;;  %v14877_v35 = vld [vmem:[%s21022_s1 + $0x184c] ss:$16 sps:$4 sm:$0xff]  }
 0x2ce   :  { %9222 = vmatprep.subr.bf16.mxu0 %v14781_v36  ;;  %10168 = vmatprep.subr.bf16.mxu1 %v14784_v37  ;;  %v14872_v36 = vld [vmem:[%s21022_s1 + $0x1840] ss:$16 sps:$4 sm:$0xff]   ;;  %v14875_v37 = vld [vmem:[%s21022_s1 + $0x1848] ss:$16 sps:$4 sm:$0xff]  }
 0x2d1   :  { %9223 = vmatpush1.bf16.msra.mxu0 %v14779_v38  ;;  %10169 = vmatpush1.bf16.msra.mxu1 %v14782_v39  ;;  %v14880_v38 = vld [vmem:[%s21022_s1 + $0x1864] ss:$16 sps:$4 sm:$0xff]   ;;  %v14883_v39 = vld [vmem:[%s21022_s1 + $0x186c] ss:$16 sps:$4 sm:$0xff]  }
 0x2d2   :  { %9224 = vmatprep.subr.bf16.mxu0 %v14787_v40  ;;  %10170 = vmatprep.subr.bf16.mxu1 %v14790_v41  ;;  %v14878_v40 = vld [vmem:[%s21022_s1 + $0x1860] ss:$16 sps:$4 sm:$0xff]   ;;  %v14881_v41 = vld [vmem:[%s21022_s1 + $0x1868] ss:$16 sps:$4 sm:$0xff]  }
 0x2d5   :  { %9225 = vmatpush1.bf16.msra.mxu0 %v14785_v42  ;;  %10171 = vmatpush1.bf16.msra.mxu1 %v14788_v43  ;;  %v14886_v42 = vld [vmem:[%s21022_s1 + $0x1884] ss:$16 sps:$4 sm:$0xff]   ;;  %v14889_v43 = vld [vmem:[%s21022_s1 + $0x188c] ss:$16 sps:$4 sm:$0xff]  }
 0x2d6   :  { %9226 = vmatprep.subr.bf16.mxu0 %v14793_v44  ;;  %10172 = vmatprep.subr.bf16.mxu1 %v14796_v45  ;;  %v14884_v44 = vld [vmem:[%s21022_s1 + $0x1880] ss:$16 sps:$4 sm:$0xff]   ;;  %v14887_v45 = vld [vmem:[%s21022_s1 + $0x1888] ss:$16 sps:$4 sm:$0xff]  }
 0x2d9   :  { %9227 = vmatpush1.bf16.msra.mxu0 %v14791_v46  ;;  %10173 = vmatpush1.bf16.msra.mxu1 %v14794_v47  ;;  %v14892_v46 = vld [vmem:[%s21022_s1 + $0x18a4] ss:$16 sps:$4 sm:$0xff]   ;;  %v14895_v47 = vld [vmem:[%s21022_s1 + $0x18ac] ss:$16 sps:$4 sm:$0xff]  }
 0x2da   :  { %9228 = vmatprep.subr.bf16.mxu0 %v14799_v48  ;;  %10174 = vmatprep.subr.bf16.mxu1 %v14802_v49  ;;  %v14890_v48 = vld [vmem:[%s21022_s1 + $0x18a0] ss:$16 sps:$4 sm:$0xff]   ;;  %v14893_v49 = vld [vmem:[%s21022_s1 + $0x18a8] ss:$16 sps:$4 sm:$0xff]  }
 0x2dd   :  { %9229 = vmatpush1.bf16.msra.mxu0 %v14797_v50  ;;  %10175 = vmatpush1.bf16.msra.mxu1 %v14800_v51  ;;  %v14898_v50 = vld [vmem:[%s21022_s1 + $0x18c4] ss:$16 sps:$4 sm:$0xff]   ;;  %v14901_v51 = vld [vmem:[%s21022_s1 + $0x18cc] ss:$16 sps:$4 sm:$0xff]  }
 0x2de   :  { %9230 = vmatprep.subr.bf16.mxu0 %v14805_v52  ;;  %10176 = vmatprep.subr.bf16.mxu1 %v14808_v53  ;;  %v14896_v52 = vld [vmem:[%s21022_s1 + $0x18c0] ss:$16 sps:$4 sm:$0xff]   ;;  %v14899_v53 = vld [vmem:[%s21022_s1 + $0x18c8] ss:$16 sps:$4 sm:$0xff]  }
 0x2e1   :  { %9231 = vmatpush1.bf16.msra.mxu0 %v14803_v54  ;;  %10177 = vmatpush1.bf16.msra.mxu1 %v14806_v55  ;;  %v14904_v54 = vld [vmem:[%s21022_s1 + $0x18e4] ss:$16 sps:$4 sm:$0xff]   ;;  %v14907_v55 = vld [vmem:[%s21022_s1 + $0x18ec] ss:$16 sps:$4 sm:$0xff]  }
 0x2e2   :  { %9232 = vmatprep.subr.bf16.mxu0 %v14811_v56  ;;  %10178 = vmatprep.subr.bf16.mxu1 %v14814_v57  ;;  %v14902_v56 = vld [vmem:[%s21022_s1 + $0x18e0] ss:$16 sps:$4 sm:$0xff]   ;;  %v14905_v57 = vld [vmem:[%s21022_s1 + $0x18e8] ss:$16 sps:$4 sm:$0xff]  }
 0x2e5   :  { %9233 = vmatpush1.bf16.msra.mxu0 %v14809_v58  ;;  %10179 = vmatpush1.bf16.msra.mxu1 %v14812_v59  ;;  %v14910_v58 = vld [vmem:[%s21022_s1 + $0x1904] ss:$16 sps:$4 sm:$0xff]   ;;  %v14913_v59 = vld [vmem:[%s21022_s1 + $0x190c] ss:$16 sps:$4 sm:$0xff]  }
 0x2e6   :  { %9234 = vmatprep.subr.bf16.mxu0 %v14817_v60  ;;  %10180 = vmatprep.subr.bf16.mxu1 %v14820_v61  ;;  %v14908_v60 = vld [vmem:[%s21022_s1 + $0x1900] ss:$16 sps:$4 sm:$0xff]   ;;  %v14911_v61 = vld [vmem:[%s21022_s1 + $0x1908] ss:$16 sps:$4 sm:$0xff]  }
 0x2e9   :  { %9235 = vmatpush1.bf16.msra.mxu0 %v14815_v62  ;;  %10181 = vmatpush1.bf16.msra.mxu1 %v14818_v63  ;;  %v14916_v62 = vld [vmem:[%s21022_s1 + $0x1924] ss:$16 sps:$4 sm:$0xff]   ;;  %v14919_v63 = vld [vmem:[%s21022_s1 + $0x192c] ss:$16 sps:$4 sm:$0xff]  }
 0x2ea   :  { %9236 = vmatprep.subr.bf16.mxu0 %v14823_v0  ;;  %10182 = vmatprep.subr.bf16.mxu1 %v14826_v1  ;;  %v14914_v0 = vld [vmem:[%s21022_s1 + $0x1920] ss:$16 sps:$4 sm:$0xff]   ;;  %v14917_v1 = vld [vmem:[%s21022_s1 + $0x1928] ss:$16 sps:$4 sm:$0xff]  }
 0x2ed   :  { %9237 = vmatpush1.bf16.msra.mxu0 %v14821_v2  ;;  %10183 = vmatpush1.bf16.msra.mxu1 %v14824_v3  ;;  %v14922_v2 = vld [vmem:[%s21022_s1 + $0x1944] ss:$16 sps:$4 sm:$0xff]   ;;  %v14925_v3 = vld [vmem:[%s21022_s1 + $0x194c] ss:$16 sps:$4 sm:$0xff]  }
 0x2ee   :  { %9238 = vmatprep.subr.bf16.mxu0 %v14829_v4  ;;  %10184 = vmatprep.subr.bf16.mxu1 %v14832_v5  ;;  %v14920_v4 = vld [vmem:[%s21022_s1 + $0x1940] ss:$16 sps:$4 sm:$0xff]   ;;  %v14923_v5 = vld [vmem:[%s21022_s1 + $0x1948] ss:$16 sps:$4 sm:$0xff]  }
 0x2f1   :  { %9239 = vmatpush1.bf16.msra.mxu0 %v14827_v6  ;;  %10185 = vmatpush1.bf16.msra.mxu1 %v14830_v7  ;;  %v14928_v6 = vld [vmem:[%s21022_s1 + $0x1964] ss:$16 sps:$4 sm:$0xff]   ;;  %v14931_v7 = vld [vmem:[%s21022_s1 + $0x196c] ss:$16 sps:$4 sm:$0xff]  }
 0x2f2   :  { %9240 = vmatprep.subr.bf16.mxu0 %v14835_v8  ;;  %10186 = vmatprep.subr.bf16.mxu1 %v14838_v9  ;;  %v14926_v8 = vld [vmem:[%s21022_s1 + $0x1960] ss:$16 sps:$4 sm:$0xff]   ;;  %v14929_v9 = vld [vmem:[%s21022_s1 + $0x1968] ss:$16 sps:$4 sm:$0xff]  }
 0x2f5   :  { %9241 = vmatpush1.bf16.msra.mxu0 %v14833_v10  ;;  %10187 = vmatpush1.bf16.msra.mxu1 %v14836_v11  ;;  %v14934_v10 = vld [vmem:[%s21022_s1 + $0x1984] ss:$16 sps:$4 sm:$0xff]   ;;  %v14937_v11 = vld [vmem:[%s21022_s1 + $0x198c] ss:$16 sps:$4 sm:$0xff]  }
 0x2f6   :  { %9242 = vmatprep.subr.bf16.mxu0 %v14841_v12  ;;  %10188 = vmatprep.subr.bf16.mxu1 %v14844_v13  ;;  %v14932_v12 = vld [vmem:[%s21022_s1 + $0x1980] ss:$16 sps:$4 sm:$0xff]   ;;  %v14935_v13 = vld [vmem:[%s21022_s1 + $0x1988] ss:$16 sps:$4 sm:$0xff]  }
 0x2f9   :  { %9243 = vmatpush1.bf16.msra.mxu0 %v14839_v14  ;;  %10189 = vmatpush1.bf16.msra.mxu1 %v14842_v15  ;;  %v14940_v14 = vld [vmem:[%s21022_s1 + $0x19a4] ss:$16 sps:$4 sm:$0xff]   ;;  %v14943_v15 = vld [vmem:[%s21022_s1 + $0x19ac] ss:$16 sps:$4 sm:$0xff]  }
 0x2fa   :  { %9244 = vmatprep.subr.bf16.mxu0 %v14847_v16  ;;  %10190 = vmatprep.subr.bf16.mxu1 %v14850_v17  ;;  %v14938_v16 = vld [vmem:[%s21022_s1 + $0x19a0] ss:$16 sps:$4 sm:$0xff]   ;;  %v14941_v17 = vld [vmem:[%s21022_s1 + $0x19a8] ss:$16 sps:$4 sm:$0xff]  }
 0x2fd   :  { %9245 = vmatpush1.bf16.msra.mxu0 %v14845_v18  ;;  %10191 = vmatpush1.bf16.msra.mxu1 %v14848_v19  ;;  %v14946_v18 = vld [vmem:[%s21022_s1 + $0x19c4] ss:$16 sps:$4 sm:$0xff]   ;;  %v14949_v19 = vld [vmem:[%s21022_s1 + $0x19cc] ss:$16 sps:$4 sm:$0xff]  }
 0x2fe   :  { %9246 = vmatprep.subr.bf16.mxu0 %v14853_v20  ;;  %10192 = vmatprep.subr.bf16.mxu1 %v14856_v21  ;;  %v14944_v20 = vld [vmem:[%s21022_s1 + $0x19c0] ss:$16 sps:$4 sm:$0xff]   ;;  %v14947_v21 = vld [vmem:[%s21022_s1 + $0x19c8] ss:$16 sps:$4 sm:$0xff]  }
 0x301   :  { %9247 = vmatpush1.bf16.msra.mxu0 %v14851_v22  ;;  %10193 = vmatpush1.bf16.msra.mxu1 %v14854_v23  ;;  %v14952_v22 = vld [vmem:[%s21022_s1 + $0x19e4] ss:$16 sps:$4 sm:$0xff]   ;;  %v14955_v23 = vld [vmem:[%s21022_s1 + $0x19ec] ss:$16 sps:$4 sm:$0xff]  }
 0x302   :  { %9259 = vmatprep.subr.bf16.mxu0 %v14862_v25  ;;  %10205 = vmatprep.subr.bf16.mxu1 %v14865_v26  ;;  %v14953_v25 = vld [vmem:[%s21022_s1 + $0x19e8] ss:$16 sps:$4 sm:$0xff]   ;;  %v14956_v26 = vld [vmem:[%s21021_s0 + $0x60] ss:$176 sps:$4 sm:$0xff]  }
 0x304   :  { %9249 = vmatmul.mubr.bf16.vlgmr.msra.gmra.mrb[0].mxu0 %v14857_v24  ;;  %10195 = vmatmul.mubr.bf16.vlgmr.msra.gmra.mrb[0].mxu1 %v14857_v24  ;;  %v14950_v24 = vld [vmem:[%s21022_s1 + $0x19e0] ss:$16 sps:$4 sm:$0xff]  }
 0x305   :  { %9260 = vmatpush1.bf16.msra.mxu0 %v14860_v27  ;;  %10206 = vmatpush1.bf16.msra.mxu1 %v14863_v28  ;;  %v14961_v27 = vld [vmem:[%s21022_s1 + $0x1a04] ss:$16 sps:$4 sm:$0xff]   ;;  %v14964_v28 = vld [vmem:[%s21022_s1 + $0x1a0c] ss:$16 sps:$4 sm:$0xff]  }
 0x306   :  { %9261 = vmatprep.subr.bf16.mxu0 %v14868_v29  ;;  %10207 = vmatprep.subr.bf16.mxu1 %v14871_v30  ;;  %v14959_v29 = vld [vmem:[%s21022_s1 + $0x1a00] ss:$16 sps:$4 sm:$0xff]   ;;  %v14962_v30 = vld [vmem:[%s21022_s1 + $0x1a08] ss:$16 sps:$4 sm:$0xff]  }
 0x307   :  { %9291 = vmatprep.mubr.bf16.mxu0 %v14958_v31  ;;  %10237 = vmatprep.mubr.bf16.mxu1 %v14958_v31  ;;  %v14967_v31 = vld [vmem:[%s21022_s1 + $0x1a24] ss:$16 sps:$4 sm:$0xff]  }
 0x309   :  { %9262 = vmatpush1.bf16.msra.mxu0 %v14866_v32  ;;  %10208 = vmatpush1.bf16.msra.mxu1 %v14869_v33  ;;  %v14970_v32 = vld [vmem:[%s21022_s1 + $0x1a2c] ss:$16 sps:$4 sm:$0xff]  }
 0x30a   :  { %9263 = vmatprep.subr.bf16.mxu0 %v14874_v34  ;;  %10209 = vmatprep.subr.bf16.mxu1 %v14877_v35  ;;  %v15057_v33 = vld [vmem:[%s21021_s0 + $0x6c] ss:$176 sps:$4 sm:$0xff]   ;;  %v14965_v34 = vld [vmem:[%s21022_s1 + $0x1a20] ss:$16 sps:$4 sm:$0xff]   ;;  %v14968_v35 = vld [vmem:[%s21022_s1 + $0x1a28] ss:$16 sps:$4 sm:$0xff]  }
 0x30d   :  { %9264 = vmatpush1.bf16.msra.mxu0 %v14872_v36  ;;  %10210 = vmatpush1.bf16.msra.mxu1 %v14875_v37  ;;  %v14973_v36 = vld [vmem:[%s21022_s1 + $0x1a44] ss:$16 sps:$4 sm:$0xff]   ;;  %v14976_v37 = vld [vmem:[%s21022_s1 + $0x1a4c] ss:$16 sps:$4 sm:$0xff]  }
 0x30e   :  { %9265 = vmatprep.subr.bf16.mxu0 %v14880_v38  ;;  %10211 = vmatprep.subr.bf16.mxu1 %v14883_v39  ;;  %v14971_v38 = vld [vmem:[%s21022_s1 + $0x1a40] ss:$16 sps:$4 sm:$0xff]   ;;  %v14974_v39 = vld [vmem:[%s21022_s1 + $0x1a48] ss:$16 sps:$4 sm:$0xff]  }
 0x311   :  { %9266 = vmatpush1.bf16.msra.mxu0 %v14878_v40  ;;  %10212 = vmatpush1.bf16.msra.mxu1 %v14881_v41  ;;  %v14979_v40 = vld [vmem:[%s21022_s1 + $0x1a64] ss:$16 sps:$4 sm:$0xff]   ;;  %v14982_v41 = vld [vmem:[%s21022_s1 + $0x1a6c] ss:$16 sps:$4 sm:$0xff]  }
 0x312   :  { %9267 = vmatprep.subr.bf16.mxu0 %v14886_v42  ;;  %10213 = vmatprep.subr.bf16.mxu1 %v14889_v43  ;;  %v14977_v42 = vld [vmem:[%s21022_s1 + $0x1a60] ss:$16 sps:$4 sm:$0xff]   ;;  %v14980_v43 = vld [vmem:[%s21022_s1 + $0x1a68] ss:$16 sps:$4 sm:$0xff]  }
 0x315   :  { %9268 = vmatpush1.bf16.msra.mxu0 %v14884_v44  ;;  %10214 = vmatpush1.bf16.msra.mxu1 %v14887_v45  ;;  %v14985_v44 = vld [vmem:[%s21022_s1 + $0x1a84] ss:$16 sps:$4 sm:$0xff]   ;;  %v14988_v45 = vld [vmem:[%s21022_s1 + $0x1a8c] ss:$16 sps:$4 sm:$0xff]  }
 0x316   :  { %9269 = vmatprep.subr.bf16.mxu0 %v14892_v46  ;;  %10215 = vmatprep.subr.bf16.mxu1 %v14895_v47  ;;  %v14983_v46 = vld [vmem:[%s21022_s1 + $0x1a80] ss:$16 sps:$4 sm:$0xff]   ;;  %v14986_v47 = vld [vmem:[%s21022_s1 + $0x1a88] ss:$16 sps:$4 sm:$0xff]  }
 0x319   :  { %9270 = vmatpush1.bf16.msra.mxu0 %v14890_v48  ;;  %10216 = vmatpush1.bf16.msra.mxu1 %v14893_v49  ;;  %v14991_v48 = vld [vmem:[%s21022_s1 + $0x1aa4] ss:$16 sps:$4 sm:$0xff]   ;;  %v14994_v49 = vld [vmem:[%s21022_s1 + $0x1aac] ss:$16 sps:$4 sm:$0xff]  }
 0x31a   :  { %9271 = vmatprep.subr.bf16.mxu0 %v14898_v50  ;;  %10217 = vmatprep.subr.bf16.mxu1 %v14901_v51  ;;  %v14989_v50 = vld [vmem:[%s21022_s1 + $0x1aa0] ss:$16 sps:$4 sm:$0xff]   ;;  %v14992_v51 = vld [vmem:[%s21022_s1 + $0x1aa8] ss:$16 sps:$4 sm:$0xff]  }
 0x31d   :  { %9272 = vmatpush1.bf16.msra.mxu0 %v14896_v52  ;;  %10218 = vmatpush1.bf16.msra.mxu1 %v14899_v53  ;;  %v14997_v52 = vld [vmem:[%s21022_s1 + $0x1ac4] ss:$16 sps:$4 sm:$0xff]   ;;  %v15000_v53 = vld [vmem:[%s21022_s1 + $0x1acc] ss:$16 sps:$4 sm:$0xff]  }
 0x31e   :  { %9273 = vmatprep.subr.bf16.mxu0 %v14904_v54  ;;  %10219 = vmatprep.subr.bf16.mxu1 %v14907_v55  ;;  %v14995_v54 = vld [vmem:[%s21022_s1 + $0x1ac0] ss:$16 sps:$4 sm:$0xff]   ;;  %v14998_v55 = vld [vmem:[%s21022_s1 + $0x1ac8] ss:$16 sps:$4 sm:$0xff]  }
 0x321   :  { %9274 = vmatpush1.bf16.msra.mxu0 %v14902_v56  ;;  %10220 = vmatpush1.bf16.msra.mxu1 %v14905_v57  ;;  %v15003_v56 = vld [vmem:[%s21022_s1 + $0x1ae4] ss:$16 sps:$4 sm:$0xff]   ;;  %v15006_v57 = vld [vmem:[%s21022_s1 + $0x1aec] ss:$16 sps:$4 sm:$0xff]  }
 0x322   :  { %9275 = vmatprep.subr.bf16.mxu0 %v14910_v58  ;;  %10221 = vmatprep.subr.bf16.mxu1 %v14913_v59  ;;  %v15001_v58 = vld [vmem:[%s21022_s1 + $0x1ae0] ss:$16 sps:$4 sm:$0xff]   ;;  %v15004_v59 = vld [vmem:[%s21022_s1 + $0x1ae8] ss:$16 sps:$4 sm:$0xff]  }
 0x325   :  { %9276 = vmatpush1.bf16.msra.mxu0 %v14908_v60  ;;  %10222 = vmatpush1.bf16.msra.mxu1 %v14911_v61  ;;  %v15009_v60 = vld [vmem:[%s21022_s1 + $0x1b04] ss:$16 sps:$4 sm:$0xff]   ;;  %v15012_v61 = vld [vmem:[%s21022_s1 + $0x1b0c] ss:$16 sps:$4 sm:$0xff]  }
 0x326   :  { %9277 = vmatprep.subr.bf16.mxu0 %v14916_v62  ;;  %10223 = vmatprep.subr.bf16.mxu1 %v14919_v63  ;;  %v15007_v62 = vld [vmem:[%s21022_s1 + $0x1b00] ss:$16 sps:$4 sm:$0xff]   ;;  %v15010_v63 = vld [vmem:[%s21022_s1 + $0x1b08] ss:$16 sps:$4 sm:$0xff]  }
 0x329   :  { %9278 = vmatpush1.bf16.msra.mxu0 %v14914_v0  ;;  %10224 = vmatpush1.bf16.msra.mxu1 %v14917_v1  ;;  %v15015_v0 = vld [vmem:[%s21022_s1 + $0x1b24] ss:$16 sps:$4 sm:$0xff]   ;;  %v15018_v1 = vld [vmem:[%s21022_s1 + $0x1b2c] ss:$16 sps:$4 sm:$0xff]  }
 0x32a   :  { %9279 = vmatprep.subr.bf16.mxu0 %v14922_v2  ;;  %10225 = vmatprep.subr.bf16.mxu1 %v14925_v3  ;;  %v15013_v2 = vld [vmem:[%s21022_s1 + $0x1b20] ss:$16 sps:$4 sm:$0xff]   ;;  %v15016_v3 = vld [vmem:[%s21022_s1 + $0x1b28] ss:$16 sps:$4 sm:$0xff]  }
 0x32d   :  { %9280 = vmatpush1.bf16.msra.mxu0 %v14920_v4  ;;  %10226 = vmatpush1.bf16.msra.mxu1 %v14923_v5  ;;  %v15021_v4 = vld [vmem:[%s21022_s1 + $0x1b44] ss:$16 sps:$4 sm:$0xff]   ;;  %v15024_v5 = vld [vmem:[%s21022_s1 + $0x1b4c] ss:$16 sps:$4 sm:$0xff]  }
 0x32e   :  { %9281 = vmatprep.subr.bf16.mxu0 %v14928_v6  ;;  %10227 = vmatprep.subr.bf16.mxu1 %v14931_v7 }
 0x331   :  { %9282 = vmatpush1.bf16.msra.mxu0 %v14926_v8  ;;  %10228 = vmatpush1.bf16.msra.mxu1 %v14929_v9 }
 0x332   :  { %9283 = vmatprep.subr.bf16.mxu0 %v14934_v10  ;;  %10229 = vmatprep.subr.bf16.mxu1 %v14937_v11 }
 0x335   :  { %9284 = vmatpush1.bf16.msra.mxu0 %v14932_v12  ;;  %10230 = vmatpush1.bf16.msra.mxu1 %v14935_v13 }
 0x336   :  { %9285 = vmatprep.subr.bf16.mxu0 %v14940_v14  ;;  %10231 = vmatprep.subr.bf16.mxu1 %v14943_v15 }
 0x339   :  { %9286 = vmatpush1.bf16.msra.mxu0 %v14938_v16  ;;  %10232 = vmatpush1.bf16.msra.mxu1 %v14941_v17 }
 0x33a   :  { %9287 = vmatprep.subr.bf16.mxu0 %v14946_v18  ;;  %10233 = vmatprep.subr.bf16.mxu1 %v14949_v19 }
 0x33d   :  { %9288 = vmatpush1.bf16.msra.mxu0 %v14944_v20  ;;  %10234 = vmatpush1.bf16.msra.mxu1 %v14947_v21 }
 0x33e   :  { %9289 = vmatprep.subr.bf16.mxu0 %v14952_v22  ;;  %10235 = vmatprep.subr.bf16.mxu1 %v14955_v23 }
 0x341   :  { %9290 = vmatpush1.bf16.msra.mxu0 %v14950_v24  ;;  %10236 = vmatpush1.bf16.msra.mxu1 %v14953_v25 }
 0x342   :  { %9302 = vmatprep.subr.bf16.mxu0 %v14961_v27  ;;  %10248 = vmatprep.subr.bf16.mxu1 %v14964_v28 }
 0x344   :  { %9292 = vmatmul.mubr.bf16.vlgmr.msra.gmra.mrb[0].mxu0 %v14956_v26  ;;  %10238 = vmatmul.mubr.bf16.vlgmr.msra.gmra.mrb[0].mxu1 %v14956_v26 }
 0x345   :  { %9303 = vmatpush1.bf16.msra.mxu0 %v14959_v29  ;;  %10249 = vmatpush1.bf16.msra.mxu1 %v14962_v30 }
 0x346   :  { %9304 = vmatprep.subr.bf16.mxu0 %v14967_v31  ;;  %10250 = vmatprep.subr.bf16.mxu1 %v14970_v32 }
 0x347   :  { %9334 = vmatprep.mubr.bf16.mxu0 %v15057_v33  ;;  %10280 = vmatprep.mubr.bf16.mxu1 %v15057_v33 }
 0x349   :  { %9305 = vmatpush1.bf16.msra.mxu0 %v14965_v34  ;;  %10251 = vmatpush1.bf16.msra.mxu1 %v14968_v35 }
 0x34a   :  { %9306 = vmatprep.subr.bf16.mxu0 %v14973_v36  ;;  %10252 = vmatprep.subr.bf16.mxu1 %v14976_v37 }
 0x34d   :  { %9307 = vmatpush1.bf16.msra.mxu0 %v14971_v38  ;;  %10253 = vmatpush1.bf16.msra.mxu1 %v14974_v39 }
 0x34e   :  { %9308 = vmatprep.subr.bf16.mxu0 %v14979_v40  ;;  %10254 = vmatprep.subr.bf16.mxu1 %v14982_v41 }
 0x351   :  { %9309 = vmatpush1.bf16.msra.mxu0 %v14977_v42  ;;  %10255 = vmatpush1.bf16.msra.mxu1 %v14980_v43 }
 0x352   :  { %9310 = vmatprep.subr.bf16.mxu0 %v14985_v44  ;;  %10256 = vmatprep.subr.bf16.mxu1 %v14988_v45 }
 0x355   :  { %9311 = vmatpush1.bf16.msra.mxu0 %v14983_v46  ;;  %10257 = vmatpush1.bf16.msra.mxu1 %v14986_v47 }
 0x356   :  { %9312 = vmatprep.subr.bf16.mxu0 %v14991_v48  ;;  %10258 = vmatprep.subr.bf16.mxu1 %v14994_v49 }
 0x359   :  { %9313 = vmatpush1.bf16.msra.mxu0 %v14989_v50  ;;  %10259 = vmatpush1.bf16.msra.mxu1 %v14992_v51 }
 0x35a   :  { %9314 = vmatprep.subr.bf16.mxu0 %v14997_v52  ;;  %10260 = vmatprep.subr.bf16.mxu1 %v15000_v53 }
 0x35d   :  { %9315 = vmatpush1.bf16.msra.mxu0 %v14995_v54  ;;  %10261 = vmatpush1.bf16.msra.mxu1 %v14998_v55 }
 0x35e   :  { %9316 = vmatprep.subr.bf16.mxu0 %v15003_v56  ;;  %10262 = vmatprep.subr.bf16.mxu1 %v15006_v57 }
 0x361   :  { %9317 = vmatpush1.bf16.msra.mxu0 %v15001_v58  ;;  %10263 = vmatpush1.bf16.msra.mxu1 %v15004_v59 }
 0x362   :  { %9318 = vmatprep.subr.bf16.mxu0 %v15009_v60  ;;  %10264 = vmatprep.subr.bf16.mxu1 %v15012_v61 }
 0x365   :  { %9319 = vmatpush1.bf16.msra.mxu0 %v15007_v62  ;;  %10265 = vmatpush1.bf16.msra.mxu1 %v15010_v63 }
 0x366   :  { %9320 = vmatprep.subr.bf16.mxu0 %v15015_v0  ;;  %10266 = vmatprep.subr.bf16.mxu1 %v15018_v1 }
 0x367   :  { %18 = vsyncpa [#allocation6], 0  ;;  %v15019_v6 = vld [vmem:[%s21022_s1 + $0x1b40] ss:$16 sps:$4 sm:$0xff]   ;;  %v15022_v7 = vld [vmem:[%s21022_s1 + $0x1b48] ss:$16 sps:$4 sm:$0xff]  }
 0x368   :  { %v15027_v8 = vld [vmem:[%s21022_s1 + $0x1b64] ss:$16 sps:$4 sm:$0xff]   ;;  %v15030_v9 = vld [vmem:[%s21022_s1 + $0x1b6c] ss:$16 sps:$4 sm:$0xff]   ;;  %v15025_v10 = vld [vmem:[%s21022_s1 + $0x1b60] ss:$16 sps:$4 sm:$0xff]  }
 0x369   :  { %9321 = vmatpush1.bf16.msra.mxu0 %v15013_v2  ;;  %10267 = vmatpush1.bf16.msra.mxu1 %v15016_v3  ;;  %v15028_v11 = vld [vmem:[%s21022_s1 + $0x1b68] ss:$16 sps:$4 sm:$0xff]   ;;  %v15033_v12 = vld [vmem:[%s21022_s1 + $0x1b84] ss:$16 sps:$4 sm:$0xff]   ;;  %v15036_v13 = vld [vmem:[%s21022_s1 + $0x1b8c] ss:$16 sps:$4 sm:$0xff]  }
 0x36a   :  { %9322 = vmatprep.subr.bf16.mxu0 %v15021_v4  ;;  %10268 = vmatprep.subr.bf16.mxu1 %v15024_v5  ;;  %v15031_v14 = vld [vmem:[%s21022_s1 + $0x1b80] ss:$16 sps:$4 sm:$0xff]   ;;  %v15034_v15 = vld [vmem:[%s21022_s1 + $0x1b88] ss:$16 sps:$4 sm:$0xff]   ;;  %v15039_v16 = vld [vmem:[%s21022_s1 + $0x1ba4] ss:$16 sps:$4 sm:$0xff]  }
 0x36b   :  { %v15042_v17 = vld [vmem:[%s21022_s1 + $0x1bac] ss:$16 sps:$4 sm:$0xff]   ;;  %v15037_v18 = vld [vmem:[%s21022_s1 + $0x1ba0] ss:$16 sps:$4 sm:$0xff]   ;;  %v15040_v19 = vld [vmem:[%s21022_s1 + $0x1ba8] ss:$16 sps:$4 sm:$0xff]  }
 0x36c   :  { %v15045_v20 = vld [vmem:[%s21022_s1 + $0x1bc4] ss:$16 sps:$4 sm:$0xff]   ;;  %v15048_v21 = vld [vmem:[%s21022_s1 + $0x1bcc] ss:$16 sps:$4 sm:$0xff]   ;;  %v15043_v22 = vld [vmem:[%s21022_s1 + $0x1bc0] ss:$16 sps:$4 sm:$0xff]  }
 0x36d   :  { %9323 = vmatpush1.bf16.msra.mxu0 %v15019_v6  ;;  %10269 = vmatpush1.bf16.msra.mxu1 %v15022_v7  ;;  %v15046_v23 = vld [vmem:[%s21022_s1 + $0x1bc8] ss:$16 sps:$4 sm:$0xff]   ;;  %v15051_v24 = vld [vmem:[%s21022_s1 + $0x1be4] ss:$16 sps:$4 sm:$0xff]   ;;  %v15054_v25 = vld [vmem:[%s21022_s1 + $0x1bec] ss:$16 sps:$4 sm:$0xff]  }
 0x36e   :  { %9324 = vmatprep.subr.bf16.mxu0 %v15027_v8  ;;  %10270 = vmatprep.subr.bf16.mxu1 %v15030_v9  ;;  %v15049_v26 = vld [vmem:[%s21022_s1 + $0x1be0] ss:$16 sps:$4 sm:$0xff]   ;;  %v15052_v27 = vld [vmem:[%s21022_s1 + $0x1be8] ss:$16 sps:$4 sm:$0xff]   ;;  %v15060_v28 = vld [vmem:[%s21022_s1 + $0x1c04] ss:$16 sps:$4 sm:$0xff]  }
 0x36f   :  { %v15063_v29 = vld [vmem:[%s21022_s1 + $0x1c0c] ss:$16 sps:$4 sm:$0xff]   ;;  %v15055_v30 = vld [vmem:[%s21021_s0 + $0x68] ss:$176 sps:$4 sm:$0xff]   ;;  %v15058_v31 = vld [vmem:[%s21022_s1 + $0x1c00] ss:$16 sps:$4 sm:$0xff]  }
 0x370   :  { %v15061_v32 = vld [vmem:[%s21022_s1 + $0x1c08] ss:$16 sps:$4 sm:$0xff]   ;;  %v15066_v33 = vld [vmem:[%s21022_s1 + $0x1c24] ss:$16 sps:$4 sm:$0xff]   ;;  %v15069_v34 = vld [vmem:[%s21022_s1 + $0x1c2c] ss:$16 sps:$4 sm:$0xff]  }
 0x371   :  { %9325 = vmatpush1.bf16.msra.mxu0 %v15025_v10  ;;  %10271 = vmatpush1.bf16.msra.mxu1 %v15028_v11  ;;  %v15156_v35 = vld [vmem:[%s21021_s0 + $0x74] ss:$176 sps:$4 sm:$0xff]   ;;  %v15064_v36 = vld [vmem:[%s21022_s1 + $0x1c20] ss:$16 sps:$4 sm:$0xff]   ;;  %v15067_v37 = vld [vmem:[%s21022_s1 + $0x1c28] ss:$16 sps:$4 sm:$0xff]  }
 0x372   :  { %9326 = vmatprep.subr.bf16.mxu0 %v15033_v12  ;;  %10272 = vmatprep.subr.bf16.mxu1 %v15036_v13  ;;  %v15072_v38 = vld [vmem:[%s21022_s1 + $0x1c44] ss:$16 sps:$4 sm:$0xff]   ;;  %v15075_v39 = vld [vmem:[%s21022_s1 + $0x1c4c] ss:$16 sps:$4 sm:$0xff]   ;;  %v15070_v40 = vld [vmem:[%s21022_s1 + $0x1c40] ss:$16 sps:$4 sm:$0xff]  }
 0x373   :  { %v15073_v41 = vld [vmem:[%s21022_s1 + $0x1c48] ss:$16 sps:$4 sm:$0xff]   ;;  %v15078_v42 = vld [vmem:[%s21022_s1 + $0x1c64] ss:$16 sps:$4 sm:$0xff]   ;;  %v15081_v43 = vld [vmem:[%s21022_s1 + $0x1c6c] ss:$16 sps:$4 sm:$0xff]  }
 0x374   :  { %v15076_v44 = vld [vmem:[%s21022_s1 + $0x1c60] ss:$16 sps:$4 sm:$0xff]   ;;  %v15079_v45 = vld [vmem:[%s21022_s1 + $0x1c68] ss:$16 sps:$4 sm:$0xff]   ;;  %v15084_v46 = vld [vmem:[%s21022_s1 + $0x1c84] ss:$16 sps:$4 sm:$0xff]  }
 0x375   :  { %9327 = vmatpush1.bf16.msra.mxu0 %v15031_v14  ;;  %10273 = vmatpush1.bf16.msra.mxu1 %v15034_v15  ;;  %v15087_v47 = vld [vmem:[%s21022_s1 + $0x1c8c] ss:$16 sps:$4 sm:$0xff]   ;;  %v15082_v48 = vld [vmem:[%s21022_s1 + $0x1c80] ss:$16 sps:$4 sm:$0xff]   ;;  %v15085_v49 = vld [vmem:[%s21022_s1 + $0x1c88] ss:$16 sps:$4 sm:$0xff]  }
 0x376   :  { %9328 = vmatprep.subr.bf16.mxu0 %v15039_v16  ;;  %10274 = vmatprep.subr.bf16.mxu1 %v15042_v17  ;;  %v15090_v50 = vld [vmem:[%s21022_s1 + $0x1ca4] ss:$16 sps:$4 sm:$0xff]   ;;  %v15093_v51 = vld [vmem:[%s21022_s1 + $0x1cac] ss:$16 sps:$4 sm:$0xff]   ;;  %v15088_v52 = vld [vmem:[%s21022_s1 + $0x1ca0] ss:$16 sps:$4 sm:$0xff]  }
 0x377   :  { %v15091_v53 = vld [vmem:[%s21022_s1 + $0x1ca8] ss:$16 sps:$4 sm:$0xff]   ;;  %v15096_v54 = vld [vmem:[%s21022_s1 + $0x1cc4] ss:$16 sps:$4 sm:$0xff]   ;;  %v15099_v55 = vld [vmem:[%s21022_s1 + $0x1ccc] ss:$16 sps:$4 sm:$0xff]  }
 0x378   :  { %v15094_v56 = vld [vmem:[%s21022_s1 + $0x1cc0] ss:$16 sps:$4 sm:$0xff]   ;;  %v15097_v57 = vld [vmem:[%s21022_s1 + $0x1cc8] ss:$16 sps:$4 sm:$0xff]   ;;  %v15102_v58 = vld [vmem:[%s21022_s1 + $0x1ce4] ss:$16 sps:$4 sm:$0xff]  }
 0x379   :  { %9329 = vmatpush1.bf16.msra.mxu0 %v15037_v18  ;;  %10275 = vmatpush1.bf16.msra.mxu1 %v15040_v19  ;;  %v15105_v59 = vld [vmem:[%s21022_s1 + $0x1cec] ss:$16 sps:$4 sm:$0xff]   ;;  %v15100_v60 = vld [vmem:[%s21022_s1 + $0x1ce0] ss:$16 sps:$4 sm:$0xff]   ;;  %v15103_v61 = vld [vmem:[%s21022_s1 + $0x1ce8] ss:$16 sps:$4 sm:$0xff]  }
 0x37a   :  { %9330 = vmatprep.subr.bf16.mxu0 %v15045_v20  ;;  %10276 = vmatprep.subr.bf16.mxu1 %v15048_v21  ;;  %v15108_v62 = vld [vmem:[%s21022_s1 + $0x1d04] ss:$16 sps:$4 sm:$0xff]   ;;  %v15111_v63 = vld [vmem:[%s21022_s1 + $0x1d0c] ss:$16 sps:$4 sm:$0xff]   ;;  %v15106_v0 = vld [vmem:[%s21022_s1 + $0x1d00] ss:$16 sps:$4 sm:$0xff]  }
 0x37b   :  { %v15109_v1 = vld [vmem:[%s21022_s1 + $0x1d08] ss:$16 sps:$4 sm:$0xff]   ;;  %v15114_v2 = vld [vmem:[%s21022_s1 + $0x1d24] ss:$16 sps:$4 sm:$0xff]   ;;  %v15117_v3 = vld [vmem:[%s21022_s1 + $0x1d2c] ss:$16 sps:$4 sm:$0xff]  }
 0x37c   :  { %v15112_v4 = vld [vmem:[%s21022_s1 + $0x1d20] ss:$16 sps:$4 sm:$0xff]   ;;  %v15115_v5 = vld [vmem:[%s21022_s1 + $0x1d28] ss:$16 sps:$4 sm:$0xff]   ;;  %v15120_v6 = vld [vmem:[%s21022_s1 + $0x1d44] ss:$16 sps:$4 sm:$0xff]  }
 0x37d   :  { %9331 = vmatpush1.bf16.msra.mxu0 %v15043_v22  ;;  %10277 = vmatpush1.bf16.msra.mxu1 %v15046_v23  ;;  %v15123_v7 = vld [vmem:[%s21022_s1 + $0x1d4c] ss:$16 sps:$4 sm:$0xff]   ;;  %v15118_v8 = vld [vmem:[%s21022_s1 + $0x1d40] ss:$16 sps:$4 sm:$0xff]   ;;  %v15121_v9 = vld [vmem:[%s21022_s1 + $0x1d48] ss:$16 sps:$4 sm:$0xff]  }
 0x37e   :  { %9332 = vmatprep.subr.bf16.mxu0 %v15051_v24  ;;  %10278 = vmatprep.subr.bf16.mxu1 %v15054_v25  ;;  %v15126_v10 = vld [vmem:[%s21022_s1 + $0x1d64] ss:$16 sps:$4 sm:$0xff]   ;;  %v15129_v11 = vld [vmem:[%s21022_s1 + $0x1d6c] ss:$16 sps:$4 sm:$0xff]   ;;  %v15124_v12 = vld [vmem:[%s21022_s1 + $0x1d60] ss:$16 sps:$4 sm:$0xff]  }
 0x37f   :  { %v15127_v13 = vld [vmem:[%s21022_s1 + $0x1d68] ss:$16 sps:$4 sm:$0xff]   ;;  %v15132_v14 = vld [vmem:[%s21022_s1 + $0x1d84] ss:$16 sps:$4 sm:$0xff]   ;;  %v15135_v15 = vld [vmem:[%s21022_s1 + $0x1d8c] ss:$16 sps:$4 sm:$0xff]  }
 0x380   :  { %v15130_v16 = vld [vmem:[%s21022_s1 + $0x1d80] ss:$16 sps:$4 sm:$0xff]   ;;  %v15133_v17 = vld [vmem:[%s21022_s1 + $0x1d88] ss:$16 sps:$4 sm:$0xff]   ;;  %v15138_v18 = vld [vmem:[%s21022_s1 + $0x1da4] ss:$16 sps:$4 sm:$0xff]  }
 0x381   :  { %9333 = vmatpush1.bf16.msra.mxu0 %v15049_v26  ;;  %10279 = vmatpush1.bf16.msra.mxu1 %v15052_v27  ;;  %v15141_v19 = vld [vmem:[%s21022_s1 + $0x1dac] ss:$16 sps:$4 sm:$0xff]   ;;  %v15136_v20 = vld [vmem:[%s21022_s1 + $0x1da0] ss:$16 sps:$4 sm:$0xff]   ;;  %v15139_v21 = vld [vmem:[%s21022_s1 + $0x1da8] ss:$16 sps:$4 sm:$0xff]  }
 0x382   :  { %9345 = vmatprep.subr.bf16.mxu0 %v15060_v28  ;;  %10291 = vmatprep.subr.bf16.mxu1 %v15063_v29  ;;  %v15144_v22 = vld [vmem:[%s21022_s1 + $0x1dc4] ss:$16 sps:$4 sm:$0xff]   ;;  %v15147_v23 = vld [vmem:[%s21022_s1 + $0x1dcc] ss:$16 sps:$4 sm:$0xff]   ;;  %v15142_v24 = vld [vmem:[%s21022_s1 + $0x1dc0] ss:$16 sps:$4 sm:$0xff]  }
 0x383   :  { %v15145_v25 = vld [vmem:[%s21022_s1 + $0x1dc8] ss:$16 sps:$4 sm:$0xff]   ;;  %v15150_v26 = vld [vmem:[%s21022_s1 + $0x1de4] ss:$16 sps:$4 sm:$0xff]   ;;  %v15153_v27 = vld [vmem:[%s21022_s1 + $0x1dec] ss:$16 sps:$4 sm:$0xff]  }
 0x384   :  { %9335 = vmatmul.mubr.bf16.vlgmr.msra.gmra.mrb[0].mxu0 %v15055_v30  ;;  %10281 = vmatmul.mubr.bf16.vlgmr.msra.gmra.mrb[0].mxu1 %v15055_v30  ;;  %v15148_v28 = vld [vmem:[%s21022_s1 + $0x1de0] ss:$16 sps:$4 sm:$0xff]   ;;  %v15151_v29 = vld [vmem:[%s21022_s1 + $0x1de8] ss:$16 sps:$4 sm:$0xff]   ;;  %v15159_v30 = vld [vmem:[%s21022_s1 + $0x1e04] ss:$16 sps:$4 sm:$0xff]  }
 0x385   :  { %9346 = vmatpush1.bf16.msra.mxu0 %v15058_v31  ;;  %10292 = vmatpush1.bf16.msra.mxu1 %v15061_v32  ;;  %v15162_v31 = vld [vmem:[%s21022_s1 + $0x1e0c] ss:$16 sps:$4 sm:$0xff]   ;;  %v15154_v32 = vld [vmem:[%s21021_s0 + $0x70] ss:$176 sps:$4 sm:$0xff]   ;;  %vm10684_vm0 = vcmask 7168   ;;  %vm10846_vm1 = vcmask 1041409  }
 0x386   :  { %9347 = vmatprep.subr.bf16.mxu0 %v15066_v33  ;;  %10293 = vmatprep.subr.bf16.mxu1 %v15069_v34  ;;  %v15157_v33 = vld [vmem:[%s21022_s1 + $0x1e00] ss:$16 sps:$4 sm:$0xff]   ;;  %v15160_v34 = vld [vmem:[%s21022_s1 + $0x1e08] ss:$16 sps:$4 sm:$0xff]   ;;  %vm10848_vm2 = vcmask 1043459   ;;  %vm10850_vm3 = vcmask 1045509  }
 0x387   :  { %9377 = vmatprep.mubr.bf16.mxu0 %v15156_v35  ;;  %10323 = vmatprep.mubr.bf16.mxu1 %v15156_v35  ;;  %v15165_v35 = vld [vmem:[%s21022_s1 + $0x1e24] ss:$16 sps:$4 sm:$0xff]   ;;  %vm10852_vm4 = vcmask 1047559  }
 0x389   :  { %9348 = vmatpush1.bf16.msra.mxu0 %v15064_v36  ;;  %10294 = vmatpush1.bf16.msra.mxu1 %v15067_v37  ;;  %v15168_v36 = vld [vmem:[%s21022_s1 + $0x1e2c] ss:$16 sps:$4 sm:$0xff]  }
 0x38a   :  { %9349 = vmatprep.subr.bf16.mxu0 %v15072_v38  ;;  %10295 = vmatprep.subr.bf16.mxu1 %v15075_v39  ;;  %v15255_v37 = vld [vmem:[%s21021_s0 + $0x7c] ss:$176 sps:$4 sm:$0xff]   ;;  %v15163_v38 = vld [vmem:[%s21022_s1 + $0x1e20] ss:$16 sps:$4 sm:$0xff]   ;;  %v15166_v39 = vld [vmem:[%s21022_s1 + $0x1e28] ss:$16 sps:$4 sm:$0xff]  }
 0x38d   :  { %9350 = vmatpush1.bf16.msra.mxu0 %v15070_v40  ;;  %10296 = vmatpush1.bf16.msra.mxu1 %v15073_v41  ;;  %v15171_v40 = vld [vmem:[%s21022_s1 + $0x1e44] ss:$16 sps:$4 sm:$0xff]   ;;  %v15174_v41 = vld [vmem:[%s21022_s1 + $0x1e4c] ss:$16 sps:$4 sm:$0xff]  }
 0x38e   :  { %9351 = vmatprep.subr.bf16.mxu0 %v15078_v42  ;;  %10297 = vmatprep.subr.bf16.mxu1 %v15081_v43  ;;  %v15169_v42 = vld [vmem:[%s21022_s1 + $0x1e40] ss:$16 sps:$4 sm:$0xff]   ;;  %v15172_v43 = vld [vmem:[%s21022_s1 + $0x1e48] ss:$16 sps:$4 sm:$0xff]  }
 0x391   :  { %9352 = vmatpush1.bf16.msra.mxu0 %v15076_v44  ;;  %10298 = vmatpush1.bf16.msra.mxu1 %v15079_v45  ;;  %v15177_v44 = vld [vmem:[%s21022_s1 + $0x1e64] ss:$16 sps:$4 sm:$0xff]   ;;  %v15180_v45 = vld [vmem:[%s21022_s1 + $0x1e6c] ss:$16 sps:$4 sm:$0xff]  }
 0x392   :  { %9353 = vmatprep.subr.bf16.mxu0 %v15084_v46  ;;  %10299 = vmatprep.subr.bf16.mxu1 %v15087_v47  ;;  %v15175_v46 = vld [vmem:[%s21022_s1 + $0x1e60] ss:$16 sps:$4 sm:$0xff]   ;;  %v15178_v47 = vld [vmem:[%s21022_s1 + $0x1e68] ss:$16 sps:$4 sm:$0xff]  }
 0x395   :  { %9354 = vmatpush1.bf16.msra.mxu0 %v15082_v48  ;;  %10300 = vmatpush1.bf16.msra.mxu1 %v15085_v49  ;;  %v15183_v48 = vld [vmem:[%s21022_s1 + $0x1e84] ss:$16 sps:$4 sm:$0xff]   ;;  %v15186_v49 = vld [vmem:[%s21022_s1 + $0x1e8c] ss:$16 sps:$4 sm:$0xff]  }
 0x396   :  { %9355 = vmatprep.subr.bf16.mxu0 %v15090_v50  ;;  %10301 = vmatprep.subr.bf16.mxu1 %v15093_v51  ;;  %v15181_v50 = vld [vmem:[%s21022_s1 + $0x1e80] ss:$16 sps:$4 sm:$0xff]   ;;  %v15184_v51 = vld [vmem:[%s21022_s1 + $0x1e88] ss:$16 sps:$4 sm:$0xff]  }
 0x399   :  { %9356 = vmatpush1.bf16.msra.mxu0 %v15088_v52  ;;  %10302 = vmatpush1.bf16.msra.mxu1 %v15091_v53  ;;  %v15189_v52 = vld [vmem:[%s21022_s1 + $0x1ea4] ss:$16 sps:$4 sm:$0xff]   ;;  %v15192_v53 = vld [vmem:[%s21022_s1 + $0x1eac] ss:$16 sps:$4 sm:$0xff]  }
 0x39a   :  { %9357 = vmatprep.subr.bf16.mxu0 %v15096_v54  ;;  %10303 = vmatprep.subr.bf16.mxu1 %v15099_v55  ;;  %v15187_v54 = vld [vmem:[%s21022_s1 + $0x1ea0] ss:$16 sps:$4 sm:$0xff]   ;;  %v15190_v55 = vld [vmem:[%s21022_s1 + $0x1ea8] ss:$16 sps:$4 sm:$0xff]  }
 0x39d   :  { %9358 = vmatpush1.bf16.msra.mxu0 %v15094_v56  ;;  %10304 = vmatpush1.bf16.msra.mxu1 %v15097_v57  ;;  %v15195_v56 = vld [vmem:[%s21022_s1 + $0x1ec4] ss:$16 sps:$4 sm:$0xff]   ;;  %v15198_v57 = vld [vmem:[%s21022_s1 + $0x1ecc] ss:$16 sps:$4 sm:$0xff]  }
 0x39e   :  { %9359 = vmatprep.subr.bf16.mxu0 %v15102_v58  ;;  %10305 = vmatprep.subr.bf16.mxu1 %v15105_v59  ;;  %v15193_v58 = vld [vmem:[%s21022_s1 + $0x1ec0] ss:$16 sps:$4 sm:$0xff]   ;;  %v15196_v59 = vld [vmem:[%s21022_s1 + $0x1ec8] ss:$16 sps:$4 sm:$0xff]  }
 0x3a1   :  { %9360 = vmatpush1.bf16.msra.mxu0 %v15100_v60  ;;  %10306 = vmatpush1.bf16.msra.mxu1 %v15103_v61  ;;  %v15201_v60 = vld [vmem:[%s21022_s1 + $0x1ee4] ss:$16 sps:$4 sm:$0xff]   ;;  %v15204_v61 = vld [vmem:[%s21022_s1 + $0x1eec] ss:$16 sps:$4 sm:$0xff]  }
 0x3a2   :  { %9361 = vmatprep.subr.bf16.mxu0 %v15108_v62  ;;  %10307 = vmatprep.subr.bf16.mxu1 %v15111_v63  ;;  %v15199_v62 = vld [vmem:[%s21022_s1 + $0x1ee0] ss:$16 sps:$4 sm:$0xff]   ;;  %v15202_v63 = vld [vmem:[%s21022_s1 + $0x1ee8] ss:$16 sps:$4 sm:$0xff]  }
 0x3a5   :  { %9362 = vmatpush1.bf16.msra.mxu0 %v15106_v0  ;;  %10308 = vmatpush1.bf16.msra.mxu1 %v15109_v1  ;;  %v15207_v0 = vld [vmem:[%s21022_s1 + $0x1f04] ss:$16 sps:$4 sm:$0xff]   ;;  %v15210_v1 = vld [vmem:[%s21022_s1 + $0x1f0c] ss:$16 sps:$4 sm:$0xff]  }
 0x3a6   :  { %9363 = vmatprep.subr.bf16.mxu0 %v15114_v2  ;;  %10309 = vmatprep.subr.bf16.mxu1 %v15117_v3  ;;  %v15205_v2 = vld [vmem:[%s21022_s1 + $0x1f00] ss:$16 sps:$4 sm:$0xff]   ;;  %v15208_v3 = vld [vmem:[%s21022_s1 + $0x1f08] ss:$16 sps:$4 sm:$0xff]  }
 0x3a9   :  { %9364 = vmatpush1.bf16.msra.mxu0 %v15112_v4  ;;  %10310 = vmatpush1.bf16.msra.mxu1 %v15115_v5  ;;  %v15213_v4 = vld [vmem:[%s21022_s1 + $0x1f24] ss:$16 sps:$4 sm:$0xff]   ;;  %v15216_v5 = vld [vmem:[%s21022_s1 + $0x1f2c] ss:$16 sps:$4 sm:$0xff]  }
 0x3aa   :  { %9365 = vmatprep.subr.bf16.mxu0 %v15120_v6  ;;  %10311 = vmatprep.subr.bf16.mxu1 %v15123_v7  ;;  %v15211_v6 = vld [vmem:[%s21022_s1 + $0x1f20] ss:$16 sps:$4 sm:$0xff]   ;;  %v15214_v7 = vld [vmem:[%s21022_s1 + $0x1f28] ss:$16 sps:$4 sm:$0xff]  }
 0x3ad   :  { %9366 = vmatpush1.bf16.msra.mxu0 %v15118_v8  ;;  %10312 = vmatpush1.bf16.msra.mxu1 %v15121_v9  ;;  %v15219_v8 = vld [vmem:[%s21022_s1 + $0x1f44] ss:$16 sps:$4 sm:$0xff]   ;;  %v15222_v9 = vld [vmem:[%s21022_s1 + $0x1f4c] ss:$16 sps:$4 sm:$0xff]  }
 0x3ae   :  { %9367 = vmatprep.subr.bf16.mxu0 %v15126_v10  ;;  %10313 = vmatprep.subr.bf16.mxu1 %v15129_v11  ;;  %v15217_v10 = vld [vmem:[%s21022_s1 + $0x1f40] ss:$16 sps:$4 sm:$0xff]   ;;  %v15220_v11 = vld [vmem:[%s21022_s1 + $0x1f48] ss:$16 sps:$4 sm:$0xff]  }
 0x3b1   :  { %9368 = vmatpush1.bf16.msra.mxu0 %v15124_v12  ;;  %10314 = vmatpush1.bf16.msra.mxu1 %v15127_v13  ;;  %v15225_v12 = vld [vmem:[%s21022_s1 + $0x1f64] ss:$16 sps:$4 sm:$0xff]   ;;  %v15228_v13 = vld [vmem:[%s21022_s1 + $0x1f6c] ss:$16 sps:$4 sm:$0xff]  }
 0x3b2   :  { %9369 = vmatprep.subr.bf16.mxu0 %v15132_v14  ;;  %10315 = vmatprep.subr.bf16.mxu1 %v15135_v15  ;;  %v15223_v14 = vld [vmem:[%s21022_s1 + $0x1f60] ss:$16 sps:$4 sm:$0xff]   ;;  %v15226_v15 = vld [vmem:[%s21022_s1 + $0x1f68] ss:$16 sps:$4 sm:$0xff]  }
 0x3b5   :  { %9370 = vmatpush1.bf16.msra.mxu0 %v15130_v16  ;;  %10316 = vmatpush1.bf16.msra.mxu1 %v15133_v17  ;;  %v15231_v16 = vld [vmem:[%s21022_s1 + $0x1f84] ss:$16 sps:$4 sm:$0xff]   ;;  %v15234_v17 = vld [vmem:[%s21022_s1 + $0x1f8c] ss:$16 sps:$4 sm:$0xff]  }
 0x3b6   :  { %9371 = vmatprep.subr.bf16.mxu0 %v15138_v18  ;;  %10317 = vmatprep.subr.bf16.mxu1 %v15141_v19  ;;  %v15229_v18 = vld [vmem:[%s21022_s1 + $0x1f80] ss:$16 sps:$4 sm:$0xff]   ;;  %v15232_v19 = vld [vmem:[%s21022_s1 + $0x1f88] ss:$16 sps:$4 sm:$0xff]  }
 0x3b9   :  { %9372 = vmatpush1.bf16.msra.mxu0 %v15136_v20  ;;  %10318 = vmatpush1.bf16.msra.mxu1 %v15139_v21  ;;  %v15237_v20 = vld [vmem:[%s21022_s1 + $0x1fa4] ss:$16 sps:$4 sm:$0xff]   ;;  %v15240_v21 = vld [vmem:[%s21022_s1 + $0x1fac] ss:$16 sps:$4 sm:$0xff]  }
 0x3ba   :  { %9373 = vmatprep.subr.bf16.mxu0 %v15144_v22  ;;  %10319 = vmatprep.subr.bf16.mxu1 %v15147_v23  ;;  %v15235_v22 = vld [vmem:[%s21022_s1 + $0x1fa0] ss:$16 sps:$4 sm:$0xff]   ;;  %v15238_v23 = vld [vmem:[%s21022_s1 + $0x1fa8] ss:$16 sps:$4 sm:$0xff]  }
 0x3bd   :  { %9374 = vmatpush1.bf16.msra.mxu0 %v15142_v24  ;;  %10320 = vmatpush1.bf16.msra.mxu1 %v15145_v25  ;;  %v15243_v24 = vld [vmem:[%s21022_s1 + $0x1fc4] ss:$16 sps:$4 sm:$0xff]   ;;  %v15246_v25 = vld [vmem:[%s21022_s1 + $0x1fcc] ss:$16 sps:$4 sm:$0xff]  }
 0x3be   :  { %9375 = vmatprep.subr.bf16.mxu0 %v15150_v26  ;;  %10321 = vmatprep.subr.bf16.mxu1 %v15153_v27  ;;  %v15241_v26 = vld [vmem:[%s21022_s1 + $0x1fc0] ss:$16 sps:$4 sm:$0xff]   ;;  %v15244_v27 = vld [vmem:[%s21022_s1 + $0x1fc8] ss:$16 sps:$4 sm:$0xff]  }
 0x3c1   :  { %9376 = vmatpush1.bf16.msra.mxu0 %v15148_v28  ;;  %10322 = vmatpush1.bf16.msra.mxu1 %v15151_v29  ;;  %v15249_v28 = vld [vmem:[%s21022_s1 + $0x1fe4] ss:$16 sps:$4 sm:$0xff]   ;;  %v15252_v29 = vld [vmem:[%s21022_s1 + $0x1fec] ss:$16 sps:$4 sm:$0xff]  }
 0x3c2   :  { %9388 = vmatprep.subr.bf16.mxu0 %v15159_v30  ;;  %10334 = vmatprep.subr.bf16.mxu1 %v15162_v31  ;;  %v15247_v30 = vld [vmem:[%s21022_s1 + $0x1fe0] ss:$16 sps:$4 sm:$0xff]   ;;  %v15250_v31 = vld [vmem:[%s21022_s1 + $0x1fe8] ss:$16 sps:$4 sm:$0xff]  }
 0x3c4   :  { %9378 = vmatmul.mubr.bf16.vlgmr.msra.gmra.mrb[0].mxu0 %v15154_v32  ;;  %10324 = vmatmul.mubr.bf16.vlgmr.msra.gmra.mrb[0].mxu1 %v15154_v32  ;;  %v15258_v32 = vld [vmem:[%s21022_s1 + $0x2004] ss:$16 sps:$4 sm:$0xff]  }
 0x3c5   :  { %9389 = vmatpush1.bf16.msra.mxu0 %v15157_v33  ;;  %10335 = vmatpush1.bf16.msra.mxu1 %v15160_v34  ;;  %v15261_v33 = vld [vmem:[%s21022_s1 + $0x200c] ss:$16 sps:$4 sm:$0xff]   ;;  %v15253_v34 = vld [vmem:[%s21021_s0 + $0x78] ss:$176 sps:$4 sm:$0xff]  }
 0x3c6   :  { %9390 = vmatprep.subr.bf16.mxu0 %v15165_v35  ;;  %10336 = vmatprep.subr.bf16.mxu1 %v15168_v36  ;;  %v15256_v35 = vld [vmem:[%s21022_s1 + $0x2000] ss:$16 sps:$4 sm:$0xff]   ;;  %v15259_v36 = vld [vmem:[%s21022_s1 + $0x2008] ss:$16 sps:$4 sm:$0xff]  }
 0x3c7   :  { %9420 = vmatprep.mubr.bf16.mxu0 %v15255_v37  ;;  %10366 = vmatprep.mubr.bf16.mxu1 %v15255_v37  ;;  %v15264_v37 = vld [vmem:[%s21022_s1 + $0x2024] ss:$16 sps:$4 sm:$0xff]  }
 0x3c9   :  { %9391 = vmatpush1.bf16.msra.mxu0 %v15163_v38  ;;  %10337 = vmatpush1.bf16.msra.mxu1 %v15166_v39  ;;  %v15267_v38 = vld [vmem:[%s21022_s1 + $0x202c] ss:$16 sps:$4 sm:$0xff]   ;;  %v15354_v39 = vld [vmem:[%s21021_s0 + $0x84] ss:$176 sps:$4 sm:$0xff]  }
 0x3ca   :  { %9392 = vmatprep.subr.bf16.mxu0 %v15171_v40  ;;  %10338 = vmatprep.subr.bf16.mxu1 %v15174_v41  ;;  %v15262_v40 = vld [vmem:[%s21022_s1 + $0x2020] ss:$16 sps:$4 sm:$0xff]   ;;  %v15265_v41 = vld [vmem:[%s21022_s1 + $0x2028] ss:$16 sps:$4 sm:$0xff]  }
 0x3cd   :  { %9393 = vmatpush1.bf16.msra.mxu0 %v15169_v42  ;;  %10339 = vmatpush1.bf16.msra.mxu1 %v15172_v43  ;;  %v15270_v42 = vld [vmem:[%s21022_s1 + $0x2044] ss:$16 sps:$4 sm:$0xff]   ;;  %v15273_v43 = vld [vmem:[%s21022_s1 + $0x204c] ss:$16 sps:$4 sm:$0xff]  }
 0x3ce   :  { %9394 = vmatprep.subr.bf16.mxu0 %v15177_v44  ;;  %10340 = vmatprep.subr.bf16.mxu1 %v15180_v45  ;;  %v15268_v44 = vld [vmem:[%s21022_s1 + $0x2040] ss:$16 sps:$4 sm:$0xff]   ;;  %v15271_v45 = vld [vmem:[%s21022_s1 + $0x2048] ss:$16 sps:$4 sm:$0xff]  }
 0x3d1   :  { %9395 = vmatpush1.bf16.msra.mxu0 %v15175_v46  ;;  %10341 = vmatpush1.bf16.msra.mxu1 %v15178_v47  ;;  %v15276_v46 = vld [vmem:[%s21022_s1 + $0x2064] ss:$16 sps:$4 sm:$0xff]   ;;  %v15279_v47 = vld [vmem:[%s21022_s1 + $0x206c] ss:$16 sps:$4 sm:$0xff]  }
 0x3d2   :  { %9396 = vmatprep.subr.bf16.mxu0 %v15183_v48  ;;  %10342 = vmatprep.subr.bf16.mxu1 %v15186_v49  ;;  %v15274_v48 = vld [vmem:[%s21022_s1 + $0x2060] ss:$16 sps:$4 sm:$0xff]   ;;  %v15277_v49 = vld [vmem:[%s21022_s1 + $0x2068] ss:$16 sps:$4 sm:$0xff]  }
 0x3d5   :  { %9397 = vmatpush1.bf16.msra.mxu0 %v15181_v50  ;;  %10343 = vmatpush1.bf16.msra.mxu1 %v15184_v51  ;;  %v15282_v50 = vld [vmem:[%s21022_s1 + $0x2084] ss:$16 sps:$4 sm:$0xff]   ;;  %v15285_v51 = vld [vmem:[%s21022_s1 + $0x208c] ss:$16 sps:$4 sm:$0xff]  }
 0x3d6   :  { %9398 = vmatprep.subr.bf16.mxu0 %v15189_v52  ;;  %10344 = vmatprep.subr.bf16.mxu1 %v15192_v53  ;;  %v15280_v52 = vld [vmem:[%s21022_s1 + $0x2080] ss:$16 sps:$4 sm:$0xff]   ;;  %v15283_v53 = vld [vmem:[%s21022_s1 + $0x2088] ss:$16 sps:$4 sm:$0xff]  }
 0x3d9   :  { %9399 = vmatpush1.bf16.msra.mxu0 %v15187_v54  ;;  %10345 = vmatpush1.bf16.msra.mxu1 %v15190_v55  ;;  %v15288_v54 = vld [vmem:[%s21022_s1 + $0x20a4] ss:$16 sps:$4 sm:$0xff]   ;;  %v15291_v55 = vld [vmem:[%s21022_s1 + $0x20ac] ss:$16 sps:$4 sm:$0xff]  }
 0x3da   :  { %9400 = vmatprep.subr.bf16.mxu0 %v15195_v56  ;;  %10346 = vmatprep.subr.bf16.mxu1 %v15198_v57  ;;  %v15286_v56 = vld [vmem:[%s21022_s1 + $0x20a0] ss:$16 sps:$4 sm:$0xff]   ;;  %v15289_v57 = vld [vmem:[%s21022_s1 + $0x20a8] ss:$16 sps:$4 sm:$0xff]  }
 0x3dd   :  { %9401 = vmatpush1.bf16.msra.mxu0 %v15193_v58  ;;  %10347 = vmatpush1.bf16.msra.mxu1 %v15196_v59  ;;  %v15294_v58 = vld [vmem:[%s21022_s1 + $0x20c4] ss:$16 sps:$4 sm:$0xff]   ;;  %v15297_v59 = vld [vmem:[%s21022_s1 + $0x20cc] ss:$16 sps:$4 sm:$0xff]  }
 0x3de   :  { %9402 = vmatprep.subr.bf16.mxu0 %v15201_v60  ;;  %10348 = vmatprep.subr.bf16.mxu1 %v15204_v61  ;;  %v15292_v60 = vld [vmem:[%s21022_s1 + $0x20c0] ss:$16 sps:$4 sm:$0xff]   ;;  %v15295_v61 = vld [vmem:[%s21022_s1 + $0x20c8] ss:$16 sps:$4 sm:$0xff]  }
 0x3e1   :  { %9403 = vmatpush1.bf16.msra.mxu0 %v15199_v62  ;;  %10349 = vmatpush1.bf16.msra.mxu1 %v15202_v63  ;;  %v15300_v62 = vld [vmem:[%s21022_s1 + $0x20e4] ss:$16 sps:$4 sm:$0xff]   ;;  %v15303_v63 = vld [vmem:[%s21022_s1 + $0x20ec] ss:$16 sps:$4 sm:$0xff]  }
 0x3e2   :  { %9404 = vmatprep.subr.bf16.mxu0 %v15207_v0  ;;  %10350 = vmatprep.subr.bf16.mxu1 %v15210_v1  ;;  %v15298_v0 = vld [vmem:[%s21022_s1 + $0x20e0] ss:$16 sps:$4 sm:$0xff]   ;;  %v15301_v1 = vld [vmem:[%s21022_s1 + $0x20e8] ss:$16 sps:$4 sm:$0xff]  }
 0x3e5   :  { %9405 = vmatpush1.bf16.msra.mxu0 %v15205_v2  ;;  %10351 = vmatpush1.bf16.msra.mxu1 %v15208_v3  ;;  %v15306_v2 = vld [vmem:[%s21022_s1 + $0x2104] ss:$16 sps:$4 sm:$0xff]   ;;  %v15309_v3 = vld [vmem:[%s21022_s1 + $0x210c] ss:$16 sps:$4 sm:$0xff]  }
 0x3e6   :  { %9406 = vmatprep.subr.bf16.mxu0 %v15213_v4  ;;  %10352 = vmatprep.subr.bf16.mxu1 %v15216_v5  ;;  %v15304_v4 = vld [vmem:[%s21022_s1 + $0x2100] ss:$16 sps:$4 sm:$0xff]   ;;  %v15307_v5 = vld [vmem:[%s21022_s1 + $0x2108] ss:$16 sps:$4 sm:$0xff]  }
 0x3e9   :  { %9407 = vmatpush1.bf16.msra.mxu0 %v15211_v6  ;;  %10353 = vmatpush1.bf16.msra.mxu1 %v15214_v7  ;;  %v15312_v6 = vld [vmem:[%s21022_s1 + $0x2124] ss:$16 sps:$4 sm:$0xff]   ;;  %v15315_v7 = vld [vmem:[%s21022_s1 + $0x212c] ss:$16 sps:$4 sm:$0xff]  }
 0x3ea   :  { %9408 = vmatprep.subr.bf16.mxu0 %v15219_v8  ;;  %10354 = vmatprep.subr.bf16.mxu1 %v15222_v9  ;;  %v15310_v8 = vld [vmem:[%s21022_s1 + $0x2120] ss:$16 sps:$4 sm:$0xff]   ;;  %v15313_v9 = vld [vmem:[%s21022_s1 + $0x2128] ss:$16 sps:$4 sm:$0xff]  }
 0x3ed   :  { %9409 = vmatpush1.bf16.msra.mxu0 %v15217_v10  ;;  %10355 = vmatpush1.bf16.msra.mxu1 %v15220_v11  ;;  %v15318_v10 = vld [vmem:[%s21022_s1 + $0x2144] ss:$16 sps:$4 sm:$0xff]   ;;  %v15321_v11 = vld [vmem:[%s21022_s1 + $0x214c] ss:$16 sps:$4 sm:$0xff]  }
 0x3ee   :  { %9410 = vmatprep.subr.bf16.mxu0 %v15225_v12  ;;  %10356 = vmatprep.subr.bf16.mxu1 %v15228_v13  ;;  %v15316_v12 = vld [vmem:[%s21022_s1 + $0x2140] ss:$16 sps:$4 sm:$0xff]   ;;  %v15319_v13 = vld [vmem:[%s21022_s1 + $0x2148] ss:$16 sps:$4 sm:$0xff]  }
 0x3f1   :  { %9411 = vmatpush1.bf16.msra.mxu0 %v15223_v14  ;;  %10357 = vmatpush1.bf16.msra.mxu1 %v15226_v15  ;;  %v15324_v14 = vld [vmem:[%s21022_s1 + $0x2164] ss:$16 sps:$4 sm:$0xff]   ;;  %v15327_v15 = vld [vmem:[%s21022_s1 + $0x216c] ss:$16 sps:$4 sm:$0xff]  }
 0x3f2   :  { %9412 = vmatprep.subr.bf16.mxu0 %v15231_v16  ;;  %10358 = vmatprep.subr.bf16.mxu1 %v15234_v17  ;;  %v15322_v16 = vld [vmem:[%s21022_s1 + $0x2160] ss:$16 sps:$4 sm:$0xff]   ;;  %v15325_v17 = vld [vmem:[%s21022_s1 + $0x2168] ss:$16 sps:$4 sm:$0xff]  }
 0x3f5   :  { %9413 = vmatpush1.bf16.msra.mxu0 %v15229_v18  ;;  %10359 = vmatpush1.bf16.msra.mxu1 %v15232_v19  ;;  %v15330_v18 = vld [vmem:[%s21022_s1 + $0x2184] ss:$16 sps:$4 sm:$0xff]   ;;  %v15333_v19 = vld [vmem:[%s21022_s1 + $0x218c] ss:$16 sps:$4 sm:$0xff]  }
 0x3f6   :  { %9414 = vmatprep.subr.bf16.mxu0 %v15237_v20  ;;  %10360 = vmatprep.subr.bf16.mxu1 %v15240_v21  ;;  %v15328_v20 = vld [vmem:[%s21022_s1 + $0x2180] ss:$16 sps:$4 sm:$0xff]   ;;  %v15331_v21 = vld [vmem:[%s21022_s1 + $0x2188] ss:$16 sps:$4 sm:$0xff]  }
 0x3f9   :  { %9415 = vmatpush1.bf16.msra.mxu0 %v15235_v22  ;;  %10361 = vmatpush1.bf16.msra.mxu1 %v15238_v23  ;;  %v15336_v22 = vld [vmem:[%s21022_s1 + $0x21a4] ss:$16 sps:$4 sm:$0xff]   ;;  %v15339_v23 = vld [vmem:[%s21022_s1 + $0x21ac] ss:$16 sps:$4 sm:$0xff]  }
 0x3fa   :  { %9416 = vmatprep.subr.bf16.mxu0 %v15243_v24  ;;  %10362 = vmatprep.subr.bf16.mxu1 %v15246_v25  ;;  %v15334_v24 = vld [vmem:[%s21022_s1 + $0x21a0] ss:$16 sps:$4 sm:$0xff]   ;;  %v15337_v25 = vld [vmem:[%s21022_s1 + $0x21a8] ss:$16 sps:$4 sm:$0xff]  }
 0x3fd   :  { %9417 = vmatpush1.bf16.msra.mxu0 %v15241_v26  ;;  %10363 = vmatpush1.bf16.msra.mxu1 %v15244_v27  ;;  %v15342_v26 = vld [vmem:[%s21022_s1 + $0x21c4] ss:$16 sps:$4 sm:$0xff]   ;;  %v15345_v27 = vld [vmem:[%s21022_s1 + $0x21cc] ss:$16 sps:$4 sm:$0xff]  }
 0x3fe   :  { %9418 = vmatprep.subr.bf16.mxu0 %v15249_v28  ;;  %10364 = vmatprep.subr.bf16.mxu1 %v15252_v29  ;;  %v15340_v28 = vld [vmem:[%s21022_s1 + $0x21c0] ss:$16 sps:$4 sm:$0xff]   ;;  %v15343_v29 = vld [vmem:[%s21022_s1 + $0x21c8] ss:$16 sps:$4 sm:$0xff]  }
 0x401   :  { %9419 = vmatpush1.bf16.msra.mxu0 %v15247_v30  ;;  %10365 = vmatpush1.bf16.msra.mxu1 %v15250_v31  ;;  %v15348_v30 = vld [vmem:[%s21022_s1 + $0x21e4] ss:$16 sps:$4 sm:$0xff]   ;;  %v15351_v31 = vld [vmem:[%s21022_s1 + $0x21ec] ss:$16 sps:$4 sm:$0xff]  }
 0x402   :  { %9431 = vmatprep.subr.bf16.mxu0 %v15258_v32  ;;  %10377 = vmatprep.subr.bf16.mxu1 %v15261_v33  ;;  %v15346_v32 = vld [vmem:[%s21022_s1 + $0x21e0] ss:$16 sps:$4 sm:$0xff]   ;;  %v15349_v33 = vld [vmem:[%s21022_s1 + $0x21e8] ss:$16 sps:$4 sm:$0xff]  }
 0x404   :  { %9421 = vmatmul.mubr.bf16.vlgmr.msra.gmra.mrb[0].mxu0 %v15253_v34  ;;  %10367 = vmatmul.mubr.bf16.vlgmr.msra.gmra.mrb[0].mxu1 %v15253_v34  ;;  %v15357_v34 = vld [vmem:[%s21022_s1 + $0x2204] ss:$16 sps:$4 sm:$0xff]  }
 0x405   :  { %9432 = vmatpush1.bf16.msra.mxu0 %v15256_v35  ;;  %10378 = vmatpush1.bf16.msra.mxu1 %v15259_v36  ;;  %v15360_v35 = vld [vmem:[%s21022_s1 + $0x220c] ss:$16 sps:$4 sm:$0xff]   ;;  %v15352_v36 = vld [vmem:[%s21021_s0 + $0x80] ss:$176 sps:$4 sm:$0xff]  }
 0x406   :  { %9433 = vmatprep.subr.bf16.mxu0 %v15264_v37  ;;  %10379 = vmatprep.subr.bf16.mxu1 %v15267_v38  ;;  %v15355_v37 = vld [vmem:[%s21022_s1 + $0x2200] ss:$16 sps:$4 sm:$0xff]   ;;  %v15358_v38 = vld [vmem:[%s21022_s1 + $0x2208] ss:$16 sps:$4 sm:$0xff]  }
 0x407   :  { %9463 = vmatprep.mubr.bf16.mxu0 %v15354_v39  ;;  %10409 = vmatprep.mubr.bf16.mxu1 %v15354_v39  ;;  %v15363_v39 = vld [vmem:[%s21022_s1 + $0x2224] ss:$16 sps:$4 sm:$0xff]  }
 0x409   :  { %9434 = vmatpush1.bf16.msra.mxu0 %v15262_v40  ;;  %10380 = vmatpush1.bf16.msra.mxu1 %v15265_v41  ;;  %v15366_v40 = vld [vmem:[%s21022_s1 + $0x222c] ss:$16 sps:$4 sm:$0xff]  }
 0x40a   :  { %9435 = vmatprep.subr.bf16.mxu0 %v15270_v42  ;;  %10381 = vmatprep.subr.bf16.mxu1 %v15273_v43  ;;  %v15453_v41 = vld [vmem:[%s21021_s0 + $0x8c] ss:$176 sps:$4 sm:$0xff]   ;;  %v15361_v42 = vld [vmem:[%s21022_s1 + $0x2220] ss:$16 sps:$4 sm:$0xff]   ;;  %v15364_v43 = vld [vmem:[%s21022_s1 + $0x2228] ss:$16 sps:$4 sm:$0xff]  }
 0x40d   :  { %9436 = vmatpush1.bf16.msra.mxu0 %v15268_v44  ;;  %10382 = vmatpush1.bf16.msra.mxu1 %v15271_v45  ;;  %v15369_v44 = vld [vmem:[%s21022_s1 + $0x2244] ss:$16 sps:$4 sm:$0xff]   ;;  %v15372_v45 = vld [vmem:[%s21022_s1 + $0x224c] ss:$16 sps:$4 sm:$0xff]  }
 0x40e   :  { %9437 = vmatprep.subr.bf16.mxu0 %v15276_v46  ;;  %10383 = vmatprep.subr.bf16.mxu1 %v15279_v47  ;;  %v15367_v46 = vld [vmem:[%s21022_s1 + $0x2240] ss:$16 sps:$4 sm:$0xff]   ;;  %v15370_v47 = vld [vmem:[%s21022_s1 + $0x2248] ss:$16 sps:$4 sm:$0xff]  }
 0x411   :  { %9438 = vmatpush1.bf16.msra.mxu0 %v15274_v48  ;;  %10384 = vmatpush1.bf16.msra.mxu1 %v15277_v49  ;;  %v15375_v48 = vld [vmem:[%s21022_s1 + $0x2264] ss:$16 sps:$4 sm:$0xff]   ;;  %v15378_v49 = vld [vmem:[%s21022_s1 + $0x226c] ss:$16 sps:$4 sm:$0xff]  }
 0x412   :  { %9439 = vmatprep.subr.bf16.mxu0 %v15282_v50  ;;  %10385 = vmatprep.subr.bf16.mxu1 %v15285_v51  ;;  %v15373_v50 = vld [vmem:[%s21022_s1 + $0x2260] ss:$16 sps:$4 sm:$0xff]   ;;  %v15376_v51 = vld [vmem:[%s21022_s1 + $0x2268] ss:$16 sps:$4 sm:$0xff]  }
 0x415   :  { %9440 = vmatpush1.bf16.msra.mxu0 %v15280_v52  ;;  %10386 = vmatpush1.bf16.msra.mxu1 %v15283_v53  ;;  %v15381_v52 = vld [vmem:[%s21022_s1 + $0x2284] ss:$16 sps:$4 sm:$0xff]   ;;  %v15384_v53 = vld [vmem:[%s21022_s1 + $0x228c] ss:$16 sps:$4 sm:$0xff]  }
 0x416   :  { %9441 = vmatprep.subr.bf16.mxu0 %v15288_v54  ;;  %10387 = vmatprep.subr.bf16.mxu1 %v15291_v55  ;;  %v15379_v54 = vld [vmem:[%s21022_s1 + $0x2280] ss:$16 sps:$4 sm:$0xff]   ;;  %v15382_v55 = vld [vmem:[%s21022_s1 + $0x2288] ss:$16 sps:$4 sm:$0xff]  }
 0x419   :  { %9442 = vmatpush1.bf16.msra.mxu0 %v15286_v56  ;;  %10388 = vmatpush1.bf16.msra.mxu1 %v15289_v57  ;;  %v15387_v56 = vld [vmem:[%s21022_s1 + $0x22a4] ss:$16 sps:$4 sm:$0xff]   ;;  %v15390_v57 = vld [vmem:[%s21022_s1 + $0x22ac] ss:$16 sps:$4 sm:$0xff]  }
 0x41a   :  { %9443 = vmatprep.subr.bf16.mxu0 %v15294_v58  ;;  %10389 = vmatprep.subr.bf16.mxu1 %v15297_v59  ;;  %v15385_v58 = vld [vmem:[%s21022_s1 + $0x22a0] ss:$16 sps:$4 sm:$0xff]   ;;  %v15388_v59 = vld [vmem:[%s21022_s1 + $0x22a8] ss:$16 sps:$4 sm:$0xff]  }
 0x41d   :  { %9444 = vmatpush1.bf16.msra.mxu0 %v15292_v60  ;;  %10390 = vmatpush1.bf16.msra.mxu1 %v15295_v61  ;;  %v15393_v60 = vld [vmem:[%s21022_s1 + $0x22c4] ss:$16 sps:$4 sm:$0xff]   ;;  %v15396_v61 = vld [vmem:[%s21022_s1 + $0x22cc] ss:$16 sps:$4 sm:$0xff]  }
 0x41e   :  { %9445 = vmatprep.subr.bf16.mxu0 %v15300_v62  ;;  %10391 = vmatprep.subr.bf16.mxu1 %v15303_v63  ;;  %v15391_v62 = vld [vmem:[%s21022_s1 + $0x22c0] ss:$16 sps:$4 sm:$0xff]   ;;  %v15394_v63 = vld [vmem:[%s21022_s1 + $0x22c8] ss:$16 sps:$4 sm:$0xff]  }
 0x421   :  { %9446 = vmatpush1.bf16.msra.mxu0 %v15298_v0  ;;  %10392 = vmatpush1.bf16.msra.mxu1 %v15301_v1  ;;  %v15399_v0 = vld [vmem:[%s21022_s1 + $0x22e4] ss:$16 sps:$4 sm:$0xff]   ;;  %v15402_v1 = vld [vmem:[%s21022_s1 + $0x22ec] ss:$16 sps:$4 sm:$0xff]  }
 0x422   :  { %9447 = vmatprep.subr.bf16.mxu0 %v15306_v2  ;;  %10393 = vmatprep.subr.bf16.mxu1 %v15309_v3  ;;  %v15397_v2 = vld [vmem:[%s21022_s1 + $0x22e0] ss:$16 sps:$4 sm:$0xff]   ;;  %v15400_v3 = vld [vmem:[%s21022_s1 + $0x22e8] ss:$16 sps:$4 sm:$0xff]  }
 0x425   :  { %9448 = vmatpush1.bf16.msra.mxu0 %v15304_v4  ;;  %10394 = vmatpush1.bf16.msra.mxu1 %v15307_v5  ;;  %v15405_v4 = vld [vmem:[%s21022_s1 + $0x2304] ss:$16 sps:$4 sm:$0xff]   ;;  %v15408_v5 = vld [vmem:[%s21022_s1 + $0x230c] ss:$16 sps:$4 sm:$0xff]  }
 0x426   :  { %9449 = vmatprep.subr.bf16.mxu0 %v15312_v6  ;;  %10395 = vmatprep.subr.bf16.mxu1 %v15315_v7  ;;  %v15403_v6 = vld [vmem:[%s21022_s1 + $0x2300] ss:$16 sps:$4 sm:$0xff]   ;;  %v15406_v7 = vld [vmem:[%s21022_s1 + $0x2308] ss:$16 sps:$4 sm:$0xff]  }
 0x429   :  { %9450 = vmatpush1.bf16.msra.mxu0 %v15310_v8  ;;  %10396 = vmatpush1.bf16.msra.mxu1 %v15313_v9  ;;  %v15411_v8 = vld [vmem:[%s21022_s1 + $0x2324] ss:$16 sps:$4 sm:$0xff]   ;;  %v15414_v9 = vld [vmem:[%s21022_s1 + $0x232c] ss:$16 sps:$4 sm:$0xff]  }
 0x42a   :  { %9451 = vmatprep.subr.bf16.mxu0 %v15318_v10  ;;  %10397 = vmatprep.subr.bf16.mxu1 %v15321_v11  ;;  %v15409_v10 = vld [vmem:[%s21022_s1 + $0x2320] ss:$16 sps:$4 sm:$0xff]   ;;  %v15412_v11 = vld [vmem:[%s21022_s1 + $0x2328] ss:$16 sps:$4 sm:$0xff]  }
 0x42d   :  { %9452 = vmatpush1.bf16.msra.mxu0 %v15316_v12  ;;  %10398 = vmatpush1.bf16.msra.mxu1 %v15319_v13  ;;  %v15417_v12 = vld [vmem:[%s21022_s1 + $0x2344] ss:$16 sps:$4 sm:$0xff]   ;;  %v15420_v13 = vld [vmem:[%s21022_s1 + $0x234c] ss:$16 sps:$4 sm:$0xff]  }
 0x42e   :  { %9453 = vmatprep.subr.bf16.mxu0 %v15324_v14  ;;  %10399 = vmatprep.subr.bf16.mxu1 %v15327_v15  ;;  %v15415_v14 = vld [vmem:[%s21022_s1 + $0x2340] ss:$16 sps:$4 sm:$0xff]   ;;  %v15418_v15 = vld [vmem:[%s21022_s1 + $0x2348] ss:$16 sps:$4 sm:$0xff]  }
 0x431   :  { %9454 = vmatpush1.bf16.msra.mxu0 %v15322_v16  ;;  %10400 = vmatpush1.bf16.msra.mxu1 %v15325_v17  ;;  %v15423_v16 = vld [vmem:[%s21022_s1 + $0x2364] ss:$16 sps:$4 sm:$0xff]   ;;  %v15426_v17 = vld [vmem:[%s21022_s1 + $0x236c] ss:$16 sps:$4 sm:$0xff]  }
 0x432   :  { %9455 = vmatprep.subr.bf16.mxu0 %v15330_v18  ;;  %10401 = vmatprep.subr.bf16.mxu1 %v15333_v19  ;;  %v15421_v18 = vld [vmem:[%s21022_s1 + $0x2360] ss:$16 sps:$4 sm:$0xff]   ;;  %v15424_v19 = vld [vmem:[%s21022_s1 + $0x2368] ss:$16 sps:$4 sm:$0xff]  }
 0x435   :  { %9456 = vmatpush1.bf16.msra.mxu0 %v15328_v20  ;;  %10402 = vmatpush1.bf16.msra.mxu1 %v15331_v21  ;;  %v15429_v20 = vld [vmem:[%s21022_s1 + $0x2384] ss:$16 sps:$4 sm:$0xff]   ;;  %v15432_v21 = vld [vmem:[%s21022_s1 + $0x238c] ss:$16 sps:$4 sm:$0xff]  }
 0x436   :  { %9457 = vmatprep.subr.bf16.mxu0 %v15336_v22  ;;  %10403 = vmatprep.subr.bf16.mxu1 %v15339_v23  ;;  %v15427_v22 = vld [vmem:[%s21022_s1 + $0x2380] ss:$16 sps:$4 sm:$0xff]   ;;  %v15430_v23 = vld [vmem:[%s21022_s1 + $0x2388] ss:$16 sps:$4 sm:$0xff]  }
 0x439   :  { %9458 = vmatpush1.bf16.msra.mxu0 %v15334_v24  ;;  %10404 = vmatpush1.bf16.msra.mxu1 %v15337_v25  ;;  %v15435_v24 = vld [vmem:[%s21022_s1 + $0x23a4] ss:$16 sps:$4 sm:$0xff]   ;;  %v15438_v25 = vld [vmem:[%s21022_s1 + $0x23ac] ss:$16 sps:$4 sm:$0xff]  }
 0x43a   :  { %9459 = vmatprep.subr.bf16.mxu0 %v15342_v26  ;;  %10405 = vmatprep.subr.bf16.mxu1 %v15345_v27  ;;  %v15433_v26 = vld [vmem:[%s21022_s1 + $0x23a0] ss:$16 sps:$4 sm:$0xff]   ;;  %v15436_v27 = vld [vmem:[%s21022_s1 + $0x23a8] ss:$16 sps:$4 sm:$0xff]  }
 0x43d   :  { %9460 = vmatpush1.bf16.msra.mxu0 %v15340_v28  ;;  %10406 = vmatpush1.bf16.msra.mxu1 %v15343_v29  ;;  %v15441_v28 = vld [vmem:[%s21022_s1 + $0x23c4] ss:$16 sps:$4 sm:$0xff]   ;;  %v15444_v29 = vld [vmem:[%s21022_s1 + $0x23cc] ss:$16 sps:$4 sm:$0xff]  }
 0x43e   :  { %9461 = vmatprep.subr.bf16.mxu0 %v15348_v30  ;;  %10407 = vmatprep.subr.bf16.mxu1 %v15351_v31  ;;  %v15439_v30 = vld [vmem:[%s21022_s1 + $0x23c0] ss:$16 sps:$4 sm:$0xff]   ;;  %v15442_v31 = vld [vmem:[%s21022_s1 + $0x23c8] ss:$16 sps:$4 sm:$0xff]  }
 0x441   :  { %9462 = vmatpush1.bf16.msra.mxu0 %v15346_v32  ;;  %10408 = vmatpush1.bf16.msra.mxu1 %v15349_v33  ;;  %v15447_v32 = vld [vmem:[%s21022_s1 + $0x23e4] ss:$16 sps:$4 sm:$0xff]   ;;  %v15450_v33 = vld [vmem:[%s21022_s1 + $0x23ec] ss:$16 sps:$4 sm:$0xff]  }
 0x442   :  { %9474 = vmatprep.subr.bf16.mxu0 %v15357_v34  ;;  %10420 = vmatprep.subr.bf16.mxu1 %v15360_v35  ;;  %v15445_v34 = vld [vmem:[%s21022_s1 + $0x23e0] ss:$16 sps:$4 sm:$0xff]   ;;  %v15448_v35 = vld [vmem:[%s21022_s1 + $0x23e8] ss:$16 sps:$4 sm:$0xff]  }
 0x444   :  { %9464 = vmatmul.mubr.bf16.vlgmr.msra.gmra.mrb[0].mxu0 %v15352_v36  ;;  %10410 = vmatmul.mubr.bf16.vlgmr.msra.gmra.mrb[0].mxu1 %v15352_v36  ;;  %v15456_v36 = vld [vmem:[%s21022_s1 + $0x2404] ss:$16 sps:$4 sm:$0xff]  }
 0x445   :  { %9475 = vmatpush1.bf16.msra.mxu0 %v15355_v37  ;;  %10421 = vmatpush1.bf16.msra.mxu1 %v15358_v38  ;;  %v15459_v37 = vld [vmem:[%s21022_s1 + $0x240c] ss:$16 sps:$4 sm:$0xff]   ;;  %v15451_v38 = vld [vmem:[%s21021_s0 + $0x88] ss:$176 sps:$4 sm:$0xff]  }
 0x446   :  { %9476 = vmatprep.subr.bf16.mxu0 %v15363_v39  ;;  %10422 = vmatprep.subr.bf16.mxu1 %v15366_v40  ;;  %v15454_v39 = vld [vmem:[%s21022_s1 + $0x2400] ss:$16 sps:$4 sm:$0xff]   ;;  %v15457_v40 = vld [vmem:[%s21022_s1 + $0x2408] ss:$16 sps:$4 sm:$0xff]  }
 0x447   :  { %9506 = vmatprep.mubr.bf16.mxu0 %v15453_v41  ;;  %10452 = vmatprep.mubr.bf16.mxu1 %v15453_v41  ;;  %v15462_v41 = vld [vmem:[%s21022_s1 + $0x2424] ss:$16 sps:$4 sm:$0xff]  }
 0x449   :  { %9477 = vmatpush1.bf16.msra.mxu0 %v15361_v42  ;;  %10423 = vmatpush1.bf16.msra.mxu1 %v15364_v43  ;;  %v15465_v42 = vld [vmem:[%s21022_s1 + $0x242c] ss:$16 sps:$4 sm:$0xff]   ;;  %v15552_v43 = vld [vmem:[%s21021_s0 + $0x94] ss:$176 sps:$4 sm:$0xff]  }
 0x44a   :  { %9478 = vmatprep.subr.bf16.mxu0 %v15369_v44  ;;  %10424 = vmatprep.subr.bf16.mxu1 %v15372_v45  ;;  %v15460_v44 = vld [vmem:[%s21022_s1 + $0x2420] ss:$16 sps:$4 sm:$0xff]   ;;  %v15463_v45 = vld [vmem:[%s21022_s1 + $0x2428] ss:$16 sps:$4 sm:$0xff]  }
 0x44d   :  { %9479 = vmatpush1.bf16.msra.mxu0 %v15367_v46  ;;  %10425 = vmatpush1.bf16.msra.mxu1 %v15370_v47  ;;  %v15468_v46 = vld [vmem:[%s21022_s1 + $0x2444] ss:$16 sps:$4 sm:$0xff]   ;;  %v15471_v47 = vld [vmem:[%s21022_s1 + $0x244c] ss:$16 sps:$4 sm:$0xff]  }
 0x44e   :  { %9480 = vmatprep.subr.bf16.mxu0 %v15375_v48  ;;  %10426 = vmatprep.subr.bf16.mxu1 %v15378_v49  ;;  %v15466_v48 = vld [vmem:[%s21022_s1 + $0x2440] ss:$16 sps:$4 sm:$0xff]   ;;  %v15469_v49 = vld [vmem:[%s21022_s1 + $0x2448] ss:$16 sps:$4 sm:$0xff]  }
 0x451   :  { %9481 = vmatpush1.bf16.msra.mxu0 %v15373_v50  ;;  %10427 = vmatpush1.bf16.msra.mxu1 %v15376_v51  ;;  %v15474_v50 = vld [vmem:[%s21022_s1 + $0x2464] ss:$16 sps:$4 sm:$0xff]   ;;  %v15477_v51 = vld [vmem:[%s21022_s1 + $0x246c] ss:$16 sps:$4 sm:$0xff]  }
 0x452   :  { %9482 = vmatprep.subr.bf16.mxu0 %v15381_v52  ;;  %10428 = vmatprep.subr.bf16.mxu1 %v15384_v53  ;;  %v15472_v52 = vld [vmem:[%s21022_s1 + $0x2460] ss:$16 sps:$4 sm:$0xff]   ;;  %v15475_v53 = vld [vmem:[%s21022_s1 + $0x2468] ss:$16 sps:$4 sm:$0xff]  }
 0x455   :  { %9483 = vmatpush1.bf16.msra.mxu0 %v15379_v54  ;;  %10429 = vmatpush1.bf16.msra.mxu1 %v15382_v55  ;;  %v15480_v54 = vld [vmem:[%s21022_s1 + $0x2484] ss:$16 sps:$4 sm:$0xff]   ;;  %v15483_v55 = vld [vmem:[%s21022_s1 + $0x248c] ss:$16 sps:$4 sm:$0xff]  }
 0x456   :  { %9484 = vmatprep.subr.bf16.mxu0 %v15387_v56  ;;  %10430 = vmatprep.subr.bf16.mxu1 %v15390_v57  ;;  %v15478_v56 = vld [vmem:[%s21022_s1 + $0x2480] ss:$16 sps:$4 sm:$0xff]   ;;  %v15481_v57 = vld [vmem:[%s21022_s1 + $0x2488] ss:$16 sps:$4 sm:$0xff]  }
 0x459   :  { %9485 = vmatpush1.bf16.msra.mxu0 %v15385_v58  ;;  %10431 = vmatpush1.bf16.msra.mxu1 %v15388_v59  ;;  %v15486_v58 = vld [vmem:[%s21022_s1 + $0x24a4] ss:$16 sps:$4 sm:$0xff]   ;;  %v15489_v59 = vld [vmem:[%s21022_s1 + $0x24ac] ss:$16 sps:$4 sm:$0xff]  }
 0x45a   :  { %9486 = vmatprep.subr.bf16.mxu0 %v15393_v60  ;;  %10432 = vmatprep.subr.bf16.mxu1 %v15396_v61  ;;  %v15484_v60 = vld [vmem:[%s21022_s1 + $0x24a0] ss:$16 sps:$4 sm:$0xff]   ;;  %v15487_v61 = vld [vmem:[%s21022_s1 + $0x24a8] ss:$16 sps:$4 sm:$0xff]  }
 0x45d   :  { %9487 = vmatpush1.bf16.msra.mxu0 %v15391_v62  ;;  %10433 = vmatpush1.bf16.msra.mxu1 %v15394_v63  ;;  %v15492_v62 = vld [vmem:[%s21022_s1 + $0x24c4] ss:$16 sps:$4 sm:$0xff]   ;;  %v15495_v63 = vld [vmem:[%s21022_s1 + $0x24cc] ss:$16 sps:$4 sm:$0xff]  }
 0x45e   :  { %9488 = vmatprep.subr.bf16.mxu0 %v15399_v0  ;;  %10434 = vmatprep.subr.bf16.mxu1 %v15402_v1  ;;  %v15490_v0 = vld [vmem:[%s21022_s1 + $0x24c0] ss:$16 sps:$4 sm:$0xff]   ;;  %v15493_v1 = vld [vmem:[%s21022_s1 + $0x24c8] ss:$16 sps:$4 sm:$0xff]  }
 0x461   :  { %9489 = vmatpush1.bf16.msra.mxu0 %v15397_v2  ;;  %10435 = vmatpush1.bf16.msra.mxu1 %v15400_v3  ;;  %v15498_v2 = vld [vmem:[%s21022_s1 + $0x24e4] ss:$16 sps:$4 sm:$0xff]   ;;  %v15501_v3 = vld [vmem:[%s21022_s1 + $0x24ec] ss:$16 sps:$4 sm:$0xff]  }
 0x462   :  { %9490 = vmatprep.subr.bf16.mxu0 %v15405_v4  ;;  %10436 = vmatprep.subr.bf16.mxu1 %v15408_v5  ;;  %v15496_v4 = vld [vmem:[%s21022_s1 + $0x24e0] ss:$16 sps:$4 sm:$0xff]   ;;  %v15499_v5 = vld [vmem:[%s21022_s1 + $0x24e8] ss:$16 sps:$4 sm:$0xff]  }
 0x465   :  { %9491 = vmatpush1.bf16.msra.mxu0 %v15403_v6  ;;  %10437 = vmatpush1.bf16.msra.mxu1 %v15406_v7  ;;  %v15504_v6 = vld [vmem:[%s21022_s1 + $0x2504] ss:$16 sps:$4 sm:$0xff]   ;;  %v15507_v7 = vld [vmem:[%s21022_s1 + $0x250c] ss:$16 sps:$4 sm:$0xff]  }
 0x466   :  { %9492 = vmatprep.subr.bf16.mxu0 %v15411_v8  ;;  %10438 = vmatprep.subr.bf16.mxu1 %v15414_v9  ;;  %v15502_v8 = vld [vmem:[%s21022_s1 + $0x2500] ss:$16 sps:$4 sm:$0xff]   ;;  %v15505_v9 = vld [vmem:[%s21022_s1 + $0x2508] ss:$16 sps:$4 sm:$0xff]  }
 0x469   :  { %9493 = vmatpush1.bf16.msra.mxu0 %v15409_v10  ;;  %10439 = vmatpush1.bf16.msra.mxu1 %v15412_v11  ;;  %v15510_v10 = vld [vmem:[%s21022_s1 + $0x2524] ss:$16 sps:$4 sm:$0xff]   ;;  %v15513_v11 = vld [vmem:[%s21022_s1 + $0x252c] ss:$16 sps:$4 sm:$0xff]  }
 0x46a   :  { %9494 = vmatprep.subr.bf16.mxu0 %v15417_v12  ;;  %10440 = vmatprep.subr.bf16.mxu1 %v15420_v13  ;;  %v15508_v12 = vld [vmem:[%s21022_s1 + $0x2520] ss:$16 sps:$4 sm:$0xff]   ;;  %v15511_v13 = vld [vmem:[%s21022_s1 + $0x2528] ss:$16 sps:$4 sm:$0xff]  }
 0x46d   :  { %9495 = vmatpush1.bf16.msra.mxu0 %v15415_v14  ;;  %10441 = vmatpush1.bf16.msra.mxu1 %v15418_v15  ;;  %v15516_v14 = vld [vmem:[%s21022_s1 + $0x2544] ss:$16 sps:$4 sm:$0xff]   ;;  %v15519_v15 = vld [vmem:[%s21022_s1 + $0x254c] ss:$16 sps:$4 sm:$0xff]  }
 0x46e   :  { %9496 = vmatprep.subr.bf16.mxu0 %v15423_v16  ;;  %10442 = vmatprep.subr.bf16.mxu1 %v15426_v17  ;;  %v15514_v16 = vld [vmem:[%s21022_s1 + $0x2540] ss:$16 sps:$4 sm:$0xff]   ;;  %v15517_v17 = vld [vmem:[%s21022_s1 + $0x2548] ss:$16 sps:$4 sm:$0xff]  }
 0x471   :  { %9497 = vmatpush1.bf16.msra.mxu0 %v15421_v18  ;;  %10443 = vmatpush1.bf16.msra.mxu1 %v15424_v19  ;;  %v15522_v18 = vld [vmem:[%s21022_s1 + $0x2564] ss:$16 sps:$4 sm:$0xff]   ;;  %v15525_v19 = vld [vmem:[%s21022_s1 + $0x256c] ss:$16 sps:$4 sm:$0xff]  }
 0x472   :  { %9498 = vmatprep.subr.bf16.mxu0 %v15429_v20  ;;  %10444 = vmatprep.subr.bf16.mxu1 %v15432_v21  ;;  %v15520_v20 = vld [vmem:[%s21022_s1 + $0x2560] ss:$16 sps:$4 sm:$0xff]   ;;  %v15523_v21 = vld [vmem:[%s21022_s1 + $0x2568] ss:$16 sps:$4 sm:$0xff]  }
 0x475   :  { %9499 = vmatpush1.bf16.msra.mxu0 %v15427_v22  ;;  %10445 = vmatpush1.bf16.msra.mxu1 %v15430_v23  ;;  %v15528_v22 = vld [vmem:[%s21022_s1 + $0x2584] ss:$16 sps:$4 sm:$0xff]   ;;  %v15531_v23 = vld [vmem:[%s21022_s1 + $0x258c] ss:$16 sps:$4 sm:$0xff]  }
 0x476   :  { %9500 = vmatprep.subr.bf16.mxu0 %v15435_v24  ;;  %10446 = vmatprep.subr.bf16.mxu1 %v15438_v25  ;;  %v15526_v24 = vld [vmem:[%s21022_s1 + $0x2580] ss:$16 sps:$4 sm:$0xff]   ;;  %v15529_v25 = vld [vmem:[%s21022_s1 + $0x2588] ss:$16 sps:$4 sm:$0xff]  }
 0x479   :  { %9501 = vmatpush1.bf16.msra.mxu0 %v15433_v26  ;;  %10447 = vmatpush1.bf16.msra.mxu1 %v15436_v27  ;;  %v15534_v26 = vld [vmem:[%s21022_s1 + $0x25a4] ss:$16 sps:$4 sm:$0xff]   ;;  %v15537_v27 = vld [vmem:[%s21022_s1 + $0x25ac] ss:$16 sps:$4 sm:$0xff]  }
 0x47a   :  { %9502 = vmatprep.subr.bf16.mxu0 %v15441_v28  ;;  %10448 = vmatprep.subr.bf16.mxu1 %v15444_v29  ;;  %v15532_v28 = vld [vmem:[%s21022_s1 + $0x25a0] ss:$16 sps:$4 sm:$0xff]   ;;  %v15535_v29 = vld [vmem:[%s21022_s1 + $0x25a8] ss:$16 sps:$4 sm:$0xff]  }
 0x47d   :  { %9503 = vmatpush1.bf16.msra.mxu0 %v15439_v30  ;;  %10449 = vmatpush1.bf16.msra.mxu1 %v15442_v31  ;;  %v15540_v30 = vld [vmem:[%s21022_s1 + $0x25c4] ss:$16 sps:$4 sm:$0xff]   ;;  %v15543_v31 = vld [vmem:[%s21022_s1 + $0x25cc] ss:$16 sps:$4 sm:$0xff]  }
 0x47e   :  { %9504 = vmatprep.subr.bf16.mxu0 %v15447_v32  ;;  %10450 = vmatprep.subr.bf16.mxu1 %v15450_v33  ;;  %v15538_v32 = vld [vmem:[%s21022_s1 + $0x25c0] ss:$16 sps:$4 sm:$0xff]   ;;  %v15541_v33 = vld [vmem:[%s21022_s1 + $0x25c8] ss:$16 sps:$4 sm:$0xff]  }
 0x481   :  { %9505 = vmatpush1.bf16.msra.mxu0 %v15445_v34  ;;  %10451 = vmatpush1.bf16.msra.mxu1 %v15448_v35  ;;  %v15546_v34 = vld [vmem:[%s21022_s1 + $0x25e4] ss:$16 sps:$4 sm:$0xff]   ;;  %v15549_v35 = vld [vmem:[%s21022_s1 + $0x25ec] ss:$16 sps:$4 sm:$0xff]  }
 0x482   :  { %9517 = vmatprep.subr.bf16.mxu0 %v15456_v36  ;;  %10463 = vmatprep.subr.bf16.mxu1 %v15459_v37  ;;  %v15544_v36 = vld [vmem:[%s21022_s1 + $0x25e0] ss:$16 sps:$4 sm:$0xff]   ;;  %v15547_v37 = vld [vmem:[%s21022_s1 + $0x25e8] ss:$16 sps:$4 sm:$0xff]  }
 0x484   :  { %9507 = vmatmul.mubr.bf16.vlgmr.msra.gmra.mrb[0].mxu0 %v15451_v38  ;;  %10453 = vmatmul.mubr.bf16.vlgmr.msra.gmra.mrb[0].mxu1 %v15451_v38  ;;  %v15555_v38 = vld [vmem:[%s21022_s1 + $0x2604] ss:$16 sps:$4 sm:$0xff]  }
 0x485   :  { %9518 = vmatpush1.bf16.msra.mxu0 %v15454_v39  ;;  %10464 = vmatpush1.bf16.msra.mxu1 %v15457_v40  ;;  %v15558_v39 = vld [vmem:[%s21022_s1 + $0x260c] ss:$16 sps:$4 sm:$0xff]   ;;  %v15550_v40 = vld [vmem:[%s21021_s0 + $0x90] ss:$176 sps:$4 sm:$0xff]  }
 0x486   :  { %9519 = vmatprep.subr.bf16.mxu0 %v15462_v41  ;;  %10465 = vmatprep.subr.bf16.mxu1 %v15465_v42  ;;  %v15553_v41 = vld [vmem:[%s21022_s1 + $0x2600] ss:$16 sps:$4 sm:$0xff]   ;;  %v15556_v42 = vld [vmem:[%s21022_s1 + $0x2608] ss:$16 sps:$4 sm:$0xff]  }
 0x487   :  { %9549 = vmatprep.mubr.bf16.mxu0 %v15552_v43  ;;  %10495 = vmatprep.mubr.bf16.mxu1 %v15552_v43  ;;  %v15561_v43 = vld [vmem:[%s21022_s1 + $0x2624] ss:$16 sps:$4 sm:$0xff]  }
 0x489   :  { %9520 = vmatpush1.bf16.msra.mxu0 %v15460_v44  ;;  %10466 = vmatpush1.bf16.msra.mxu1 %v15463_v45  ;;  %v15564_v44 = vld [vmem:[%s21022_s1 + $0x262c] ss:$16 sps:$4 sm:$0xff]  }
 0x48a   :  { %9521 = vmatprep.subr.bf16.mxu0 %v15468_v46  ;;  %10467 = vmatprep.subr.bf16.mxu1 %v15471_v47  ;;  %v15651_v45 = vld [vmem:[%s21021_s0 + $0x9c] ss:$176 sps:$4 sm:$0xff]   ;;  %v15559_v46 = vld [vmem:[%s21022_s1 + $0x2620] ss:$16 sps:$4 sm:$0xff]   ;;  %v15562_v47 = vld [vmem:[%s21022_s1 + $0x2628] ss:$16 sps:$4 sm:$0xff]  }
 0x48d   :  { %9522 = vmatpush1.bf16.msra.mxu0 %v15466_v48  ;;  %10468 = vmatpush1.bf16.msra.mxu1 %v15469_v49  ;;  %v15567_v48 = vld [vmem:[%s21022_s1 + $0x2644] ss:$16 sps:$4 sm:$0xff]   ;;  %v15570_v49 = vld [vmem:[%s21022_s1 + $0x264c] ss:$16 sps:$4 sm:$0xff]  }
 0x48e   :  { %9523 = vmatprep.subr.bf16.mxu0 %v15474_v50  ;;  %10469 = vmatprep.subr.bf16.mxu1 %v15477_v51  ;;  %v15565_v50 = vld [vmem:[%s21022_s1 + $0x2640] ss:$16 sps:$4 sm:$0xff]   ;;  %v15568_v51 = vld [vmem:[%s21022_s1 + $0x2648] ss:$16 sps:$4 sm:$0xff]  }
 0x491   :  { %9524 = vmatpush1.bf16.msra.mxu0 %v15472_v52  ;;  %10470 = vmatpush1.bf16.msra.mxu1 %v15475_v53  ;;  %v15573_v52 = vld [vmem:[%s21022_s1 + $0x2664] ss:$16 sps:$4 sm:$0xff]   ;;  %v15576_v53 = vld [vmem:[%s21022_s1 + $0x266c] ss:$16 sps:$4 sm:$0xff]  }
 0x492   :  { %9525 = vmatprep.subr.bf16.mxu0 %v15480_v54  ;;  %10471 = vmatprep.subr.bf16.mxu1 %v15483_v55  ;;  %v15571_v54 = vld [vmem:[%s21022_s1 + $0x2660] ss:$16 sps:$4 sm:$0xff]   ;;  %v15574_v55 = vld [vmem:[%s21022_s1 + $0x2668] ss:$16 sps:$4 sm:$0xff]  }
 0x495   :  { %9526 = vmatpush1.bf16.msra.mxu0 %v15478_v56  ;;  %10472 = vmatpush1.bf16.msra.mxu1 %v15481_v57  ;;  %v15579_v56 = vld [vmem:[%s21022_s1 + $0x2684] ss:$16 sps:$4 sm:$0xff]   ;;  %v15582_v57 = vld [vmem:[%s21022_s1 + $0x268c] ss:$16 sps:$4 sm:$0xff]  }
 0x496   :  { %9527 = vmatprep.subr.bf16.mxu0 %v15486_v58  ;;  %10473 = vmatprep.subr.bf16.mxu1 %v15489_v59  ;;  %v15577_v58 = vld [vmem:[%s21022_s1 + $0x2680] ss:$16 sps:$4 sm:$0xff]   ;;  %v15580_v59 = vld [vmem:[%s21022_s1 + $0x2688] ss:$16 sps:$4 sm:$0xff]  }
 0x499   :  { %9528 = vmatpush1.bf16.msra.mxu0 %v15484_v60  ;;  %10474 = vmatpush1.bf16.msra.mxu1 %v15487_v61  ;;  %v15585_v60 = vld [vmem:[%s21022_s1 + $0x26a4] ss:$16 sps:$4 sm:$0xff]   ;;  %v15588_v61 = vld [vmem:[%s21022_s1 + $0x26ac] ss:$16 sps:$4 sm:$0xff]  }
 0x49a   :  { %9529 = vmatprep.subr.bf16.mxu0 %v15492_v62  ;;  %10475 = vmatprep.subr.bf16.mxu1 %v15495_v63  ;;  %v15583_v62 = vld [vmem:[%s21022_s1 + $0x26a0] ss:$16 sps:$4 sm:$0xff]   ;;  %v15586_v63 = vld [vmem:[%s21022_s1 + $0x26a8] ss:$16 sps:$4 sm:$0xff]  }
 0x49d   :  { %9530 = vmatpush1.bf16.msra.mxu0 %v15490_v0  ;;  %10476 = vmatpush1.bf16.msra.mxu1 %v15493_v1  ;;  %v15591_v0 = vld [vmem:[%s21022_s1 + $0x26c4] ss:$16 sps:$4 sm:$0xff]   ;;  %v15594_v1 = vld [vmem:[%s21022_s1 + $0x26cc] ss:$16 sps:$4 sm:$0xff]  }
 0x49e   :  { %9531 = vmatprep.subr.bf16.mxu0 %v15498_v2  ;;  %10477 = vmatprep.subr.bf16.mxu1 %v15501_v3  ;;  %v15589_v2 = vld [vmem:[%s21022_s1 + $0x26c0] ss:$16 sps:$4 sm:$0xff]   ;;  %v15592_v3 = vld [vmem:[%s21022_s1 + $0x26c8] ss:$16 sps:$4 sm:$0xff]  }
 0x4a1   :  { %9532 = vmatpush1.bf16.msra.mxu0 %v15496_v4  ;;  %10478 = vmatpush1.bf16.msra.mxu1 %v15499_v5  ;;  %v15597_v4 = vld [vmem:[%s21022_s1 + $0x26e4] ss:$16 sps:$4 sm:$0xff]   ;;  %v15600_v5 = vld [vmem:[%s21022_s1 + $0x26ec] ss:$16 sps:$4 sm:$0xff]  }
 0x4a2   :  { %9533 = vmatprep.subr.bf16.mxu0 %v15504_v6  ;;  %10479 = vmatprep.subr.bf16.mxu1 %v15507_v7  ;;  %v15595_v6 = vld [vmem:[%s21022_s1 + $0x26e0] ss:$16 sps:$4 sm:$0xff]   ;;  %v15598_v7 = vld [vmem:[%s21022_s1 + $0x26e8] ss:$16 sps:$4 sm:$0xff]  }
 0x4a5   :  { %9534 = vmatpush1.bf16.msra.mxu0 %v15502_v8  ;;  %10480 = vmatpush1.bf16.msra.mxu1 %v15505_v9  ;;  %v15603_v8 = vld [vmem:[%s21022_s1 + $0x2704] ss:$16 sps:$4 sm:$0xff]   ;;  %v15606_v9 = vld [vmem:[%s21022_s1 + $0x270c] ss:$16 sps:$4 sm:$0xff]  }
 0x4a6   :  { %9535 = vmatprep.subr.bf16.mxu0 %v15510_v10  ;;  %10481 = vmatprep.subr.bf16.mxu1 %v15513_v11  ;;  %v15601_v10 = vld [vmem:[%s21022_s1 + $0x2700] ss:$16 sps:$4 sm:$0xff]   ;;  %v15604_v11 = vld [vmem:[%s21022_s1 + $0x2708] ss:$16 sps:$4 sm:$0xff]  }
 0x4a9   :  { %9536 = vmatpush1.bf16.msra.mxu0 %v15508_v12  ;;  %10482 = vmatpush1.bf16.msra.mxu1 %v15511_v13  ;;  %v15609_v12 = vld [vmem:[%s21022_s1 + $0x2724] ss:$16 sps:$4 sm:$0xff]   ;;  %v15612_v13 = vld [vmem:[%s21022_s1 + $0x272c] ss:$16 sps:$4 sm:$0xff]  }
 0x4aa   :  { %9537 = vmatprep.subr.bf16.mxu0 %v15516_v14  ;;  %10483 = vmatprep.subr.bf16.mxu1 %v15519_v15  ;;  %v15607_v14 = vld [vmem:[%s21022_s1 + $0x2720] ss:$16 sps:$4 sm:$0xff]   ;;  %v15610_v15 = vld [vmem:[%s21022_s1 + $0x2728] ss:$16 sps:$4 sm:$0xff]  }
 0x4ad   :  { %9538 = vmatpush1.bf16.msra.mxu0 %v15514_v16  ;;  %10484 = vmatpush1.bf16.msra.mxu1 %v15517_v17  ;;  %v15615_v16 = vld [vmem:[%s21022_s1 + $0x2744] ss:$16 sps:$4 sm:$0xff]   ;;  %v15618_v17 = vld [vmem:[%s21022_s1 + $0x274c] ss:$16 sps:$4 sm:$0xff]  }
 0x4ae   :  { %9539 = vmatprep.subr.bf16.mxu0 %v15522_v18  ;;  %10485 = vmatprep.subr.bf16.mxu1 %v15525_v19  ;;  %v15613_v18 = vld [vmem:[%s21022_s1 + $0x2740] ss:$16 sps:$4 sm:$0xff]   ;;  %v15616_v19 = vld [vmem:[%s21022_s1 + $0x2748] ss:$16 sps:$4 sm:$0xff]  }
 0x4b1   :  { %9540 = vmatpush1.bf16.msra.mxu0 %v15520_v20  ;;  %10486 = vmatpush1.bf16.msra.mxu1 %v15523_v21  ;;  %v15621_v20 = vld [vmem:[%s21022_s1 + $0x2764] ss:$16 sps:$4 sm:$0xff]   ;;  %v15624_v21 = vld [vmem:[%s21022_s1 + $0x276c] ss:$16 sps:$4 sm:$0xff]  }
 0x4b2   :  { %9541 = vmatprep.subr.bf16.mxu0 %v15528_v22  ;;  %10487 = vmatprep.subr.bf16.mxu1 %v15531_v23  ;;  %v15619_v22 = vld [vmem:[%s21022_s1 + $0x2760] ss:$16 sps:$4 sm:$0xff]   ;;  %v15622_v23 = vld [vmem:[%s21022_s1 + $0x2768] ss:$16 sps:$4 sm:$0xff]  }
 0x4b5   :  { %9542 = vmatpush1.bf16.msra.mxu0 %v15526_v24  ;;  %10488 = vmatpush1.bf16.msra.mxu1 %v15529_v25  ;;  %v15627_v24 = vld [vmem:[%s21022_s1 + $0x2784] ss:$16 sps:$4 sm:$0xff]   ;;  %v15630_v25 = vld [vmem:[%s21022_s1 + $0x278c] ss:$16 sps:$4 sm:$0xff]  }
 0x4b6   :  { %9543 = vmatprep.subr.bf16.mxu0 %v15534_v26  ;;  %10489 = vmatprep.subr.bf16.mxu1 %v15537_v27  ;;  %v15625_v26 = vld [vmem:[%s21022_s1 + $0x2780] ss:$16 sps:$4 sm:$0xff]   ;;  %v15628_v27 = vld [vmem:[%s21022_s1 + $0x2788] ss:$16 sps:$4 sm:$0xff]  }
 0x4b9   :  { %9544 = vmatpush1.bf16.msra.mxu0 %v15532_v28  ;;  %10490 = vmatpush1.bf16.msra.mxu1 %v15535_v29  ;;  %v15633_v28 = vld [vmem:[%s21022_s1 + $0x27a4] ss:$16 sps:$4 sm:$0xff]   ;;  %v15636_v29 = vld [vmem:[%s21022_s1 + $0x27ac] ss:$16 sps:$4 sm:$0xff]  }
 0x4ba   :  { %9545 = vmatprep.subr.bf16.mxu0 %v15540_v30  ;;  %10491 = vmatprep.subr.bf16.mxu1 %v15543_v31  ;;  %v15631_v30 = vld [vmem:[%s21022_s1 + $0x27a0] ss:$16 sps:$4 sm:$0xff]   ;;  %v15634_v31 = vld [vmem:[%s21022_s1 + $0x27a8] ss:$16 sps:$4 sm:$0xff]  }
 0x4bd   :  { %9546 = vmatpush1.bf16.msra.mxu0 %v15538_v32  ;;  %10492 = vmatpush1.bf16.msra.mxu1 %v15541_v33  ;;  %v15639_v32 = vld [vmem:[%s21022_s1 + $0x27c4] ss:$16 sps:$4 sm:$0xff]   ;;  %v15642_v33 = vld [vmem:[%s21022_s1 + $0x27cc] ss:$16 sps:$4 sm:$0xff]  }
 0x4be   :  { %9547 = vmatprep.subr.bf16.mxu0 %v15546_v34  ;;  %10493 = vmatprep.subr.bf16.mxu1 %v15549_v35  ;;  %v15637_v34 = vld [vmem:[%s21022_s1 + $0x27c0] ss:$16 sps:$4 sm:$0xff]   ;;  %v15640_v35 = vld [vmem:[%s21022_s1 + $0x27c8] ss:$16 sps:$4 sm:$0xff]  }
 0x4c1   :  { %9548 = vmatpush1.bf16.msra.mxu0 %v15544_v36  ;;  %10494 = vmatpush1.bf16.msra.mxu1 %v15547_v37  ;;  %v15645_v36 = vld [vmem:[%s21022_s1 + $0x27e4] ss:$16 sps:$4 sm:$0xff]   ;;  %v15648_v37 = vld [vmem:[%s21022_s1 + $0x27ec] ss:$16 sps:$4 sm:$0xff]  }
 0x4c2   :  { %9560 = vmatprep.subr.bf16.mxu0 %v15555_v38  ;;  %10506 = vmatprep.subr.bf16.mxu1 %v15558_v39  ;;  %v15643_v38 = vld [vmem:[%s21022_s1 + $0x27e0] ss:$16 sps:$4 sm:$0xff]   ;;  %v15646_v39 = vld [vmem:[%s21022_s1 + $0x27e8] ss:$16 sps:$4 sm:$0xff]  }
 0x4c4   :  { %9550 = vmatmul.mubr.bf16.vlgmr.msra.gmra.mrb[0].mxu0 %v15550_v40  ;;  %10496 = vmatmul.mubr.bf16.vlgmr.msra.gmra.mrb[0].mxu1 %v15550_v40  ;;  %v15654_v40 = vld [vmem:[%s21022_s1 + $0x2804] ss:$16 sps:$4 sm:$0xff]  }
 0x4c5   :  { %9561 = vmatpush1.bf16.msra.mxu0 %v15553_v41  ;;  %10507 = vmatpush1.bf16.msra.mxu1 %v15556_v42  ;;  %v15657_v41 = vld [vmem:[%s21022_s1 + $0x280c] ss:$16 sps:$4 sm:$0xff]   ;;  %v15649_v42 = vld [vmem:[%s21021_s0 + $0x98] ss:$176 sps:$4 sm:$0xff]  }
 0x4c6   :  { %9562 = vmatprep.subr.bf16.mxu0 %v15561_v43  ;;  %10508 = vmatprep.subr.bf16.mxu1 %v15564_v44  ;;  %v15652_v43 = vld [vmem:[%s21022_s1 + $0x2800] ss:$16 sps:$4 sm:$0xff]   ;;  %v15655_v44 = vld [vmem:[%s21022_s1 + $0x2808] ss:$16 sps:$4 sm:$0xff]  }
 0x4c7   :  { %9592 = vmatprep.mubr.bf16.mxu0 %v15651_v45  ;;  %10538 = vmatprep.mubr.bf16.mxu1 %v15651_v45  ;;  %v15660_v45 = vld [vmem:[%s21022_s1 + $0x2824] ss:$16 sps:$4 sm:$0xff]  }
 0x4c9   :  { %9563 = vmatpush1.bf16.msra.mxu0 %v15559_v46  ;;  %10509 = vmatpush1.bf16.msra.mxu1 %v15562_v47  ;;  %v15663_v46 = vld [vmem:[%s21022_s1 + $0x282c] ss:$16 sps:$4 sm:$0xff]   ;;  %v15750_v47 = vld [vmem:[%s21021_s0 + $0xa4] ss:$176 sps:$4 sm:$0xff]  }
 0x4ca   :  { %9564 = vmatprep.subr.bf16.mxu0 %v15567_v48  ;;  %10510 = vmatprep.subr.bf16.mxu1 %v15570_v49  ;;  %v15658_v48 = vld [vmem:[%s21022_s1 + $0x2820] ss:$16 sps:$4 sm:$0xff]   ;;  %v15661_v49 = vld [vmem:[%s21022_s1 + $0x2828] ss:$16 sps:$4 sm:$0xff]  }
 0x4cd   :  { %9565 = vmatpush1.bf16.msra.mxu0 %v15565_v50  ;;  %10511 = vmatpush1.bf16.msra.mxu1 %v15568_v51  ;;  %v15666_v50 = vld [vmem:[%s21022_s1 + $0x2844] ss:$16 sps:$4 sm:$0xff]   ;;  %v15669_v51 = vld [vmem:[%s21022_s1 + $0x284c] ss:$16 sps:$4 sm:$0xff]  }
 0x4ce   :  { %9566 = vmatprep.subr.bf16.mxu0 %v15573_v52  ;;  %10512 = vmatprep.subr.bf16.mxu1 %v15576_v53  ;;  %v15664_v52 = vld [vmem:[%s21022_s1 + $0x2840] ss:$16 sps:$4 sm:$0xff]   ;;  %v15667_v53 = vld [vmem:[%s21022_s1 + $0x2848] ss:$16 sps:$4 sm:$0xff]  }
 0x4d1   :  { %9567 = vmatpush1.bf16.msra.mxu0 %v15571_v54  ;;  %10513 = vmatpush1.bf16.msra.mxu1 %v15574_v55  ;;  %v15672_v54 = vld [vmem:[%s21022_s1 + $0x2864] ss:$16 sps:$4 sm:$0xff]   ;;  %v15675_v55 = vld [vmem:[%s21022_s1 + $0x286c] ss:$16 sps:$4 sm:$0xff]  }
 0x4d2   :  { %9568 = vmatprep.subr.bf16.mxu0 %v15579_v56  ;;  %10514 = vmatprep.subr.bf16.mxu1 %v15582_v57  ;;  %v15670_v56 = vld [vmem:[%s21022_s1 + $0x2860] ss:$16 sps:$4 sm:$0xff]   ;;  %v15673_v57 = vld [vmem:[%s21022_s1 + $0x2868] ss:$16 sps:$4 sm:$0xff]  }
 0x4d5   :  { %9569 = vmatpush1.bf16.msra.mxu0 %v15577_v58  ;;  %10515 = vmatpush1.bf16.msra.mxu1 %v15580_v59  ;;  %v15678_v58 = vld [vmem:[%s21022_s1 + $0x2884] ss:$16 sps:$4 sm:$0xff]   ;;  %v15681_v59 = vld [vmem:[%s21022_s1 + $0x288c] ss:$16 sps:$4 sm:$0xff]  }
 0x4d6   :  { %9570 = vmatprep.subr.bf16.mxu0 %v15585_v60  ;;  %10516 = vmatprep.subr.bf16.mxu1 %v15588_v61  ;;  %v15676_v60 = vld [vmem:[%s21022_s1 + $0x2880] ss:$16 sps:$4 sm:$0xff]   ;;  %v15679_v61 = vld [vmem:[%s21022_s1 + $0x2888] ss:$16 sps:$4 sm:$0xff]  }
 0x4d9   :  { %9571 = vmatpush1.bf16.msra.mxu0 %v15583_v62  ;;  %10517 = vmatpush1.bf16.msra.mxu1 %v15586_v63  ;;  %v15684_v62 = vld [vmem:[%s21022_s1 + $0x28a4] ss:$16 sps:$4 sm:$0xff]   ;;  %v15687_v63 = vld [vmem:[%s21022_s1 + $0x28ac] ss:$16 sps:$4 sm:$0xff]  }
 0x4da   :  { %9572 = vmatprep.subr.bf16.mxu0 %v15591_v0  ;;  %10518 = vmatprep.subr.bf16.mxu1 %v15594_v1  ;;  %v15682_v0 = vld [vmem:[%s21022_s1 + $0x28a0] ss:$16 sps:$4 sm:$0xff]   ;;  %v15685_v1 = vld [vmem:[%s21022_s1 + $0x28a8] ss:$16 sps:$4 sm:$0xff]  }
 0x4dd   :  { %9573 = vmatpush1.bf16.msra.mxu0 %v15589_v2  ;;  %10519 = vmatpush1.bf16.msra.mxu1 %v15592_v3  ;;  %v15690_v2 = vld [vmem:[%s21022_s1 + $0x28c4] ss:$16 sps:$4 sm:$0xff]   ;;  %v15693_v3 = vld [vmem:[%s21022_s1 + $0x28cc] ss:$16 sps:$4 sm:$0xff]  }
 0x4de   :  { %9574 = vmatprep.subr.bf16.mxu0 %v15597_v4  ;;  %10520 = vmatprep.subr.bf16.mxu1 %v15600_v5  ;;  %v15688_v4 = vld [vmem:[%s21022_s1 + $0x28c0] ss:$16 sps:$4 sm:$0xff]   ;;  %v15691_v5 = vld [vmem:[%s21022_s1 + $0x28c8] ss:$16 sps:$4 sm:$0xff]  }
 0x4e1   :  { %9575 = vmatpush1.bf16.msra.mxu0 %v15595_v6  ;;  %10521 = vmatpush1.bf16.msra.mxu1 %v15598_v7  ;;  %v15696_v6 = vld [vmem:[%s21022_s1 + $0x28e4] ss:$16 sps:$4 sm:$0xff]   ;;  %v15699_v7 = vld [vmem:[%s21022_s1 + $0x28ec] ss:$16 sps:$4 sm:$0xff]  }
 0x4e2   :  { %9576 = vmatprep.subr.bf16.mxu0 %v15603_v8  ;;  %10522 = vmatprep.subr.bf16.mxu1 %v15606_v9  ;;  %v15694_v8 = vld [vmem:[%s21022_s1 + $0x28e0] ss:$16 sps:$4 sm:$0xff]   ;;  %v15697_v9 = vld [vmem:[%s21022_s1 + $0x28e8] ss:$16 sps:$4 sm:$0xff]  }
 0x4e5   :  { %9577 = vmatpush1.bf16.msra.mxu0 %v15601_v10  ;;  %10523 = vmatpush1.bf16.msra.mxu1 %v15604_v11  ;;  %v15702_v10 = vld [vmem:[%s21022_s1 + $0x2904] ss:$16 sps:$4 sm:$0xff]   ;;  %v15705_v11 = vld [vmem:[%s21022_s1 + $0x290c] ss:$16 sps:$4 sm:$0xff]  }
 0x4e6   :  { %9578 = vmatprep.subr.bf16.mxu0 %v15609_v12  ;;  %10524 = vmatprep.subr.bf16.mxu1 %v15612_v13  ;;  %v15700_v12 = vld [vmem:[%s21022_s1 + $0x2900] ss:$16 sps:$4 sm:$0xff]   ;;  %v15703_v13 = vld [vmem:[%s21022_s1 + $0x2908] ss:$16 sps:$4 sm:$0xff]  }
 0x4e9   :  { %9579 = vmatpush1.bf16.msra.mxu0 %v15607_v14  ;;  %10525 = vmatpush1.bf16.msra.mxu1 %v15610_v15  ;;  %v15708_v14 = vld [vmem:[%s21022_s1 + $0x2924] ss:$16 sps:$4 sm:$0xff]   ;;  %v15711_v15 = vld [vmem:[%s21022_s1 + $0x292c] ss:$16 sps:$4 sm:$0xff]  }
 0x4ea   :  { %9580 = vmatprep.subr.bf16.mxu0 %v15615_v16  ;;  %10526 = vmatprep.subr.bf16.mxu1 %v15618_v17  ;;  %v15706_v16 = vld [vmem:[%s21022_s1 + $0x2920] ss:$16 sps:$4 sm:$0xff]   ;;  %v15709_v17 = vld [vmem:[%s21022_s1 + $0x2928] ss:$16 sps:$4 sm:$0xff]  }
 0x4ed   :  { %9581 = vmatpush1.bf16.msra.mxu0 %v15613_v18  ;;  %10527 = vmatpush1.bf16.msra.mxu1 %v15616_v19  ;;  %v15714_v18 = vld [vmem:[%s21022_s1 + $0x2944] ss:$16 sps:$4 sm:$0xff]   ;;  %v15717_v19 = vld [vmem:[%s21022_s1 + $0x294c] ss:$16 sps:$4 sm:$0xff]  }
 0x4ee   :  { %9582 = vmatprep.subr.bf16.mxu0 %v15621_v20  ;;  %10528 = vmatprep.subr.bf16.mxu1 %v15624_v21  ;;  %v15712_v20 = vld [vmem:[%s21022_s1 + $0x2940] ss:$16 sps:$4 sm:$0xff]   ;;  %v15715_v21 = vld [vmem:[%s21022_s1 + $0x2948] ss:$16 sps:$4 sm:$0xff]  }
 0x4f1   :  { %9583 = vmatpush1.bf16.msra.mxu0 %v15619_v22  ;;  %10529 = vmatpush1.bf16.msra.mxu1 %v15622_v23  ;;  %v15720_v22 = vld [vmem:[%s21022_s1 + $0x2964] ss:$16 sps:$4 sm:$0xff]   ;;  %v15723_v23 = vld [vmem:[%s21022_s1 + $0x296c] ss:$16 sps:$4 sm:$0xff]  }
 0x4f2   :  { %9584 = vmatprep.subr.bf16.mxu0 %v15627_v24  ;;  %10530 = vmatprep.subr.bf16.mxu1 %v15630_v25  ;;  %v15718_v24 = vld [vmem:[%s21022_s1 + $0x2960] ss:$16 sps:$4 sm:$0xff]   ;;  %v15721_v25 = vld [vmem:[%s21022_s1 + $0x2968] ss:$16 sps:$4 sm:$0xff]  }
 0x4f5   :  { %9585 = vmatpush1.bf16.msra.mxu0 %v15625_v26  ;;  %10531 = vmatpush1.bf16.msra.mxu1 %v15628_v27  ;;  %v15726_v26 = vld [vmem:[%s21022_s1 + $0x2984] ss:$16 sps:$4 sm:$0xff]   ;;  %v15729_v27 = vld [vmem:[%s21022_s1 + $0x298c] ss:$16 sps:$4 sm:$0xff]  }
 0x4f6   :  { %9586 = vmatprep.subr.bf16.mxu0 %v15633_v28  ;;  %10532 = vmatprep.subr.bf16.mxu1 %v15636_v29  ;;  %v15724_v28 = vld [vmem:[%s21022_s1 + $0x2980] ss:$16 sps:$4 sm:$0xff]   ;;  %v15727_v29 = vld [vmem:[%s21022_s1 + $0x2988] ss:$16 sps:$4 sm:$0xff]  }
 0x4f9   :  { %9587 = vmatpush1.bf16.msra.mxu0 %v15631_v30  ;;  %10533 = vmatpush1.bf16.msra.mxu1 %v15634_v31  ;;  %v15732_v30 = vld [vmem:[%s21022_s1 + $0x29a4] ss:$16 sps:$4 sm:$0xff]   ;;  %v15735_v31 = vld [vmem:[%s21022_s1 + $0x29ac] ss:$16 sps:$4 sm:$0xff]  }
 0x4fa   :  { %9588 = vmatprep.subr.bf16.mxu0 %v15639_v32  ;;  %10534 = vmatprep.subr.bf16.mxu1 %v15642_v33  ;;  %v15730_v32 = vld [vmem:[%s21022_s1 + $0x29a0] ss:$16 sps:$4 sm:$0xff]   ;;  %v15733_v33 = vld [vmem:[%s21022_s1 + $0x29a8] ss:$16 sps:$4 sm:$0xff]  }
 0x4fd   :  { %9589 = vmatpush1.bf16.msra.mxu0 %v15637_v34  ;;  %10535 = vmatpush1.bf16.msra.mxu1 %v15640_v35  ;;  %v15738_v34 = vld [vmem:[%s21022_s1 + $0x29c4] ss:$16 sps:$4 sm:$0xff]   ;;  %v15741_v35 = vld [vmem:[%s21022_s1 + $0x29cc] ss:$16 sps:$4 sm:$0xff]  }
 0x4fe   :  { %9590 = vmatprep.subr.bf16.mxu0 %v15645_v36  ;;  %10536 = vmatprep.subr.bf16.mxu1 %v15648_v37  ;;  %v15736_v36 = vld [vmem:[%s21022_s1 + $0x29c0] ss:$16 sps:$4 sm:$0xff]   ;;  %v15739_v37 = vld [vmem:[%s21022_s1 + $0x29c8] ss:$16 sps:$4 sm:$0xff]  }
 0x501   :  { %9591 = vmatpush1.bf16.msra.mxu0 %v15643_v38  ;;  %10537 = vmatpush1.bf16.msra.mxu1 %v15646_v39  ;;  %v15744_v38 = vld [vmem:[%s21022_s1 + $0x29e4] ss:$16 sps:$4 sm:$0xff]   ;;  %v15747_v39 = vld [vmem:[%s21022_s1 + $0x29ec] ss:$16 sps:$4 sm:$0xff]  }
 0x502   :  { %9603 = vmatprep.subr.bf16.mxu0 %v15654_v40  ;;  %10549 = vmatprep.subr.bf16.mxu1 %v15657_v41  ;;  %v15742_v40 = vld [vmem:[%s21022_s1 + $0x29e0] ss:$16 sps:$4 sm:$0xff]   ;;  %v15745_v41 = vld [vmem:[%s21022_s1 + $0x29e8] ss:$16 sps:$4 sm:$0xff]  }
 0x504   :  { %9593 = vmatmul.mubr.bf16.vlgmr.msra.gmra.mrb[0].mxu0 %v15649_v42  ;;  %10539 = vmatmul.mubr.bf16.vlgmr.msra.gmra.mrb[0].mxu1 %v15649_v42  ;;  %v15753_v42 = vld [vmem:[%s21022_s1 + $0x2a04] ss:$16 sps:$4 sm:$0xff]  }
 0x505   :  { %9604 = vmatpush1.bf16.msra.mxu0 %v15652_v43  ;;  %10550 = vmatpush1.bf16.msra.mxu1 %v15655_v44  ;;  %v15756_v43 = vld [vmem:[%s21022_s1 + $0x2a0c] ss:$16 sps:$4 sm:$0xff]   ;;  %v15748_v44 = vld [vmem:[%s21021_s0 + $0xa0] ss:$176 sps:$4 sm:$0xff]  }
 0x506   :  { %9605 = vmatprep.subr.bf16.mxu0 %v15660_v45  ;;  %10551 = vmatprep.subr.bf16.mxu1 %v15663_v46  ;;  %v15751_v45 = vld [vmem:[%s21022_s1 + $0x2a00] ss:$16 sps:$4 sm:$0xff]   ;;  %v15754_v46 = vld [vmem:[%s21022_s1 + $0x2a08] ss:$16 sps:$4 sm:$0xff]  }
 0x507   :  { %9635 = vmatprep.mubr.bf16.mxu0 %v15750_v47  ;;  %10581 = vmatprep.mubr.bf16.mxu1 %v15750_v47  ;;  %v15759_v47 = vld [vmem:[%s21022_s1 + $0x2a24] ss:$16 sps:$4 sm:$0xff]  }
 0x509   :  { %9606 = vmatpush1.bf16.msra.mxu0 %v15658_v48  ;;  %10552 = vmatpush1.bf16.msra.mxu1 %v15661_v49  ;;  %v15762_v48 = vld [vmem:[%s21022_s1 + $0x2a2c] ss:$16 sps:$4 sm:$0xff]  }
 0x50a   :  { %9607 = vmatprep.subr.bf16.mxu0 %v15666_v50  ;;  %10553 = vmatprep.subr.bf16.mxu1 %v15669_v51  ;;  %v15849_v49 = vld [vmem:[%s21021_s0 + $0xac] ss:$176 sps:$4 sm:$0xff]   ;;  %v15757_v50 = vld [vmem:[%s21022_s1 + $0x2a20] ss:$16 sps:$4 sm:$0xff]   ;;  %v15760_v51 = vld [vmem:[%s21022_s1 + $0x2a28] ss:$16 sps:$4 sm:$0xff]  }
 0x50d   :  { %9608 = vmatpush1.bf16.msra.mxu0 %v15664_v52  ;;  %10554 = vmatpush1.bf16.msra.mxu1 %v15667_v53  ;;  %v15765_v52 = vld [vmem:[%s21022_s1 + $0x2a44] ss:$16 sps:$4 sm:$0xff]   ;;  %v15768_v53 = vld [vmem:[%s21022_s1 + $0x2a4c] ss:$16 sps:$4 sm:$0xff]  }
 0x50e   :  { %9609 = vmatprep.subr.bf16.mxu0 %v15672_v54  ;;  %10555 = vmatprep.subr.bf16.mxu1 %v15675_v55  ;;  %v15763_v54 = vld [vmem:[%s21022_s1 + $0x2a40] ss:$16 sps:$4 sm:$0xff]   ;;  %v15766_v55 = vld [vmem:[%s21022_s1 + $0x2a48] ss:$16 sps:$4 sm:$0xff]  }
 0x511   :  { %9610 = vmatpush1.bf16.msra.mxu0 %v15670_v56  ;;  %10556 = vmatpush1.bf16.msra.mxu1 %v15673_v57  ;;  %v15771_v56 = vld [vmem:[%s21022_s1 + $0x2a64] ss:$16 sps:$4 sm:$0xff]   ;;  %v15774_v57 = vld [vmem:[%s21022_s1 + $0x2a6c] ss:$16 sps:$4 sm:$0xff]  }
 0x512   :  { %9611 = vmatprep.subr.bf16.mxu0 %v15678_v58  ;;  %10557 = vmatprep.subr.bf16.mxu1 %v15681_v59  ;;  %v15769_v58 = vld [vmem:[%s21022_s1 + $0x2a60] ss:$16 sps:$4 sm:$0xff]   ;;  %v15772_v59 = vld [vmem:[%s21022_s1 + $0x2a68] ss:$16 sps:$4 sm:$0xff]  }
 0x515   :  { %9612 = vmatpush1.bf16.msra.mxu0 %v15676_v60  ;;  %10558 = vmatpush1.bf16.msra.mxu1 %v15679_v61  ;;  %v15777_v60 = vld [vmem:[%s21022_s1 + $0x2a84] ss:$16 sps:$4 sm:$0xff]   ;;  %v15780_v61 = vld [vmem:[%s21022_s1 + $0x2a8c] ss:$16 sps:$4 sm:$0xff]  }
 0x516   :  { %9613 = vmatprep.subr.bf16.mxu0 %v15684_v62  ;;  %10559 = vmatprep.subr.bf16.mxu1 %v15687_v63  ;;  %v15775_v62 = vld [vmem:[%s21022_s1 + $0x2a80] ss:$16 sps:$4 sm:$0xff]   ;;  %v15778_v63 = vld [vmem:[%s21022_s1 + $0x2a88] ss:$16 sps:$4 sm:$0xff]  }
 0x519   :  { %9614 = vmatpush1.bf16.msra.mxu0 %v15682_v0  ;;  %10560 = vmatpush1.bf16.msra.mxu1 %v15685_v1  ;;  %v15783_v0 = vld [vmem:[%s21022_s1 + $0x2aa4] ss:$16 sps:$4 sm:$0xff]   ;;  %v15786_v1 = vld [vmem:[%s21022_s1 + $0x2aac] ss:$16 sps:$4 sm:$0xff]  }
 0x51a   :  { %9615 = vmatprep.subr.bf16.mxu0 %v15690_v2  ;;  %10561 = vmatprep.subr.bf16.mxu1 %v15693_v3  ;;  %v15781_v2 = vld [vmem:[%s21022_s1 + $0x2aa0] ss:$16 sps:$4 sm:$0xff]   ;;  %v15784_v3 = vld [vmem:[%s21022_s1 + $0x2aa8] ss:$16 sps:$4 sm:$0xff]  }
 0x51d   :  { %9616 = vmatpush1.bf16.msra.mxu0 %v15688_v4  ;;  %10562 = vmatpush1.bf16.msra.mxu1 %v15691_v5  ;;  %v15789_v4 = vld [vmem:[%s21022_s1 + $0x2ac4] ss:$16 sps:$4 sm:$0xff]   ;;  %v15792_v5 = vld [vmem:[%s21022_s1 + $0x2acc] ss:$16 sps:$4 sm:$0xff]  }
 0x51e   :  { %9617 = vmatprep.subr.bf16.mxu0 %v15696_v6  ;;  %10563 = vmatprep.subr.bf16.mxu1 %v15699_v7  ;;  %v15787_v6 = vld [vmem:[%s21022_s1 + $0x2ac0] ss:$16 sps:$4 sm:$0xff]   ;;  %v15790_v7 = vld [vmem:[%s21022_s1 + $0x2ac8] ss:$16 sps:$4 sm:$0xff]  }
 0x521   :  { %9618 = vmatpush1.bf16.msra.mxu0 %v15694_v8  ;;  %10564 = vmatpush1.bf16.msra.mxu1 %v15697_v9  ;;  %v15795_v8 = vld [vmem:[%s21022_s1 + $0x2ae4] ss:$16 sps:$4 sm:$0xff]   ;;  %v15798_v9 = vld [vmem:[%s21022_s1 + $0x2aec] ss:$16 sps:$4 sm:$0xff]  }
 0x522   :  { %9619 = vmatprep.subr.bf16.mxu0 %v15702_v10  ;;  %10565 = vmatprep.subr.bf16.mxu1 %v15705_v11  ;;  %v15793_v10 = vld [vmem:[%s21022_s1 + $0x2ae0] ss:$16 sps:$4 sm:$0xff]   ;;  %v15796_v11 = vld [vmem:[%s21022_s1 + $0x2ae8] ss:$16 sps:$4 sm:$0xff]  }
 0x525   :  { %9620 = vmatpush1.bf16.msra.mxu0 %v15700_v12  ;;  %10566 = vmatpush1.bf16.msra.mxu1 %v15703_v13  ;;  %v15801_v12 = vld [vmem:[%s21022_s1 + $0x2b04] ss:$16 sps:$4 sm:$0xff]   ;;  %v15804_v13 = vld [vmem:[%s21022_s1 + $0x2b0c] ss:$16 sps:$4 sm:$0xff]  }
 0x526   :  { %9621 = vmatprep.subr.bf16.mxu0 %v15708_v14  ;;  %10567 = vmatprep.subr.bf16.mxu1 %v15711_v15  ;;  %v15799_v14 = vld [vmem:[%s21022_s1 + $0x2b00] ss:$16 sps:$4 sm:$0xff]   ;;  %v15802_v15 = vld [vmem:[%s21022_s1 + $0x2b08] ss:$16 sps:$4 sm:$0xff]  }
 0x529   :  { %9622 = vmatpush1.bf16.msra.mxu0 %v15706_v16  ;;  %10568 = vmatpush1.bf16.msra.mxu1 %v15709_v17  ;;  %v15807_v16 = vld [vmem:[%s21022_s1 + $0x2b24] ss:$16 sps:$4 sm:$0xff]   ;;  %v15810_v17 = vld [vmem:[%s21022_s1 + $0x2b2c] ss:$16 sps:$4 sm:$0xff]  }
 0x52a   :  { %9623 = vmatprep.subr.bf16.mxu0 %v15714_v18  ;;  %10569 = vmatprep.subr.bf16.mxu1 %v15717_v19  ;;  %v15805_v18 = vld [vmem:[%s21022_s1 + $0x2b20] ss:$16 sps:$4 sm:$0xff]   ;;  %v15808_v19 = vld [vmem:[%s21022_s1 + $0x2b28] ss:$16 sps:$4 sm:$0xff]  }
 0x52d   :  { %9624 = vmatpush1.bf16.msra.mxu0 %v15712_v20  ;;  %10570 = vmatpush1.bf16.msra.mxu1 %v15715_v21  ;;  %v15813_v20 = vld [vmem:[%s21022_s1 + $0x2b44] ss:$16 sps:$4 sm:$0xff]   ;;  %v15816_v21 = vld [vmem:[%s21022_s1 + $0x2b4c] ss:$16 sps:$4 sm:$0xff]  }
 0x52e   :  { %9625 = vmatprep.subr.bf16.mxu0 %v15720_v22  ;;  %10571 = vmatprep.subr.bf16.mxu1 %v15723_v23  ;;  %v15811_v22 = vld [vmem:[%s21022_s1 + $0x2b40] ss:$16 sps:$4 sm:$0xff]   ;;  %v15814_v23 = vld [vmem:[%s21022_s1 + $0x2b48] ss:$16 sps:$4 sm:$0xff]  }
 0x531   :  { %9626 = vmatpush1.bf16.msra.mxu0 %v15718_v24  ;;  %10572 = vmatpush1.bf16.msra.mxu1 %v15721_v25  ;;  %v15819_v24 = vld [vmem:[%s21022_s1 + $0x2b64] ss:$16 sps:$4 sm:$0xff]   ;;  %v15822_v25 = vld [vmem:[%s21022_s1 + $0x2b6c] ss:$16 sps:$4 sm:$0xff]  }
 0x532   :  { %9627 = vmatprep.subr.bf16.mxu0 %v15726_v26  ;;  %10573 = vmatprep.subr.bf16.mxu1 %v15729_v27  ;;  %v15817_v26 = vld [vmem:[%s21022_s1 + $0x2b60] ss:$16 sps:$4 sm:$0xff]   ;;  %v15820_v27 = vld [vmem:[%s21022_s1 + $0x2b68] ss:$16 sps:$4 sm:$0xff]  }
 0x535   :  { %9628 = vmatpush1.bf16.msra.mxu0 %v15724_v28  ;;  %10574 = vmatpush1.bf16.msra.mxu1 %v15727_v29  ;;  %v15825_v28 = vld [vmem:[%s21022_s1 + $0x2b84] ss:$16 sps:$4 sm:$0xff]   ;;  %v15828_v29 = vld [vmem:[%s21022_s1 + $0x2b8c] ss:$16 sps:$4 sm:$0xff]  }
 0x536   :  { %9629 = vmatprep.subr.bf16.mxu0 %v15732_v30  ;;  %10575 = vmatprep.subr.bf16.mxu1 %v15735_v31  ;;  %v15823_v30 = vld [vmem:[%s21022_s1 + $0x2b80] ss:$16 sps:$4 sm:$0xff]   ;;  %v15826_v31 = vld [vmem:[%s21022_s1 + $0x2b88] ss:$16 sps:$4 sm:$0xff]  }
 0x539   :  { %9630 = vmatpush1.bf16.msra.mxu0 %v15730_v32  ;;  %10576 = vmatpush1.bf16.msra.mxu1 %v15733_v33  ;;  %v15831_v32 = vld [vmem:[%s21022_s1 + $0x2ba4] ss:$16 sps:$4 sm:$0xff]   ;;  %v15834_v33 = vld [vmem:[%s21022_s1 + $0x2bac] ss:$16 sps:$4 sm:$0xff]  }
 0x53a   :  { %9631 = vmatprep.subr.bf16.mxu0 %v15738_v34  ;;  %10577 = vmatprep.subr.bf16.mxu1 %v15741_v35  ;;  %v15829_v34 = vld [vmem:[%s21022_s1 + $0x2ba0] ss:$16 sps:$4 sm:$0xff]   ;;  %v15832_v35 = vld [vmem:[%s21022_s1 + $0x2ba8] ss:$16 sps:$4 sm:$0xff]  }
 0x53d   :  { %9632 = vmatpush1.bf16.msra.mxu0 %v15736_v36  ;;  %10578 = vmatpush1.bf16.msra.mxu1 %v15739_v37  ;;  %v15837_v36 = vld [vmem:[%s21022_s1 + $0x2bc4] ss:$16 sps:$4 sm:$0xff]   ;;  %v15840_v37 = vld [vmem:[%s21022_s1 + $0x2bcc] ss:$16 sps:$4 sm:$0xff]  }
 0x53e   :  { %9633 = vmatprep.subr.bf16.mxu0 %v15744_v38  ;;  %10579 = vmatprep.subr.bf16.mxu1 %v15747_v39  ;;  %v15835_v38 = vld [vmem:[%s21022_s1 + $0x2bc0] ss:$16 sps:$4 sm:$0xff]   ;;  %v15838_v39 = vld [vmem:[%s21022_s1 + $0x2bc8] ss:$16 sps:$4 sm:$0xff]  }
 0x541   :  { %9634 = vmatpush1.bf16.msra.mxu0 %v15742_v40  ;;  %10580 = vmatpush1.bf16.msra.mxu1 %v15745_v41  ;;  %v15843_v40 = vld [vmem:[%s21022_s1 + $0x2be4] ss:$16 sps:$4 sm:$0xff]   ;;  %v15846_v41 = vld [vmem:[%s21022_s1 + $0x2bec] ss:$16 sps:$4 sm:$0xff]  }
 0x542   :  { %9646 = vmatprep.subr.bf16.mxu0 %v15753_v42  ;;  %10592 = vmatprep.subr.bf16.mxu1 %v15756_v43  ;;  %v15841_v42 = vld [vmem:[%s21022_s1 + $0x2be0] ss:$16 sps:$4 sm:$0xff]   ;;  %v15844_v43 = vld [vmem:[%s21022_s1 + $0x2be8] ss:$16 sps:$4 sm:$0xff]  }
 0x544   :  { %9636 = vmatmul.mubr.bf16.vlgmr.msra.gmra.mrb[0].mxu0 %v15748_v44  ;;  %10582 = vmatmul.mubr.bf16.vlgmr.msra.gmra.mrb[0].mxu1 %v15748_v44  ;;  %v15847_v44 = vld [vmem:[%s21021_s0 + $0xa8] ss:$176 sps:$4 sm:$0xff]  }
 0x545   :  { %9647 = vmatpush1.bf16.msra.mxu0 %v15751_v45  ;;  %10593 = vmatpush1.bf16.msra.mxu1 %v15754_v46  ;;  %v10637_v45 = vlaneseq }
 0x546   :  { %9648 = vmatprep.subr.bf16.mxu0 %v15759_v47  ;;  %10594 = vmatprep.subr.bf16.mxu1 %v15762_v48  ;;  %v10635_v48 = vld [vmem:[%s21023_s2] sm:$0xf] }
 0x547   :  { %9678 = vmatprep.mubr.bf16.mxu0 %v15849_v49  ;;  %10624 = vmatprep.mubr.bf16.mxu1 %v15849_v49  ;;  %v20515_v46 = vshrl.u32 %v10637_v45, 7  ;;  %v15892_v45 = vld [vmem:[%s21025_s4 + $0xe0] ss:$16 sps:$4 sm:$0xff]  }
 0x549   :  { %9649 = vmatpush1.bf16.msra.mxu0 %v15757_v50  ;;  %10595 = vmatpush1.bf16.msra.mxu1 %v15760_v51  ;;  %v10639_v47 = vsub.s32 0, %v20515_v46  ;;  %v10643_v49 = vsub.s32 1, %v20515_v46  ;;  %v10647_v50 = vsub.s32 2, %v20515_v46 }
 0x54a   :  { %9650 = vmatprep.subr.bf16.mxu0 %v15765_v52  ;;  %10596 = vmatprep.subr.bf16.mxu1 %v15768_v53  ;;  %v10651_v53 = vsub.s32 3, %v20515_v46 }
 0x54b   :  { %v10640_v51 = vrot.slane %v10635_v48, %v10639_v47  ;;  %v10644_v52 = vrot.slane %v10635_v48, %v10643_v49 }
 0x54d   :  { %9651 = vmatpush1.bf16.msra.mxu0 %v15763_v54  ;;  %10597 = vmatpush1.bf16.msra.mxu1 %v15766_v55 }
 0x54e   :  { %9652 = vmatprep.subr.bf16.mxu0 %v15771_v56  ;;  %10598 = vmatprep.subr.bf16.mxu1 %v15774_v57  ;;  %v10648_v56 = vrot.slane %v10635_v48, %v10647_v50 }
 0x551   :  { %9653 = vmatpush1.bf16.msra.mxu0 %v15769_v58  ;;  %10599 = vmatpush1.bf16.msra.mxu1 %v15772_v59 }
 0x552   :  { %9654 = vmatprep.subr.bf16.mxu0 %v15777_v60  ;;  %10600 = vmatprep.subr.bf16.mxu1 %v15780_v61  ;;  %v10652_v61 = vrot.slane %v10635_v48, %v10651_v53  ;;  %v15895_v48 = vld [vmem:[%s21025_s4 + $0xe8] ss:$16 sps:$4 sm:$0xff]  }
 0x555   :  { %9655 = vmatpush1.bf16.msra.mxu0 %v15775_v62  ;;  %10601 = vmatpush1.bf16.msra.mxu1 %v15778_v63 }
 0x556   :  { %9656 = vmatprep.subr.bf16.mxu0 %v15783_v0  ;;  %10602 = vmatprep.subr.bf16.mxu1 %v15786_v1 }
 0x559   :  { %9657 = vmatpush1.bf16.msra.mxu0 %v15781_v2  ;;  %10603 = vmatpush1.bf16.msra.mxu1 %v15784_v3 }
 0x55a   :  { %9658 = vmatprep.subr.bf16.mxu0 %v15789_v4  ;;  %10604 = vmatprep.subr.bf16.mxu1 %v15792_v5 }
 0x55d   :  { %9659 = vmatpush1.bf16.msra.mxu0 %v15787_v6  ;;  %10605 = vmatpush1.bf16.msra.mxu1 %v15790_v7 }
 0x55e   :  { %9660 = vmatprep.subr.bf16.mxu0 %v15795_v8  ;;  %10606 = vmatprep.subr.bf16.mxu1 %v15798_v9 }
 0x561   :  { %9661 = vmatpush1.bf16.msra.mxu0 %v15793_v10  ;;  %10607 = vmatpush1.bf16.msra.mxu1 %v15796_v11 }
 0x562   :  { %9662 = vmatprep.subr.bf16.mxu0 %v15801_v12  ;;  %10608 = vmatprep.subr.bf16.mxu1 %v15804_v13 }
 0x565   :  { %9663 = vmatpush1.bf16.msra.mxu0 %v15799_v14  ;;  %10609 = vmatpush1.bf16.msra.mxu1 %v15802_v15  ;;  %v16102_v14 = vmov 0   ;;  %v15850_v15 = vld [vmem:[%s21025_s4] ss:$16 sps:$4 sm:$0xff]  }
 0x566   :  { %9664 = vmatprep.subr.bf16.mxu0 %v15807_v16  ;;  %10610 = vmatprep.subr.bf16.mxu1 %v15810_v17  ;;  %v15852_v16 = vld [vmem:[%s21025_s4 + $0x4] ss:$16 sps:$4 sm:$0xff]   ;;  %v15853_v17 = vld [vmem:[%s21025_s4 + $0x8] ss:$16 sps:$4 sm:$0xff]  }
 0x567   :  { %13670 = vset.pattern.permute.xlu1 %v16102_v14  ;;  %13671 = vset.pattern.permute.xlu0 %v16102_v14 }
 0x569   :  { %9665 = vmatpush1.bf16.msra.mxu0 %v15805_v18  ;;  %10611 = vmatpush1.bf16.msra.mxu1 %v15808_v19  ;;  %v15855_v18 = vld [vmem:[%s21025_s4 + $0xc] ss:$16 sps:$4 sm:$0xff]   ;;  %v15858_v19 = vld [vmem:[%s21025_s4 + $0x24] ss:$16 sps:$4 sm:$0xff]  }
 0x56a   :  { %9666 = vmatprep.subr.bf16.mxu0 %v15813_v20  ;;  %10612 = vmatprep.subr.bf16.mxu1 %v15816_v21  ;;  %v15861_v20 = vld [vmem:[%s21025_s4 + $0x2c] ss:$16 sps:$4 sm:$0xff]   ;;  %v15856_v21 = vld [vmem:[%s21025_s4 + $0x20] ss:$16 sps:$4 sm:$0xff]  }
 0x56d   :  { %9667 = vmatpush1.bf16.msra.mxu0 %v15811_v22  ;;  %10613 = vmatpush1.bf16.msra.mxu1 %v15814_v23  ;;  %v15859_v22 = vld [vmem:[%s21025_s4 + $0x28] ss:$16 sps:$4 sm:$0xff]   ;;  %v15864_v23 = vld [vmem:[%s21025_s4 + $0x44] ss:$16 sps:$4 sm:$0xff]  }
 0x56e   :  { %9668 = vmatprep.subr.bf16.mxu0 %v15819_v24  ;;  %10614 = vmatprep.subr.bf16.mxu1 %v15822_v25  ;;  %v15867_v24 = vld [vmem:[%s21025_s4 + $0x4c] ss:$16 sps:$4 sm:$0xff]   ;;  %v15862_v25 = vld [vmem:[%s21025_s4 + $0x40] ss:$16 sps:$4 sm:$0xff]  }
 0x571   :  { %9669 = vmatpush1.bf16.msra.mxu0 %v15817_v26  ;;  %10615 = vmatpush1.bf16.msra.mxu1 %v15820_v27  ;;  %v15865_v26 = vld [vmem:[%s21025_s4 + $0x48] ss:$16 sps:$4 sm:$0xff]   ;;  %v15870_v27 = vld [vmem:[%s21025_s4 + $0x64] ss:$16 sps:$4 sm:$0xff]  }
 0x572   :  { %9670 = vmatprep.subr.bf16.mxu0 %v15825_v28  ;;  %10616 = vmatprep.subr.bf16.mxu1 %v15828_v29  ;;  %v15873_v28 = vld [vmem:[%s21025_s4 + $0x6c] ss:$16 sps:$4 sm:$0xff]   ;;  %v15868_v29 = vld [vmem:[%s21025_s4 + $0x60] ss:$16 sps:$4 sm:$0xff]  }
 0x575   :  { %9671 = vmatpush1.bf16.msra.mxu0 %v15823_v30  ;;  %10617 = vmatpush1.bf16.msra.mxu1 %v15826_v31  ;;  %v15871_v30 = vld [vmem:[%s21025_s4 + $0x68] ss:$16 sps:$4 sm:$0xff]   ;;  %v15876_v31 = vld [vmem:[%s21025_s4 + $0x84] ss:$16 sps:$4 sm:$0xff]  }
 0x576   :  { %9672 = vmatprep.subr.bf16.mxu0 %v15831_v32  ;;  %10618 = vmatprep.subr.bf16.mxu1 %v15834_v33  ;;  %v15879_v32 = vld [vmem:[%s21025_s4 + $0x8c] ss:$16 sps:$4 sm:$0xff]   ;;  %v15874_v33 = vld [vmem:[%s21025_s4 + $0x80] ss:$16 sps:$4 sm:$0xff]  }
 0x579   :  { %9673 = vmatpush1.bf16.msra.mxu0 %v15829_v34  ;;  %10619 = vmatpush1.bf16.msra.mxu1 %v15832_v35  ;;  %v15877_v34 = vld [vmem:[%s21025_s4 + $0x88] ss:$16 sps:$4 sm:$0xff]   ;;  %v15882_v35 = vld [vmem:[%s21025_s4 + $0xa4] ss:$16 sps:$4 sm:$0xff]  }
 0x57a   :  { %9674 = vmatprep.subr.bf16.mxu0 %v15837_v36  ;;  %10620 = vmatprep.subr.bf16.mxu1 %v15840_v37  ;;  %v15885_v36 = vld [vmem:[%s21025_s4 + $0xac] ss:$16 sps:$4 sm:$0xff]   ;;  %v15880_v37 = vld [vmem:[%s21025_s4 + $0xa0] ss:$16 sps:$4 sm:$0xff]  }
 0x57d   :  { %9675 = vmatpush1.bf16.msra.mxu0 %v15835_v38  ;;  %10621 = vmatpush1.bf16.msra.mxu1 %v15838_v39  ;;  %v15883_v38 = vld [vmem:[%s21025_s4 + $0xa8] ss:$16 sps:$4 sm:$0xff]   ;;  %v15888_v39 = vld [vmem:[%s21025_s4 + $0xc4] ss:$16 sps:$4 sm:$0xff]  }
 0x57e   :  { %9676 = vmatprep.subr.bf16.mxu0 %v15843_v40  ;;  %10622 = vmatprep.subr.bf16.mxu1 %v15846_v41  ;;  %v15891_v40 = vld [vmem:[%s21025_s4 + $0xcc] ss:$16 sps:$4 sm:$0xff]   ;;  %v15886_v41 = vld [vmem:[%s21025_s4 + $0xc0] ss:$16 sps:$4 sm:$0xff]  }
 0x581   :  { %9677 = vmatpush1.bf16.msra.mxu0 %v15841_v42  ;;  %10623 = vmatpush1.bf16.msra.mxu1 %v15844_v43  ;;  %v15889_v42 = vld [vmem:[%s21025_s4 + $0xc8] ss:$16 sps:$4 sm:$0xff]   ;;  %v15894_v43 = vld [vmem:[%s21025_s4 + $0xe4] ss:$16 sps:$4 sm:$0xff]  }
 0x582   :  { %11682 = vmatprep.subr.bf16.mxu0 %v15852_v16  ;;  %11764 = vmatprep.subr.bf16.mxu1 %v15855_v18 }
 0x584   :  { %9679 = vmatmul.mubr.bf16.vlgmr.msra.gmra.mrb[0].mxu0 %v15847_v44  ;;  %10625 = vmatmul.mubr.bf16.vlgmr.msra.gmra.mrb[0].mxu1 %v15847_v44  ;;  %v15897_v44 = vld [vmem:[%s21025_s4 + $0xec] ss:$16 sps:$4 sm:$0xff]  }
 0x585   :  { %11683 = vmatpush1.bf16.msra.mxu0 %v15850_v15  ;;  %11765 = vmatpush1.bf16.msra.mxu1 %v15853_v17 }
 0x586   :  { %11684 = vmatprep.subr.bf16.mxu0 %v15858_v19  ;;  %11766 = vmatprep.subr.bf16.mxu1 %v15861_v20 }
 0x589   :  { %11685 = vmatpush1.bf16.msra.mxu0 %v15856_v21  ;;  %11767 = vmatpush1.bf16.msra.mxu1 %v15859_v22 }
 0x58a   :  { %11686 = vmatprep.subr.bf16.mxu0 %v15864_v23  ;;  %11768 = vmatprep.subr.bf16.mxu1 %v15867_v24 }
 0x58d   :  { %11687 = vmatpush1.bf16.msra.mxu0 %v15862_v25  ;;  %11769 = vmatpush1.bf16.msra.mxu1 %v15865_v26 }
 0x58e   :  { %11688 = vmatprep.subr.bf16.mxu0 %v15870_v27  ;;  %11770 = vmatprep.subr.bf16.mxu1 %v15873_v28 }
 0x591   :  { %11689 = vmatpush1.bf16.msra.mxu0 %v15868_v29  ;;  %11771 = vmatpush1.bf16.msra.mxu1 %v15871_v30 }
 0x592   :  { %11690 = vmatprep.subr.bf16.mxu0 %v15876_v31  ;;  %11772 = vmatprep.subr.bf16.mxu1 %v15879_v32 }
 0x595   :  { %11691 = vmatpush1.bf16.msra.mxu0 %v15874_v33  ;;  %11773 = vmatpush1.bf16.msra.mxu1 %v15877_v34 }
 0x596   :  { %11692 = vmatprep.subr.bf16.mxu0 %v15882_v35  ;;  %11774 = vmatprep.subr.bf16.mxu1 %v15885_v36 }
 0x599   :  { %11693 = vmatpush1.bf16.msra.mxu0 %v15880_v37  ;;  %11775 = vmatpush1.bf16.msra.mxu1 %v15883_v38 }
 0x59a   :  { %11694 = vmatprep.subr.bf16.mxu0 %v15888_v39  ;;  %11776 = vmatprep.subr.bf16.mxu1 %v15891_v40 }
 0x59d   :  { %11695 = vmatpush1.bf16.msra.mxu0 %v15886_v41  ;;  %11777 = vmatpush1.bf16.msra.mxu1 %v15889_v42 }
 0x59e   :  { %11696 = vmatprep.subr.bf16.mxu0 %v15894_v43  ;;  %11778 = vmatprep.subr.bf16.mxu1 %v15897_v44 }
 0x5a1   :  { %11697 = vmatpush1.bf16.msra.mxu0 %v15892_v45  ;;  %11779 = vmatpush1.bf16.msra.mxu1 %v15895_v48 }
 0x657   :  { %v20528_v54 = vpop.f32.mrb[0].mxu0  ;;  %v20530_v55 = vpop.f32.mrb[0].mxu1 }
 0x658   :  { %v10657_v57 = vmul.f32 %v10640_v51, %v20528_v54  ;;  %v20535_v58 = vpop.f32.mrb[1].mxu0  ;;  %v20537_v59 = vpop.f32.mrb[1].mxu1  ;;  %v10659_v3 = vmul.f32 %v10648_v56, %v20530_v55 }
 0x659   :  { %v10658_v60 = vmul.f32 %v10644_v52, %v20535_v58  ;;  %v20542_v62 = vpop.f32.mrb[2].mxu0  ;;  %v20544_v63 = vpop.f32.mrb[2].mxu1  ;;  %v10660_v6 = vmul.f32 %v10652_v61, %v20537_v59 }
 0x65a   :  { %v10661_v0 = vmul.f32 %v10640_v51, %v20542_v62  ;;  %v20547_v1 = vpop.f32.mrb[3].mxu0  ;;  %v20549_v2 = vpop.f32.mrb[3].mxu1  ;;  %v10663_v7 = vmul.f32 %v10648_v56, %v20544_v63  ;;  %v15900_v51 = vld [vmem:[%s21025_s4 + $0x104] ss:$16 sps:$4 sm:$0xff]   ;;  %v15898_v56 = vld [vmem:[%s21025_s4 + $0x100] ss:$16 sps:$4 sm:$0xff]  }
 0x65b   :  { %v10665_v4 = vadd.f32 %v10658_v60, %v10657_v57  ;;  %v10662_v5 = vmul.f32 %v10644_v52, %v20547_v1  ;;  %v10664_v10 = vmul.f32 %v10652_v61, %v20549_v2  ;;  %v15903_v52 = vld [vmem:[%s21025_s4 + $0x10c] ss:$16 sps:$4 sm:$0xff]   ;;  %11698 = vmatprep.subr.bf16.mxu0 %v15900_v51  ;;  %v15901_v57 = vld [vmem:[%s21025_s4 + $0x108] ss:$16 sps:$4 sm:$0xff]   ;;  %v15906_v60 = vld [vmem:[%s21025_s4 + $0x124] ss:$16 sps:$4 sm:$0xff]  }
 0x65c   :  { %11780 = vmatprep.subr.bf16.mxu1 %v15903_v52  ;;  %v15909_v61 = vld [vmem:[%s21025_s4 + $0x12c] ss:$16 sps:$4 sm:$0xff]   ;;  %11699 = vmatpush1.bf16.msra.mxu0 %v15898_v56  ;;  %v15912_v52 = vld [vmem:[%s21025_s4 + $0x144] ss:$16 sps:$4 sm:$0xff]  }
 0x65d   :  { %v10670_v8 = vadd.f32 %v10662_v5, %v10661_v0  ;;  %v10666_v9 = vadd.f32 %v10665_v4, %v10659_v3  ;;  %v15904_v0 = vld [vmem:[%s21025_s4 + $0x120] ss:$16 sps:$4 sm:$0xff]   ;;  %11781 = vmatpush1.bf16.msra.mxu1 %v15901_v57  ;;  %11700 = vmatprep.subr.bf16.mxu0 %v15906_v60  ;;  %v15907_v3 = vld [vmem:[%s21025_s4 + $0x128] ss:$16 sps:$4 sm:$0xff]   ;;  %v15915_v56 = vld [vmem:[%s21025_s4 + $0x14c] ss:$16 sps:$4 sm:$0xff]  }
 0x65e   :  { %11782 = vmatprep.subr.bf16.mxu1 %v15909_v61  ;;  %v13357_v4 = vld [vmem:[#allocation2] ss:$0 sm:$0xff]  ;;  %v15913_v61 = vld [vmem:[%s21025_s4 + $0x148] ss:$16 sps:$4 sm:$0xff]  }
 0x65f   :  { %v10667_v11 = vadd.f32 %v10666_v9, %v10660_v6  ;;  %v10671_v12 = vadd.f32 %v10670_v8, %v10663_v7  ;;  %v15910_v60 = vld [vmem:[%s21025_s4 + $0x140] ss:$16 sps:$4 sm:$0xff]  }
 0x660   :  { %11701 = vmatpush1.bf16.msra.mxu0 %v15904_v0 }
 0x661   :  { %10668 = vadd.xlane.f32.xlu0 %v10667_v11  ;;  %v10672_v13 = vadd.f32 %v10671_v12, %v10664_v10  ;;  %11783 = vmatpush1.bf16.msra.mxu1 %v15907_v3 }
 0x662   :  { %11702 = vmatprep.subr.bf16.mxu0 %v15912_v52  ;;  %11784 = vmatprep.subr.bf16.mxu1 %v15915_v56 }
 0x664   :  { %11703 = vmatpush1.bf16.msra.mxu0 %v15910_v60 }
 0x665   :  { %10673 = vadd.xlane.f32.xlu0 %v10672_v13  ;;  %11785 = vmatpush1.bf16.msra.mxu1 %v15913_v61 }
 0x6ee   :  { %v10669_v5 = vpop.xlane.xlu0 %10668 }
 0x6ef   :  { %v10682_v6 = vadd.f32 %v13357_v4, %v10669_v5 }
 0x6f1   :  { %v10685_v7 = vsel %vm10684_vm0, %v10682_v6, -inf }
 0x6f2   :  { %v10686_v8 = vrot.slane %v10685_v7, 4  ;;  %v10674_v9 = vpop.xlane.xlu0 %10673 }
 0x6f3   :  { %v10683_v10 = vadd.f32 %v13357_v4, %v10674_v9  ;;  %v15919_v9 = vld [vmem:[%s21025_s4 + $0x168] ss:$16 sps:$4 sm:$0xff]  }
 0x6f4   :  { %v10687_v11 = vmax.f32 %v10685_v7, %v10686_v8  ;;  %v15921_v7 = vld [vmem:[%s21025_s4 + $0x16c] ss:$16 sps:$4 sm:$0xff]   ;;  %v15916_v8 = vld [vmem:[%s21025_s4 + $0x160] ss:$16 sps:$4 sm:$0xff]  }
 0x6f5   :  { %v10692_v12 = vsel %vm10684_vm0, %v10683_v10, -inf  ;;  %11786 = vmatprep.subr.bf16.mxu1 %v15921_v7 }
 0x6f6   :  { %v10688_v13 = vrot.slane %v10687_v11, 2  ;;  %v10693_v14 = vrot.slane %v10692_v12, 4  ;;  %11787 = vmatpush1.bf16.msra.mxu1 %v15919_v9 }
 0x6f8   :  { %v10689_v15 = vmax.f32 %v10687_v11, %v10688_v13  ;;  %v10694_v16 = vmax.f32 %v10692_v12, %v10693_v14  ;;  %v15927_v11 = vld [vmem:[%s21025_s4 + $0x18c] ss:$16 sps:$4 sm:$0xff]   ;;  %v15922_v12 = vld [vmem:[%s21025_s4 + $0x180] ss:$16 sps:$4 sm:$0xff]   ;;  %v15925_v13 = vld [vmem:[%s21025_s4 + $0x188] ss:$16 sps:$4 sm:$0xff]  }
 0x6f9   :  { %11788 = vmatprep.subr.bf16.mxu1 %v15927_v11  ;;  %v15930_v14 = vld [vmem:[%s21025_s4 + $0x1a4] ss:$16 sps:$4 sm:$0xff]  }
 0x6fa   :  { %v10690_v17 = vrot.slane %v10689_v15, 1  ;;  %v10695_v18 = vrot.slane %v10694_v16, 2  ;;  %11789 = vmatpush1.bf16.msra.mxu1 %v15925_v13 }
 0x6fc   :  { %v10691_v19 = vmax.f32 %v10689_v15, %v10690_v17  ;;  %v10696_v20 = vmax.f32 %v10694_v16, %v10695_v18  ;;  %v15933_v15 = vld [vmem:[%s21025_s4 + $0x1ac] ss:$16 sps:$4 sm:$0xff]   ;;  %v15928_v16 = vld [vmem:[%s21025_s4 + $0x1a0] ss:$16 sps:$4 sm:$0xff]   ;;  %v15931_v17 = vld [vmem:[%s21025_s4 + $0x1a8] ss:$16 sps:$4 sm:$0xff]  }
 0x6fd   :  { %11790 = vmatprep.subr.bf16.mxu1 %v15933_v15  ;;  %v15936_v18 = vld [vmem:[%s21025_s4 + $0x1c4] ss:$16 sps:$4 sm:$0xff]  }
 0x6fe   :  { %v10699_v21 = vsub.f32 %v10682_v6, %v10691_v19  ;;  %v10697_v22 = vrot.slane %v10696_v20, 1  ;;  %v15918_v6 = vld [vmem:[%s21025_s4 + $0x164] ss:$16 sps:$4 sm:$0xff]   ;;  %11791 = vmatpush1.bf16.msra.mxu1 %v15931_v17  ;;  %v15939_v19 = vld [vmem:[%s21025_s4 + $0x1cc] ss:$16 sps:$4 sm:$0xff]  }
 0x6ff   :  { %11704 = vmatprep.subr.bf16.mxu0 %v15918_v6  ;;  %11792 = vmatprep.subr.bf16.mxu1 %v15939_v19 }
 0x700   :  { %v10701_v23 = vmul.f32 1.442695, %v10699_v21  ;;  %v10698_v24 = vmax.f32 %v10696_v20, %v10697_v22  ;;  %11705 = vmatpush1.bf16.msra.mxu0 %v15916_v8  ;;  %v15934_v20 = vld [vmem:[%s21025_s4 + $0x1c0] ss:$16 sps:$4 sm:$0xff]   ;;  %v15942_v22 = vld [vmem:[%s21025_s4 + $0x1e4] ss:$16 sps:$4 sm:$0xff]  }
 0x702   :  { %16042 = vpow2.f32 %v10701_v23  ;;  %v10700_v25 = vsub.f32 %v10683_v10, %v10698_v24  ;;  %v15924_v10 = vld [vmem:[%s21025_s4 + $0x184] ss:$16 sps:$4 sm:$0xff]   ;;  %v15945_v23 = vld [vmem:[%s21025_s4 + $0x1ec] ss:$16 sps:$4 sm:$0xff]   ;;  %v15940_v24 = vld [vmem:[%s21025_s4 + $0x1e0] ss:$16 sps:$4 sm:$0xff]  }
 0x703   :  { %11706 = vmatprep.subr.bf16.mxu0 %v15924_v10 }
 0x704   :  { %v10703_v26 = vmul.f32 1.442695, %v10700_v25  ;;  %11707 = vmatpush1.bf16.msra.mxu0 %v15922_v12 }
 0x705   :  { %11708 = vmatprep.subr.bf16.mxu0 %v15930_v14 }
 0x706   :  { %16044 = vpow2.f32 %v10703_v26  ;;  %v15948_v26 = vld [vmem:[%s21025_s4 + $0x204] ss:$16 sps:$4 sm:$0xff]  }
 0x708   :  { %11709 = vmatpush1.bf16.msra.mxu0 %v15928_v16 }
 0x709   :  { %11710 = vmatprep.subr.bf16.mxu0 %v15936_v18 }
 0x70c   :  { %v16043_v27 = vpop.eup %16042  ;;  %11711 = vmatpush1.bf16.msra.mxu0 %v15934_v20 }
 0x70d   :  { %v10705_v28 = vsel %vm10684_vm0, %v16043_v27, 0.0  ;;  %11712 = vmatprep.subr.bf16.mxu0 %v15942_v22 }
 0x70e   :  { %v10706_v29 = vrot.slane %v10705_v28, 4 }
 0x710   :  { %v16045_v30 = vpop.eup %16044  ;;  %v10707_v31 = vadd.f32 %v10706_v29, %v10705_v28  ;;  %11713 = vmatpush1.bf16.msra.mxu0 %v15940_v24  ;;  %v16103_v29 = vmov 1983009808  }
 0x711   :  { %v10712_v32 = vsel %vm10684_vm0, %v16045_v30, 0.0  ;;  %11723 = vmatprep.subr.bf16.mxu0 %v15948_v26 }
 0x712   :  { %v10708_v33 = vrot.slane %v10707_v31, 2  ;;  %v10713_v34 = vrot.slane %v10712_v32, 4 }
 0x714   :  { %v10709_v35 = vadd.f32 %v10708_v33, %v10707_v31  ;;  %v10714_v36 = vadd.f32 %v10713_v34, %v10712_v32 }
 0x716   :  { %v10710_v37 = vrot.slane %v10709_v35, 1  ;;  %v10715_v38 = vrot.slane %v10714_v36, 2 }
 0x718   :  { %v10711_v39 = vadd.f32 %v10710_v37, %v10709_v35  ;;  %v10716_v40 = vadd.f32 %v10715_v38, %v10714_v36 }
 0x71a   :  { %16046 = vlog2.f32 %v10711_v39  ;;  %v10717_v41 = vrot.slane %v10716_v40, 1 }
 0x71b   :  { %16048 = vrcp.f32 %v10711_v39 }
 0x71c   :  { %v10718_v42 = vadd.f32 %v10717_v41, %v10716_v40 }
 0x71e   :  { %16050 = vrcp.f32 %v10718_v42 }
 0x71f   :  { %16052 = vlog2.f32 %v10718_v42 }
 0x724   :  { %v16047_v43 = vpop.eup %16046 }
 0x725   :  { %v16049_v44 = vpop.eup %16048  ;;  %v10724_v45 = vmul.f32 0.6931472, %v16047_v43 }
 0x726   :  { %v10720_v48 = vmul.f32 %v16049_v44, %v16043_v27  ;;  %v15951_v27 = vld [vmem:[%s21025_s4 + $0x20c] ss:$16 sps:$4 sm:$0xff]  }
 0x727   :  { %v10727_v51 = vsub.f32 %v10699_v21, %v10724_v45  ;;  %v15937_v21 = vld [vmem:[%s21025_s4 + $0x1c8] ss:$16 sps:$4 sm:$0xff]  }
 0x728   :  { %v16051_v57 = vpop.eup %16050  ;;  %10735 = vperm.xlu1 %13670, %v10720_v48   ;;  %10731 = vst.msk [vmem:[%s21028_s7] sm:$0xff] %vm10684_vm0, %v10720_v48  ;;  %11793 = vmatpush1.bf16.msra.mxu1 %v15937_v21 }
 0x729   :  { %v16053_v0 = vpop.eup %16052  ;;  %10729 = vst.msk [vmem:[%s21027_s6] sm:$0xff] %vm10684_vm0, %v10727_v51  ;;  %v10722_v3 = vmul.f32 %v16051_v57, %v16045_v30  ;;  %11794 = vmatprep.subr.bf16.mxu1 %v15945_v23  ;;  %v10810_v30 = vunpack.c.l.s4 %v16103_v29 }
 0x72a   :  { %v10726_v4 = vmul.f32 0.6931472, %v16053_v0 }
 0x72b   :  { %10732 = vst.msk [vmem:[%s21028_s7 + $0x8] sm:$0xff] %vm10684_vm0, %v10722_v3  ;;  %v10811_v40 = vunpack.c.0.s8 %v10810_v30  ;;  %s16104_s7 = smov [#allocation3]  }
 0x72c   :  { %v10728_v5 = vsub.f32 %v10700_v25, %v10726_v4  ;;  %10740 = vperm.xlu1 %13670, %v10722_v3   ;;  %v15943_v25 = vld [vmem:[%s21025_s4 + $0x1e8] ss:$16 sps:$4 sm:$0xff]   ;;  %s11879_s2 = sshll.u32 %s16104_s7, 4  ;;  %s11880_s2 = int_to_ptr.vmem [resolvable:$true] %s11879_s2 }
 0x72d   :  { %11795 = vmatpush1.bf16.msra.mxu1 %v15943_v25  ;;  %v20783_v25 = vsub.s32 %v10811_v40, %v20515_v46  ;;  %s16054_s13 = scalar_lea.vmem %s11880_s2, 128  ;;  %p16059_p1 = scmp.lt.s32.totalorder %s11880_s2, %s11880_s2 }
 0x72e   :  { %10730 = vst.msk [vmem:[%s21027_s6 + $0x8] sm:$0xff] %vm10684_vm0, %v10728_v5  ;;  %11805 = vmatprep.subr.bf16.mxu1 %v15951_v27  ;;  %p16055_p0 = scmp.ne.s32.totalorder %s11880_s2, %s16054_s13  ;;  %p16060_p2 = scmp.lt.s32.totalorder %s16054_s13, %s16054_s13 }
 0x730   :  { %p16061_p3 = por %p16060_p2, %p16059_p1 }
 0x732   :  { %p16062_p4 = pnand %p16061_p3, %p16055_p0 }
 0x7a7   :  { %v10736_v28 = vpop.permute.xlu1 %10735 }
 0x7a8   :  { %v10743_v31 = vmul.f32 %v10736_v28, %v20528_v54  ;;  %v10744_v32 = vmul.f32 %v10736_v28, %v20535_v58  ;;  %v10745_v33 = vmul.f32 %v10736_v28, %v20530_v55  ;;  %v10746_v34 = vmul.f32 %v10736_v28, %v20537_v59 }
 0x7aa   :  { %v10751_v35 = vrot.slane %v10743_v31, 4  ;;  %v10757_v36 = vrot.slane %v10744_v32, 4  ;;  %v10763_v37 = vrot.slane %v10745_v33, 4  ;;  %v10769_v38 = vrot.slane %v10746_v34, 4 }
 0x7ab   :  { %v10741_v39 = vpop.permute.xlu1 %10740 }
 0x7ac   :  { %v10752_v41 = vadd.f32 %v10751_v35, %v10743_v31  ;;  %v10758_v42 = vadd.f32 %v10757_v36, %v10744_v32  ;;  %v10764_v43 = vadd.f32 %v10763_v37, %v10745_v33  ;;  %v10770_v44 = vadd.f32 %v10769_v38, %v10746_v34 }
 0x7ad   :  { %v10747_v45 = vmul.f32 %v10741_v39, %v20542_v62  ;;  %v10748_v54 = vmul.f32 %v10741_v39, %v20547_v1  ;;  %v10749_v58 = vmul.f32 %v10741_v39, %v20544_v63  ;;  %v10750_v55 = vmul.f32 %v10741_v39, %v20549_v2 }
 0x7ae   :  { %v10753_v48 = vrot.slane %v10752_v41, 2  ;;  %v10759_v59 = vrot.slane %v10758_v42, 2  ;;  %v10765_v51 = vrot.slane %v10764_v43, 2  ;;  %v10771_v52 = vrot.slane %v10770_v44, 2 }
 0x7af   :  { %v10775_v56 = vrot.slane %v10747_v45, 4  ;;  %v10781_v57 = vrot.slane %v10748_v54, 4  ;;  %v10787_v60 = vrot.slane %v10749_v58, 4  ;;  %v10793_v61 = vrot.slane %v10750_v55, 4 }
 0x7b0   :  { %v10754_v0 = vadd.f32 %v10753_v48, %v10752_v41  ;;  %v10760_v3 = vadd.f32 %v10759_v59, %v10758_v42  ;;  %v10766_v4 = vadd.f32 %v10765_v51, %v10764_v43  ;;  %v10772_v5 = vadd.f32 %v10771_v52, %v10770_v44 }
 0x7b1   :  { %v10776_v6 = vadd.f32 %v10775_v56, %v10747_v45  ;;  %v10782_v62 = vadd.f32 %v10781_v57, %v10748_v54  ;;  %v10788_v7 = vadd.f32 %v10787_v60, %v10749_v58  ;;  %v10794_v1 = vadd.f32 %v10793_v61, %v10750_v55 }
 0x7b2   :  { %v10755_v8 = vrot.slane %v10754_v0, 1  ;;  %v10761_v63 = vrot.slane %v10760_v3, 1  ;;  %v10767_v9 = vrot.slane %v10766_v4, 1  ;;  %v10773_v2 = vrot.slane %v10772_v5, 1 }
 0x7b3   :  { %v10777_v10 = vrot.slane %v10776_v6, 2  ;;  %v10783_v11 = vrot.slane %v10782_v62, 2  ;;  %v10789_v12 = vrot.slane %v10788_v7, 2  ;;  %v10795_v13 = vrot.slane %v10794_v1, 2 }
 0x7b4   :  { %v10756_v14 = vadd.f32 %v10755_v8, %v10754_v0  ;;  %v10768_v15 = vadd.f32 %v10767_v9, %v10766_v4  ;;  %v10762_v16 = vadd.f32 %v10761_v63, %v10760_v3  ;;  %v10774_v17 = vadd.f32 %v10773_v2, %v10772_v5  ;;  %v15954_v63 = vld [vmem:[%s21025_s4 + $0x224] ss:$16 sps:$4 sm:$0xff]   ;;  %v15957_v9 = vld [vmem:[%s21025_s4 + $0x22c] ss:$16 sps:$4 sm:$0xff]  }
 0x7b5   :  { %v10778_v18 = vadd.f32 %v10777_v10, %v10776_v6  ;;  %v10784_v19 = vadd.f32 %v10783_v11, %v10782_v62  ;;  %v10790_v20 = vadd.f32 %v10789_v12, %v10788_v7  ;;  %v10796_v21 = vadd.f32 %v10795_v13, %v10794_v1  ;;  %v15946_v7 = vld [vmem:[%s21025_s4 + $0x200] ss:$16 sps:$4 sm:$0xff]   ;;  %v15949_v1 = vld [vmem:[%s21025_s4 + $0x208] ss:$16 sps:$4 sm:$0xff]  }
 0x7b6   :  { %v10807_v22 = vcombine.low %v10756_v14, %v10762_v16  ;;  %v10856_v23 = vpack.c.bf16 %v10756_v14, %v10756_v14  ;;  %v10808_v24 = vcombine.low %v10768_v15, %v10774_v17  ;;  %v10857_v30 = vpack.c.bf16 %v10762_v16, %v10762_v16  ;;  %v15952_v12 = vld [vmem:[%s21025_s4 + $0x220] ss:$16 sps:$4 sm:$0xff]   ;;  %v15955_v13 = vld [vmem:[%s21025_s4 + $0x228] ss:$16 sps:$4 sm:$0xff]   ;;  %v15963_v16 = vld [vmem:[%s21025_s4 + $0x24c] ss:$16 sps:$4 sm:$0xff]  }
 0x7b7   :  { %v10779_v26 = vrot.slane %v10778_v18, 1  ;;  %v10785_v27 = vrot.slane %v10784_v19, 1  ;;  %v10791_v28 = vrot.slane %v10790_v20, 1  ;;  %v10797_v29 = vrot.slane %v10796_v21, 1 }
 0x7b8   :  { %v10858_v31 = vpack.c.bf16 %v10768_v15, %v10768_v15  ;;  %v11022_v36 = vunpack.c.l.b16 %v10856_v23  ;;  %v10859_v37 = vpack.c.bf16 %v10774_v17, %v10774_v17  ;;  %v10815_v38 = vrot.slane %v10807_v22, %v20783_v25  ;;  %v15960_v15 = vld [vmem:[%s21025_s4 + $0x244] ss:$16 sps:$4 sm:$0xff]   ;;  %v15964_v22 = vld [vmem:[%s21025_s4 + $0x260] ss:$16 sps:$4 sm:$0xff]   ;;  %v15967_v23 = vld [vmem:[%s21025_s4 + $0x268] ss:$16 sps:$4 sm:$0xff]  }
 0x7b9   :  { %v10780_v32 = vadd.f32 %v10779_v26, %v10778_v18  ;;  %v10786_v33 = vadd.f32 %v10785_v27, %v10784_v19  ;;  %v10792_v34 = vadd.f32 %v10791_v28, %v10790_v20  ;;  %v10798_v35 = vadd.f32 %v10797_v29, %v10796_v21  ;;  %v15958_v18 = vld [vmem:[%s21025_s4 + $0x240] ss:$16 sps:$4 sm:$0xff]   ;;  %v15961_v19 = vld [vmem:[%s21025_s4 + $0x248] ss:$16 sps:$4 sm:$0xff]   ;;  %v15966_v20 = vld [vmem:[%s21025_s4 + $0x264] ss:$16 sps:$4 sm:$0xff]  }
 0x7ba   :  { %v10822_v39 = vrot.slane %v10808_v24, %v20783_v25  ;;  %v11024_v54 = vunpack.c.l.b16 %v10858_v31  ;;  %v11023_v52 = vunpack.c.l.b16 %v10857_v30  ;;  %v11025_v57 = vunpack.c.l.b16 %v10859_v37  ;;  %v15969_v21 = vld [vmem:[%s21025_s4 + $0x26c] ss:$16 sps:$4 sm:$0xff]   ;;  %v15972_v24 = vld [vmem:[%s21025_s4 + $0x284] ss:$16 sps:$4 sm:$0xff]   ;;  %v15970_v27 = vld [vmem:[%s21025_s4 + $0x280] ss:$16 sps:$4 sm:$0xff]  }
 0x7bb   :  { %v10824_v41 = vcombine.low %v10780_v32, %v10786_v33  ;;  %v10825_v40 = vcombine.low %v10792_v34, %v10798_v35  ;;  %v10860_v42 = vpack.c.bf16 %v10780_v32, %v10780_v32  ;;  %v10862_v43 = vpack.c.bf16 %v10792_v34, %v10792_v34  ;;  %v15975_v26 = vld [vmem:[%s21025_s4 + $0x28c] ss:$16 sps:$4 sm:$0xff]   ;;  %v15973_v28 = vld [vmem:[%s21025_s4 + $0x288] ss:$16 sps:$4 sm:$0xff]   ;;  %v15978_v29 = vld [vmem:[%s21025_s4 + $0x2a4] ss:$16 sps:$4 sm:$0xff]  }
 0x7bc   :  { %v10861_v44 = vpack.c.bf16 %v10786_v33, %v10786_v33  ;;  %v10863_v45 = vpack.c.bf16 %v10798_v35, %v10798_v35  ;;  %v10823_v58 = vcombine.low %v10815_v38, %v10822_v39  ;;  %v15981_v30 = vld [vmem:[%s21025_s4 + $0x2ac] ss:$16 sps:$4 sm:$0xff]   ;;  %v15976_v31 = vld [vmem:[%s21025_s4 + $0x2a0] ss:$16 sps:$4 sm:$0xff]   ;;  %v15979_v32 = vld [vmem:[%s21025_s4 + $0x2a8] ss:$16 sps:$4 sm:$0xff]  }
 0x7bd   :  { %v11026_v55 = vunpack.c.l.b16 %v10860_v42  ;;  %v11028_v48 = vunpack.c.l.b16 %v10862_v43  ;;  %v10832_v59 = vrot.slane %v10824_v41, %v20783_v25  ;;  %v10839_v51 = vrot.slane %v10825_v40, %v20783_v25  ;;  %v15984_v33 = vld [vmem:[%s21025_s4 + $0x2c4] ss:$16 sps:$4 sm:$0xff]   ;;  %v15987_v34 = vld [vmem:[%s21025_s4 + $0x2cc] ss:$16 sps:$4 sm:$0xff]   ;;  %v15982_v35 = vld [vmem:[%s21025_s4 + $0x2c0] ss:$16 sps:$4 sm:$0xff]  }
 0x7be   :  { %v11027_v56 = vunpack.c.l.b16 %v10861_v44  ;;  %v11029_v60 = vunpack.c.l.b16 %v10863_v45  ;;  %v15990_v37 = vld [vmem:[%s21025_s4 + $0x2e4] ss:$16 sps:$4 sm:$0xff]   ;;  %v15993_v38 = vld [vmem:[%s21025_s4 + $0x2ec] ss:$16 sps:$4 sm:$0xff]   ;;  %v15988_v39 = vld [vmem:[%s21025_s4 + $0x2e0] ss:$16 sps:$4 sm:$0xff]  }
 0x7bf   :  { %v11030_v61 = vsel %vm10846_vm1, %v11026_v55, %v11022_v36  ;;  %v20791_v0 = vsel %vm10846_vm1, %v11028_v48, %v11024_v54  ;;  %v10840_v3 = vcombine.low %v10832_v59, %v10839_v51  ;;  %v15985_v36 = vld [vmem:[%s21025_s4 + $0x2c8] ss:$16 sps:$4 sm:$0xff]   ;;  %v15996_v40 = vld [vmem:[%s21025_s4 + $0x304] ss:$16 sps:$4 sm:$0xff]   ;;  %v15999_v42 = vld [vmem:[%s21025_s4 + $0x30c] ss:$16 sps:$4 sm:$0xff]  }
 0x7c0   :  { %v11031_v4 = vsel %vm10846_vm1, %v11027_v56, %v11023_v52  ;;  %v11034_v5 = vpack.c.b16 %v11030_v61, %v11030_v61  ;;  %v11033_v6 = vsel %vm10846_vm1, %v11029_v60, %v11025_v57  ;;  %v15991_v41 = vld [vmem:[%s21025_s4 + $0x2e8] ss:$16 sps:$4 sm:$0xff]   ;;  %v15994_v43 = vld [vmem:[%s21025_s4 + $0x300] ss:$16 sps:$4 sm:$0xff]   ;;  %v16002_v45 = vld [vmem:[%s21025_s4 + $0x324] ss:$16 sps:$4 sm:$0xff]  }
 0x7c1   :  { %v11035_v62 = vpack.c.b16 %v11031_v4, %v11031_v4  ;;  %v10845_v8 = vrot.slane %v10840_v3, 7  ;;  %v11037_v10 = vpack.c.b16 %v11033_v6, %v11033_v6  ;;  %v15997_v44 = vld [vmem:[%s21025_s4 + $0x308] ss:$16 sps:$4 sm:$0xff]   ;;  %v16005_v54 = vld [vmem:[%s21025_s4 + $0x32c] ss:$16 sps:$4 sm:$0xff]  }
 0x7c2   :  { %v16003_v55 = vld [vmem:[%s21025_s4 + $0x328] ss:$16 sps:$4 sm:$0xff]   ;;  %v16008_v48 = vld [vmem:[%s21025_s4 + $0x344] ss:$16 sps:$4 sm:$0xff]   ;;  %v16011_v59 = vld [vmem:[%s21025_s4 + $0x34c] ss:$16 sps:$4 sm:$0xff]  }
 0x7c3   :  { %11714 = vmatprep.mubr.bf16.mxu0 %v11035_v62  ;;  %11796 = vmatprep.mubr.bf16.mxu1 %v11035_v62  ;;  %v10847_v2 = vsel %vm10846_vm1, %v10845_v8, %v10823_v58  ;;  %v16000_v58 = vld [vmem:[%s21025_s4 + $0x320] ss:$16 sps:$4 sm:$0xff]   ;;  %v16009_v52 = vld [vmem:[%s21025_s4 + $0x348] ss:$16 sps:$4 sm:$0xff]   ;;  %v16014_v56 = vld [vmem:[%s21025_s4 + $0x364] ss:$16 sps:$4 sm:$0xff]  }
 0x7c4   :  { %11715 = vmatmul.mubr.bf16.vlgmr.msra.gmra.mrb[4].mxu0 %v11034_v5  ;;  %11797 = vmatmul.mubr.bf16.vlgmr.msra.gmra.mrb[4].mxu1 %v11034_v5  ;;  %v10849_v11 = vsel %vm10848_vm2, %v10845_v8, %v10847_v2  ;;  %v16006_v51 = vld [vmem:[%s21025_s4 + $0x340] ss:$16 sps:$4 sm:$0xff]   ;;  %v16017_v57 = vld [vmem:[%s21025_s4 + $0x36c] ss:$16 sps:$4 sm:$0xff]   ;;  %v16015_v61 = vld [vmem:[%s21025_s4 + $0x368] ss:$16 sps:$4 sm:$0xff]  }
 0x7c5   :  { %11724 = vmatpush1.bf16.msra.mxu0 %v15946_v7  ;;  %11806 = vmatpush1.bf16.msra.mxu1 %v15949_v1  ;;  %v10851_v14 = vsel %vm10850_vm3, %v10845_v8, %v10849_v11  ;;  %v16012_v60 = vld [vmem:[%s21025_s4 + $0x360] ss:$16 sps:$4 sm:$0xff]   ;;  %v16020_v3 = vld [vmem:[%s21025_s4 + $0x384] ss:$16 sps:$4 sm:$0xff]   ;;  %v16023_v4 = vld [vmem:[%s21025_s4 + $0x38c] ss:$16 sps:$4 sm:$0xff]  }
 0x7c6   :  { %11755 = vmatprep.mubr.bf16.mxu0 %v11037_v10  ;;  %11837 = vmatprep.mubr.bf16.mxu1 %v11037_v10  ;;  %v10853_v17 = vsel %vm10852_vm4, %v10845_v8, %v10851_v14  ;;  %v16018_v5 = vld [vmem:[%s21025_s4 + $0x380] ss:$16 sps:$4 sm:$0xff]   ;;  %v16021_v6 = vld [vmem:[%s21025_s4 + $0x388] ss:$16 sps:$4 sm:$0xff]   ;;  %v16026_v62 = vld [vmem:[%s21025_s4 + $0x3a4] ss:$16 sps:$4 sm:$0xff]  }
 0x7c7   :  { %11725 = vmatprep.subr.bf16.mxu0 %v15954_v63  ;;  %11807 = vmatprep.subr.bf16.mxu1 %v15957_v9  ;;  %10855 = vst [vmem:[#allocation3] sm:$0xff] %v10853_v17  ;;  %v16029_v7 = vld [vmem:[%s21025_s4 + $0x3ac] ss:$16 sps:$4 sm:$0xff]   ;;  %v16024_v1 = vld [vmem:[%s21025_s4 + $0x3a0] ss:$16 sps:$4 sm:$0xff]  }
 0x7c8   :  { %v16027_v8 = vld [vmem:[%s21025_s4 + $0x3a8] ss:$16 sps:$4 sm:$0xff]   ;;  %v16032_v63 = vld [vmem:[%s21025_s4 + $0x3c4] ss:$16 sps:$4 sm:$0xff]   ;;  %v16035_v9 = vld [vmem:[%s21025_s4 + $0x3cc] ss:$16 sps:$4 sm:$0xff]  }
 0x7c9   :  { %11726 = vmatpush1.bf16.msra.mxu0 %v15952_v12  ;;  %11808 = vmatpush1.bf16.msra.mxu1 %v15955_v13  ;;  %v16030_v2 = vld [vmem:[%s21025_s4 + $0x3c0] ss:$16 sps:$4 sm:$0xff]   ;;  %v16033_v10 = vld [vmem:[%s21025_s4 + $0x3c8] ss:$16 sps:$4 sm:$0xff]   ;;  %v16038_v11 = vld [vmem:[%s21025_s4 + $0x3e4] ss:$16 sps:$4 sm:$0xff]  }
 0x7ca   :  { %11727 = vmatprep.subr.bf16.mxu0 %v15960_v15  ;;  %11809 = vmatprep.subr.bf16.mxu1 %v15963_v16  ;;  %v16041_v12 = vld [vmem:[%s21025_s4 + $0x3ec] ss:$16 sps:$4 sm:$0xff]   ;;  %v16036_v13 = vld [vmem:[%s21025_s4 + $0x3e0] ss:$16 sps:$4 sm:$0xff]   ;;  %v16039_v14 = vld [vmem:[%s21025_s4 + $0x3e8] ss:$16 sps:$4 sm:$0xff]   ;;  %v11036_v15 = vpack.c.b16 %v20791_v0, %v20791_v0 }
 0x7cd   :  { %11728 = vmatpush1.bf16.msra.mxu0 %v15958_v18  ;;  %11810 = vmatpush1.bf16.msra.mxu1 %v15961_v19 }
 0x7ce   :  { %11729 = vmatprep.subr.bf16.mxu0 %v15966_v20  ;;  %11811 = vmatprep.subr.bf16.mxu1 %v15969_v21 }
 0x7d1   :  { %11730 = vmatpush1.bf16.msra.mxu0 %v15964_v22  ;;  %11812 = vmatpush1.bf16.msra.mxu1 %v15967_v23 }
 0x7d2   :  { %11731 = vmatprep.subr.bf16.mxu0 %v15972_v24  ;;  %11813 = vmatprep.subr.bf16.mxu1 %v15975_v26 }
 0x7d5   :  { %11732 = vmatpush1.bf16.msra.mxu0 %v15970_v27  ;;  %11814 = vmatpush1.bf16.msra.mxu1 %v15973_v28 }
 0x7d6   :  { %11733 = vmatprep.subr.bf16.mxu0 %v15978_v29  ;;  %11815 = vmatprep.subr.bf16.mxu1 %v15981_v30 }
 0x7d9   :  { %11734 = vmatpush1.bf16.msra.mxu0 %v15976_v31  ;;  %11816 = vmatpush1.bf16.msra.mxu1 %v15979_v32 }
 0x7da   :  { %11735 = vmatprep.subr.bf16.mxu0 %v15984_v33  ;;  %11817 = vmatprep.subr.bf16.mxu1 %v15987_v34 }
 0x7dd   :  { %11736 = vmatpush1.bf16.msra.mxu0 %v15982_v35  ;;  %11818 = vmatpush1.bf16.msra.mxu1 %v15985_v36 }
 0x7de   :  { %11737 = vmatprep.subr.bf16.mxu0 %v15990_v37  ;;  %11819 = vmatprep.subr.bf16.mxu1 %v15993_v38 }
 0x7e1   :  { %11738 = vmatpush1.bf16.msra.mxu0 %v15988_v39  ;;  %11820 = vmatpush1.bf16.msra.mxu1 %v15991_v41 }
 0x7e2   :  { %11739 = vmatprep.subr.bf16.mxu0 %v15996_v40  ;;  %11821 = vmatprep.subr.bf16.mxu1 %v15999_v42 }
 0x7e5   :  { %11740 = vmatpush1.bf16.msra.mxu0 %v15994_v43  ;;  %11822 = vmatpush1.bf16.msra.mxu1 %v15997_v44 }
 0x7e6   :  { %11741 = vmatprep.subr.bf16.mxu0 %v16002_v45  ;;  %11823 = vmatprep.subr.bf16.mxu1 %v16005_v54 }
 0x7e9   :  { %11742 = vmatpush1.bf16.msra.mxu0 %v16000_v58  ;;  %11824 = vmatpush1.bf16.msra.mxu1 %v16003_v55 }
 0x7ea   :  { %11743 = vmatprep.subr.bf16.mxu0 %v16008_v48  ;;  %11825 = vmatprep.subr.bf16.mxu1 %v16011_v59 }
 0x7ed   :  { %11744 = vmatpush1.bf16.msra.mxu0 %v16006_v51  ;;  %11826 = vmatpush1.bf16.msra.mxu1 %v16009_v52 }
 0x7ee   :  { %11745 = vmatprep.subr.bf16.mxu0 %v16014_v56  ;;  %11827 = vmatprep.subr.bf16.mxu1 %v16017_v57 }
 0x7f1   :  { %11746 = vmatpush1.bf16.msra.mxu0 %v16012_v60  ;;  %11828 = vmatpush1.bf16.msra.mxu1 %v16015_v61 }
 0x7f2   :  { %11747 = vmatprep.subr.bf16.mxu0 %v16020_v3  ;;  %11829 = vmatprep.subr.bf16.mxu1 %v16023_v4 }
 0x7f5   :  { %11748 = vmatpush1.bf16.msra.mxu0 %v16018_v5  ;;  %11830 = vmatpush1.bf16.msra.mxu1 %v16021_v6 }
 0x7f6   :  { %11749 = vmatprep.subr.bf16.mxu0 %v16026_v62  ;;  %11831 = vmatprep.subr.bf16.mxu1 %v16029_v7 }
 0x7f9   :  { %11750 = vmatpush1.bf16.msra.mxu0 %v16024_v1  ;;  %11832 = vmatpush1.bf16.msra.mxu1 %v16027_v8 }
 0x7fa   :  { %11751 = vmatprep.subr.bf16.mxu0 %v16032_v63  ;;  %11833 = vmatprep.subr.bf16.mxu1 %v16035_v9 }
 0x7fd   :  { %11752 = vmatpush1.bf16.msra.mxu0 %v16030_v2  ;;  %11834 = vmatpush1.bf16.msra.mxu1 %v16033_v10 }
 0x7fe   :  { %11753 = vmatprep.subr.bf16.mxu0 %v16038_v11  ;;  %11835 = vmatprep.subr.bf16.mxu1 %v16041_v12 }
 0x801   :  { %11754 = vmatpush1.bf16.msra.mxu0 %v16036_v13  ;;  %11836 = vmatpush1.bf16.msra.mxu1 %v16039_v14 }
 0x804   :  { %11756 = vmatmul.mubr.bf16.vlgmr.msra.gmra.mrb[4].mxu0 %v11036_v15  ;;  %11838 = vmatmul.mubr.bf16.vlgmr.msra.gmra.mrb[4].mxu1 %v11036_v15 }
 0x805   :  { %16065 = shalt.err (!%p16062_p4)
}
 0x806   :  { %s16066_s15 = scalar_lea.hbm %s21029_s8, 128 }
 0x807   :  { %p16067_p5 = scmp.ne.s32.totalorder %s21029_s8, %s16066_s15  ;;  %p16070_p6 = scmp.lt.u32.totalorder %s16066_s15, %s21029_s8 }
 0x809   :  { %p16072_p7 = pnand %p16070_p6, %p16067_p5 }
 0x80b   :  { %16075 = shalt.err (!%p16072_p7)
}
 0x80c   :  { %11882 = dma.vmem_to_hbm [thread:$0]  %s11880_s2, 128, %s21029_s8, [#allocation4]   ;;  %v10992_v0 = vld [vmem:[%s21026_s5] sm:$0xf] }
 0x80d   :  { %v10997_v16 = vrot.slane %v10992_v0, %v10639_v47  ;;  %v11005_v17 = vrot.slane %v10992_v0, %v10647_v50  ;;  %v11001_v18 = vrot.slane %v10992_v0, %v10643_v49  ;;  %v11009_v19 = vrot.slane %v10992_v0, %v10651_v53  ;;  %s16105_s5 = smov [#allocation5]  }
 0x80e   :  { %s11889_s8 = sshll.u32 %s16105_s5, 4  ;;  %s11890_s8 = int_to_ptr.vmem [resolvable:$true] %s11889_s8 }
 0x80f   :  { %s16076_s22 = scalar_lea.vmem %s11890_s8, 128  ;;  %p16081_p9 = scmp.lt.s32.totalorder %s11890_s8, %s11890_s8 }
 0x810   :  { %p16077_p8 = scmp.ne.s32.totalorder %s11890_s8, %s16076_s22  ;;  %p16082_p10 = scmp.lt.s32.totalorder %s16076_s22, %s16076_s22 }
 0x812   :  { %p16083_p11 = por %p16082_p10, %p16081_p9 }
 0x814   :  { %p16084_p12 = pnand %p16083_p11, %p16077_p8 }
 0x8d7   :  { %v11757_v20 = vpop.f32.mrb[4].mxu0  ;;  %v11839_v21 = vpop.f32.mrb[4].mxu1 }
 0x8d8   :  { %v13486_v22 = vadd.f32 %v11757_v20, %v10997_v16  ;;  %v13488_v23 = vadd.f32 %v11839_v21, %v11005_v17  ;;  %v11759_v24 = vpop.f32.mrb[5].mxu0  ;;  %v11841_v26 = vpop.f32.mrb[5].mxu1 }
 0x8d9   :  { %v13487_v27 = vadd.f32 %v11759_v24, %v11001_v18  ;;  %v13489_v28 = vadd.f32 %v11841_v26, %v11009_v19  ;;  %v11761_v29 = vpop.f32.mrb[6].mxu0  ;;  %v11843_v30 = vpop.f32.mrb[6].mxu1 }
 0x8da   :  { %v11762_v47 = vpop.f32.mrb[7].mxu0  ;;  %v11844_v31 = vpop.f32.mrb[7].mxu1 }
 0x8db   :  { %v11850_v32 = vcombine.low %v13486_v22, %v13487_v27  ;;  %v11851_v50 = vcombine.low %v13488_v23, %v13489_v28 }
 0x8dd   :  { %v11858_v49 = vrot.slane %v11850_v32, %v20783_v25  ;;  %v11865_v46 = vrot.slane %v11851_v50, %v20783_v25 }
 0x8df   :  { %v11866_v53 = vcombine.low %v11858_v49, %v11865_v46 }
 0x8e1   :  { %11868 = vst [vmem:[#allocation5] sm:$0xff] %v11866_v53 }
 0x8e2   :  { %16087 = shalt.err (!%p16084_p12)
}
 0x8e3   :  { %s16088_s25 = scalar_lea.hbm %s21030_s9, 128 }
 0x8e4   :  { %p16089_p13 = scmp.ne.s32.totalorder %s21030_s9, %s16088_s25  ;;  %p16092_p0 = scmp.lt.u32.totalorder %s16088_s25, %s21030_s9 }
 0x8e6   :  { %p16094_p1 = pnand %p16092_p0, %p16089_p13 }
 0x8e8   :  { %16097 = shalt.err (!%p16094_p1)
}
 0x8e9   :  { %11892 = dma.vmem_to_hbm [thread:$0]  %s11890_s8, 128, %s21030_s9, [#allocation6]  }
 0x8ea   :  { %16098 = dma.done.wait [#allocation4], 128  }
 0x8eb   :  { %16099 = vsyncadd [#allocation4], 4294967168 }
 0x8ec   :  { %16100 = dma.done.wait [#allocation6], 128  }
 0x8ed   :  { %16101 = vsyncadd [#allocation6], 4294967168 }
 0x8ee   :  { %11903 = vsyncpa [#allocation4], 1 }
 0x8ef   :  { %11904 = vsyncpa [#allocation6], 1 }

</bundles_post_ra>
